<compile_context>
chip_gen: v6e
topology: v6e:2x2x1
jax: 0.10.0
libtpu: 0.0.40
codegen_flags: <defaults>
</compile_context>

<pallas_src>
from functools import partial

import jax
import jax.numpy as jnp
import numpy as np
from jax.experimental import pallas as pl
from jax.experimental.pallas import tpu as pltpu

BETA = 0.95          # snn.Leaky(beta=0.95)
THRESH = 1.0         # snnTorch default threshold
NUM_STEPS = 25
IN_FEATS = 28 * 28   # 784
HIDDEN = 1000
OUT = 10

IN_PAD = 896         # 784  -> 7 * 128 (lane-dense fc1 LHS)
HIDDEN_PAD = 1024    # 1000 -> 8 * 128
OUT_PAD = 128        # 10   -> 1 * 128

B_SUB = 8            # batch sub-chunk kept vreg-resident (one f32 sublane tile)
H_CHUNK = 512        # hidden lane chunk kept vreg-resident (4 vregs / array)


def _round_up(n, m):
    return (n + m - 1) // m * m


def snn_kernel(x_ref, w1_ref, b1_ref, w2_ref, b2_ref,
               spk_ref, mem_ref, cur1_buf, spk1_buf, cur2_buf):
    """One batch block of the full 25-step SNN forward pass.

    x_ref:  (b_blk, 896)           w1_ref: (896, 1024)   b1_ref: (1, 1024)
    w2_ref: (1024, 128)            b2_ref: (1, 128)
    spk_ref / mem_ref: (25, b_blk, 128)
    cur1_buf: VMEM (b_blk, 1024)
    spk1_buf: VMEM (25*b_blk, 1024)   cur2_buf: VMEM (25*b_blk, 128)
    """
    b_blk = x_ref.shape[0]
    n_bsub = b_blk // B_SUB
    n_hchunk = HIDDEN_PAD // H_CHUNK

    # ---- Phase 1: fc1 is time-invariant -> one MXU matmul per batch block.
    cur1_buf[...] = (jnp.dot(x_ref[...], w1_ref[...],
                             preferred_element_type=jnp.float32)
                     + b1_ref[...])                            # (b_blk, 1024)

    # ---- Phase 2: layer-1 Leaky recurrence (pure VPU).  Chunk loops outer,
    # time loop inner: each (8 x 512) chunk's cur1/mem1/spk1 stay in vregs for
    # all 25 steps; only the spike frames are stored (aligned, unmasked).
    # reset_t == spk_{t-1}, THRESH == 1.0 -> mem = BETA*mem + cur - spk_prev.
    @pl.loop(0, n_bsub)
    def _phase2(bs):
        r0 = pl.multiple_of(bs * B_SUB, B_SUB)
        for hc in range(n_hchunk):                 # static (2 chunks)
            c0 = hc * H_CHUNK
            cur1 = cur1_buf[pl.ds(r0, B_SUB), pl.ds(c0, H_CHUNK)]
            mem1 = jnp.zeros_like(cur1)
            spk1 = jnp.zeros_like(cur1)
            for t in range(NUM_STEPS):             # static, fully unrolled
                mem1 = BETA * mem1 + cur1 - spk1
                spk1 = (mem1 > THRESH).astype(jnp.float32)
                row = pl.multiple_of(t * b_blk + r0, B_SUB)
                spk1_buf[pl.ds(row, B_SUB), pl.ds(c0, H_CHUNK)] = spk1

    # ---- Phase 3: one batched fc2 matmul over ALL time steps (MXU off the
    # serial critical path, full (25*b_blk, 1024) x (1024, 128) tiles).
    cur2_buf[...] = (jnp.dot(spk1_buf[...], w2_ref[...],
                             preferred_element_type=jnp.float32)
                     + b2_ref[...])                            # (25*b_blk, 128)

    # ---- Phase 4: layer-2 Leaky recurrence on precomputed currents.
    # Small state (1 vreg per 8-row sub-chunk) -> static unroll; lane-dense
    # unmasked stores into the padded (…,128) outputs.
    for bs in range(n_bsub):                       # static
        r0 = bs * B_SUB
        mem2 = jnp.zeros((B_SUB, OUT_PAD), jnp.float32)
        spk2 = jnp.zeros((B_SUB, OUT_PAD), jnp.float32)
        for t in range(NUM_STEPS):                 # static, fully unrolled
            cur2 = cur2_buf[pl.ds(t * b_blk + r0, B_SUB), :]
            mem2 = BETA * mem2 + cur2 - spk2
            spk2 = (mem2 > THRESH).astype(jnp.float32)
            spk_ref[t, pl.ds(r0, B_SUB), :] = spk2
            mem_ref[t, pl.ds(r0, B_SUB), :] = mem2


@partial(jax.jit, static_argnames=("b_block_max",))
def net_forward(x, w1, b1, w2, b2, b_block_max=64):
    """x: (B, 1, 28, 28) NCHW.  Returns (spk2_rec, mem2_rec): (25, B, 10)."""
    B = x.shape[0]
    x_flat = x.reshape(B, -1).astype(jnp.float32)              # x.view(B, -1)

    b_pad = _round_up(B, B_SUB)                  # f32 sublane alignment
    b_blk = _round_up(min(b_block_max, b_pad), B_SUB)
    b_pad = _round_up(b_pad, b_blk)
    grid = (b_pad // b_blk,)

    # Zero-pad batch / in / hidden / out dims.  Zero pads => padded hidden and
    # output lanes never spike and contribute nothing to the valid region.
    x_p = jnp.zeros((b_pad, IN_PAD), jnp.float32).at[:B, :IN_FEATS].set(x_flat)
    w1_p = jnp.zeros((IN_PAD, HIDDEN_PAD), jnp.float32).at[:IN_FEATS, :HIDDEN].set(w1)
    b1_p = jnp.zeros((1, HIDDEN_PAD), jnp.float32).at[0, :HIDDEN].set(b1)
    w2_p = jnp.zeros((HIDDEN_PAD, OUT_PAD), jnp.float32).at[:HIDDEN, :OUT].set(w2)
    b2_p = jnp.zeros((1, OUT_PAD), jnp.float32).at[0, :OUT].set(b2)

    spk_p, mem_p = pl.pallas_call(
        snn_kernel,
        out_shape=(
            jax.ShapeDtypeStruct((NUM_STEPS, b_pad, OUT_PAD), jnp.float32),
            jax.ShapeDtypeStruct((NUM_STEPS, b_pad, OUT_PAD), jnp.float32),
        ),
        grid_spec=pltpu.PrefetchScalarGridSpec(
            num_scalar_prefetch=0,
            grid=grid,
            in_specs=[
                pl.BlockSpec((b_blk, IN_PAD), lambda i: (i, 0)),
                pl.BlockSpec((IN_PAD, HIDDEN_PAD), lambda i: (0, 0)),
                pl.BlockSpec((1, HIDDEN_PAD), lambda i: (0, 0)),
                pl.BlockSpec((HIDDEN_PAD, OUT_PAD), lambda i: (0, 0)),
                pl.BlockSpec((1, OUT_PAD), lambda i: (0, 0)),
            ],
            out_specs=(
                pl.BlockSpec((NUM_STEPS, b_blk, OUT_PAD), lambda i: (0, i, 0)),
                pl.BlockSpec((NUM_STEPS, b_blk, OUT_PAD), lambda i: (0, i, 0)),
            ),
            scratch_shapes=[
                pltpu.VMEM((b_blk, HIDDEN_PAD), jnp.float32),                # cur1
                pltpu.VMEM((NUM_STEPS * b_blk, HIDDEN_PAD), jnp.float32),    # spk1 frames
                pltpu.VMEM((NUM_STEPS * b_blk, OUT_PAD), jnp.float32),       # cur2 frames
            ],
        ),
        compiler_params=pltpu.CompilerParams(
            dimension_semantics=("parallel",),      # batch blocks shard across TCs
            vmem_limit_bytes=48 * 1024 * 1024,
        ),
    )(x_p, w1_p, b1_p, w2_p, b2_p)

    # Slice back to the valid (unpadded) region.
    return spk_p[:, :B, :OUT], mem_p[:, :B, :OUT]


def reference_forward(x, w1, b1, w2, b2):
    """Pure-JAX f32 reference mirroring the PyTorch module's semantics."""
    B = x.shape[0]
    xf = x.reshape(B, -1).astype(jnp.float32)
    cur1 = xf @ w1 + b1                       # fc1(x) is the same every step
    mem1 = jnp.zeros_like(cur1)
    mem2 = jnp.zeros((B, OUT), jnp.float32)
    spk_rec, mem_rec = [], []
    for _ in range(NUM_STEPS):
        reset1 = (mem1 > THRESH).astype(jnp.float32)
        mem1 = BETA * mem1 + cur1 - reset1 * THRESH
        spk1 = (mem1 > THRESH).astype(jnp.float32)
        cur2 = spk1 @ w2 + b2
        reset2 = (mem2 > THRESH).astype(jnp.float32)
        mem2 = BETA * mem2 + cur2 - reset2 * THRESH
        spk2 = (mem2 > THRESH).astype(jnp.float32)
        spk_rec.append(spk2)
        mem_rec.append(mem2)
    return jnp.stack(spk_rec, 0), jnp.stack(mem_rec, 0)


def init_linear(key, fan_in, fan_out):
    """PyTorch nn.Linear default init: U(-1/sqrt(fan_in), 1/sqrt(fan_in))."""
    kw, kb = jax.random.split(key)
    bound = 1.0 / np.sqrt(fan_in)
    w = jax.random.uniform(kw, (fan_in, fan_out), jnp.float32, -bound, bound)
    b = jax.random.uniform(kb, (fan_out,), jnp.float32, -bound, bound)
    return w, b


if __name__ == "__main__":
    key = jax.random.PRNGKey(0)
    kx, k1, k2 = jax.random.split(key, 3)

    B = 2
    x = jax.random.normal(kx, (B, 1, 28, 28), jnp.float32)  # NCHW, like PyTorch
    w1, b1 = init_linear(k1, IN_FEATS, HIDDEN)
    w2, b2 = init_linear(k2, HIDDEN, OUT)

    spk_rec, mem_rec = net_forward(x, w1, b1, w2, b2)
    jax.block_until_ready((spk_rec, mem_rec))

    spk_ref_v, mem_ref_v = reference_forward(x, w1, b1, w2, b2)
    np.testing.assert_allclose(np.asarray(spk_rec), np.asarray(spk_ref_v), atol=1e-5)
    np.testing.assert_allclose(np.asarray(mem_rec), np.asarray(mem_ref_v), atol=1e-4)

    assert spk_rec.shape == (NUM_STEPS, B, OUT)
    assert mem_rec.shape == (NUM_STEPS, B, OUT)
    print("KERNEL_OK")
</pallas_src>

<mosaic_0001>
module attributes {stable_mosaic.version = 11 : i64} {
  func.func @snn_kernel(%arg0: i32, %arg1: memref<8x896xf32, #tpu.memory_space<vmem>>, %arg2: memref<896x1024xf32, #tpu.memory_space<vmem>>, %arg3: memref<1x1024xf32, #tpu.memory_space<vmem>>, %arg4: memref<1024x128xf32, #tpu.memory_space<vmem>>, %arg5: memref<1x128xf32, #tpu.memory_space<vmem>>, %arg6: memref<25x8x128xf32, #tpu.memory_space<vmem>>, %arg7: memref<25x8x128xf32, #tpu.memory_space<vmem>>, %arg8: memref<8x1024xf32, #tpu.memory_space<vmem>>, %arg9: memref<200x1024xf32, #tpu.memory_space<vmem>>, %arg10: memref<200x128xf32, #tpu.memory_space<vmem>>) attributes {dimension_semantics = [#tpu.dimension_semantics<parallel>], iteration_bounds = array<i64: 1>, scalar_prefetch = 0 : i64, scratch_operands = 3 : i64, tpu.core_type = #tpu.core_type<tc>, window_params = [{transform_indices = @transform_0, window_bounds = array<i64: 8, 896>}, {pipeline_mode = #tpu.pipeline_mode<synchronous>, transform_indices = @transform_1, window_bounds = array<i64: 896, 1024>}, {pipeline_mode = #tpu.pipeline_mode<synchronous>, transform_indices = @transform_2, window_bounds = array<i64: 1, 1024>}, {pipeline_mode = #tpu.pipeline_mode<synchronous>, transform_indices = @transform_3, window_bounds = array<i64: 1024, 128>}, {pipeline_mode = #tpu.pipeline_mode<synchronous>, transform_indices = @transform_4, window_bounds = array<i64: 1, 128>}, {transform_indices = @transform_5, window_bounds = array<i64: 25, 8, 128>}, {transform_indices = @transform_6, window_bounds = array<i64: 25, 8, 128>}]} {
    %c0 = arith.constant 0 : index
    %c0_0 = arith.constant 0 : index
    %0 = vector.load %arg1[%c0, %c0_0] : memref<8x896xf32, #tpu.memory_space<vmem>>, vector<8x896xf32>
    %c0_1 = arith.constant 0 : index
    %c0_2 = arith.constant 0 : index
    %1 = vector.load %arg2[%c0_1, %c0_2] : memref<896x1024xf32, #tpu.memory_space<vmem>>, vector<896x1024xf32>
    %cst = arith.constant dense<0.000000e+00> : vector<8x1024xf32>
    %2 = tpu.matmul %0, %1, %cst {dimension_numbers = #tpu.dot_dimension_numbers<[1], [0], [0], [1], [0, 0, 1, 1], [], []>} : vector<8x896xf32>, vector<896x1024xf32>, vector<8x1024xf32> -> vector<8x1024xf32>
    %c0_3 = arith.constant 0 : index
    %c0_4 = arith.constant 0 : index
    %3 = vector.load %arg3[%c0_3, %c0_4] : memref<1x1024xf32, #tpu.memory_space<vmem>>, vector<1x1024xf32>
    %4 = vector.broadcast %3 : vector<1x1024xf32> to vector<8x1024xf32>
    %5 = arith.addf %2, %4 : vector<8x1024xf32>
    %c0_5 = arith.constant 0 : index
    %c0_6 = arith.constant 0 : index
    %6 = vector.load %arg8[%c0_5, %c0_6] : memref<8x1024xf32, #tpu.memory_space<vmem>>, vector<8x1024xf32>
    tpu.vector_store %arg8[%c0_5, %c0_6], %5 {strides = array<i32>} : memref<8x1024xf32, #tpu.memory_space<vmem>>, vector<8x1024xf32>,
    %c0_i32 = arith.constant 0 : i32
    %c1_i32 = arith.constant 1 : i32
    %7 = arith.muli %c0_i32, %c1_i32 : i32
    %c0_i32_7 = arith.constant 0 : i32
    %8 = arith.addi %c0_i32_7, %7 : i32
    %c8_i32 = arith.constant 8 : i32
    %9 = arith.muli %8, %c8_i32 : i32
    %10 = tpu.assume_multiple %9, 8 : i32
    %11 = arith.index_cast %10 : i32 to index
    %c0_8 = arith.constant 0 : index
    %12 = vector.load %arg8[%11, %c0_8] : memref<8x1024xf32, #tpu.memory_space<vmem>>, vector<8x512xf32>
    %cst_9 = arith.constant 0.000000e+00 : f32
    %13 = vector.broadcast %cst_9 : f32 to vector<8x512xf32>
    %cst_10 = arith.constant 0.000000e+00 : f32
    %14 = vector.broadcast %cst_10 : f32 to vector<8x512xf32>
    %cst_11 = arith.constant 0.949999988 : f32
    %15 = vector.broadcast %cst_11 : f32 to vector<8x512xf32>
    %16 = arith.mulf %15, %13 : vector<8x512xf32>
    %17 = arith.addf %16, %12 : vector<8x512xf32>
    %18 = arith.subf %17, %14 : vector<8x512xf32>
    %cst_12 = arith.constant 1.000000e+00 : f32
    %19 = vector.broadcast %cst_12 : f32 to vector<8x512xf32>
    %20 = arith.cmpf ogt, %18, %19 : vector<8x512xf32>
    %21 = arith.extui %20 : vector<8x512xi1> to vector<8x512xi32>
    %22 = arith.sitofp %21 : vector<8x512xi32> to vector<8x512xf32>
    %c0_i32_13 = arith.constant 0 : i32
    %23 = arith.addi %c0_i32_13, %10 : i32
    %24 = tpu.assume_multiple %23, 8 : i32
    %25 = arith.index_cast %24 : i32 to index
    %c0_14 = arith.constant 0 : index
    %26 = vector.load %arg9[%25, %c0_14] : memref<200x1024xf32, #tpu.memory_space<vmem>>, vector<8x512xf32>
    tpu.vector_store %arg9[%25, %c0_14], %22 {strides = array<i32>} : memref<200x1024xf32, #tpu.memory_space<vmem>>, vector<8x512xf32>,
    %cst_15 = arith.constant 0.949999988 : f32
    %27 = vector.broadcast %cst_15 : f32 to vector<8x512xf32>
    %28 = arith.mulf %27, %18 : vector<8x512xf32>
    %29 = arith.addf %28, %12 : vector<8x512xf32>
    %30 = arith.subf %29, %22 : vector<8x512xf32>
    %cst_16 = arith.constant 1.000000e+00 : f32
    %31 = vector.broadcast %cst_16 : f32 to vector<8x512xf32>
    %32 = arith.cmpf ogt, %30, %31 : vector<8x512xf32>
    %33 = arith.extui %32 : vector<8x512xi1> to vector<8x512xi32>
    %34 = arith.sitofp %33 : vector<8x512xi32> to vector<8x512xf32>
    %c8_i32_17 = arith.constant 8 : i32
    %35 = arith.addi %c8_i32_17, %10 : i32
    %36 = tpu.assume_multiple %35, 8 : i32
    %37 = arith.index_cast %36 : i32 to index
    %c0_18 = arith.constant 0 : index
    %38 = vector.load %arg9[%37, %c0_18] : memref<200x1024xf32, #tpu.memory_space<vmem>>, vector<8x512xf32>
    tpu.vector_store %arg9[%37, %c0_18], %34 {strides = array<i32>} : memref<200x1024xf32, #tpu.memory_space<vmem>>, vector<8x512xf32>,
    %cst_19 = arith.constant 0.949999988 : f32
    %39 = vector.broadcast %cst_19 : f32 to vector<8x512xf32>
    %40 = arith.mulf %39, %30 : vector<8x512xf32>
    %41 = arith.addf %40, %12 : vector<8x512xf32>
    %42 = arith.subf %41, %34 : vector<8x512xf32>
    %cst_20 = arith.constant 1.000000e+00 : f32
    %43 = vector.broadcast %cst_20 : f32 to vector<8x512xf32>
    %44 = arith.cmpf ogt, %42, %43 : vector<8x512xf32>
    %45 = arith.extui %44 : vector<8x512xi1> to vector<8x512xi32>
    %46 = arith.sitofp %45 : vector<8x512xi32> to vector<8x512xf32>
    %c16_i32 = arith.constant 16 : i32
    %47 = arith.addi %c16_i32, %10 : i32
    %48 = tpu.assume_multiple %47, 8 : i32
    %49 = arith.index_cast %48 : i32 to index
    %c0_21 = arith.constant 0 : index
    %50 = vector.load %arg9[%49, %c0_21] : memref<200x1024xf32, #tpu.memory_space<vmem>>, vector<8x512xf32>
    tpu.vector_store %arg9[%49, %c0_21], %46 {strides = array<i32>} : memref<200x1024xf32, #tpu.memory_space<vmem>>, vector<8x512xf32>,
    %cst_22 = arith.constant 0.949999988 : f32
    %51 = vector.broadcast %cst_22 : f32 to vector<8x512xf32>
    %52 = arith.mulf %51, %42 : vector<8x512xf32>
    %53 = arith.addf %52, %12 : vector<8x512xf32>
    %54 = arith.subf %53, %46 : vector<8x512xf32>
    %cst_23 = arith.constant 1.000000e+00 : f32
    %55 = vector.broadcast %cst_23 : f32 to vector<8x512xf32>
    %56 = arith.cmpf ogt, %54, %55 : vector<8x512xf32>
    %57 = arith.extui %56 : vector<8x512xi1> to vector<8x512xi32>
    %58 = arith.sitofp %57 : vector<8x512xi32> to vector<8x512xf32>
    %c24_i32 = arith.constant 24 : i32
    %59 = arith.addi %c24_i32, %10 : i32
    %60 = tpu.assume_multiple %59, 8 : i32
    %61 = arith.index_cast %60 : i32 to index
    %c0_24 = arith.constant 0 : index
    %62 = vector.load %arg9[%61, %c0_24] : memref<200x1024xf32, #tpu.memory_space<vmem>>, vector<8x512xf32>
    tpu.vector_store %arg9[%61, %c0_24], %58 {strides = array<i32>} : memref<200x1024xf32, #tpu.memory_space<vmem>>, vector<8x512xf32>,
    %cst_25 = arith.constant 0.949999988 : f32
    %63 = vector.broadcast %cst_25 : f32 to vector<8x512xf32>
    %64 = arith.mulf %63, %54 : vector<8x512xf32>
    %65 = arith.addf %64, %12 : vector<8x512xf32>
    %66 = arith.subf %65, %58 : vector<8x512xf32>
    %cst_26 = arith.constant 1.000000e+00 : f32
    %67 = vector.broadcast %cst_26 : f32 to vector<8x512xf32>
    %68 = arith.cmpf ogt, %66, %67 : vector<8x512xf32>
    %69 = arith.extui %68 : vector<8x512xi1> to vector<8x512xi32>
    %70 = arith.sitofp %69 : vector<8x512xi32> to vector<8x512xf32>
    %c32_i32 = arith.constant 32 : i32
    %71 = arith.addi %c32_i32, %10 : i32
    %72 = tpu.assume_multiple %71, 8 : i32
    %73 = arith.index_cast %72 : i32 to index
    %c0_27 = arith.constant 0 : index
    %74 = vector.load %arg9[%73, %c0_27] : memref<200x1024xf32, #tpu.memory_space<vmem>>, vector<8x512xf32>
    tpu.vector_store %arg9[%73, %c0_27], %70 {strides = array<i32>} : memref<200x1024xf32, #tpu.memory_space<vmem>>, vector<8x512xf32>,
    %cst_28 = arith.constant 0.949999988 : f32
    %75 = vector.broadcast %cst_28 : f32 to vector<8x512xf32>
    %76 = arith.mulf %75, %66 : vector<8x512xf32>
    %77 = arith.addf %76, %12 : vector<8x512xf32>
    %78 = arith.subf %77, %70 : vector<8x512xf32>
    %cst_29 = arith.constant 1.000000e+00 : f32
    %79 = vector.broadcast %cst_29 : f32 to vector<8x512xf32>
    %80 = arith.cmpf ogt, %78, %79 : vector<8x512xf32>
    %81 = arith.extui %80 : vector<8x512xi1> to vector<8x512xi32>
    %82 = arith.sitofp %81 : vector<8x512xi32> to vector<8x512xf32>
    %c40_i32 = arith.constant 40 : i32
    %83 = arith.addi %c40_i32, %10 : i32
    %84 = tpu.assume_multiple %83, 8 : i32
    %85 = arith.index_cast %84 : i32 to index
    %c0_30 = arith.constant 0 : index
    %86 = vector.load %arg9[%85, %c0_30] : memref<200x1024xf32, #tpu.memory_space<vmem>>, vector<8x512xf32>
    tpu.vector_store %arg9[%85, %c0_30], %82 {strides = array<i32>} : memref<200x1024xf32, #tpu.memory_space<vmem>>, vector<8x512xf32>,
    %cst_31 = arith.constant 0.949999988 : f32
    %87 = vector.broadcast %cst_31 : f32 to vector<8x512xf32>
    %88 = arith.mulf %87, %78 : vector<8x512xf32>
    %89 = arith.addf %88, %12 : vector<8x512xf32>
    %90 = arith.subf %89, %82 : vector<8x512xf32>
    %cst_32 = arith.constant 1.000000e+00 : f32
    %91 = vector.broadcast %cst_32 : f32 to vector<8x512xf32>
    %92 = arith.cmpf ogt, %90, %91 : vector<8x512xf32>
    %93 = arith.extui %92 : vector<8x512xi1> to vector<8x512xi32>
    %94 = arith.sitofp %93 : vector<8x512xi32> to vector<8x512xf32>
    %c48_i32 = arith.constant 48 : i32
    %95 = arith.addi %c48_i32, %10 : i32
    %96 = tpu.assume_multiple %95, 8 : i32
    %97 = arith.index_cast %96 : i32 to index
    %c0_33 = arith.constant 0 : index
    %98 = vector.load %arg9[%97, %c0_33] : memref<200x1024xf32, #tpu.memory_space<vmem>>, vector<8x512xf32>
    tpu.vector_store %arg9[%97, %c0_33], %94 {strides = array<i32>} : memref<200x1024xf32, #tpu.memory_space<vmem>>, vector<8x512xf32>,
    %cst_34 = arith.constant 0.949999988 : f32
    %99 = vector.broadcast %cst_34 : f32 to vector<8x512xf32>
    %100 = arith.mulf %99, %90 : vector<8x512xf32>
    %101 = arith.addf %100, %12 : vector<8x512xf32>
    %102 = arith.subf %101, %94 : vector<8x512xf32>
    %cst_35 = arith.constant 1.000000e+00 : f32
    %103 = vector.broadcast %cst_35 : f32 to vector<8x512xf32>
    %104 = arith.cmpf ogt, %102, %103 : vector<8x512xf32>
    %105 = arith.extui %104 : vector<8x512xi1> to vector<8x512xi32>
    %106 = arith.sitofp %105 : vector<8x512xi32> to vector<8x512xf32>
    %c56_i32 = arith.constant 56 : i32
    %107 = arith.addi %c56_i32, %10 : i32
    %108 = tpu.assume_multiple %107, 8 : i32
    %109 = arith.index_cast %108 : i32 to index
    %c0_36 = arith.constant 0 : index
    %110 = vector.load %arg9[%109, %c0_36] : memref<200x1024xf32, #tpu.memory_space<vmem>>, vector<8x512xf32>
    tpu.vector_store %arg9[%109, %c0_36], %106 {strides = array<i32>} : memref<200x1024xf32, #tpu.memory_space<vmem>>, vector<8x512xf32>,
    %cst_37 = arith.constant 0.949999988 : f32
    %111 = vector.broadcast %cst_37 : f32 to vector<8x512xf32>
    %112 = arith.mulf %111, %102 : vector<8x512xf32>
    %113 = arith.addf %112, %12 : vector<8x512xf32>
    %114 = arith.subf %113, %106 : vector<8x512xf32>
    %cst_38 = arith.constant 1.000000e+00 : f32
    %115 = vector.broadcast %cst_38 : f32 to vector<8x512xf32>
    %116 = arith.cmpf ogt, %114, %115 : vector<8x512xf32>
    %117 = arith.extui %116 : vector<8x512xi1> to vector<8x512xi32>
    %118 = arith.sitofp %117 : vector<8x512xi32> to vector<8x512xf32>
    %c64_i32 = arith.constant 64 : i32
    %119 = arith.addi %c64_i32, %10 : i32
    %120 = tpu.assume_multiple %119, 8 : i32
    %121 = arith.index_cast %120 : i32 to index
    %c0_39 = arith.constant 0 : index
    %122 = vector.load %arg9[%121, %c0_39] : memref<200x1024xf32, #tpu.memory_space<vmem>>, vector<8x512xf32>
    tpu.vector_store %arg9[%121, %c0_39], %118 {strides = array<i32>} : memref<200x1024xf32, #tpu.memory_space<vmem>>, vector<8x512xf32>,
    %cst_40 = arith.constant 0.949999988 : f32
    %123 = vector.broadcast %cst_40 : f32 to vector<8x512xf32>
    %124 = arith.mulf %123, %114 : vector<8x512xf32>
    %125 = arith.addf %124, %12 : vector<8x512xf32>
    %126 = arith.subf %125, %118 : vector<8x512xf32>
    %cst_41 = arith.constant 1.000000e+00 : f32
    %127 = vector.broadcast %cst_41 : f32 to vector<8x512xf32>
    %128 = arith.cmpf ogt, %126, %127 : vector<8x512xf32>
    %129 = arith.extui %128 : vector<8x512xi1> to vector<8x512xi32>
    %130 = arith.sitofp %129 : vector<8x512xi32> to vector<8x512xf32>
    %c72_i32 = arith.constant 72 : i32
    %131 = arith.addi %c72_i32, %10 : i32
    %132 = tpu.assume_multiple %131, 8 : i32
    %133 = arith.index_cast %132 : i32 to index
    %c0_42 = arith.constant 0 : index
    %134 = vector.load %arg9[%133, %c0_42] : memref<200x1024xf32, #tpu.memory_space<vmem>>, vector<8x512xf32>
    tpu.vector_store %arg9[%133, %c0_42], %130 {strides = array<i32>} : memref<200x1024xf32, #tpu.memory_space<vmem>>, vector<8x512xf32>,
    %cst_43 = arith.constant 0.949999988 : f32
    %135 = vector.broadcast %cst_43 : f32 to vector<8x512xf32>
    %136 = arith.mulf %135, %126 : vector<8x512xf32>
    %137 = arith.addf %136, %12 : vector<8x512xf32>
    %138 = arith.subf %137, %130 : vector<8x512xf32>
    %cst_44 = arith.constant 1.000000e+00 : f32
    %139 = vector.broadcast %cst_44 : f32 to vector<8x512xf32>
    %140 = arith.cmpf ogt, %138, %139 : vector<8x512xf32>
    %141 = arith.extui %140 : vector<8x512xi1> to vector<8x512xi32>
    %142 = arith.sitofp %141 : vector<8x512xi32> to vector<8x512xf32>
    %c80_i32 = arith.constant 80 : i32
    %143 = arith.addi %c80_i32, %10 : i32
    %144 = tpu.assume_multiple %143, 8 : i32
    %145 = arith.index_cast %144 : i32 to index
    %c0_45 = arith.constant 0 : index
    %146 = vector.load %arg9[%145, %c0_45] : memref<200x1024xf32, #tpu.memory_space<vmem>>, vector<8x512xf32>
    tpu.vector_store %arg9[%145, %c0_45], %142 {strides = array<i32>} : memref<200x1024xf32, #tpu.memory_space<vmem>>, vector<8x512xf32>,
    %cst_46 = arith.constant 0.949999988 : f32
    %147 = vector.broadcast %cst_46 : f32 to vector<8x512xf32>
    %148 = arith.mulf %147, %138 : vector<8x512xf32>
    %149 = arith.addf %148, %12 : vector<8x512xf32>
    %150 = arith.subf %149, %142 : vector<8x512xf32>
    %cst_47 = arith.constant 1.000000e+00 : f32
    %151 = vector.broadcast %cst_47 : f32 to vector<8x512xf32>
    %152 = arith.cmpf ogt, %150, %151 : vector<8x512xf32>
    %153 = arith.extui %152 : vector<8x512xi1> to vector<8x512xi32>
    %154 = arith.sitofp %153 : vector<8x512xi32> to vector<8x512xf32>
    %c88_i32 = arith.constant 88 : i32
    %155 = arith.addi %c88_i32, %10 : i32
    %156 = tpu.assume_multiple %155, 8 : i32
    %157 = arith.index_cast %156 : i32 to index
    %c0_48 = arith.constant 0 : index
    %158 = vector.load %arg9[%157, %c0_48] : memref<200x1024xf32, #tpu.memory_space<vmem>>, vector<8x512xf32>
    tpu.vector_store %arg9[%157, %c0_48], %154 {strides = array<i32>} : memref<200x1024xf32, #tpu.memory_space<vmem>>, vector<8x512xf32>,
    %cst_49 = arith.constant 0.949999988 : f32
    %159 = vector.broadcast %cst_49 : f32 to vector<8x512xf32>
    %160 = arith.mulf %159, %150 : vector<8x512xf32>
    %161 = arith.addf %160, %12 : vector<8x512xf32>
    %162 = arith.subf %161, %154 : vector<8x512xf32>
    %cst_50 = arith.constant 1.000000e+00 : f32
    %163 = vector.broadcast %cst_50 : f32 to vector<8x512xf32>
    %164 = arith.cmpf ogt, %162, %163 : vector<8x512xf32>
    %165 = arith.extui %164 : vector<8x512xi1> to vector<8x512xi32>
    %166 = arith.sitofp %165 : vector<8x512xi32> to vector<8x512xf32>
    %c96_i32 = arith.constant 96 : i32
    %167 = arith.addi %c96_i32, %10 : i32
    %168 = tpu.assume_multiple %167, 8 : i32
    %169 = arith.index_cast %168 : i32 to index
    %c0_51 = arith.constant 0 : index
    %170 = vector.load %arg9[%169, %c0_51] : memref<200x1024xf32, #tpu.memory_space<vmem>>, vector<8x512xf32>
    tpu.vector_store %arg9[%169, %c0_51], %166 {strides = array<i32>} : memref<200x1024xf32, #tpu.memory_space<vmem>>, vector<8x512xf32>,
    %cst_52 = arith.constant 0.949999988 : f32
    %171 = vector.broadcast %cst_52 : f32 to vector<8x512xf32>
    %172 = arith.mulf %171, %162 : vector<8x512xf32>
    %173 = arith.addf %172, %12 : vector<8x512xf32>
    %174 = arith.subf %173, %166 : vector<8x512xf32>
    %cst_53 = arith.constant 1.000000e+00 : f32
    %175 = vector.broadcast %cst_53 : f32 to vector<8x512xf32>
    %176 = arith.cmpf ogt, %174, %175 : vector<8x512xf32>
    %177 = arith.extui %176 : vector<8x512xi1> to vector<8x512xi32>
    %178 = arith.sitofp %177 : vector<8x512xi32> to vector<8x512xf32>
    %c104_i32 = arith.constant 104 : i32
    %179 = arith.addi %c104_i32, %10 : i32
    %180 = tpu.assume_multiple %179, 8 : i32
    %181 = arith.index_cast %180 : i32 to index
    %c0_54 = arith.constant 0 : index
    %182 = vector.load %arg9[%181, %c0_54] : memref<200x1024xf32, #tpu.memory_space<vmem>>, vector<8x512xf32>
    tpu.vector_store %arg9[%181, %c0_54], %178 {strides = array<i32>} : memref<200x1024xf32, #tpu.memory_space<vmem>>, vector<8x512xf32>,
    %cst_55 = arith.constant 0.949999988 : f32
    %183 = vector.broadcast %cst_55 : f32 to vector<8x512xf32>
    %184 = arith.mulf %183, %174 : vector<8x512xf32>
    %185 = arith.addf %184, %12 : vector<8x512xf32>
    %186 = arith.subf %185, %178 : vector<8x512xf32>
    %cst_56 = arith.constant 1.000000e+00 : f32
    %187 = vector.broadcast %cst_56 : f32 to vector<8x512xf32>
    %188 = arith.cmpf ogt, %186, %187 : vector<8x512xf32>
    %189 = arith.extui %188 : vector<8x512xi1> to vector<8x512xi32>
    %190 = arith.sitofp %189 : vector<8x512xi32> to vector<8x512xf32>
    %c112_i32 = arith.constant 112 : i32
    %191 = arith.addi %c112_i32, %10 : i32
    %192 = tpu.assume_multiple %191, 8 : i32
    %193 = arith.index_cast %192 : i32 to index
    %c0_57 = arith.constant 0 : index
    %194 = vector.load %arg9[%193, %c0_57] : memref<200x1024xf32, #tpu.memory_space<vmem>>, vector<8x512xf32>
    tpu.vector_store %arg9[%193, %c0_57], %190 {strides = array<i32>} : memref<200x1024xf32, #tpu.memory_space<vmem>>, vector<8x512xf32>,
    %cst_58 = arith.constant 0.949999988 : f32
    %195 = vector.broadcast %cst_58 : f32 to vector<8x512xf32>
    %196 = arith.mulf %195, %186 : vector<8x512xf32>
    %197 = arith.addf %196, %12 : vector<8x512xf32>
    %198 = arith.subf %197, %190 : vector<8x512xf32>
    %cst_59 = arith.constant 1.000000e+00 : f32
    %199 = vector.broadcast %cst_59 : f32 to vector<8x512xf32>
    %200 = arith.cmpf ogt, %198, %199 : vector<8x512xf32>
    %201 = arith.extui %200 : vector<8x512xi1> to vector<8x512xi32>
    %202 = arith.sitofp %201 : vector<8x512xi32> to vector<8x512xf32>
    %c120_i32 = arith.constant 120 : i32
    %203 = arith.addi %c120_i32, %10 : i32
    %204 = tpu.assume_multiple %203, 8 : i32
    %205 = arith.index_cast %204 : i32 to index
    %c0_60 = arith.constant 0 : index
    %206 = vector.load %arg9[%205, %c0_60] : memref<200x1024xf32, #tpu.memory_space<vmem>>, vector<8x512xf32>
    tpu.vector_store %arg9[%205, %c0_60], %202 {strides = array<i32>} : memref<200x1024xf32, #tpu.memory_space<vmem>>, vector<8x512xf32>,
    %cst_61 = arith.constant 0.949999988 : f32
    %207 = vector.broadcast %cst_61 : f32 to vector<8x512xf32>
    %208 = arith.mulf %207, %198 : vector<8x512xf32>
    %209 = arith.addf %208, %12 : vector<8x512xf32>
    %210 = arith.subf %209, %202 : vector<8x512xf32>
    %cst_62 = arith.constant 1.000000e+00 : f32
    %211 = vector.broadcast %cst_62 : f32 to vector<8x512xf32>
    %212 = arith.cmpf ogt, %210, %211 : vector<8x512xf32>
    %213 = arith.extui %212 : vector<8x512xi1> to vector<8x512xi32>
    %214 = arith.sitofp %213 : vector<8x512xi32> to vector<8x512xf32>
    %c128_i32 = arith.constant 128 : i32
    %215 = arith.addi %c128_i32, %10 : i32
    %216 = tpu.assume_multiple %215, 8 : i32
    %217 = arith.index_cast %216 : i32 to index
    %c0_63 = arith.constant 0 : index
    %218 = vector.load %arg9[%217, %c0_63] : memref<200x1024xf32, #tpu.memory_space<vmem>>, vector<8x512xf32>
    tpu.vector_store %arg9[%217, %c0_63], %214 {strides = array<i32>} : memref<200x1024xf32, #tpu.memory_space<vmem>>, vector<8x512xf32>,
    %cst_64 = arith.constant 0.949999988 : f32
    %219 = vector.broadcast %cst_64 : f32 to vector<8x512xf32>
    %220 = arith.mulf %219, %210 : vector<8x512xf32>
    %221 = arith.addf %220, %12 : vector<8x512xf32>
    %222 = arith.subf %221, %214 : vector<8x512xf32>
    %cst_65 = arith.constant 1.000000e+00 : f32
    %223 = vector.broadcast %cst_65 : f32 to vector<8x512xf32>
    %224 = arith.cmpf ogt, %222, %223 : vector<8x512xf32>
    %225 = arith.extui %224 : vector<8x512xi1> to vector<8x512xi32>
    %226 = arith.sitofp %225 : vector<8x512xi32> to vector<8x512xf32>
    %c136_i32 = arith.constant 136 : i32
    %227 = arith.addi %c136_i32, %10 : i32
    %228 = tpu.assume_multiple %227, 8 : i32
    %229 = arith.index_cast %228 : i32 to index
    %c0_66 = arith.constant 0 : index
    %230 = vector.load %arg9[%229, %c0_66] : memref<200x1024xf32, #tpu.memory_space<vmem>>, vector<8x512xf32>
    tpu.vector_store %arg9[%229, %c0_66], %226 {strides = array<i32>} : memref<200x1024xf32, #tpu.memory_space<vmem>>, vector<8x512xf32>,
    %cst_67 = arith.constant 0.949999988 : f32
    %231 = vector.broadcast %cst_67 : f32 to vector<8x512xf32>
    %232 = arith.mulf %231, %222 : vector<8x512xf32>
    %233 = arith.addf %232, %12 : vector<8x512xf32>
    %234 = arith.subf %233, %226 : vector<8x512xf32>
    %cst_68 = arith.constant 1.000000e+00 : f32
    %235 = vector.broadcast %cst_68 : f32 to vector<8x512xf32>
    %236 = arith.cmpf ogt, %234, %235 : vector<8x512xf32>
    %237 = arith.extui %236 : vector<8x512xi1> to vector<8x512xi32>
    %238 = arith.sitofp %237 : vector<8x512xi32> to vector<8x512xf32>
    %c144_i32 = arith.constant 144 : i32
    %239 = arith.addi %c144_i32, %10 : i32
    %240 = tpu.assume_multiple %239, 8 : i32
    %241 = arith.index_cast %240 : i32 to index
    %c0_69 = arith.constant 0 : index
    %242 = vector.load %arg9[%241, %c0_69] : memref<200x1024xf32, #tpu.memory_space<vmem>>, vector<8x512xf32>
    tpu.vector_store %arg9[%241, %c0_69], %238 {strides = array<i32>} : memref<200x1024xf32, #tpu.memory_space<vmem>>, vector<8x512xf32>,
    %cst_70 = arith.constant 0.949999988 : f32
    %243 = vector.broadcast %cst_70 : f32 to vector<8x512xf32>
    %244 = arith.mulf %243, %234 : vector<8x512xf32>
    %245 = arith.addf %244, %12 : vector<8x512xf32>
    %246 = arith.subf %245, %238 : vector<8x512xf32>
    %cst_71 = arith.constant 1.000000e+00 : f32
    %247 = vector.broadcast %cst_71 : f32 to vector<8x512xf32>
    %248 = arith.cmpf ogt, %246, %247 : vector<8x512xf32>
    %249 = arith.extui %248 : vector<8x512xi1> to vector<8x512xi32>
    %250 = arith.sitofp %249 : vector<8x512xi32> to vector<8x512xf32>
    %c152_i32 = arith.constant 152 : i32
    %251 = arith.addi %c152_i32, %10 : i32
    %252 = tpu.assume_multiple %251, 8 : i32
    %253 = arith.index_cast %252 : i32 to index
    %c0_72 = arith.constant 0 : index
    %254 = vector.load %arg9[%253, %c0_72] : memref<200x1024xf32, #tpu.memory_space<vmem>>, vector<8x512xf32>
    tpu.vector_store %arg9[%253, %c0_72], %250 {strides = array<i32>} : memref<200x1024xf32, #tpu.memory_space<vmem>>, vector<8x512xf32>,
    %cst_73 = arith.constant 0.949999988 : f32
    %255 = vector.broadcast %cst_73 : f32 to vector<8x512xf32>
    %256 = arith.mulf %255, %246 : vector<8x512xf32>
    %257 = arith.addf %256, %12 : vector<8x512xf32>
    %258 = arith.subf %257, %250 : vector<8x512xf32>
    %cst_74 = arith.constant 1.000000e+00 : f32
    %259 = vector.broadcast %cst_74 : f32 to vector<8x512xf32>
    %260 = arith.cmpf ogt, %258, %259 : vector<8x512xf32>
    %261 = arith.extui %260 : vector<8x512xi1> to vector<8x512xi32>
    %262 = arith.sitofp %261 : vector<8x512xi32> to vector<8x512xf32>
    %c160_i32 = arith.constant 160 : i32
    %263 = arith.addi %c160_i32, %10 : i32
    %264 = tpu.assume_multiple %263, 8 : i32
    %265 = arith.index_cast %264 : i32 to index
    %c0_75 = arith.constant 0 : index
    %266 = vector.load %arg9[%265, %c0_75] : memref<200x1024xf32, #tpu.memory_space<vmem>>, vector<8x512xf32>
    tpu.vector_store %arg9[%265, %c0_75], %262 {strides = array<i32>} : memref<200x1024xf32, #tpu.memory_space<vmem>>, vector<8x512xf32>,
    %cst_76 = arith.constant 0.949999988 : f32
    %267 = vector.broadcast %cst_76 : f32 to vector<8x512xf32>
    %268 = arith.mulf %267, %258 : vector<8x512xf32>
    %269 = arith.addf %268, %12 : vector<8x512xf32>
    %270 = arith.subf %269, %262 : vector<8x512xf32>
    %cst_77 = arith.constant 1.000000e+00 : f32
    %271 = vector.broadcast %cst_77 : f32 to vector<8x512xf32>
    %272 = arith.cmpf ogt, %270, %271 : vector<8x512xf32>
    %273 = arith.extui %272 : vector<8x512xi1> to vector<8x512xi32>
    %274 = arith.sitofp %273 : vector<8x512xi32> to vector<8x512xf32>
    %c168_i32 = arith.constant 168 : i32
    %275 = arith.addi %c168_i32, %10 : i32
    %276 = tpu.assume_multiple %275, 8 : i32
    %277 = arith.index_cast %276 : i32 to index
    %c0_78 = arith.constant 0 : index
    %278 = vector.load %arg9[%277, %c0_78] : memref<200x1024xf32, #tpu.memory_space<vmem>>, vector<8x512xf32>
    tpu.vector_store %arg9[%277, %c0_78], %274 {strides = array<i32>} : memref<200x1024xf32, #tpu.memory_space<vmem>>, vector<8x512xf32>,
    %cst_79 = arith.constant 0.949999988 : f32
    %279 = vector.broadcast %cst_79 : f32 to vector<8x512xf32>
    %280 = arith.mulf %279, %270 : vector<8x512xf32>
    %281 = arith.addf %280, %12 : vector<8x512xf32>
    %282 = arith.subf %281, %274 : vector<8x512xf32>
    %cst_80 = arith.constant 1.000000e+00 : f32
    %283 = vector.broadcast %cst_80 : f32 to vector<8x512xf32>
    %284 = arith.cmpf ogt, %282, %283 : vector<8x512xf32>
    %285 = arith.extui %284 : vector<8x512xi1> to vector<8x512xi32>
    %286 = arith.sitofp %285 : vector<8x512xi32> to vector<8x512xf32>
    %c176_i32 = arith.constant 176 : i32
    %287 = arith.addi %c176_i32, %10 : i32
    %288 = tpu.assume_multiple %287, 8 : i32
    %289 = arith.index_cast %288 : i32 to index
    %c0_81 = arith.constant 0 : index
    %290 = vector.load %arg9[%289, %c0_81] : memref<200x1024xf32, #tpu.memory_space<vmem>>, vector<8x512xf32>
    tpu.vector_store %arg9[%289, %c0_81], %286 {strides = array<i32>} : memref<200x1024xf32, #tpu.memory_space<vmem>>, vector<8x512xf32>,
    %cst_82 = arith.constant 0.949999988 : f32
    %291 = vector.broadcast %cst_82 : f32 to vector<8x512xf32>
    %292 = arith.mulf %291, %282 : vector<8x512xf32>
    %293 = arith.addf %292, %12 : vector<8x512xf32>
    %294 = arith.subf %293, %286 : vector<8x512xf32>
    %cst_83 = arith.constant 1.000000e+00 : f32
    %295 = vector.broadcast %cst_83 : f32 to vector<8x512xf32>
    %296 = arith.cmpf ogt, %294, %295 : vector<8x512xf32>
    %297 = arith.extui %296 : vector<8x512xi1> to vector<8x512xi32>
    %298 = arith.sitofp %297 : vector<8x512xi32> to vector<8x512xf32>
    %c184_i32 = arith.constant 184 : i32
    %299 = arith.addi %c184_i32, %10 : i32
    %300 = tpu.assume_multiple %299, 8 : i32
    %301 = arith.index_cast %300 : i32 to index
    %c0_84 = arith.constant 0 : index
    %302 = vector.load %arg9[%301, %c0_84] : memref<200x1024xf32, #tpu.memory_space<vmem>>, vector<8x512xf32>
    tpu.vector_store %arg9[%301, %c0_84], %298 {strides = array<i32>} : memref<200x1024xf32, #tpu.memory_space<vmem>>, vector<8x512xf32>,
    %cst_85 = arith.constant 0.949999988 : f32
    %303 = vector.broadcast %cst_85 : f32 to vector<8x512xf32>
    %304 = arith.mulf %303, %294 : vector<8x512xf32>
    %305 = arith.addf %304, %12 : vector<8x512xf32>
    %306 = arith.subf %305, %298 : vector<8x512xf32>
    %cst_86 = arith.constant 1.000000e+00 : f32
    %307 = vector.broadcast %cst_86 : f32 to vector<8x512xf32>
    %308 = arith.cmpf ogt, %306, %307 : vector<8x512xf32>
    %309 = arith.extui %308 : vector<8x512xi1> to vector<8x512xi32>
    %310 = arith.sitofp %309 : vector<8x512xi32> to vector<8x512xf32>
    %c192_i32 = arith.constant 192 : i32
    %311 = arith.addi %c192_i32, %10 : i32
    %312 = tpu.assume_multiple %311, 8 : i32
    %313 = arith.index_cast %312 : i32 to index
    %c0_87 = arith.constant 0 : index
    %314 = vector.load %arg9[%313, %c0_87] : memref<200x1024xf32, #tpu.memory_space<vmem>>, vector<8x512xf32>
    tpu.vector_store %arg9[%313, %c0_87], %310 {strides = array<i32>} : memref<200x1024xf32, #tpu.memory_space<vmem>>, vector<8x512xf32>,
    %315 = arith.index_cast %10 : i32 to index
    %c512 = arith.constant 512 : index
    %316 = vector.load %arg8[%315, %c512] : memref<8x1024xf32, #tpu.memory_space<vmem>>, vector<8x512xf32>
    %cst_88 = arith.constant 0.000000e+00 : f32
    %317 = vector.broadcast %cst_88 : f32 to vector<8x512xf32>
    %cst_89 = arith.constant 0.000000e+00 : f32
    %318 = vector.broadcast %cst_89 : f32 to vector<8x512xf32>
    %cst_90 = arith.constant 0.949999988 : f32
    %319 = vector.broadcast %cst_90 : f32 to vector<8x512xf32>
    %320 = arith.mulf %319, %317 : vector<8x512xf32>
    %321 = arith.addf %320, %316 : vector<8x512xf32>
    %322 = arith.subf %321, %318 : vector<8x512xf32>
    %cst_91 = arith.constant 1.000000e+00 : f32
    %323 = vector.broadcast %cst_91 : f32 to vector<8x512xf32>
    %324 = arith.cmpf ogt, %322, %323 : vector<8x512xf32>
    %325 = arith.extui %324 : vector<8x512xi1> to vector<8x512xi32>
    %326 = arith.sitofp %325 : vector<8x512xi32> to vector<8x512xf32>
    %c0_i32_92 = arith.constant 0 : i32
    %327 = arith.addi %c0_i32_92, %10 : i32
    %328 = tpu.assume_multiple %327, 8 : i32
    %329 = arith.index_cast %328 : i32 to index
    %c512_93 = arith.constant 512 : index
    %330 = vector.load %arg9[%329, %c512_93] : memref<200x1024xf32, #tpu.memory_space<vmem>>, vector<8x512xf32>
    tpu.vector_store %arg9[%329, %c512_93], %326 {strides = array<i32>} : memref<200x1024xf32, #tpu.memory_space<vmem>>, vector<8x512xf32>,
    %cst_94 = arith.constant 0.949999988 : f32
    %331 = vector.broadcast %cst_94 : f32 to vector<8x512xf32>
    %332 = arith.mulf %331, %322 : vector<8x512xf32>
    %333 = arith.addf %332, %316 : vector<8x512xf32>
    %334 = arith.subf %333, %326 : vector<8x512xf32>
    %cst_95 = arith.constant 1.000000e+00 : f32
    %335 = vector.broadcast %cst_95 : f32 to vector<8x512xf32>
    %336 = arith.cmpf ogt, %334, %335 : vector<8x512xf32>
    %337 = arith.extui %336 : vector<8x512xi1> to vector<8x512xi32>
    %338 = arith.sitofp %337 : vector<8x512xi32> to vector<8x512xf32>
    %c8_i32_96 = arith.constant 8 : i32
    %339 = arith.addi %c8_i32_96, %10 : i32
    %340 = tpu.assume_multiple %339, 8 : i32
    %341 = arith.index_cast %340 : i32 to index
    %c512_97 = arith.constant 512 : index
    %342 = vector.load %arg9[%341, %c512_97] : memref<200x1024xf32, #tpu.memory_space<vmem>>, vector<8x512xf32>
    tpu.vector_store %arg9[%341, %c512_97], %338 {strides = array<i32>} : memref<200x1024xf32, #tpu.memory_space<vmem>>, vector<8x512xf32>,
    %cst_98 = arith.constant 0.949999988 : f32
    %343 = vector.broadcast %cst_98 : f32 to vector<8x512xf32>
    %344 = arith.mulf %343, %334 : vector<8x512xf32>
    %345 = arith.addf %344, %316 : vector<8x512xf32>
    %346 = arith.subf %345, %338 : vector<8x512xf32>
    %cst_99 = arith.constant 1.000000e+00 : f32
    %347 = vector.broadcast %cst_99 : f32 to vector<8x512xf32>
    %348 = arith.cmpf ogt, %346, %347 : vector<8x512xf32>
    %349 = arith.extui %348 : vector<8x512xi1> to vector<8x512xi32>
    %350 = arith.sitofp %349 : vector<8x512xi32> to vector<8x512xf32>
    %c16_i32_100 = arith.constant 16 : i32
    %351 = arith.addi %c16_i32_100, %10 : i32
    %352 = tpu.assume_multiple %351, 8 : i32
    %353 = arith.index_cast %352 : i32 to index
    %c512_101 = arith.constant 512 : index
    %354 = vector.load %arg9[%353, %c512_101] : memref<200x1024xf32, #tpu.memory_space<vmem>>, vector<8x512xf32>
    tpu.vector_store %arg9[%353, %c512_101], %350 {strides = array<i32>} : memref<200x1024xf32, #tpu.memory_space<vmem>>, vector<8x512xf32>,
    %cst_102 = arith.constant 0.949999988 : f32
    %355 = vector.broadcast %cst_102 : f32 to vector<8x512xf32>
    %356 = arith.mulf %355, %346 : vector<8x512xf32>
    %357 = arith.addf %356, %316 : vector<8x512xf32>
    %358 = arith.subf %357, %350 : vector<8x512xf32>
    %cst_103 = arith.constant 1.000000e+00 : f32
    %359 = vector.broadcast %cst_103 : f32 to vector<8x512xf32>
    %360 = arith.cmpf ogt, %358, %359 : vector<8x512xf32>
    %361 = arith.extui %360 : vector<8x512xi1> to vector<8x512xi32>
    %362 = arith.sitofp %361 : vector<8x512xi32> to vector<8x512xf32>
    %c24_i32_104 = arith.constant 24 : i32
    %363 = arith.addi %c24_i32_104, %10 : i32
    %364 = tpu.assume_multiple %363, 8 : i32
    %365 = arith.index_cast %364 : i32 to index
    %c512_105 = arith.constant 512 : index
    %366 = vector.load %arg9[%365, %c512_105] : memref<200x1024xf32, #tpu.memory_space<vmem>>, vector<8x512xf32>
    tpu.vector_store %arg9[%365, %c512_105], %362 {strides = array<i32>} : memref<200x1024xf32, #tpu.memory_space<vmem>>, vector<8x512xf32>,
    %cst_106 = arith.constant 0.949999988 : f32
    %367 = vector.broadcast %cst_106 : f32 to vector<8x512xf32>
    %368 = arith.mulf %367, %358 : vector<8x512xf32>
    %369 = arith.addf %368, %316 : vector<8x512xf32>
    %370 = arith.subf %369, %362 : vector<8x512xf32>
    %cst_107 = arith.constant 1.000000e+00 : f32
    %371 = vector.broadcast %cst_107 : f32 to vector<8x512xf32>
    %372 = arith.cmpf ogt, %370, %371 : vector<8x512xf32>
    %373 = arith.extui %372 : vector<8x512xi1> to vector<8x512xi32>
    %374 = arith.sitofp %373 : vector<8x512xi32> to vector<8x512xf32>
    %c32_i32_108 = arith.constant 32 : i32
    %375 = arith.addi %c32_i32_108, %10 : i32
    %376 = tpu.assume_multiple %375, 8 : i32
    %377 = arith.index_cast %376 : i32 to index
    %c512_109 = arith.constant 512 : index
    %378 = vector.load %arg9[%377, %c512_109] : memref<200x1024xf32, #tpu.memory_space<vmem>>, vector<8x512xf32>
    tpu.vector_store %arg9[%377, %c512_109], %374 {strides = array<i32>} : memref<200x1024xf32, #tpu.memory_space<vmem>>, vector<8x512xf32>,
    %cst_110 = arith.constant 0.949999988 : f32
    %379 = vector.broadcast %cst_110 : f32 to vector<8x512xf32>
    %380 = arith.mulf %379, %370 : vector<8x512xf32>
    %381 = arith.addf %380, %316 : vector<8x512xf32>
    %382 = arith.subf %381, %374 : vector<8x512xf32>
    %cst_111 = arith.constant 1.000000e+00 : f32
    %383 = vector.broadcast %cst_111 : f32 to vector<8x512xf32>
    %384 = arith.cmpf ogt, %382, %383 : vector<8x512xf32>
    %385 = arith.extui %384 : vector<8x512xi1> to vector<8x512xi32>
    %386 = arith.sitofp %385 : vector<8x512xi32> to vector<8x512xf32>
    %c40_i32_112 = arith.constant 40 : i32
    %387 = arith.addi %c40_i32_112, %10 : i32
    %388 = tpu.assume_multiple %387, 8 : i32
    %389 = arith.index_cast %388 : i32 to index
    %c512_113 = arith.constant 512 : index
    %390 = vector.load %arg9[%389, %c512_113] : memref<200x1024xf32, #tpu.memory_space<vmem>>, vector<8x512xf32>
    tpu.vector_store %arg9[%389, %c512_113], %386 {strides = array<i32>} : memref<200x1024xf32, #tpu.memory_space<vmem>>, vector<8x512xf32>,
    %cst_114 = arith.constant 0.949999988 : f32
    %391 = vector.broadcast %cst_114 : f32 to vector<8x512xf32>
    %392 = arith.mulf %391, %382 : vector<8x512xf32>
    %393 = arith.addf %392, %316 : vector<8x512xf32>
    %394 = arith.subf %393, %386 : vector<8x512xf32>
    %cst_115 = arith.constant 1.000000e+00 : f32
    %395 = vector.broadcast %cst_115 : f32 to vector<8x512xf32>
    %396 = arith.cmpf ogt, %394, %395 : vector<8x512xf32>
    %397 = arith.extui %396 : vector<8x512xi1> to vector<8x512xi32>
    %398 = arith.sitofp %397 : vector<8x512xi32> to vector<8x512xf32>
    %c48_i32_116 = arith.constant 48 : i32
    %399 = arith.addi %c48_i32_116, %10 : i32
    %400 = tpu.assume_multiple %399, 8 : i32
    %401 = arith.index_cast %400 : i32 to index
    %c512_117 = arith.constant 512 : index
    %402 = vector.load %arg9[%401, %c512_117] : memref<200x1024xf32, #tpu.memory_space<vmem>>, vector<8x512xf32>
    tpu.vector_store %arg9[%401, %c512_117], %398 {strides = array<i32>} : memref<200x1024xf32, #tpu.memory_space<vmem>>, vector<8x512xf32>,
    %cst_118 = arith.constant 0.949999988 : f32
    %403 = vector.broadcast %cst_118 : f32 to vector<8x512xf32>
    %404 = arith.mulf %403, %394 : vector<8x512xf32>
    %405 = arith.addf %404, %316 : vector<8x512xf32>
    %406 = arith.subf %405, %398 : vector<8x512xf32>
    %cst_119 = arith.constant 1.000000e+00 : f32
    %407 = vector.broadcast %cst_119 : f32 to vector<8x512xf32>
    %408 = arith.cmpf ogt, %406, %407 : vector<8x512xf32>
    %409 = arith.extui %408 : vector<8x512xi1> to vector<8x512xi32>
    %410 = arith.sitofp %409 : vector<8x512xi32> to vector<8x512xf32>
    %c56_i32_120 = arith.constant 56 : i32
    %411 = arith.addi %c56_i32_120, %10 : i32
    %412 = tpu.assume_multiple %411, 8 : i32
    %413 = arith.index_cast %412 : i32 to index
    %c512_121 = arith.constant 512 : index
    %414 = vector.load %arg9[%413, %c512_121] : memref<200x1024xf32, #tpu.memory_space<vmem>>, vector<8x512xf32>
    tpu.vector_store %arg9[%413, %c512_121], %410 {strides = array<i32>} : memref<200x1024xf32, #tpu.memory_space<vmem>>, vector<8x512xf32>,
    %cst_122 = arith.constant 0.949999988 : f32
    %415 = vector.broadcast %cst_122 : f32 to vector<8x512xf32>
    %416 = arith.mulf %415, %406 : vector<8x512xf32>
    %417 = arith.addf %416, %316 : vector<8x512xf32>
    %418 = arith.subf %417, %410 : vector<8x512xf32>
    %cst_123 = arith.constant 1.000000e+00 : f32
    %419 = vector.broadcast %cst_123 : f32 to vector<8x512xf32>
    %420 = arith.cmpf ogt, %418, %419 : vector<8x512xf32>
    %421 = arith.extui %420 : vector<8x512xi1> to vector<8x512xi32>
    %422 = arith.sitofp %421 : vector<8x512xi32> to vector<8x512xf32>
    %c64_i32_124 = arith.constant 64 : i32
    %423 = arith.addi %c64_i32_124, %10 : i32
    %424 = tpu.assume_multiple %423, 8 : i32
    %425 = arith.index_cast %424 : i32 to index
    %c512_125 = arith.constant 512 : index
    %426 = vector.load %arg9[%425, %c512_125] : memref<200x1024xf32, #tpu.memory_space<vmem>>, vector<8x512xf32>
    tpu.vector_store %arg9[%425, %c512_125], %422 {strides = array<i32>} : memref<200x1024xf32, #tpu.memory_space<vmem>>, vector<8x512xf32>,
    %cst_126 = arith.constant 0.949999988 : f32
    %427 = vector.broadcast %cst_126 : f32 to vector<8x512xf32>
    %428 = arith.mulf %427, %418 : vector<8x512xf32>
    %429 = arith.addf %428, %316 : vector<8x512xf32>
    %430 = arith.subf %429, %422 : vector<8x512xf32>
    %cst_127 = arith.constant 1.000000e+00 : f32
    %431 = vector.broadcast %cst_127 : f32 to vector<8x512xf32>
    %432 = arith.cmpf ogt, %430, %431 : vector<8x512xf32>
    %433 = arith.extui %432 : vector<8x512xi1> to vector<8x512xi32>
    %434 = arith.sitofp %433 : vector<8x512xi32> to vector<8x512xf32>
    %c72_i32_128 = arith.constant 72 : i32
    %435 = arith.addi %c72_i32_128, %10 : i32
    %436 = tpu.assume_multiple %435, 8 : i32
    %437 = arith.index_cast %436 : i32 to index
    %c512_129 = arith.constant 512 : index
    %438 = vector.load %arg9[%437, %c512_129] : memref<200x1024xf32, #tpu.memory_space<vmem>>, vector<8x512xf32>
    tpu.vector_store %arg9[%437, %c512_129], %434 {strides = array<i32>} : memref<200x1024xf32, #tpu.memory_space<vmem>>, vector<8x512xf32>,
    %cst_130 = arith.constant 0.949999988 : f32
    %439 = vector.broadcast %cst_130 : f32 to vector<8x512xf32>
    %440 = arith.mulf %439, %430 : vector<8x512xf32>
    %441 = arith.addf %440, %316 : vector<8x512xf32>
    %442 = arith.subf %441, %434 : vector<8x512xf32>
    %cst_131 = arith.constant 1.000000e+00 : f32
    %443 = vector.broadcast %cst_131 : f32 to vector<8x512xf32>
    %444 = arith.cmpf ogt, %442, %443 : vector<8x512xf32>
    %445 = arith.extui %444 : vector<8x512xi1> to vector<8x512xi32>
    %446 = arith.sitofp %445 : vector<8x512xi32> to vector<8x512xf32>
    %c80_i32_132 = arith.constant 80 : i32
    %447 = arith.addi %c80_i32_132, %10 : i32
    %448 = tpu.assume_multiple %447, 8 : i32
    %449 = arith.index_cast %448 : i32 to index
    %c512_133 = arith.constant 512 : index
    %450 = vector.load %arg9[%449, %c512_133] : memref<200x1024xf32, #tpu.memory_space<vmem>>, vector<8x512xf32>
    tpu.vector_store %arg9[%449, %c512_133], %446 {strides = array<i32>} : memref<200x1024xf32, #tpu.memory_space<vmem>>, vector<8x512xf32>,
    %cst_134 = arith.constant 0.949999988 : f32
    %451 = vector.broadcast %cst_134 : f32 to vector<8x512xf32>
    %452 = arith.mulf %451, %442 : vector<8x512xf32>
    %453 = arith.addf %452, %316 : vector<8x512xf32>
    %454 = arith.subf %453, %446 : vector<8x512xf32>
    %cst_135 = arith.constant 1.000000e+00 : f32
    %455 = vector.broadcast %cst_135 : f32 to vector<8x512xf32>
    %456 = arith.cmpf ogt, %454, %455 : vector<8x512xf32>
    %457 = arith.extui %456 : vector<8x512xi1> to vector<8x512xi32>
    %458 = arith.sitofp %457 : vector<8x512xi32> to vector<8x512xf32>
    %c88_i32_136 = arith.constant 88 : i32
    %459 = arith.addi %c88_i32_136, %10 : i32
    %460 = tpu.assume_multiple %459, 8 : i32
    %461 = arith.index_cast %460 : i32 to index
    %c512_137 = arith.constant 512 : index
    %462 = vector.load %arg9[%461, %c512_137] : memref<200x1024xf32, #tpu.memory_space<vmem>>, vector<8x512xf32>
    tpu.vector_store %arg9[%461, %c512_137], %458 {strides = array<i32>} : memref<200x1024xf32, #tpu.memory_space<vmem>>, vector<8x512xf32>,
    %cst_138 = arith.constant 0.949999988 : f32
    %463 = vector.broadcast %cst_138 : f32 to vector<8x512xf32>
    %464 = arith.mulf %463, %454 : vector<8x512xf32>
    %465 = arith.addf %464, %316 : vector<8x512xf32>
    %466 = arith.subf %465, %458 : vector<8x512xf32>
    %cst_139 = arith.constant 1.000000e+00 : f32
    %467 = vector.broadcast %cst_139 : f32 to vector<8x512xf32>
    %468 = arith.cmpf ogt, %466, %467 : vector<8x512xf32>
    %469 = arith.extui %468 : vector<8x512xi1> to vector<8x512xi32>
    %470 = arith.sitofp %469 : vector<8x512xi32> to vector<8x512xf32>
    %c96_i32_140 = arith.constant 96 : i32
    %471 = arith.addi %c96_i32_140, %10 : i32
    %472 = tpu.assume_multiple %471, 8 : i32
    %473 = arith.index_cast %472 : i32 to index
    %c512_141 = arith.constant 512 : index
    %474 = vector.load %arg9[%473, %c512_141] : memref<200x1024xf32, #tpu.memory_space<vmem>>, vector<8x512xf32>
    tpu.vector_store %arg9[%473, %c512_141], %470 {strides = array<i32>} : memref<200x1024xf32, #tpu.memory_space<vmem>>, vector<8x512xf32>,
    %cst_142 = arith.constant 0.949999988 : f32
    %475 = vector.broadcast %cst_142 : f32 to vector<8x512xf32>
    %476 = arith.mulf %475, %466 : vector<8x512xf32>
    %477 = arith.addf %476, %316 : vector<8x512xf32>
    %478 = arith.subf %477, %470 : vector<8x512xf32>
    %cst_143 = arith.constant 1.000000e+00 : f32
    %479 = vector.broadcast %cst_143 : f32 to vector<8x512xf32>
    %480 = arith.cmpf ogt, %478, %479 : vector<8x512xf32>
    %481 = arith.extui %480 : vector<8x512xi1> to vector<8x512xi32>
    %482 = arith.sitofp %481 : vector<8x512xi32> to vector<8x512xf32>
    %c104_i32_144 = arith.constant 104 : i32
    %483 = arith.addi %c104_i32_144, %10 : i32
    %484 = tpu.assume_multiple %483, 8 : i32
    %485 = arith.index_cast %484 : i32 to index
    %c512_145 = arith.constant 512 : index
    %486 = vector.load %arg9[%485, %c512_145] : memref<200x1024xf32, #tpu.memory_space<vmem>>, vector<8x512xf32>
    tpu.vector_store %arg9[%485, %c512_145], %482 {strides = array<i32>} : memref<200x1024xf32, #tpu.memory_space<vmem>>, vector<8x512xf32>,
    %cst_146 = arith.constant 0.949999988 : f32
    %487 = vector.broadcast %cst_146 : f32 to vector<8x512xf32>
    %488 = arith.mulf %487, %478 : vector<8x512xf32>
    %489 = arith.addf %488, %316 : vector<8x512xf32>
    %490 = arith.subf %489, %482 : vector<8x512xf32>
    %cst_147 = arith.constant 1.000000e+00 : f32
    %491 = vector.broadcast %cst_147 : f32 to vector<8x512xf32>
    %492 = arith.cmpf ogt, %490, %491 : vector<8x512xf32>
    %493 = arith.extui %492 : vector<8x512xi1> to vector<8x512xi32>
    %494 = arith.sitofp %493 : vector<8x512xi32> to vector<8x512xf32>
    %c112_i32_148 = arith.constant 112 : i32
    %495 = arith.addi %c112_i32_148, %10 : i32
    %496 = tpu.assume_multiple %495, 8 : i32
    %497 = arith.index_cast %496 : i32 to index
    %c512_149 = arith.constant 512 : index
    %498 = vector.load %arg9[%497, %c512_149] : memref<200x1024xf32, #tpu.memory_space<vmem>>, vector<8x512xf32>
    tpu.vector_store %arg9[%497, %c512_149], %494 {strides = array<i32>} : memref<200x1024xf32, #tpu.memory_space<vmem>>, vector<8x512xf32>,
    %cst_150 = arith.constant 0.949999988 : f32
    %499 = vector.broadcast %cst_150 : f32 to vector<8x512xf32>
    %500 = arith.mulf %499, %490 : vector<8x512xf32>
    %501 = arith.addf %500, %316 : vector<8x512xf32>
    %502 = arith.subf %501, %494 : vector<8x512xf32>
    %cst_151 = arith.constant 1.000000e+00 : f32
    %503 = vector.broadcast %cst_151 : f32 to vector<8x512xf32>
    %504 = arith.cmpf ogt, %502, %503 : vector<8x512xf32>
    %505 = arith.extui %504 : vector<8x512xi1> to vector<8x512xi32>
    %506 = arith.sitofp %505 : vector<8x512xi32> to vector<8x512xf32>
    %c120_i32_152 = arith.constant 120 : i32
    %507 = arith.addi %c120_i32_152, %10 : i32
    %508 = tpu.assume_multiple %507, 8 : i32
    %509 = arith.index_cast %508 : i32 to index
    %c512_153 = arith.constant 512 : index
    %510 = vector.load %arg9[%509, %c512_153] : memref<200x1024xf32, #tpu.memory_space<vmem>>, vector<8x512xf32>
    tpu.vector_store %arg9[%509, %c512_153], %506 {strides = array<i32>} : memref<200x1024xf32, #tpu.memory_space<vmem>>, vector<8x512xf32>,
    %cst_154 = arith.constant 0.949999988 : f32
    %511 = vector.broadcast %cst_154 : f32 to vector<8x512xf32>
    %512 = arith.mulf %511, %502 : vector<8x512xf32>
    %513 = arith.addf %512, %316 : vector<8x512xf32>
    %514 = arith.subf %513, %506 : vector<8x512xf32>
    %cst_155 = arith.constant 1.000000e+00 : f32
    %515 = vector.broadcast %cst_155 : f32 to vector<8x512xf32>
    %516 = arith.cmpf ogt, %514, %515 : vector<8x512xf32>
    %517 = arith.extui %516 : vector<8x512xi1> to vector<8x512xi32>
    %518 = arith.sitofp %517 : vector<8x512xi32> to vector<8x512xf32>
    %c128_i32_156 = arith.constant 128 : i32
    %519 = arith.addi %c128_i32_156, %10 : i32
    %520 = tpu.assume_multiple %519, 8 : i32
    %521 = arith.index_cast %520 : i32 to index
    %c512_157 = arith.constant 512 : index
    %522 = vector.load %arg9[%521, %c512_157] : memref<200x1024xf32, #tpu.memory_space<vmem>>, vector<8x512xf32>
    tpu.vector_store %arg9[%521, %c512_157], %518 {strides = array<i32>} : memref<200x1024xf32, #tpu.memory_space<vmem>>, vector<8x512xf32>,
    %cst_158 = arith.constant 0.949999988 : f32
    %523 = vector.broadcast %cst_158 : f32 to vector<8x512xf32>
    %524 = arith.mulf %523, %514 : vector<8x512xf32>
    %525 = arith.addf %524, %316 : vector<8x512xf32>
    %526 = arith.subf %525, %518 : vector<8x512xf32>
    %cst_159 = arith.constant 1.000000e+00 : f32
    %527 = vector.broadcast %cst_159 : f32 to vector<8x512xf32>
    %528 = arith.cmpf ogt, %526, %527 : vector<8x512xf32>
    %529 = arith.extui %528 : vector<8x512xi1> to vector<8x512xi32>
    %530 = arith.sitofp %529 : vector<8x512xi32> to vector<8x512xf32>
    %c136_i32_160 = arith.constant 136 : i32
    %531 = arith.addi %c136_i32_160, %10 : i32
    %532 = tpu.assume_multiple %531, 8 : i32
    %533 = arith.index_cast %532 : i32 to index
    %c512_161 = arith.constant 512 : index
    %534 = vector.load %arg9[%533, %c512_161] : memref<200x1024xf32, #tpu.memory_space<vmem>>, vector<8x512xf32>
    tpu.vector_store %arg9[%533, %c512_161], %530 {strides = array<i32>} : memref<200x1024xf32, #tpu.memory_space<vmem>>, vector<8x512xf32>,
    %cst_162 = arith.constant 0.949999988 : f32
    %535 = vector.broadcast %cst_162 : f32 to vector<8x512xf32>
    %536 = arith.mulf %535, %526 : vector<8x512xf32>
    %537 = arith.addf %536, %316 : vector<8x512xf32>
    %538 = arith.subf %537, %530 : vector<8x512xf32>
    %cst_163 = arith.constant 1.000000e+00 : f32
    %539 = vector.broadcast %cst_163 : f32 to vector<8x512xf32>
    %540 = arith.cmpf ogt, %538, %539 : vector<8x512xf32>
    %541 = arith.extui %540 : vector<8x512xi1> to vector<8x512xi32>
    %542 = arith.sitofp %541 : vector<8x512xi32> to vector<8x512xf32>
    %c144_i32_164 = arith.constant 144 : i32
    %543 = arith.addi %c144_i32_164, %10 : i32
    %544 = tpu.assume_multiple %543, 8 : i32
    %545 = arith.index_cast %544 : i32 to index
    %c512_165 = arith.constant 512 : index
    %546 = vector.load %arg9[%545, %c512_165] : memref<200x1024xf32, #tpu.memory_space<vmem>>, vector<8x512xf32>
    tpu.vector_store %arg9[%545, %c512_165], %542 {strides = array<i32>} : memref<200x1024xf32, #tpu.memory_space<vmem>>, vector<8x512xf32>,
    %cst_166 = arith.constant 0.949999988 : f32
    %547 = vector.broadcast %cst_166 : f32 to vector<8x512xf32>
    %548 = arith.mulf %547, %538 : vector<8x512xf32>
    %549 = arith.addf %548, %316 : vector<8x512xf32>
    %550 = arith.subf %549, %542 : vector<8x512xf32>
    %cst_167 = arith.constant 1.000000e+00 : f32
    %551 = vector.broadcast %cst_167 : f32 to vector<8x512xf32>
    %552 = arith.cmpf ogt, %550, %551 : vector<8x512xf32>
    %553 = arith.extui %552 : vector<8x512xi1> to vector<8x512xi32>
    %554 = arith.sitofp %553 : vector<8x512xi32> to vector<8x512xf32>
    %c152_i32_168 = arith.constant 152 : i32
    %555 = arith.addi %c152_i32_168, %10 : i32
    %556 = tpu.assume_multiple %555, 8 : i32
    %557 = arith.index_cast %556 : i32 to index
    %c512_169 = arith.constant 512 : index
    %558 = vector.load %arg9[%557, %c512_169] : memref<200x1024xf32, #tpu.memory_space<vmem>>, vector<8x512xf32>
    tpu.vector_store %arg9[%557, %c512_169], %554 {strides = array<i32>} : memref<200x1024xf32, #tpu.memory_space<vmem>>, vector<8x512xf32>,
    %cst_170 = arith.constant 0.949999988 : f32
    %559 = vector.broadcast %cst_170 : f32 to vector<8x512xf32>
    %560 = arith.mulf %559, %550 : vector<8x512xf32>
    %561 = arith.addf %560, %316 : vector<8x512xf32>
    %562 = arith.subf %561, %554 : vector<8x512xf32>
    %cst_171 = arith.constant 1.000000e+00 : f32
    %563 = vector.broadcast %cst_171 : f32 to vector<8x512xf32>
    %564 = arith.cmpf ogt, %562, %563 : vector<8x512xf32>
    %565 = arith.extui %564 : vector<8x512xi1> to vector<8x512xi32>
    %566 = arith.sitofp %565 : vector<8x512xi32> to vector<8x512xf32>
    %c160_i32_172 = arith.constant 160 : i32
    %567 = arith.addi %c160_i32_172, %10 : i32
    %568 = tpu.assume_multiple %567, 8 : i32
    %569 = arith.index_cast %568 : i32 to index
    %c512_173 = arith.constant 512 : index
    %570 = vector.load %arg9[%569, %c512_173] : memref<200x1024xf32, #tpu.memory_space<vmem>>, vector<8x512xf32>
    tpu.vector_store %arg9[%569, %c512_173], %566 {strides = array<i32>} : memref<200x1024xf32, #tpu.memory_space<vmem>>, vector<8x512xf32>,
    %cst_174 = arith.constant 0.949999988 : f32
    %571 = vector.broadcast %cst_174 : f32 to vector<8x512xf32>
    %572 = arith.mulf %571, %562 : vector<8x512xf32>
    %573 = arith.addf %572, %316 : vector<8x512xf32>
    %574 = arith.subf %573, %566 : vector<8x512xf32>
    %cst_175 = arith.constant 1.000000e+00 : f32
    %575 = vector.broadcast %cst_175 : f32 to vector<8x512xf32>
    %576 = arith.cmpf ogt, %574, %575 : vector<8x512xf32>
    %577 = arith.extui %576 : vector<8x512xi1> to vector<8x512xi32>
    %578 = arith.sitofp %577 : vector<8x512xi32> to vector<8x512xf32>
    %c168_i32_176 = arith.constant 168 : i32
    %579 = arith.addi %c168_i32_176, %10 : i32
    %580 = tpu.assume_multiple %579, 8 : i32
    %581 = arith.index_cast %580 : i32 to index
    %c512_177 = arith.constant 512 : index
    %582 = vector.load %arg9[%581, %c512_177] : memref<200x1024xf32, #tpu.memory_space<vmem>>, vector<8x512xf32>
    tpu.vector_store %arg9[%581, %c512_177], %578 {strides = array<i32>} : memref<200x1024xf32, #tpu.memory_space<vmem>>, vector<8x512xf32>,
    %cst_178 = arith.constant 0.949999988 : f32
    %583 = vector.broadcast %cst_178 : f32 to vector<8x512xf32>
    %584 = arith.mulf %583, %574 : vector<8x512xf32>
    %585 = arith.addf %584, %316 : vector<8x512xf32>
    %586 = arith.subf %585, %578 : vector<8x512xf32>
    %cst_179 = arith.constant 1.000000e+00 : f32
    %587 = vector.broadcast %cst_179 : f32 to vector<8x512xf32>
    %588 = arith.cmpf ogt, %586, %587 : vector<8x512xf32>
    %589 = arith.extui %588 : vector<8x512xi1> to vector<8x512xi32>
    %590 = arith.sitofp %589 : vector<8x512xi32> to vector<8x512xf32>
    %c176_i32_180 = arith.constant 176 : i32
    %591 = arith.addi %c176_i32_180, %10 : i32
    %592 = tpu.assume_multiple %591, 8 : i32
    %593 = arith.index_cast %592 : i32 to index
    %c512_181 = arith.constant 512 : index
    %594 = vector.load %arg9[%593, %c512_181] : memref<200x1024xf32, #tpu.memory_space<vmem>>, vector<8x512xf32>
    tpu.vector_store %arg9[%593, %c512_181], %590 {strides = array<i32>} : memref<200x1024xf32, #tpu.memory_space<vmem>>, vector<8x512xf32>,
    %cst_182 = arith.constant 0.949999988 : f32
    %595 = vector.broadcast %cst_182 : f32 to vector<8x512xf32>
    %596 = arith.mulf %595, %586 : vector<8x512xf32>
    %597 = arith.addf %596, %316 : vector<8x512xf32>
    %598 = arith.subf %597, %590 : vector<8x512xf32>
    %cst_183 = arith.constant 1.000000e+00 : f32
    %599 = vector.broadcast %cst_183 : f32 to vector<8x512xf32>
    %600 = arith.cmpf ogt, %598, %599 : vector<8x512xf32>
    %601 = arith.extui %600 : vector<8x512xi1> to vector<8x512xi32>
    %602 = arith.sitofp %601 : vector<8x512xi32> to vector<8x512xf32>
    %c184_i32_184 = arith.constant 184 : i32
    %603 = arith.addi %c184_i32_184, %10 : i32
    %604 = tpu.assume_multiple %603, 8 : i32
    %605 = arith.index_cast %604 : i32 to index
    %c512_185 = arith.constant 512 : index
    %606 = vector.load %arg9[%605, %c512_185] : memref<200x1024xf32, #tpu.memory_space<vmem>>, vector<8x512xf32>
    tpu.vector_store %arg9[%605, %c512_185], %602 {strides = array<i32>} : memref<200x1024xf32, #tpu.memory_space<vmem>>, vector<8x512xf32>,
    %cst_186 = arith.constant 0.949999988 : f32
    %607 = vector.broadcast %cst_186 : f32 to vector<8x512xf32>
    %608 = arith.mulf %607, %598 : vector<8x512xf32>
    %609 = arith.addf %608, %316 : vector<8x512xf32>
    %610 = arith.subf %609, %602 : vector<8x512xf32>
    %cst_187 = arith.constant 1.000000e+00 : f32
    %611 = vector.broadcast %cst_187 : f32 to vector<8x512xf32>
    %612 = arith.cmpf ogt, %610, %611 : vector<8x512xf32>
    %613 = arith.extui %612 : vector<8x512xi1> to vector<8x512xi32>
    %614 = arith.sitofp %613 : vector<8x512xi32> to vector<8x512xf32>
    %c192_i32_188 = arith.constant 192 : i32
    %615 = arith.addi %c192_i32_188, %10 : i32
    %616 = tpu.assume_multiple %615, 8 : i32
    %617 = arith.index_cast %616 : i32 to index
    %c512_189 = arith.constant 512 : index
    %618 = vector.load %arg9[%617, %c512_189] : memref<200x1024xf32, #tpu.memory_space<vmem>>, vector<8x512xf32>
    tpu.vector_store %arg9[%617, %c512_189], %614 {strides = array<i32>} : memref<200x1024xf32, #tpu.memory_space<vmem>>, vector<8x512xf32>,
    %c1_i32_190 = arith.constant 1 : i32
    %c0_191 = arith.constant 0 : index
    %c0_192 = arith.constant 0 : index
    %619 = vector.load %arg9[%c0_191, %c0_192] : memref<200x1024xf32, #tpu.memory_space<vmem>>, vector<200x1024xf32>
    %c0_193 = arith.constant 0 : index
    %c0_194 = arith.constant 0 : index
    %620 = vector.load %arg4[%c0_193, %c0_194] : memref<1024x128xf32, #tpu.memory_space<vmem>>, vector<1024x128xf32>
    %cst_195 = arith.constant dense<0.000000e+00> : vector<200x128xf32>
    %621 = tpu.matmul %619, %620, %cst_195 {dimension_numbers = #tpu.dot_dimension_numbers<[1], [0], [0], [1], [0, 0, 1, 1], [], []>} : vector<200x1024xf32>, vector<1024x128xf32>, vector<200x128xf32> -> vector<200x128xf32>
    %c0_196 = arith.constant 0 : index
    %c0_197 = arith.constant 0 : index
    %622 = vector.load %arg5[%c0_196, %c0_197] : memref<1x128xf32, #tpu.memory_space<vmem>>, vector<1x128xf32>
    %623 = vector.broadcast %622 : vector<1x128xf32> to vector<200x128xf32>
    %624 = arith.addf %621, %623 : vector<200x128xf32>
    %c0_198 = arith.constant 0 : index
    %c0_199 = arith.constant 0 : index
    %625 = vector.load %arg10[%c0_198, %c0_199] : memref<200x128xf32, #tpu.memory_space<vmem>>, vector<200x128xf32>
    tpu.vector_store %arg10[%c0_198, %c0_199], %624 {strides = array<i32>} : memref<200x128xf32, #tpu.memory_space<vmem>>, vector<200x128xf32>,
    %cst_200 = arith.constant 0.000000e+00 : f32
    %626 = vector.broadcast %cst_200 : f32 to vector<8x128xf32>
    %cst_201 = arith.constant 0.000000e+00 : f32
    %627 = vector.broadcast %cst_201 : f32 to vector<8x128xf32>
    %c0_202 = arith.constant 0 : index
    %c0_203 = arith.constant 0 : index
    %628 = vector.load %arg10[%c0_202, %c0_203] : memref<200x128xf32, #tpu.memory_space<vmem>>, vector<8x128xf32>
    %cst_204 = arith.constant 0.949999988 : f32
    %629 = vector.broadcast %cst_204 : f32 to vector<8x128xf32>
    %630 = arith.mulf %629, %626 : vector<8x128xf32>
    %631 = arith.addf %630, %628 : vector<8x128xf32>
    %632 = arith.subf %631, %627 : vector<8x128xf32>
    %cst_205 = arith.constant 1.000000e+00 : f32
    %633 = vector.broadcast %cst_205 : f32 to vector<8x128xf32>
    %634 = arith.cmpf ogt, %632, %633 : vector<8x128xf32>
    %635 = arith.extui %634 : vector<8x128xi1> to vector<8x128xi32>
    %636 = arith.sitofp %635 : vector<8x128xi32> to vector<8x128xf32>
    %c0_206 = arith.constant 0 : index
    %c0_207 = arith.constant 0 : index
    %c0_208 = arith.constant 0 : index
    %637 = vector.load %arg6[%c0_206, %c0_207, %c0_208] : memref<25x8x128xf32, #tpu.memory_space<vmem>>, vector<1x8x128xf32>
    %638 = vector.shape_cast %637 : vector<1x8x128xf32> to vector<8x128xf32>
    %639 = vector.shape_cast %636 : vector<8x128xf32> to vector<1x8x128xf32>
    tpu.vector_store %arg6[%c0_206, %c0_207, %c0_208], %639 {strides = array<i32>} : memref<25x8x128xf32, #tpu.memory_space<vmem>>, vector<1x8x128xf32>,
    %c0_209 = arith.constant 0 : index
    %c0_210 = arith.constant 0 : index
    %c0_211 = arith.constant 0 : index
    %640 = vector.load %arg7[%c0_209, %c0_210, %c0_211] : memref<25x8x128xf32, #tpu.memory_space<vmem>>, vector<1x8x128xf32>
    %641 = vector.shape_cast %640 : vector<1x8x128xf32> to vector<8x128xf32>
    %642 = vector.shape_cast %632 : vector<8x128xf32> to vector<1x8x128xf32>
    tpu.vector_store %arg7[%c0_209, %c0_210, %c0_211], %642 {strides = array<i32>} : memref<25x8x128xf32, #tpu.memory_space<vmem>>, vector<1x8x128xf32>,
    %c8 = arith.constant 8 : index
    %c0_212 = arith.constant 0 : index
    %643 = vector.load %arg10[%c8, %c0_212] : memref<200x128xf32, #tpu.memory_space<vmem>>, vector<8x128xf32>
    %cst_213 = arith.constant 0.949999988 : f32
    %644 = vector.broadcast %cst_213 : f32 to vector<8x128xf32>
    %645 = arith.mulf %644, %632 : vector<8x128xf32>
    %646 = arith.addf %645, %643 : vector<8x128xf32>
    %647 = arith.subf %646, %636 : vector<8x128xf32>
    %cst_214 = arith.constant 1.000000e+00 : f32
    %648 = vector.broadcast %cst_214 : f32 to vector<8x128xf32>
    %649 = arith.cmpf ogt, %647, %648 : vector<8x128xf32>
    %650 = arith.extui %649 : vector<8x128xi1> to vector<8x128xi32>
    %651 = arith.sitofp %650 : vector<8x128xi32> to vector<8x128xf32>
    %c1 = arith.constant 1 : index
    %c0_215 = arith.constant 0 : index
    %c0_216 = arith.constant 0 : index
    %652 = vector.load %arg6[%c1, %c0_215, %c0_216] : memref<25x8x128xf32, #tpu.memory_space<vmem>>, vector<1x8x128xf32>
    %653 = vector.shape_cast %652 : vector<1x8x128xf32> to vector<8x128xf32>
    %654 = vector.shape_cast %651 : vector<8x128xf32> to vector<1x8x128xf32>
    tpu.vector_store %arg6[%c1, %c0_215, %c0_216], %654 {strides = array<i32>} : memref<25x8x128xf32, #tpu.memory_space<vmem>>, vector<1x8x128xf32>,
    %c1_217 = arith.constant 1 : index
    %c0_218 = arith.constant 0 : index
    %c0_219 = arith.constant 0 : index
    %655 = vector.load %arg7[%c1_217, %c0_218, %c0_219] : memref<25x8x128xf32, #tpu.memory_space<vmem>>, vector<1x8x128xf32>
    %656 = vector.shape_cast %655 : vector<1x8x128xf32> to vector<8x128xf32>
    %657 = vector.shape_cast %647 : vector<8x128xf32> to vector<1x8x128xf32>
    tpu.vector_store %arg7[%c1_217, %c0_218, %c0_219], %657 {strides = array<i32>} : memref<25x8x128xf32, #tpu.memory_space<vmem>>, vector<1x8x128xf32>,
    %c16 = arith.constant 16 : index
    %c0_220 = arith.constant 0 : index
    %658 = vector.load %arg10[%c16, %c0_220] : memref<200x128xf32, #tpu.memory_space<vmem>>, vector<8x128xf32>
    %cst_221 = arith.constant 0.949999988 : f32
    %659 = vector.broadcast %cst_221 : f32 to vector<8x128xf32>
    %660 = arith.mulf %659, %647 : vector<8x128xf32>
    %661 = arith.addf %660, %658 : vector<8x128xf32>
    %662 = arith.subf %661, %651 : vector<8x128xf32>
    %cst_222 = arith.constant 1.000000e+00 : f32
    %663 = vector.broadcast %cst_222 : f32 to vector<8x128xf32>
    %664 = arith.cmpf ogt, %662, %663 : vector<8x128xf32>
    %665 = arith.extui %664 : vector<8x128xi1> to vector<8x128xi32>
    %666 = arith.sitofp %665 : vector<8x128xi32> to vector<8x128xf32>
    %c2 = arith.constant 2 : index
    %c0_223 = arith.constant 0 : index
    %c0_224 = arith.constant 0 : index
    %667 = vector.load %arg6[%c2, %c0_223, %c0_224] : memref<25x8x128xf32, #tpu.memory_space<vmem>>, vector<1x8x128xf32>
    %668 = vector.shape_cast %667 : vector<1x8x128xf32> to vector<8x128xf32>
    %669 = vector.shape_cast %666 : vector<8x128xf32> to vector<1x8x128xf32>
    tpu.vector_store %arg6[%c2, %c0_223, %c0_224], %669 {strides = array<i32>} : memref<25x8x128xf32, #tpu.memory_space<vmem>>, vector<1x8x128xf32>,
    %c2_225 = arith.constant 2 : index
    %c0_226 = arith.constant 0 : index
    %c0_227 = arith.constant 0 : index
    %670 = vector.load %arg7[%c2_225, %c0_226, %c0_227] : memref<25x8x128xf32, #tpu.memory_space<vmem>>, vector<1x8x128xf32>
    %671 = vector.shape_cast %670 : vector<1x8x128xf32> to vector<8x128xf32>
    %672 = vector.shape_cast %662 : vector<8x128xf32> to vector<1x8x128xf32>
    tpu.vector_store %arg7[%c2_225, %c0_226, %c0_227], %672 {strides = array<i32>} : memref<25x8x128xf32, #tpu.memory_space<vmem>>, vector<1x8x128xf32>,
    %c24 = arith.constant 24 : index
    %c0_228 = arith.constant 0 : index
    %673 = vector.load %arg10[%c24, %c0_228] : memref<200x128xf32, #tpu.memory_space<vmem>>, vector<8x128xf32>
    %cst_229 = arith.constant 0.949999988 : f32
    %674 = vector.broadcast %cst_229 : f32 to vector<8x128xf32>
    %675 = arith.mulf %674, %662 : vector<8x128xf32>
    %676 = arith.addf %675, %673 : vector<8x128xf32>
    %677 = arith.subf %676, %666 : vector<8x128xf32>
    %cst_230 = arith.constant 1.000000e+00 : f32
    %678 = vector.broadcast %cst_230 : f32 to vector<8x128xf32>
    %679 = arith.cmpf ogt, %677, %678 : vector<8x128xf32>
    %680 = arith.extui %679 : vector<8x128xi1> to vector<8x128xi32>
    %681 = arith.sitofp %680 : vector<8x128xi32> to vector<8x128xf32>
    %c3 = arith.constant 3 : index
    %c0_231 = arith.constant 0 : index
    %c0_232 = arith.constant 0 : index
    %682 = vector.load %arg6[%c3, %c0_231, %c0_232] : memref<25x8x128xf32, #tpu.memory_space<vmem>>, vector<1x8x128xf32>
    %683 = vector.shape_cast %682 : vector<1x8x128xf32> to vector<8x128xf32>
    %684 = vector.shape_cast %681 : vector<8x128xf32> to vector<1x8x128xf32>
    tpu.vector_store %arg6[%c3, %c0_231, %c0_232], %684 {strides = array<i32>} : memref<25x8x128xf32, #tpu.memory_space<vmem>>, vector<1x8x128xf32>,
    %c3_233 = arith.constant 3 : index
    %c0_234 = arith.constant 0 : index
    %c0_235 = arith.constant 0 : index
    %685 = vector.load %arg7[%c3_233, %c0_234, %c0_235] : memref<25x8x128xf32, #tpu.memory_space<vmem>>, vector<1x8x128xf32>
    %686 = vector.shape_cast %685 : vector<1x8x128xf32> to vector<8x128xf32>
    %687 = vector.shape_cast %677 : vector<8x128xf32> to vector<1x8x128xf32>
    tpu.vector_store %arg7[%c3_233, %c0_234, %c0_235], %687 {strides = array<i32>} : memref<25x8x128xf32, #tpu.memory_space<vmem>>, vector<1x8x128xf32>,
    %c32 = arith.constant 32 : index
    %c0_236 = arith.constant 0 : index
    %688 = vector.load %arg10[%c32, %c0_236] : memref<200x128xf32, #tpu.memory_space<vmem>>, vector<8x128xf32>
    %cst_237 = arith.constant 0.949999988 : f32
    %689 = vector.broadcast %cst_237 : f32 to vector<8x128xf32>
    %690 = arith.mulf %689, %677 : vector<8x128xf32>
    %691 = arith.addf %690, %688 : vector<8x128xf32>
    %692 = arith.subf %691, %681 : vector<8x128xf32>
    %cst_238 = arith.constant 1.000000e+00 : f32
    %693 = vector.broadcast %cst_238 : f32 to vector<8x128xf32>
    %694 = arith.cmpf ogt, %692, %693 : vector<8x128xf32>
    %695 = arith.extui %694 : vector<8x128xi1> to vector<8x128xi32>
    %696 = arith.sitofp %695 : vector<8x128xi32> to vector<8x128xf32>
    %c4 = arith.constant 4 : index
    %c0_239 = arith.constant 0 : index
    %c0_240 = arith.constant 0 : index
    %697 = vector.load %arg6[%c4, %c0_239, %c0_240] : memref<25x8x128xf32, #tpu.memory_space<vmem>>, vector<1x8x128xf32>
    %698 = vector.shape_cast %697 : vector<1x8x128xf32> to vector<8x128xf32>
    %699 = vector.shape_cast %696 : vector<8x128xf32> to vector<1x8x128xf32>
    tpu.vector_store %arg6[%c4, %c0_239, %c0_240], %699 {strides = array<i32>} : memref<25x8x128xf32, #tpu.memory_space<vmem>>, vector<1x8x128xf32>,
    %c4_241 = arith.constant 4 : index
    %c0_242 = arith.constant 0 : index
    %c0_243 = arith.constant 0 : index
    %700 = vector.load %arg7[%c4_241, %c0_242, %c0_243] : memref<25x8x128xf32, #tpu.memory_space<vmem>>, vector<1x8x128xf32>
    %701 = vector.shape_cast %700 : vector<1x8x128xf32> to vector<8x128xf32>
    %702 = vector.shape_cast %692 : vector<8x128xf32> to vector<1x8x128xf32>
    tpu.vector_store %arg7[%c4_241, %c0_242, %c0_243], %702 {strides = array<i32>} : memref<25x8x128xf32, #tpu.memory_space<vmem>>, vector<1x8x128xf32>,
    %c40 = arith.constant 40 : index
    %c0_244 = arith.constant 0 : index
    %703 = vector.load %arg10[%c40, %c0_244] : memref<200x128xf32, #tpu.memory_space<vmem>>, vector<8x128xf32>
    %cst_245 = arith.constant 0.949999988 : f32
    %704 = vector.broadcast %cst_245 : f32 to vector<8x128xf32>
    %705 = arith.mulf %704, %692 : vector<8x128xf32>
    %706 = arith.addf %705, %703 : vector<8x128xf32>
    %707 = arith.subf %706, %696 : vector<8x128xf32>
    %cst_246 = arith.constant 1.000000e+00 : f32
    %708 = vector.broadcast %cst_246 : f32 to vector<8x128xf32>
    %709 = arith.cmpf ogt, %707, %708 : vector<8x128xf32>
    %710 = arith.extui %709 : vector<8x128xi1> to vector<8x128xi32>
    %711 = arith.sitofp %710 : vector<8x128xi32> to vector<8x128xf32>
    %c5 = arith.constant 5 : index
    %c0_247 = arith.constant 0 : index
    %c0_248 = arith.constant 0 : index
    %712 = vector.load %arg6[%c5, %c0_247, %c0_248] : memref<25x8x128xf32, #tpu.memory_space<vmem>>, vector<1x8x128xf32>
    %713 = vector.shape_cast %712 : vector<1x8x128xf32> to vector<8x128xf32>
    %714 = vector.shape_cast %711 : vector<8x128xf32> to vector<1x8x128xf32>
    tpu.vector_store %arg6[%c5, %c0_247, %c0_248], %714 {strides = array<i32>} : memref<25x8x128xf32, #tpu.memory_space<vmem>>, vector<1x8x128xf32>,
    %c5_249 = arith.constant 5 : index
    %c0_250 = arith.constant 0 : index
    %c0_251 = arith.constant 0 : index
    %715 = vector.load %arg7[%c5_249, %c0_250, %c0_251] : memref<25x8x128xf32, #tpu.memory_space<vmem>>, vector<1x8x128xf32>
    %716 = vector.shape_cast %715 : vector<1x8x128xf32> to vector<8x128xf32>
    %717 = vector.shape_cast %707 : vector<8x128xf32> to vector<1x8x128xf32>
    tpu.vector_store %arg7[%c5_249, %c0_250, %c0_251], %717 {strides = array<i32>} : memref<25x8x128xf32, #tpu.memory_space<vmem>>, vector<1x8x128xf32>,
    %c48 = arith.constant 48 : index
    %c0_252 = arith.constant 0 : index
    %718 = vector.load %arg10[%c48, %c0_252] : memref<200x128xf32, #tpu.memory_space<vmem>>, vector<8x128xf32>
    %cst_253 = arith.constant 0.949999988 : f32
    %719 = vector.broadcast %cst_253 : f32 to vector<8x128xf32>
    %720 = arith.mulf %719, %707 : vector<8x128xf32>
    %721 = arith.addf %720, %718 : vector<8x128xf32>
    %722 = arith.subf %721, %711 : vector<8x128xf32>
    %cst_254 = arith.constant 1.000000e+00 : f32
    %723 = vector.broadcast %cst_254 : f32 to vector<8x128xf32>
    %724 = arith.cmpf ogt, %722, %723 : vector<8x128xf32>
    %725 = arith.extui %724 : vector<8x128xi1> to vector<8x128xi32>
    %726 = arith.sitofp %725 : vector<8x128xi32> to vector<8x128xf32>
    %c6 = arith.constant 6 : index
    %c0_255 = arith.constant 0 : index
    %c0_256 = arith.constant 0 : index
    %727 = vector.load %arg6[%c6, %c0_255, %c0_256] : memref<25x8x128xf32, #tpu.memory_space<vmem>>, vector<1x8x128xf32>
    %728 = vector.shape_cast %727 : vector<1x8x128xf32> to vector<8x128xf32>
    %729 = vector.shape_cast %726 : vector<8x128xf32> to vector<1x8x128xf32>
    tpu.vector_store %arg6[%c6, %c0_255, %c0_256], %729 {strides = array<i32>} : memref<25x8x128xf32, #tpu.memory_space<vmem>>, vector<1x8x128xf32>,
    %c6_257 = arith.constant 6 : index
    %c0_258 = arith.constant 0 : index
    %c0_259 = arith.constant 0 : index
    %730 = vector.load %arg7[%c6_257, %c0_258, %c0_259] : memref<25x8x128xf32, #tpu.memory_space<vmem>>, vector<1x8x128xf32>
    %731 = vector.shape_cast %730 : vector<1x8x128xf32> to vector<8x128xf32>
    %732 = vector.shape_cast %722 : vector<8x128xf32> to vector<1x8x128xf32>
    tpu.vector_store %arg7[%c6_257, %c0_258, %c0_259], %732 {strides = array<i32>} : memref<25x8x128xf32, #tpu.memory_space<vmem>>, vector<1x8x128xf32>,
    %c56 = arith.constant 56 : index
    %c0_260 = arith.constant 0 : index
    %733 = vector.load %arg10[%c56, %c0_260] : memref<200x128xf32, #tpu.memory_space<vmem>>, vector<8x128xf32>
    %cst_261 = arith.constant 0.949999988 : f32
    %734 = vector.broadcast %cst_261 : f32 to vector<8x128xf32>
    %735 = arith.mulf %734, %722 : vector<8x128xf32>
    %736 = arith.addf %735, %733 : vector<8x128xf32>
    %737 = arith.subf %736, %726 : vector<8x128xf32>
    %cst_262 = arith.constant 1.000000e+00 : f32
    %738 = vector.broadcast %cst_262 : f32 to vector<8x128xf32>
    %739 = arith.cmpf ogt, %737, %738 : vector<8x128xf32>
    %740 = arith.extui %739 : vector<8x128xi1> to vector<8x128xi32>
    %741 = arith.sitofp %740 : vector<8x128xi32> to vector<8x128xf32>
    %c7 = arith.constant 7 : index
    %c0_263 = arith.constant 0 : index
    %c0_264 = arith.constant 0 : index
    %742 = vector.load %arg6[%c7, %c0_263, %c0_264] : memref<25x8x128xf32, #tpu.memory_space<vmem>>, vector<1x8x128xf32>
    %743 = vector.shape_cast %742 : vector<1x8x128xf32> to vector<8x128xf32>
    %744 = vector.shape_cast %741 : vector<8x128xf32> to vector<1x8x128xf32>
    tpu.vector_store %arg6[%c7, %c0_263, %c0_264], %744 {strides = array<i32>} : memref<25x8x128xf32, #tpu.memory_space<vmem>>, vector<1x8x128xf32>,
    %c7_265 = arith.constant 7 : index
    %c0_266 = arith.constant 0 : index
    %c0_267 = arith.constant 0 : index
    %745 = vector.load %arg7[%c7_265, %c0_266, %c0_267] : memref<25x8x128xf32, #tpu.memory_space<vmem>>, vector<1x8x128xf32>
    %746 = vector.shape_cast %745 : vector<1x8x128xf32> to vector<8x128xf32>
    %747 = vector.shape_cast %737 : vector<8x128xf32> to vector<1x8x128xf32>
    tpu.vector_store %arg7[%c7_265, %c0_266, %c0_267], %747 {strides = array<i32>} : memref<25x8x128xf32, #tpu.memory_space<vmem>>, vector<1x8x128xf32>,
    %c64 = arith.constant 64 : index
    %c0_268 = arith.constant 0 : index
    %748 = vector.load %arg10[%c64, %c0_268] : memref<200x128xf32, #tpu.memory_space<vmem>>, vector<8x128xf32>
    %cst_269 = arith.constant 0.949999988 : f32
    %749 = vector.broadcast %cst_269 : f32 to vector<8x128xf32>
    %750 = arith.mulf %749, %737 : vector<8x128xf32>
    %751 = arith.addf %750, %748 : vector<8x128xf32>
    %752 = arith.subf %751, %741 : vector<8x128xf32>
    %cst_270 = arith.constant 1.000000e+00 : f32
    %753 = vector.broadcast %cst_270 : f32 to vector<8x128xf32>
    %754 = arith.cmpf ogt, %752, %753 : vector<8x128xf32>
    %755 = arith.extui %754 : vector<8x128xi1> to vector<8x128xi32>
    %756 = arith.sitofp %755 : vector<8x128xi32> to vector<8x128xf32>
    %c8_271 = arith.constant 8 : index
    %c0_272 = arith.constant 0 : index
    %c0_273 = arith.constant 0 : index
    %757 = vector.load %arg6[%c8_271, %c0_272, %c0_273] : memref<25x8x128xf32, #tpu.memory_space<vmem>>, vector<1x8x128xf32>
    %758 = vector.shape_cast %757 : vector<1x8x128xf32> to vector<8x128xf32>
    %759 = vector.shape_cast %756 : vector<8x128xf32> to vector<1x8x128xf32>
    tpu.vector_store %arg6[%c8_271, %c0_272, %c0_273], %759 {strides = array<i32>} : memref<25x8x128xf32, #tpu.memory_space<vmem>>, vector<1x8x128xf32>,
    %c8_274 = arith.constant 8 : index
    %c0_275 = arith.constant 0 : index
    %c0_276 = arith.constant 0 : index
    %760 = vector.load %arg7[%c8_274, %c0_275, %c0_276] : memref<25x8x128xf32, #tpu.memory_space<vmem>>, vector<1x8x128xf32>
    %761 = vector.shape_cast %760 : vector<1x8x128xf32> to vector<8x128xf32>
    %762 = vector.shape_cast %752 : vector<8x128xf32> to vector<1x8x128xf32>
    tpu.vector_store %arg7[%c8_274, %c0_275, %c0_276], %762 {strides = array<i32>} : memref<25x8x128xf32, #tpu.memory_space<vmem>>, vector<1x8x128xf32>,
    %c72 = arith.constant 72 : index
    %c0_277 = arith.constant 0 : index
    %763 = vector.load %arg10[%c72, %c0_277] : memref<200x128xf32, #tpu.memory_space<vmem>>, vector<8x128xf32>
    %cst_278 = arith.constant 0.949999988 : f32
    %764 = vector.broadcast %cst_278 : f32 to vector<8x128xf32>
    %765 = arith.mulf %764, %752 : vector<8x128xf32>
    %766 = arith.addf %765, %763 : vector<8x128xf32>
    %767 = arith.subf %766, %756 : vector<8x128xf32>
    %cst_279 = arith.constant 1.000000e+00 : f32
    %768 = vector.broadcast %cst_279 : f32 to vector<8x128xf32>
    %769 = arith.cmpf ogt, %767, %768 : vector<8x128xf32>
    %770 = arith.extui %769 : vector<8x128xi1> to vector<8x128xi32>
    %771 = arith.sitofp %770 : vector<8x128xi32> to vector<8x128xf32>
    %c9 = arith.constant 9 : index
    %c0_280 = arith.constant 0 : index
    %c0_281 = arith.constant 0 : index
    %772 = vector.load %arg6[%c9, %c0_280, %c0_281] : memref<25x8x128xf32, #tpu.memory_space<vmem>>, vector<1x8x128xf32>
    %773 = vector.shape_cast %772 : vector<1x8x128xf32> to vector<8x128xf32>
    %774 = vector.shape_cast %771 : vector<8x128xf32> to vector<1x8x128xf32>
    tpu.vector_store %arg6[%c9, %c0_280, %c0_281], %774 {strides = array<i32>} : memref<25x8x128xf32, #tpu.memory_space<vmem>>, vector<1x8x128xf32>,
    %c9_282 = arith.constant 9 : index
    %c0_283 = arith.constant 0 : index
    %c0_284 = arith.constant 0 : index
    %775 = vector.load %arg7[%c9_282, %c0_283, %c0_284] : memref<25x8x128xf32, #tpu.memory_space<vmem>>, vector<1x8x128xf32>
    %776 = vector.shape_cast %775 : vector<1x8x128xf32> to vector<8x128xf32>
    %777 = vector.shape_cast %767 : vector<8x128xf32> to vector<1x8x128xf32>
    tpu.vector_store %arg7[%c9_282, %c0_283, %c0_284], %777 {strides = array<i32>} : memref<25x8x128xf32, #tpu.memory_space<vmem>>, vector<1x8x128xf32>,
    %c80 = arith.constant 80 : index
    %c0_285 = arith.constant 0 : index
    %778 = vector.load %arg10[%c80, %c0_285] : memref<200x128xf32, #tpu.memory_space<vmem>>, vector<8x128xf32>
    %cst_286 = arith.constant 0.949999988 : f32
    %779 = vector.broadcast %cst_286 : f32 to vector<8x128xf32>
    %780 = arith.mulf %779, %767 : vector<8x128xf32>
    %781 = arith.addf %780, %778 : vector<8x128xf32>
    %782 = arith.subf %781, %771 : vector<8x128xf32>
    %cst_287 = arith.constant 1.000000e+00 : f32
    %783 = vector.broadcast %cst_287 : f32 to vector<8x128xf32>
    %784 = arith.cmpf ogt, %782, %783 : vector<8x128xf32>
    %785 = arith.extui %784 : vector<8x128xi1> to vector<8x128xi32>
    %786 = arith.sitofp %785 : vector<8x128xi32> to vector<8x128xf32>
    %c10 = arith.constant 10 : index
    %c0_288 = arith.constant 0 : index
    %c0_289 = arith.constant 0 : index
    %787 = vector.load %arg6[%c10, %c0_288, %c0_289] : memref<25x8x128xf32, #tpu.memory_space<vmem>>, vector<1x8x128xf32>
    %788 = vector.shape_cast %787 : vector<1x8x128xf32> to vector<8x128xf32>
    %789 = vector.shape_cast %786 : vector<8x128xf32> to vector<1x8x128xf32>
    tpu.vector_store %arg6[%c10, %c0_288, %c0_289], %789 {strides = array<i32>} : memref<25x8x128xf32, #tpu.memory_space<vmem>>, vector<1x8x128xf32>,
    %c10_290 = arith.constant 10 : index
    %c0_291 = arith.constant 0 : index
    %c0_292 = arith.constant 0 : index
    %790 = vector.load %arg7[%c10_290, %c0_291, %c0_292] : memref<25x8x128xf32, #tpu.memory_space<vmem>>, vector<1x8x128xf32>
    %791 = vector.shape_cast %790 : vector<1x8x128xf32> to vector<8x128xf32>
    %792 = vector.shape_cast %782 : vector<8x128xf32> to vector<1x8x128xf32>
    tpu.vector_store %arg7[%c10_290, %c0_291, %c0_292], %792 {strides = array<i32>} : memref<25x8x128xf32, #tpu.memory_space<vmem>>, vector<1x8x128xf32>,
    %c88 = arith.constant 88 : index
    %c0_293 = arith.constant 0 : index
    %793 = vector.load %arg10[%c88, %c0_293] : memref<200x128xf32, #tpu.memory_space<vmem>>, vector<8x128xf32>
    %cst_294 = arith.constant 0.949999988 : f32
    %794 = vector.broadcast %cst_294 : f32 to vector<8x128xf32>
    %795 = arith.mulf %794, %782 : vector<8x128xf32>
    %796 = arith.addf %795, %793 : vector<8x128xf32>
    %797 = arith.subf %796, %786 : vector<8x128xf32>
    %cst_295 = arith.constant 1.000000e+00 : f32
    %798 = vector.broadcast %cst_295 : f32 to vector<8x128xf32>
    %799 = arith.cmpf ogt, %797, %798 : vector<8x128xf32>
    %800 = arith.extui %799 : vector<8x128xi1> to vector<8x128xi32>
    %801 = arith.sitofp %800 : vector<8x128xi32> to vector<8x128xf32>
    %c11 = arith.constant 11 : index
    %c0_296 = arith.constant 0 : index
    %c0_297 = arith.constant 0 : index
    %802 = vector.load %arg6[%c11, %c0_296, %c0_297] : memref<25x8x128xf32, #tpu.memory_space<vmem>>, vector<1x8x128xf32>
    %803 = vector.shape_cast %802 : vector<1x8x128xf32> to vector<8x128xf32>
    %804 = vector.shape_cast %801 : vector<8x128xf32> to vector<1x8x128xf32>
    tpu.vector_store %arg6[%c11, %c0_296, %c0_297], %804 {strides = array<i32>} : memref<25x8x128xf32, #tpu.memory_space<vmem>>, vector<1x8x128xf32>,
    %c11_298 = arith.constant 11 : index
    %c0_299 = arith.constant 0 : index
    %c0_300 = arith.constant 0 : index
    %805 = vector.load %arg7[%c11_298, %c0_299, %c0_300] : memref<25x8x128xf32, #tpu.memory_space<vmem>>, vector<1x8x128xf32>
    %806 = vector.shape_cast %805 : vector<1x8x128xf32> to vector<8x128xf32>
    %807 = vector.shape_cast %797 : vector<8x128xf32> to vector<1x8x128xf32>
    tpu.vector_store %arg7[%c11_298, %c0_299, %c0_300], %807 {strides = array<i32>} : memref<25x8x128xf32, #tpu.memory_space<vmem>>, vector<1x8x128xf32>,
    %c96 = arith.constant 96 : index
    %c0_301 = arith.constant 0 : index
    %808 = vector.load %arg10[%c96, %c0_301] : memref<200x128xf32, #tpu.memory_space<vmem>>, vector<8x128xf32>
    %cst_302 = arith.constant 0.949999988 : f32
    %809 = vector.broadcast %cst_302 : f32 to vector<8x128xf32>
    %810 = arith.mulf %809, %797 : vector<8x128xf32>
    %811 = arith.addf %810, %808 : vector<8x128xf32>
    %812 = arith.subf %811, %801 : vector<8x128xf32>
    %cst_303 = arith.constant 1.000000e+00 : f32
    %813 = vector.broadcast %cst_303 : f32 to vector<8x128xf32>
    %814 = arith.cmpf ogt, %812, %813 : vector<8x128xf32>
    %815 = arith.extui %814 : vector<8x128xi1> to vector<8x128xi32>
    %816 = arith.sitofp %815 : vector<8x128xi32> to vector<8x128xf32>
    %c12 = arith.constant 12 : index
    %c0_304 = arith.constant 0 : index
    %c0_305 = arith.constant 0 : index
    %817 = vector.load %arg6[%c12, %c0_304, %c0_305] : memref<25x8x128xf32, #tpu.memory_space<vmem>>, vector<1x8x128xf32>
    %818 = vector.shape_cast %817 : vector<1x8x128xf32> to vector<8x128xf32>
    %819 = vector.shape_cast %816 : vector<8x128xf32> to vector<1x8x128xf32>
    tpu.vector_store %arg6[%c12, %c0_304, %c0_305], %819 {strides = array<i32>} : memref<25x8x128xf32, #tpu.memory_space<vmem>>, vector<1x8x128xf32>,
    %c12_306 = arith.constant 12 : index
    %c0_307 = arith.constant 0 : index
    %c0_308 = arith.constant 0 : index
    %820 = vector.load %arg7[%c12_306, %c0_307, %c0_308] : memref<25x8x128xf32, #tpu.memory_space<vmem>>, vector<1x8x128xf32>
    %821 = vector.shape_cast %820 : vector<1x8x128xf32> to vector<8x128xf32>
    %822 = vector.shape_cast %812 : vector<8x128xf32> to vector<1x8x128xf32>
    tpu.vector_store %arg7[%c12_306, %c0_307, %c0_308], %822 {strides = array<i32>} : memref<25x8x128xf32, #tpu.memory_space<vmem>>, vector<1x8x128xf32>,
    %c104 = arith.constant 104 : index
    %c0_309 = arith.constant 0 : index
    %823 = vector.load %arg10[%c104, %c0_309] : memref<200x128xf32, #tpu.memory_space<vmem>>, vector<8x128xf32>
    %cst_310 = arith.constant 0.949999988 : f32
    %824 = vector.broadcast %cst_310 : f32 to vector<8x128xf32>
    %825 = arith.mulf %824, %812 : vector<8x128xf32>
    %826 = arith.addf %825, %823 : vector<8x128xf32>
    %827 = arith.subf %826, %816 : vector<8x128xf32>
    %cst_311 = arith.constant 1.000000e+00 : f32
    %828 = vector.broadcast %cst_311 : f32 to vector<8x128xf32>
    %829 = arith.cmpf ogt, %827, %828 : vector<8x128xf32>
    %830 = arith.extui %829 : vector<8x128xi1> to vector<8x128xi32>
    %831 = arith.sitofp %830 : vector<8x128xi32> to vector<8x128xf32>
    %c13 = arith.constant 13 : index
    %c0_312 = arith.constant 0 : index
    %c0_313 = arith.constant 0 : index
    %832 = vector.load %arg6[%c13, %c0_312, %c0_313] : memref<25x8x128xf32, #tpu.memory_space<vmem>>, vector<1x8x128xf32>
    %833 = vector.shape_cast %832 : vector<1x8x128xf32> to vector<8x128xf32>
    %834 = vector.shape_cast %831 : vector<8x128xf32> to vector<1x8x128xf32>
    tpu.vector_store %arg6[%c13, %c0_312, %c0_313], %834 {strides = array<i32>} : memref<25x8x128xf32, #tpu.memory_space<vmem>>, vector<1x8x128xf32>,
    %c13_314 = arith.constant 13 : index
    %c0_315 = arith.constant 0 : index
    %c0_316 = arith.constant 0 : index
    %835 = vector.load %arg7[%c13_314, %c0_315, %c0_316] : memref<25x8x128xf32, #tpu.memory_space<vmem>>, vector<1x8x128xf32>
    %836 = vector.shape_cast %835 : vector<1x8x128xf32> to vector<8x128xf32>
    %837 = vector.shape_cast %827 : vector<8x128xf32> to vector<1x8x128xf32>
    tpu.vector_store %arg7[%c13_314, %c0_315, %c0_316], %837 {strides = array<i32>} : memref<25x8x128xf32, #tpu.memory_space<vmem>>, vector<1x8x128xf32>,
    %c112 = arith.constant 112 : index
    %c0_317 = arith.constant 0 : index
    %838 = vector.load %arg10[%c112, %c0_317] : memref<200x128xf32, #tpu.memory_space<vmem>>, vector<8x128xf32>
    %cst_318 = arith.constant 0.949999988 : f32
    %839 = vector.broadcast %cst_318 : f32 to vector<8x128xf32>
    %840 = arith.mulf %839, %827 : vector<8x128xf32>
    %841 = arith.addf %840, %838 : vector<8x128xf32>
    %842 = arith.subf %841, %831 : vector<8x128xf32>
    %cst_319 = arith.constant 1.000000e+00 : f32
    %843 = vector.broadcast %cst_319 : f32 to vector<8x128xf32>
    %844 = arith.cmpf ogt, %842, %843 : vector<8x128xf32>
    %845 = arith.extui %844 : vector<8x128xi1> to vector<8x128xi32>
    %846 = arith.sitofp %845 : vector<8x128xi32> to vector<8x128xf32>
    %c14 = arith.constant 14 : index
    %c0_320 = arith.constant 0 : index
    %c0_321 = arith.constant 0 : index
    %847 = vector.load %arg6[%c14, %c0_320, %c0_321] : memref<25x8x128xf32, #tpu.memory_space<vmem>>, vector<1x8x128xf32>
    %848 = vector.shape_cast %847 : vector<1x8x128xf32> to vector<8x128xf32>
    %849 = vector.shape_cast %846 : vector<8x128xf32> to vector<1x8x128xf32>
    tpu.vector_store %arg6[%c14, %c0_320, %c0_321], %849 {strides = array<i32>} : memref<25x8x128xf32, #tpu.memory_space<vmem>>, vector<1x8x128xf32>,
    %c14_322 = arith.constant 14 : index
    %c0_323 = arith.constant 0 : index
    %c0_324 = arith.constant 0 : index
    %850 = vector.load %arg7[%c14_322, %c0_323, %c0_324] : memref<25x8x128xf32, #tpu.memory_space<vmem>>, vector<1x8x128xf32>
    %851 = vector.shape_cast %850 : vector<1x8x128xf32> to vector<8x128xf32>
    %852 = vector.shape_cast %842 : vector<8x128xf32> to vector<1x8x128xf32>
    tpu.vector_store %arg7[%c14_322, %c0_323, %c0_324], %852 {strides = array<i32>} : memref<25x8x128xf32, #tpu.memory_space<vmem>>, vector<1x8x128xf32>,
    %c120 = arith.constant 120 : index
    %c0_325 = arith.constant 0 : index
    %853 = vector.load %arg10[%c120, %c0_325] : memref<200x128xf32, #tpu.memory_space<vmem>>, vector<8x128xf32>
    %cst_326 = arith.constant 0.949999988 : f32
    %854 = vector.broadcast %cst_326 : f32 to vector<8x128xf32>
    %855 = arith.mulf %854, %842 : vector<8x128xf32>
    %856 = arith.addf %855, %853 : vector<8x128xf32>
    %857 = arith.subf %856, %846 : vector<8x128xf32>
    %cst_327 = arith.constant 1.000000e+00 : f32
    %858 = vector.broadcast %cst_327 : f32 to vector<8x128xf32>
    %859 = arith.cmpf ogt, %857, %858 : vector<8x128xf32>
    %860 = arith.extui %859 : vector<8x128xi1> to vector<8x128xi32>
    %861 = arith.sitofp %860 : vector<8x128xi32> to vector<8x128xf32>
    %c15 = arith.constant 15 : index
    %c0_328 = arith.constant 0 : index
    %c0_329 = arith.constant 0 : index
    %862 = vector.load %arg6[%c15, %c0_328, %c0_329] : memref<25x8x128xf32, #tpu.memory_space<vmem>>, vector<1x8x128xf32>
    %863 = vector.shape_cast %862 : vector<1x8x128xf32> to vector<8x128xf32>
    %864 = vector.shape_cast %861 : vector<8x128xf32> to vector<1x8x128xf32>
    tpu.vector_store %arg6[%c15, %c0_328, %c0_329], %864 {strides = array<i32>} : memref<25x8x128xf32, #tpu.memory_space<vmem>>, vector<1x8x128xf32>,
    %c15_330 = arith.constant 15 : index
    %c0_331 = arith.constant 0 : index
    %c0_332 = arith.constant 0 : index
    %865 = vector.load %arg7[%c15_330, %c0_331, %c0_332] : memref<25x8x128xf32, #tpu.memory_space<vmem>>, vector<1x8x128xf32>
    %866 = vector.shape_cast %865 : vector<1x8x128xf32> to vector<8x128xf32>
    %867 = vector.shape_cast %857 : vector<8x128xf32> to vector<1x8x128xf32>
    tpu.vector_store %arg7[%c15_330, %c0_331, %c0_332], %867 {strides = array<i32>} : memref<25x8x128xf32, #tpu.memory_space<vmem>>, vector<1x8x128xf32>,
    %c128 = arith.constant 128 : index
    %c0_333 = arith.constant 0 : index
    %868 = vector.load %arg10[%c128, %c0_333] : memref<200x128xf32, #tpu.memory_space<vmem>>, vector<8x128xf32>
    %cst_334 = arith.constant 0.949999988 : f32
    %869 = vector.broadcast %cst_334 : f32 to vector<8x128xf32>
    %870 = arith.mulf %869, %857 : vector<8x128xf32>
    %871 = arith.addf %870, %868 : vector<8x128xf32>
    %872 = arith.subf %871, %861 : vector<8x128xf32>
    %cst_335 = arith.constant 1.000000e+00 : f32
    %873 = vector.broadcast %cst_335 : f32 to vector<8x128xf32>
    %874 = arith.cmpf ogt, %872, %873 : vector<8x128xf32>
    %875 = arith.extui %874 : vector<8x128xi1> to vector<8x128xi32>
    %876 = arith.sitofp %875 : vector<8x128xi32> to vector<8x128xf32>
    %c16_336 = arith.constant 16 : index
    %c0_337 = arith.constant 0 : index
    %c0_338 = arith.constant 0 : index
    %877 = vector.load %arg6[%c16_336, %c0_337, %c0_338] : memref<25x8x128xf32, #tpu.memory_space<vmem>>, vector<1x8x128xf32>
    %878 = vector.shape_cast %877 : vector<1x8x128xf32> to vector<8x128xf32>
    %879 = vector.shape_cast %876 : vector<8x128xf32> to vector<1x8x128xf32>
    tpu.vector_store %arg6[%c16_336, %c0_337, %c0_338], %879 {strides = array<i32>} : memref<25x8x128xf32, #tpu.memory_space<vmem>>, vector<1x8x128xf32>,
    %c16_339 = arith.constant 16 : index
    %c0_340 = arith.constant 0 : index
    %c0_341 = arith.constant 0 : index
    %880 = vector.load %arg7[%c16_339, %c0_340, %c0_341] : memref<25x8x128xf32, #tpu.memory_space<vmem>>, vector<1x8x128xf32>
    %881 = vector.shape_cast %880 : vector<1x8x128xf32> to vector<8x128xf32>
    %882 = vector.shape_cast %872 : vector<8x128xf32> to vector<1x8x128xf32>
    tpu.vector_store %arg7[%c16_339, %c0_340, %c0_341], %882 {strides = array<i32>} : memref<25x8x128xf32, #tpu.memory_space<vmem>>, vector<1x8x128xf32>,
    %c136 = arith.constant 136 : index
    %c0_342 = arith.constant 0 : index
    %883 = vector.load %arg10[%c136, %c0_342] : memref<200x128xf32, #tpu.memory_space<vmem>>, vector<8x128xf32>
    %cst_343 = arith.constant 0.949999988 : f32
    %884 = vector.broadcast %cst_343 : f32 to vector<8x128xf32>
    %885 = arith.mulf %884, %872 : vector<8x128xf32>
    %886 = arith.addf %885, %883 : vector<8x128xf32>
    %887 = arith.subf %886, %876 : vector<8x128xf32>
    %cst_344 = arith.constant 1.000000e+00 : f32
    %888 = vector.broadcast %cst_344 : f32 to vector<8x128xf32>
    %889 = arith.cmpf ogt, %887, %888 : vector<8x128xf32>
    %890 = arith.extui %889 : vector<8x128xi1> to vector<8x128xi32>
    %891 = arith.sitofp %890 : vector<8x128xi32> to vector<8x128xf32>
    %c17 = arith.constant 17 : index
    %c0_345 = arith.constant 0 : index
    %c0_346 = arith.constant 0 : index
    %892 = vector.load %arg6[%c17, %c0_345, %c0_346] : memref<25x8x128xf32, #tpu.memory_space<vmem>>, vector<1x8x128xf32>
    %893 = vector.shape_cast %892 : vector<1x8x128xf32> to vector<8x128xf32>
    %894 = vector.shape_cast %891 : vector<8x128xf32> to vector<1x8x128xf32>
    tpu.vector_store %arg6[%c17, %c0_345, %c0_346], %894 {strides = array<i32>} : memref<25x8x128xf32, #tpu.memory_space<vmem>>, vector<1x8x128xf32>,
    %c17_347 = arith.constant 17 : index
    %c0_348 = arith.constant 0 : index
    %c0_349 = arith.constant 0 : index
    %895 = vector.load %arg7[%c17_347, %c0_348, %c0_349] : memref<25x8x128xf32, #tpu.memory_space<vmem>>, vector<1x8x128xf32>
    %896 = vector.shape_cast %895 : vector<1x8x128xf32> to vector<8x128xf32>
    %897 = vector.shape_cast %887 : vector<8x128xf32> to vector<1x8x128xf32>
    tpu.vector_store %arg7[%c17_347, %c0_348, %c0_349], %897 {strides = array<i32>} : memref<25x8x128xf32, #tpu.memory_space<vmem>>, vector<1x8x128xf32>,
    %c144 = arith.constant 144 : index
    %c0_350 = arith.constant 0 : index
    %898 = vector.load %arg10[%c144, %c0_350] : memref<200x128xf32, #tpu.memory_space<vmem>>, vector<8x128xf32>
    %cst_351 = arith.constant 0.949999988 : f32
    %899 = vector.broadcast %cst_351 : f32 to vector<8x128xf32>
    %900 = arith.mulf %899, %887 : vector<8x128xf32>
    %901 = arith.addf %900, %898 : vector<8x128xf32>
    %902 = arith.subf %901, %891 : vector<8x128xf32>
    %cst_352 = arith.constant 1.000000e+00 : f32
    %903 = vector.broadcast %cst_352 : f32 to vector<8x128xf32>
    %904 = arith.cmpf ogt, %902, %903 : vector<8x128xf32>
    %905 = arith.extui %904 : vector<8x128xi1> to vector<8x128xi32>
    %906 = arith.sitofp %905 : vector<8x128xi32> to vector<8x128xf32>
    %c18 = arith.constant 18 : index
    %c0_353 = arith.constant 0 : index
    %c0_354 = arith.constant 0 : index
    %907 = vector.load %arg6[%c18, %c0_353, %c0_354] : memref<25x8x128xf32, #tpu.memory_space<vmem>>, vector<1x8x128xf32>
    %908 = vector.shape_cast %907 : vector<1x8x128xf32> to vector<8x128xf32>
    %909 = vector.shape_cast %906 : vector<8x128xf32> to vector<1x8x128xf32>
    tpu.vector_store %arg6[%c18, %c0_353, %c0_354], %909 {strides = array<i32>} : memref<25x8x128xf32, #tpu.memory_space<vmem>>, vector<1x8x128xf32>,
    %c18_355 = arith.constant 18 : index
    %c0_356 = arith.constant 0 : index
    %c0_357 = arith.constant 0 : index
    %910 = vector.load %arg7[%c18_355, %c0_356, %c0_357] : memref<25x8x128xf32, #tpu.memory_space<vmem>>, vector<1x8x128xf32>
    %911 = vector.shape_cast %910 : vector<1x8x128xf32> to vector<8x128xf32>
    %912 = vector.shape_cast %902 : vector<8x128xf32> to vector<1x8x128xf32>
    tpu.vector_store %arg7[%c18_355, %c0_356, %c0_357], %912 {strides = array<i32>} : memref<25x8x128xf32, #tpu.memory_space<vmem>>, vector<1x8x128xf32>,
    %c152 = arith.constant 152 : index
    %c0_358 = arith.constant 0 : index
    %913 = vector.load %arg10[%c152, %c0_358] : memref<200x128xf32, #tpu.memory_space<vmem>>, vector<8x128xf32>
    %cst_359 = arith.constant 0.949999988 : f32
    %914 = vector.broadcast %cst_359 : f32 to vector<8x128xf32>
    %915 = arith.mulf %914, %902 : vector<8x128xf32>
    %916 = arith.addf %915, %913 : vector<8x128xf32>
    %917 = arith.subf %916, %906 : vector<8x128xf32>
    %cst_360 = arith.constant 1.000000e+00 : f32
    %918 = vector.broadcast %cst_360 : f32 to vector<8x128xf32>
    %919 = arith.cmpf ogt, %917, %918 : vector<8x128xf32>
    %920 = arith.extui %919 : vector<8x128xi1> to vector<8x128xi32>
    %921 = arith.sitofp %920 : vector<8x128xi32> to vector<8x128xf32>
    %c19 = arith.constant 19 : index
    %c0_361 = arith.constant 0 : index
    %c0_362 = arith.constant 0 : index
    %922 = vector.load %arg6[%c19, %c0_361, %c0_362] : memref<25x8x128xf32, #tpu.memory_space<vmem>>, vector<1x8x128xf32>
    %923 = vector.shape_cast %922 : vector<1x8x128xf32> to vector<8x128xf32>
    %924 = vector.shape_cast %921 : vector<8x128xf32> to vector<1x8x128xf32>
    tpu.vector_store %arg6[%c19, %c0_361, %c0_362], %924 {strides = array<i32>} : memref<25x8x128xf32, #tpu.memory_space<vmem>>, vector<1x8x128xf32>,
    %c19_363 = arith.constant 19 : index
    %c0_364 = arith.constant 0 : index
    %c0_365 = arith.constant 0 : index
    %925 = vector.load %arg7[%c19_363, %c0_364, %c0_365] : memref<25x8x128xf32, #tpu.memory_space<vmem>>, vector<1x8x128xf32>
    %926 = vector.shape_cast %925 : vector<1x8x128xf32> to vector<8x128xf32>
    %927 = vector.shape_cast %917 : vector<8x128xf32> to vector<1x8x128xf32>
    tpu.vector_store %arg7[%c19_363, %c0_364, %c0_365], %927 {strides = array<i32>} : memref<25x8x128xf32, #tpu.memory_space<vmem>>, vector<1x8x128xf32>,
    %c160 = arith.constant 160 : index
    %c0_366 = arith.constant 0 : index
    %928 = vector.load %arg10[%c160, %c0_366] : memref<200x128xf32, #tpu.memory_space<vmem>>, vector<8x128xf32>
    %cst_367 = arith.constant 0.949999988 : f32
    %929 = vector.broadcast %cst_367 : f32 to vector<8x128xf32>
    %930 = arith.mulf %929, %917 : vector<8x128xf32>
    %931 = arith.addf %930, %928 : vector<8x128xf32>
    %932 = arith.subf %931, %921 : vector<8x128xf32>
    %cst_368 = arith.constant 1.000000e+00 : f32
    %933 = vector.broadcast %cst_368 : f32 to vector<8x128xf32>
    %934 = arith.cmpf ogt, %932, %933 : vector<8x128xf32>
    %935 = arith.extui %934 : vector<8x128xi1> to vector<8x128xi32>
    %936 = arith.sitofp %935 : vector<8x128xi32> to vector<8x128xf32>
    %c20 = arith.constant 20 : index
    %c0_369 = arith.constant 0 : index
    %c0_370 = arith.constant 0 : index
    %937 = vector.load %arg6[%c20, %c0_369, %c0_370] : memref<25x8x128xf32, #tpu.memory_space<vmem>>, vector<1x8x128xf32>
    %938 = vector.shape_cast %937 : vector<1x8x128xf32> to vector<8x128xf32>
    %939 = vector.shape_cast %936 : vector<8x128xf32> to vector<1x8x128xf32>
    tpu.vector_store %arg6[%c20, %c0_369, %c0_370], %939 {strides = array<i32>} : memref<25x8x128xf32, #tpu.memory_space<vmem>>, vector<1x8x128xf32>,
    %c20_371 = arith.constant 20 : index
    %c0_372 = arith.constant 0 : index
    %c0_373 = arith.constant 0 : index
    %940 = vector.load %arg7[%c20_371, %c0_372, %c0_373] : memref<25x8x128xf32, #tpu.memory_space<vmem>>, vector<1x8x128xf32>
    %941 = vector.shape_cast %940 : vector<1x8x128xf32> to vector<8x128xf32>
    %942 = vector.shape_cast %932 : vector<8x128xf32> to vector<1x8x128xf32>
    tpu.vector_store %arg7[%c20_371, %c0_372, %c0_373], %942 {strides = array<i32>} : memref<25x8x128xf32, #tpu.memory_space<vmem>>, vector<1x8x128xf32>,
    %c168 = arith.constant 168 : index
    %c0_374 = arith.constant 0 : index
    %943 = vector.load %arg10[%c168, %c0_374] : memref<200x128xf32, #tpu.memory_space<vmem>>, vector<8x128xf32>
    %cst_375 = arith.constant 0.949999988 : f32
    %944 = vector.broadcast %cst_375 : f32 to vector<8x128xf32>
    %945 = arith.mulf %944, %932 : vector<8x128xf32>
    %946 = arith.addf %945, %943 : vector<8x128xf32>
    %947 = arith.subf %946, %936 : vector<8x128xf32>
    %cst_376 = arith.constant 1.000000e+00 : f32
    %948 = vector.broadcast %cst_376 : f32 to vector<8x128xf32>
    %949 = arith.cmpf ogt, %947, %948 : vector<8x128xf32>
    %950 = arith.extui %949 : vector<8x128xi1> to vector<8x128xi32>
    %951 = arith.sitofp %950 : vector<8x128xi32> to vector<8x128xf32>
    %c21 = arith.constant 21 : index
    %c0_377 = arith.constant 0 : index
    %c0_378 = arith.constant 0 : index
    %952 = vector.load %arg6[%c21, %c0_377, %c0_378] : memref<25x8x128xf32, #tpu.memory_space<vmem>>, vector<1x8x128xf32>
    %953 = vector.shape_cast %952 : vector<1x8x128xf32> to vector<8x128xf32>
    %954 = vector.shape_cast %951 : vector<8x128xf32> to vector<1x8x128xf32>
    tpu.vector_store %arg6[%c21, %c0_377, %c0_378], %954 {strides = array<i32>} : memref<25x8x128xf32, #tpu.memory_space<vmem>>, vector<1x8x128xf32>,
    %c21_379 = arith.constant 21 : index
    %c0_380 = arith.constant 0 : index
    %c0_381 = arith.constant 0 : index
    %955 = vector.load %arg7[%c21_379, %c0_380, %c0_381] : memref<25x8x128xf32, #tpu.memory_space<vmem>>, vector<1x8x128xf32>
    %956 = vector.shape_cast %955 : vector<1x8x128xf32> to vector<8x128xf32>
    %957 = vector.shape_cast %947 : vector<8x128xf32> to vector<1x8x128xf32>
    tpu.vector_store %arg7[%c21_379, %c0_380, %c0_381], %957 {strides = array<i32>} : memref<25x8x128xf32, #tpu.memory_space<vmem>>, vector<1x8x128xf32>,
    %c176 = arith.constant 176 : index
    %c0_382 = arith.constant 0 : index
    %958 = vector.load %arg10[%c176, %c0_382] : memref<200x128xf32, #tpu.memory_space<vmem>>, vector<8x128xf32>
    %cst_383 = arith.constant 0.949999988 : f32
    %959 = vector.broadcast %cst_383 : f32 to vector<8x128xf32>
    %960 = arith.mulf %959, %947 : vector<8x128xf32>
    %961 = arith.addf %960, %958 : vector<8x128xf32>
    %962 = arith.subf %961, %951 : vector<8x128xf32>
    %cst_384 = arith.constant 1.000000e+00 : f32
    %963 = vector.broadcast %cst_384 : f32 to vector<8x128xf32>
    %964 = arith.cmpf ogt, %962, %963 : vector<8x128xf32>
    %965 = arith.extui %964 : vector<8x128xi1> to vector<8x128xi32>
    %966 = arith.sitofp %965 : vector<8x128xi32> to vector<8x128xf32>
    %c22 = arith.constant 22 : index
    %c0_385 = arith.constant 0 : index
    %c0_386 = arith.constant 0 : index
    %967 = vector.load %arg6[%c22, %c0_385, %c0_386] : memref<25x8x128xf32, #tpu.memory_space<vmem>>, vector<1x8x128xf32>
    %968 = vector.shape_cast %967 : vector<1x8x128xf32> to vector<8x128xf32>
    %969 = vector.shape_cast %966 : vector<8x128xf32> to vector<1x8x128xf32>
    tpu.vector_store %arg6[%c22, %c0_385, %c0_386], %969 {strides = array<i32>} : memref<25x8x128xf32, #tpu.memory_space<vmem>>, vector<1x8x128xf32>,
    %c22_387 = arith.constant 22 : index
    %c0_388 = arith.constant 0 : index
    %c0_389 = arith.constant 0 : index
    %970 = vector.load %arg7[%c22_387, %c0_388, %c0_389] : memref<25x8x128xf32, #tpu.memory_space<vmem>>, vector<1x8x128xf32>
    %971 = vector.shape_cast %970 : vector<1x8x128xf32> to vector<8x128xf32>
    %972 = vector.shape_cast %962 : vector<8x128xf32> to vector<1x8x128xf32>
    tpu.vector_store %arg7[%c22_387, %c0_388, %c0_389], %972 {strides = array<i32>} : memref<25x8x128xf32, #tpu.memory_space<vmem>>, vector<1x8x128xf32>,
    %c184 = arith.constant 184 : index
    %c0_390 = arith.constant 0 : index
    %973 = vector.load %arg10[%c184, %c0_390] : memref<200x128xf32, #tpu.memory_space<vmem>>, vector<8x128xf32>
    %cst_391 = arith.constant 0.949999988 : f32
    %974 = vector.broadcast %cst_391 : f32 to vector<8x128xf32>
    %975 = arith.mulf %974, %962 : vector<8x128xf32>
    %976 = arith.addf %975, %973 : vector<8x128xf32>
    %977 = arith.subf %976, %966 : vector<8x128xf32>
    %cst_392 = arith.constant 1.000000e+00 : f32
    %978 = vector.broadcast %cst_392 : f32 to vector<8x128xf32>
    %979 = arith.cmpf ogt, %977, %978 : vector<8x128xf32>
    %980 = arith.extui %979 : vector<8x128xi1> to vector<8x128xi32>
    %981 = arith.sitofp %980 : vector<8x128xi32> to vector<8x128xf32>
    %c23 = arith.constant 23 : index
    %c0_393 = arith.constant 0 : index
    %c0_394 = arith.constant 0 : index
    %982 = vector.load %arg6[%c23, %c0_393, %c0_394] : memref<25x8x128xf32, #tpu.memory_space<vmem>>, vector<1x8x128xf32>
    %983 = vector.shape_cast %982 : vector<1x8x128xf32> to vector<8x128xf32>
    %984 = vector.shape_cast %981 : vector<8x128xf32> to vector<1x8x128xf32>
    tpu.vector_store %arg6[%c23, %c0_393, %c0_394], %984 {strides = array<i32>} : memref<25x8x128xf32, #tpu.memory_space<vmem>>, vector<1x8x128xf32>,
    %c23_395 = arith.constant 23 : index
    %c0_396 = arith.constant 0 : index
    %c0_397 = arith.constant 0 : index
    %985 = vector.load %arg7[%c23_395, %c0_396, %c0_397] : memref<25x8x128xf32, #tpu.memory_space<vmem>>, vector<1x8x128xf32>
    %986 = vector.shape_cast %985 : vector<1x8x128xf32> to vector<8x128xf32>
    %987 = vector.shape_cast %977 : vector<8x128xf32> to vector<1x8x128xf32>
    tpu.vector_store %arg7[%c23_395, %c0_396, %c0_397], %987 {strides = array<i32>} : memref<25x8x128xf32, #tpu.memory_space<vmem>>, vector<1x8x128xf32>,
    %c192 = arith.constant 192 : index
    %c0_398 = arith.constant 0 : index
    %988 = vector.load %arg10[%c192, %c0_398] : memref<200x128xf32, #tpu.memory_space<vmem>>, vector<8x128xf32>
    %cst_399 = arith.constant 0.949999988 : f32
    %989 = vector.broadcast %cst_399 : f32 to vector<8x128xf32>
    %990 = arith.mulf %989, %977 : vector<8x128xf32>
    %991 = arith.addf %990, %988 : vector<8x128xf32>
    %992 = arith.subf %991, %981 : vector<8x128xf32>
    %cst_400 = arith.constant 1.000000e+00 : f32
    %993 = vector.broadcast %cst_400 : f32 to vector<8x128xf32>
    %994 = arith.cmpf ogt, %992, %993 : vector<8x128xf32>
    %995 = arith.extui %994 : vector<8x128xi1> to vector<8x128xi32>
    %996 = arith.sitofp %995 : vector<8x128xi32> to vector<8x128xf32>
    %c24_401 = arith.constant 24 : index
    %c0_402 = arith.constant 0 : index
    %c0_403 = arith.constant 0 : index
    %997 = vector.load %arg6[%c24_401, %c0_402, %c0_403] : memref<25x8x128xf32, #tpu.memory_space<vmem>>, vector<1x8x128xf32>
    %998 = vector.shape_cast %997 : vector<1x8x128xf32> to vector<8x128xf32>
    %999 = vector.shape_cast %996 : vector<8x128xf32> to vector<1x8x128xf32>
    tpu.vector_store %arg6[%c24_401, %c0_402, %c0_403], %999 {strides = array<i32>} : memref<25x8x128xf32, #tpu.memory_space<vmem>>, vector<1x8x128xf32>,
    %c24_404 = arith.constant 24 : index
    %c0_405 = arith.constant 0 : index
    %c0_406 = arith.constant 0 : index
    %1000 = vector.load %arg7[%c24_404, %c0_405, %c0_406] : memref<25x8x128xf32, #tpu.memory_space<vmem>>, vector<1x8x128xf32>
    %1001 = vector.shape_cast %1000 : vector<1x8x128xf32> to vector<8x128xf32>
    %1002 = vector.shape_cast %992 : vector<8x128xf32> to vector<1x8x128xf32>
    tpu.vector_store %arg7[%c24_404, %c0_405, %c0_406], %1002 {strides = array<i32>} : memref<25x8x128xf32, #tpu.memory_space<vmem>>, vector<1x8x128xf32>,
    return
  }
  func.func @transform_0(%arg0: i32) -> (i32, i32) {
    %c0_i32 = arith.constant 0 : i32
    %c0_i32_0 = arith.constant 0 : i32
    return %arg0, %c0_i32 : i32, i32
  }
  func.func @transform_1(%arg0: i32) -> (i32, i32) {
    %c0_i32 = arith.constant 0 : i32
    %c0_i32_0 = arith.constant 0 : i32
    %c0_i32_1 = arith.constant 0 : i32
    return %c0_i32, %c0_i32_0 : i32, i32
  }
  func.func @transform_2(%arg0: i32) -> (i32, i32) {
    %c0_i32 = arith.constant 0 : i32
    %c0_i32_0 = arith.constant 0 : i32
    %c0_i32_1 = arith.constant 0 : i32
    return %c0_i32, %c0_i32_0 : i32, i32
  }
  func.func @transform_3(%arg0: i32) -> (i32, i32) {
    %c0_i32 = arith.constant 0 : i32
    %c0_i32_0 = arith.constant 0 : i32
    %c0_i32_1 = arith.constant 0 : i32
    return %c0_i32, %c0_i32_0 : i32, i32
  }
  func.func @transform_4(%arg0: i32) -> (i32, i32) {
    %c0_i32 = arith.constant 0 : i32
    %c0_i32_0 = arith.constant 0 : i32
    %c0_i32_1 = arith.constant 0 : i32
    return %c0_i32, %c0_i32_0 : i32, i32
  }
  func.func @transform_5(%arg0: i32) -> (i32, i32, i32) {
    %c0_i32 = arith.constant 0 : i32
    %c0_i32_0 = arith.constant 0 : i32
    %c0_i32_1 = arith.constant 0 : i32
    return %c0_i32, %arg0, %c0_i32_0 : i32, i32, i32
  }
  func.func @transform_6(%arg0: i32) -> (i32, i32, i32) {
    %c0_i32 = arith.constant 0 : i32
    %c0_i32_0 = arith.constant 0 : i32
    %c0_i32_1 = arith.constant 0 : i32
    return %c0_i32, %arg0, %c0_i32_0 : i32, i32, i32
  }
}

</mosaic_0001>

<bundles_post_ra>
// kernel: net_forward.1
= control target key start
LH: loop header
LB: loop body
LE: loop exit
PB: predicated region body
PF: predicated region fallthrough
CT: control target
= control target key end

     0   :  { %s11025_s1 = inlined_call_operand.vmem [shape: f32[896,1024], index: 1, kind: input, shape index: {}]   ;;  %s11026_s0 = inlined_call_operand.vmem [shape: f32[8,896], index: 0, kind: input, shape index: {}]   ;;  %s11027_s2 = inlined_call_operand.vmem [shape: f32[1,1024], index: 2, kind: input, shape index: {}]   ;;  %s11028_s3 = inlined_call_operand.vmem [shape: f32[1024,128], index: 3, kind: input, shape index: {}]   ;;  %s11029_s4 = inlined_call_operand.vmem [shape: f32[1,128], index: 4, kind: input, shape index: {}]   ;;  %s11030_s6 = inlined_call_operand.vmem [shape: f32[25,8,128], index: 6, kind: output, shape index: {1}]   ;;  %s11031_s5 = inlined_call_operand.vmem [shape: f32[25,8,128], index: 5, kind: output, shape index: {0}]  }
   0x1   :  { %v150_v0 = vld [vmem:[%s11025_s1 + $0x3c8] sm:$0xff]  ;;  %v149_v2 = vld [vmem:[%s11025_s1 + $0x3c0] sm:$0xff] }
   0x2   :  { %v406_v1 = vld [vmem:[%s11025_s1 + $0xbc8] sm:$0xff]  ;;  %967 = vmatprep.subr.mxu0 %v150_v0  ;;  %v405_v3 = vld [vmem:[%s11025_s1 + $0xbc0] sm:$0xff] }
   0x3   :  { %1038 = vmatprep.subr.mxu1 %v406_v1  ;;  %v142_v4 = vld [vmem:[%s11025_s1 + $0x388] sm:$0xff]  ;;  %968 = vmatpush1.msra.mxu0 %v149_v2  ;;  %v141_v6 = vld [vmem:[%s11025_s1 + $0x380] sm:$0xff] }
   0x4   :  { %v398_v5 = vld [vmem:[%s11025_s1 + $0xb88] sm:$0xff]  ;;  %1039 = vmatpush1.msra.mxu1 %v405_v3  ;;  %v397_v7 = vld [vmem:[%s11025_s1 + $0xb80] sm:$0xff]  ;;  %969 = vmatprep.subr.mxu0 %v142_v4 }
   0x5   :  { %v134_v8 = vld [vmem:[%s11025_s1 + $0x348] sm:$0xff]  ;;  %1040 = vmatprep.subr.mxu1 %v398_v5  ;;  %v133_v10 = vld [vmem:[%s11025_s1 + $0x340] sm:$0xff]  ;;  %970 = vmatpush1.msra.mxu0 %v141_v6 }
   0x6   :  { %v390_v9 = vld [vmem:[%s11025_s1 + $0xb48] sm:$0xff]  ;;  %v389_v11 = vld [vmem:[%s11025_s1 + $0xb40] sm:$0xff]  ;;  %1041 = vmatpush1.msra.mxu1 %v397_v7  ;;  %971 = vmatprep.subr.mxu0 %v134_v8 }
   0x7   :  { %v126_v12 = vld [vmem:[%s11025_s1 + $0x308] sm:$0xff]  ;;  %1042 = vmatprep.subr.mxu1 %v390_v9  ;;  %v125_v14 = vld [vmem:[%s11025_s1 + $0x300] sm:$0xff]  ;;  %972 = vmatpush1.msra.mxu0 %v133_v10 }
   0x8   :  { %v382_v13 = vld [vmem:[%s11025_s1 + $0xb08] sm:$0xff]  ;;  %v381_v15 = vld [vmem:[%s11025_s1 + $0xb00] sm:$0xff]  ;;  %1043 = vmatpush1.msra.mxu1 %v389_v11  ;;  %973 = vmatprep.subr.mxu0 %v126_v12 }
   0x9   :  { %v118_v16 = vld [vmem:[%s11025_s1 + $0x2c8] sm:$0xff]  ;;  %1044 = vmatprep.subr.mxu1 %v382_v13  ;;  %v117_v18 = vld [vmem:[%s11025_s1 + $0x2c0] sm:$0xff]  ;;  %974 = vmatpush1.msra.mxu0 %v125_v14 }
   0xa   :  { %v374_v17 = vld [vmem:[%s11025_s1 + $0xac8] sm:$0xff]  ;;  %v373_v19 = vld [vmem:[%s11025_s1 + $0xac0] sm:$0xff]  ;;  %1045 = vmatpush1.msra.mxu1 %v381_v15  ;;  %975 = vmatprep.subr.mxu0 %v118_v16 }
   0xb   :  { %v110_v20 = vld [vmem:[%s11025_s1 + $0x288] sm:$0xff]  ;;  %1046 = vmatprep.subr.mxu1 %v374_v17  ;;  %v109_v22 = vld [vmem:[%s11025_s1 + $0x280] sm:$0xff]  ;;  %976 = vmatpush1.msra.mxu0 %v117_v18 }
   0xc   :  { %v366_v21 = vld [vmem:[%s11025_s1 + $0xa88] sm:$0xff]  ;;  %v365_v23 = vld [vmem:[%s11025_s1 + $0xa80] sm:$0xff]  ;;  %1047 = vmatpush1.msra.mxu1 %v373_v19  ;;  %977 = vmatprep.subr.mxu0 %v110_v20 }
   0xd   :  { %v102_v24 = vld [vmem:[%s11025_s1 + $0x248] sm:$0xff]  ;;  %1048 = vmatprep.subr.mxu1 %v366_v21  ;;  %v101_v26 = vld [vmem:[%s11025_s1 + $0x240] sm:$0xff]  ;;  %978 = vmatpush1.msra.mxu0 %v109_v22 }
   0xe   :  { %v358_v25 = vld [vmem:[%s11025_s1 + $0xa48] sm:$0xff]  ;;  %v357_v27 = vld [vmem:[%s11025_s1 + $0xa40] sm:$0xff]  ;;  %1049 = vmatpush1.msra.mxu1 %v365_v23  ;;  %979 = vmatprep.subr.mxu0 %v102_v24 }
   0xf   :  { %v94_v28 = vld [vmem:[%s11025_s1 + $0x208] sm:$0xff]  ;;  %1050 = vmatprep.subr.mxu1 %v358_v25  ;;  %v93_v30 = vld [vmem:[%s11025_s1 + $0x200] sm:$0xff]  ;;  %980 = vmatpush1.msra.mxu0 %v101_v26 }
  0x10   :  { %v350_v29 = vld [vmem:[%s11025_s1 + $0xa08] sm:$0xff]  ;;  %v349_v31 = vld [vmem:[%s11025_s1 + $0xa00] sm:$0xff]  ;;  %1051 = vmatpush1.msra.mxu1 %v357_v27  ;;  %981 = vmatprep.subr.mxu0 %v94_v28 }
  0x11   :  { %v86_v32 = vld [vmem:[%s11025_s1 + $0x1c8] sm:$0xff]  ;;  %1052 = vmatprep.subr.mxu1 %v350_v29  ;;  %v85_v34 = vld [vmem:[%s11025_s1 + $0x1c0] sm:$0xff]  ;;  %982 = vmatpush1.msra.mxu0 %v93_v30 }
  0x12   :  { %v342_v33 = vld [vmem:[%s11025_s1 + $0x9c8] sm:$0xff]  ;;  %v341_v35 = vld [vmem:[%s11025_s1 + $0x9c0] sm:$0xff]  ;;  %1053 = vmatpush1.msra.mxu1 %v349_v31  ;;  %983 = vmatprep.subr.mxu0 %v86_v32 }
  0x13   :  { %v78_v36 = vld [vmem:[%s11025_s1 + $0x188] sm:$0xff]  ;;  %1054 = vmatprep.subr.mxu1 %v342_v33  ;;  %v77_v38 = vld [vmem:[%s11025_s1 + $0x180] sm:$0xff]  ;;  %984 = vmatpush1.msra.mxu0 %v85_v34 }
  0x14   :  { %v334_v37 = vld [vmem:[%s11025_s1 + $0x988] sm:$0xff]  ;;  %v333_v39 = vld [vmem:[%s11025_s1 + $0x980] sm:$0xff]  ;;  %1055 = vmatpush1.msra.mxu1 %v341_v35  ;;  %985 = vmatprep.subr.mxu0 %v78_v36 }
  0x15   :  { %v70_v40 = vld [vmem:[%s11025_s1 + $0x148] sm:$0xff]  ;;  %1056 = vmatprep.subr.mxu1 %v334_v37  ;;  %v69_v42 = vld [vmem:[%s11025_s1 + $0x140] sm:$0xff]  ;;  %986 = vmatpush1.msra.mxu0 %v77_v38 }
  0x16   :  { %v326_v41 = vld [vmem:[%s11025_s1 + $0x948] sm:$0xff]  ;;  %v325_v43 = vld [vmem:[%s11025_s1 + $0x940] sm:$0xff]  ;;  %1057 = vmatpush1.msra.mxu1 %v333_v39  ;;  %987 = vmatprep.subr.mxu0 %v70_v40 }
  0x17   :  { %v62_v44 = vld [vmem:[%s11025_s1 + $0x108] sm:$0xff]  ;;  %1058 = vmatprep.subr.mxu1 %v326_v41  ;;  %v61_v46 = vld [vmem:[%s11025_s1 + $0x100] sm:$0xff]  ;;  %988 = vmatpush1.msra.mxu0 %v69_v42 }
  0x18   :  { %v318_v45 = vld [vmem:[%s11025_s1 + $0x908] sm:$0xff]  ;;  %v317_v47 = vld [vmem:[%s11025_s1 + $0x900] sm:$0xff]  ;;  %1059 = vmatpush1.msra.mxu1 %v325_v43  ;;  %989 = vmatprep.subr.mxu0 %v62_v44 }
  0x19   :  { %v54_v48 = vld [vmem:[%s11025_s1 + $0xc8] sm:$0xff]  ;;  %1060 = vmatprep.subr.mxu1 %v318_v45  ;;  %v53_v50 = vld [vmem:[%s11025_s1 + $0xc0] sm:$0xff]  ;;  %990 = vmatpush1.msra.mxu0 %v61_v46 }
  0x1a   :  { %v310_v49 = vld [vmem:[%s11025_s1 + $0x8c8] sm:$0xff]  ;;  %v309_v51 = vld [vmem:[%s11025_s1 + $0x8c0] sm:$0xff]  ;;  %1061 = vmatpush1.msra.mxu1 %v317_v47  ;;  %991 = vmatprep.subr.mxu0 %v54_v48 }
  0x1b   :  { %v46_v52 = vld [vmem:[%s11025_s1 + $0x88] sm:$0xff]  ;;  %1062 = vmatprep.subr.mxu1 %v310_v49  ;;  %v45_v54 = vld [vmem:[%s11025_s1 + $0x80] sm:$0xff]  ;;  %992 = vmatpush1.msra.mxu0 %v53_v50 }
  0x1c   :  { %v302_v53 = vld [vmem:[%s11025_s1 + $0x888] sm:$0xff]  ;;  %v301_v55 = vld [vmem:[%s11025_s1 + $0x880] sm:$0xff]  ;;  %1063 = vmatpush1.msra.mxu1 %v309_v51  ;;  %993 = vmatprep.subr.mxu0 %v46_v52 }
  0x1d   :  { %v38_v56 = vld [vmem:[%s11025_s1 + $0x48] sm:$0xff]  ;;  %1064 = vmatprep.subr.mxu1 %v302_v53  ;;  %v37_v58 = vld [vmem:[%s11025_s1 + $0x40] sm:$0xff]  ;;  %994 = vmatpush1.msra.mxu0 %v45_v54 }
  0x1e   :  { %v294_v57 = vld [vmem:[%s11025_s1 + $0x848] sm:$0xff]  ;;  %v293_v59 = vld [vmem:[%s11025_s1 + $0x840] sm:$0xff]  ;;  %1065 = vmatpush1.msra.mxu1 %v301_v55  ;;  %995 = vmatprep.subr.mxu0 %v38_v56 }
  0x1f   :  { %v30_v60 = vld [vmem:[%s11025_s1 + $0x8] sm:$0xff]  ;;  %1066 = vmatprep.subr.mxu1 %v294_v57  ;;  %v29_v62 = vld [vmem:[%s11025_s1] sm:$0xff]  ;;  %996 = vmatpush1.msra.mxu0 %v37_v58 }
  0x20   :  { %v286_v61 = vld [vmem:[%s11025_s1 + $0x808] sm:$0xff]  ;;  %v285_v63 = vld [vmem:[%s11025_s1 + $0x800] sm:$0xff]  ;;  %1067 = vmatpush1.msra.mxu1 %v293_v59  ;;  %997 = vmatprep.subr.mxu0 %v30_v60 }
  0x21   :  { %v278_v0 = vld [vmem:[%s11025_s1 + $0x7c8] sm:$0xff]  ;;  %1068 = vmatprep.subr.mxu1 %v286_v61  ;;  %v277_v2 = vld [vmem:[%s11025_s1 + $0x7c0] sm:$0xff]  ;;  %998 = vmatpush1.msra.mxu0 %v29_v62 }
  0x22   :  { %v534_v1 = vld [vmem:[%s11025_s1 + $0xfc8] sm:$0xff]  ;;  %v533_v3 = vld [vmem:[%s11025_s1 + $0xfc0] sm:$0xff]  ;;  %1069 = vmatpush1.msra.mxu1 %v285_v63  ;;  %999 = vmatprep.subr.mxu0 %v278_v0 }
  0x23   :  { %v270_v4 = vld [vmem:[%s11025_s1 + $0x788] sm:$0xff]  ;;  %1070 = vmatprep.subr.mxu1 %v534_v1  ;;  %v269_v6 = vld [vmem:[%s11025_s1 + $0x780] sm:$0xff]  ;;  %1000 = vmatpush2.msra.mxu0 %v277_v2  ;;  %v25_v1 = vld [vmem:[%s11026_s0 + $0x18] sm:$0xff] }
  0x24   :  { %v526_v5 = vld [vmem:[%s11025_s1 + $0xf88] sm:$0xff]  ;;  %v525_v7 = vld [vmem:[%s11025_s1 + $0xf80] sm:$0xff]  ;;  %1071 = vmatpush2.msra.mxu1 %v533_v3  ;;  %1001 = vmatprep.subr.mxu0 %v270_v4  ;;  %v24_v3 = vld [vmem:[%s11026_s0 + $0x10] sm:$0xff] }
  0x25   :  { %v262_v8 = vld [vmem:[%s11025_s1 + $0x748] sm:$0xff]  ;;  %1072 = vmatprep.subr.mxu1 %v526_v5  ;;  %v261_v10 = vld [vmem:[%s11025_s1 + $0x740] sm:$0xff]  ;;  %1002 = vmatpush2.msra.mxu0 %v269_v6 }
  0x26   :  { %v518_v9 = vld [vmem:[%s11025_s1 + $0xf48] sm:$0xff]  ;;  %v517_v11 = vld [vmem:[%s11025_s1 + $0xf40] sm:$0xff]  ;;  %1073 = vmatpush2.msra.mxu1 %v525_v7  ;;  %1003 = vmatprep.subr.mxu0 %v262_v8 }
  0x27   :  { %v254_v12 = vld [vmem:[%s11025_s1 + $0x708] sm:$0xff]  ;;  %1074 = vmatprep.subr.mxu1 %v518_v9  ;;  %v253_v14 = vld [vmem:[%s11025_s1 + $0x700] sm:$0xff]  ;;  %1004 = vmatpush2.msra.mxu0 %v261_v10 }
  0x28   :  { %v510_v13 = vld [vmem:[%s11025_s1 + $0xf08] sm:$0xff]  ;;  %v509_v15 = vld [vmem:[%s11025_s1 + $0xf00] sm:$0xff]  ;;  %1075 = vmatpush2.msra.mxu1 %v517_v11  ;;  %1005 = vmatprep.subr.mxu0 %v254_v12 }
  0x29   :  { %v246_v16 = vld [vmem:[%s11025_s1 + $0x6c8] sm:$0xff]  ;;  %1076 = vmatprep.subr.mxu1 %v510_v13  ;;  %v245_v18 = vld [vmem:[%s11025_s1 + $0x6c0] sm:$0xff]  ;;  %1006 = vmatpush2.msra.mxu0 %v253_v14 }
  0x2a   :  { %v502_v17 = vld [vmem:[%s11025_s1 + $0xec8] sm:$0xff]  ;;  %v501_v19 = vld [vmem:[%s11025_s1 + $0xec0] sm:$0xff]  ;;  %1077 = vmatpush2.msra.mxu1 %v509_v15  ;;  %1007 = vmatprep.subr.mxu0 %v246_v16 }
  0x2b   :  { %v238_v20 = vld [vmem:[%s11025_s1 + $0x688] sm:$0xff]  ;;  %1078 = vmatprep.subr.mxu1 %v502_v17  ;;  %v237_v22 = vld [vmem:[%s11025_s1 + $0x680] sm:$0xff]  ;;  %1008 = vmatpush2.msra.mxu0 %v245_v18 }
  0x2c   :  { %v494_v21 = vld [vmem:[%s11025_s1 + $0xe88] sm:$0xff]  ;;  %v493_v23 = vld [vmem:[%s11025_s1 + $0xe80] sm:$0xff]  ;;  %1079 = vmatpush2.msra.mxu1 %v501_v19  ;;  %1009 = vmatprep.subr.mxu0 %v238_v20 }
  0x2d   :  { %v230_v24 = vld [vmem:[%s11025_s1 + $0x648] sm:$0xff]  ;;  %1080 = vmatprep.subr.mxu1 %v494_v21  ;;  %v229_v26 = vld [vmem:[%s11025_s1 + $0x640] sm:$0xff]  ;;  %1010 = vmatpush2.msra.mxu0 %v237_v22 }
  0x2e   :  { %v486_v25 = vld [vmem:[%s11025_s1 + $0xe48] sm:$0xff]  ;;  %v485_v27 = vld [vmem:[%s11025_s1 + $0xe40] sm:$0xff]  ;;  %1081 = vmatpush2.msra.mxu1 %v493_v23  ;;  %1011 = vmatprep.subr.mxu0 %v230_v24 }
  0x2f   :  { %v222_v28 = vld [vmem:[%s11025_s1 + $0x608] sm:$0xff]  ;;  %1082 = vmatprep.subr.mxu1 %v486_v25  ;;  %v221_v30 = vld [vmem:[%s11025_s1 + $0x600] sm:$0xff]  ;;  %1012 = vmatpush2.msra.mxu0 %v229_v26 }
  0x30   :  { %v478_v29 = vld [vmem:[%s11025_s1 + $0xe08] sm:$0xff]  ;;  %v477_v31 = vld [vmem:[%s11025_s1 + $0xe00] sm:$0xff]  ;;  %1083 = vmatpush2.msra.mxu1 %v485_v27  ;;  %1013 = vmatprep.subr.mxu0 %v222_v28 }
  0x31   :  { %v214_v32 = vld [vmem:[%s11025_s1 + $0x5c8] sm:$0xff]  ;;  %1084 = vmatprep.subr.mxu1 %v478_v29  ;;  %v213_v34 = vld [vmem:[%s11025_s1 + $0x5c0] sm:$0xff]  ;;  %1014 = vmatpush2.msra.mxu0 %v221_v30 }
  0x32   :  { %v470_v33 = vld [vmem:[%s11025_s1 + $0xdc8] sm:$0xff]  ;;  %v469_v35 = vld [vmem:[%s11025_s1 + $0xdc0] sm:$0xff]  ;;  %1085 = vmatpush2.msra.mxu1 %v477_v31  ;;  %1015 = vmatprep.subr.mxu0 %v214_v32 }
  0x33   :  { %v206_v36 = vld [vmem:[%s11025_s1 + $0x588] sm:$0xff]  ;;  %1086 = vmatprep.subr.mxu1 %v470_v33  ;;  %v205_v38 = vld [vmem:[%s11025_s1 + $0x580] sm:$0xff]  ;;  %1016 = vmatpush2.msra.mxu0 %v213_v34 }
  0x34   :  { %v462_v37 = vld [vmem:[%s11025_s1 + $0xd88] sm:$0xff]  ;;  %v461_v39 = vld [vmem:[%s11025_s1 + $0xd80] sm:$0xff]  ;;  %1087 = vmatpush2.msra.mxu1 %v469_v35  ;;  %1017 = vmatprep.subr.mxu0 %v206_v36 }
  0x35   :  { %v198_v40 = vld [vmem:[%s11025_s1 + $0x548] sm:$0xff]  ;;  %1088 = vmatprep.subr.mxu1 %v462_v37  ;;  %v197_v42 = vld [vmem:[%s11025_s1 + $0x540] sm:$0xff]  ;;  %1018 = vmatpush2.msra.mxu0 %v205_v38 }
  0x36   :  { %v454_v41 = vld [vmem:[%s11025_s1 + $0xd48] sm:$0xff]  ;;  %v453_v43 = vld [vmem:[%s11025_s1 + $0xd40] sm:$0xff]  ;;  %1089 = vmatpush2.msra.mxu1 %v461_v39  ;;  %1019 = vmatprep.subr.mxu0 %v198_v40 }
  0x37   :  { %v190_v44 = vld [vmem:[%s11025_s1 + $0x508] sm:$0xff]  ;;  %1090 = vmatprep.subr.mxu1 %v454_v41  ;;  %v189_v46 = vld [vmem:[%s11025_s1 + $0x500] sm:$0xff]  ;;  %1020 = vmatpush2.msra.mxu0 %v197_v42 }
  0x38   :  { %v446_v45 = vld [vmem:[%s11025_s1 + $0xd08] sm:$0xff]  ;;  %v445_v47 = vld [vmem:[%s11025_s1 + $0xd00] sm:$0xff]  ;;  %1091 = vmatpush2.msra.mxu1 %v453_v43  ;;  %1021 = vmatprep.subr.mxu0 %v190_v44 }
  0x39   :  { %v182_v48 = vld [vmem:[%s11025_s1 + $0x4c8] sm:$0xff]  ;;  %1092 = vmatprep.subr.mxu1 %v446_v45  ;;  %v181_v50 = vld [vmem:[%s11025_s1 + $0x4c0] sm:$0xff]  ;;  %1022 = vmatpush2.msra.mxu0 %v189_v46 }
  0x3a   :  { %v438_v49 = vld [vmem:[%s11025_s1 + $0xcc8] sm:$0xff]  ;;  %v437_v51 = vld [vmem:[%s11025_s1 + $0xcc0] sm:$0xff]  ;;  %1093 = vmatpush2.msra.mxu1 %v445_v47  ;;  %1023 = vmatprep.subr.mxu0 %v182_v48 }
  0x3b   :  { %v174_v52 = vld [vmem:[%s11025_s1 + $0x488] sm:$0xff]  ;;  %1094 = vmatprep.subr.mxu1 %v438_v49  ;;  %v173_v54 = vld [vmem:[%s11025_s1 + $0x480] sm:$0xff]  ;;  %1024 = vmatpush2.msra.mxu0 %v181_v50 }
  0x3c   :  { %v430_v53 = vld [vmem:[%s11025_s1 + $0xc88] sm:$0xff]  ;;  %v429_v55 = vld [vmem:[%s11025_s1 + $0xc80] sm:$0xff]  ;;  %1095 = vmatpush2.msra.mxu1 %v437_v51  ;;  %1025 = vmatprep.subr.mxu0 %v174_v52 }
  0x3d   :  { %v166_v56 = vld [vmem:[%s11025_s1 + $0x448] sm:$0xff]  ;;  %1096 = vmatprep.subr.mxu1 %v430_v53  ;;  %v165_v58 = vld [vmem:[%s11025_s1 + $0x440] sm:$0xff]  ;;  %1026 = vmatpush2.msra.mxu0 %v173_v54 }
  0x3e   :  { %v422_v57 = vld [vmem:[%s11025_s1 + $0xc48] sm:$0xff]  ;;  %v421_v59 = vld [vmem:[%s11025_s1 + $0xc40] sm:$0xff]  ;;  %1097 = vmatpush2.msra.mxu1 %v429_v55  ;;  %1027 = vmatprep.subr.mxu0 %v166_v56 }
  0x3f   :  { %v158_v60 = vld [vmem:[%s11025_s1 + $0x408] sm:$0xff]  ;;  %1098 = vmatprep.subr.mxu1 %v422_v57  ;;  %v157_v62 = vld [vmem:[%s11025_s1 + $0x400] sm:$0xff]  ;;  %1028 = vmatpush2.msra.mxu0 %v165_v58 }
  0x40   :  { %v414_v61 = vld [vmem:[%s11025_s1 + $0xc08] sm:$0xff]  ;;  %1099 = vmatpush2.msra.mxu1 %v421_v59  ;;  %v413_v0 = vld [vmem:[%s11025_s1 + $0xc00] sm:$0xff]  ;;  %1029 = vmatprep.subr.mxu0 %v158_v60 }
  0x41   :  { %v6011_v63 = vld [vmem:[%s11026_s0 + $0x8] sm:$0xff]  ;;  %1100 = vmatprep.subr.mxu1 %v414_v61  ;;  %v6022_v2 = vld [vmem:[%s11026_s0] sm:$0xff]  ;;  %1030 = vmatpush2.msra.mxu0 %v157_v62 }
  0x42   :  { %1031 = vmatprep.mubr.f32.mxu0 %v6011_v63  ;;  %v662_v4 = vld [vmem:[%s11025_s1 + $0x13c8] sm:$0xff]  ;;  %1101 = vmatpush2.msra.mxu1 %v413_v0  ;;  %v661_v6 = vld [vmem:[%s11025_s1 + $0x13c0] sm:$0xff] }
  0x43   :  { %v918_v5 = vld [vmem:[%s11025_s1 + $0x1bc8] sm:$0xff]  ;;  %1102 = vmatprep.mubr.f32.mxu1 %v25_v1  ;;  %v917_v7 = vld [vmem:[%s11025_s1 + $0x1bc0] sm:$0xff]  ;;  %1032 = vmatmul.mubr.f32.vlgmr.msra.gmra.mxu0 %v6022_v2 }
  0x44   :  { %1103 = vmatmul.mubr.f32.vlgmr.msra.gmra.mxu1 %v24_v3  ;;  %v654_v8 = vld [vmem:[%s11025_s1 + $0x1388] sm:$0xff]  ;;  %1109 = vmatprep.subr.mxu0 %v662_v4  ;;  %v653_v10 = vld [vmem:[%s11025_s1 + $0x1380] sm:$0xff] }
  0x45   :  { %v910_v9 = vld [vmem:[%s11025_s1 + $0x1b88] sm:$0xff]  ;;  %1180 = vmatprep.subr.mxu1 %v918_v5  ;;  %v909_v11 = vld [vmem:[%s11025_s1 + $0x1b80] sm:$0xff]  ;;  %1110 = vmatpush1.msra.mxu0 %v661_v6 }
  0x46   :  { %1181 = vmatpush1.msra.mxu1 %v917_v7  ;;  %v646_v12 = vld [vmem:[%s11025_s1 + $0x1348] sm:$0xff]  ;;  %1111 = vmatprep.subr.mxu0 %v654_v8  ;;  %v645_v14 = vld [vmem:[%s11025_s1 + $0x1340] sm:$0xff]  ;;  %v28_v7 = vld [vmem:[%s11026_s0 + $0x30] sm:$0xff] }
  0x47   :  { %v902_v13 = vld [vmem:[%s11025_s1 + $0x1b48] sm:$0xff]  ;;  %1182 = vmatprep.subr.mxu1 %v910_v9  ;;  %v901_v15 = vld [vmem:[%s11025_s1 + $0x1b40] sm:$0xff]  ;;  %1112 = vmatpush1.msra.mxu0 %v653_v10  ;;  %v152_v8 = vld [vmem:[%s11025_s1 + $0x3d8] sm:$0xff] }
  0x48   :  { %1183 = vmatpush1.msra.mxu1 %v909_v11  ;;  %v638_v16 = vld [vmem:[%s11025_s1 + $0x1308] sm:$0xff]  ;;  %1113 = vmatprep.subr.mxu0 %v646_v12  ;;  %v637_v18 = vld [vmem:[%s11025_s1 + $0x1300] sm:$0xff]  ;;  %v151_v10 = vld [vmem:[%s11025_s1 + $0x3d0] sm:$0xff]  ;;  %v5590_v11 = vmov 0.0  }
  0x49   :  { %v894_v17 = vld [vmem:[%s11025_s1 + $0x1b08] sm:$0xff]  ;;  %1184 = vmatprep.subr.mxu1 %v902_v13  ;;  %v893_v19 = vld [vmem:[%s11025_s1 + $0x1b00] sm:$0xff]  ;;  %1114 = vmatpush1.msra.mxu0 %v645_v14  ;;  %v144_v13 = vld [vmem:[%s11025_s1 + $0x398] sm:$0xff] }
  0x4a   :  { %1185 = vmatpush1.msra.mxu1 %v901_v15  ;;  %v630_v20 = vld [vmem:[%s11025_s1 + $0x12c8] sm:$0xff]  ;;  %1115 = vmatprep.subr.mxu0 %v638_v16  ;;  %v629_v22 = vld [vmem:[%s11025_s1 + $0x12c0] sm:$0xff]  ;;  %v143_v15 = vld [vmem:[%s11025_s1 + $0x390] sm:$0xff] }
  0x4b   :  { %v886_v21 = vld [vmem:[%s11025_s1 + $0x1ac8] sm:$0xff]  ;;  %1186 = vmatprep.subr.mxu1 %v894_v17  ;;  %v885_v23 = vld [vmem:[%s11025_s1 + $0x1ac0] sm:$0xff]  ;;  %1116 = vmatpush1.msra.mxu0 %v637_v18  ;;  %v136_v17 = vld [vmem:[%s11025_s1 + $0x358] sm:$0xff] }
  0x4c   :  { %1187 = vmatpush1.msra.mxu1 %v893_v19  ;;  %v622_v24 = vld [vmem:[%s11025_s1 + $0x1288] sm:$0xff]  ;;  %1117 = vmatprep.subr.mxu0 %v630_v20  ;;  %v621_v26 = vld [vmem:[%s11025_s1 + $0x1280] sm:$0xff]  ;;  %v135_v19 = vld [vmem:[%s11025_s1 + $0x350] sm:$0xff] }
  0x4d   :  { %v878_v25 = vld [vmem:[%s11025_s1 + $0x1a88] sm:$0xff]  ;;  %1188 = vmatprep.subr.mxu1 %v886_v21  ;;  %v877_v27 = vld [vmem:[%s11025_s1 + $0x1a80] sm:$0xff]  ;;  %1118 = vmatpush1.msra.mxu0 %v629_v22  ;;  %v128_v21 = vld [vmem:[%s11025_s1 + $0x318] sm:$0xff] }
  0x4e   :  { %1189 = vmatpush1.msra.mxu1 %v885_v23  ;;  %v614_v28 = vld [vmem:[%s11025_s1 + $0x1248] sm:$0xff]  ;;  %1119 = vmatprep.subr.mxu0 %v622_v24  ;;  %v613_v30 = vld [vmem:[%s11025_s1 + $0x1240] sm:$0xff]  ;;  %v127_v23 = vld [vmem:[%s11025_s1 + $0x310] sm:$0xff] }
  0x4f   :  { %v870_v29 = vld [vmem:[%s11025_s1 + $0x1a48] sm:$0xff]  ;;  %1190 = vmatprep.subr.mxu1 %v878_v25  ;;  %v869_v31 = vld [vmem:[%s11025_s1 + $0x1a40] sm:$0xff]  ;;  %1120 = vmatpush1.msra.mxu0 %v621_v26  ;;  %v120_v25 = vld [vmem:[%s11025_s1 + $0x2d8] sm:$0xff] }
  0x50   :  { %1191 = vmatpush1.msra.mxu1 %v877_v27  ;;  %v606_v32 = vld [vmem:[%s11025_s1 + $0x1208] sm:$0xff]  ;;  %1121 = vmatprep.subr.mxu0 %v614_v28  ;;  %v605_v34 = vld [vmem:[%s11025_s1 + $0x1200] sm:$0xff]  ;;  %v119_v27 = vld [vmem:[%s11025_s1 + $0x2d0] sm:$0xff] }
  0x51   :  { %v862_v33 = vld [vmem:[%s11025_s1 + $0x1a08] sm:$0xff]  ;;  %1192 = vmatprep.subr.mxu1 %v870_v29  ;;  %v861_v35 = vld [vmem:[%s11025_s1 + $0x1a00] sm:$0xff]  ;;  %1122 = vmatpush1.msra.mxu0 %v613_v30  ;;  %v112_v29 = vld [vmem:[%s11025_s1 + $0x298] sm:$0xff] }
  0x52   :  { %1193 = vmatpush1.msra.mxu1 %v869_v31  ;;  %v598_v36 = vld [vmem:[%s11025_s1 + $0x11c8] sm:$0xff]  ;;  %1123 = vmatprep.subr.mxu0 %v606_v32  ;;  %v597_v38 = vld [vmem:[%s11025_s1 + $0x11c0] sm:$0xff]  ;;  %v111_v31 = vld [vmem:[%s11025_s1 + $0x290] sm:$0xff] }
  0x53   :  { %v854_v37 = vld [vmem:[%s11025_s1 + $0x19c8] sm:$0xff]  ;;  %1194 = vmatprep.subr.mxu1 %v862_v33  ;;  %v853_v39 = vld [vmem:[%s11025_s1 + $0x19c0] sm:$0xff]  ;;  %1124 = vmatpush1.msra.mxu0 %v605_v34  ;;  %v104_v33 = vld [vmem:[%s11025_s1 + $0x258] sm:$0xff] }
  0x54   :  { %1195 = vmatpush1.msra.mxu1 %v861_v35  ;;  %v590_v40 = vld [vmem:[%s11025_s1 + $0x1188] sm:$0xff]  ;;  %1125 = vmatprep.subr.mxu0 %v598_v36  ;;  %v589_v42 = vld [vmem:[%s11025_s1 + $0x1180] sm:$0xff]  ;;  %v103_v35 = vld [vmem:[%s11025_s1 + $0x250] sm:$0xff] }
  0x55   :  { %v846_v41 = vld [vmem:[%s11025_s1 + $0x1988] sm:$0xff]  ;;  %1196 = vmatprep.subr.mxu1 %v854_v37  ;;  %v845_v43 = vld [vmem:[%s11025_s1 + $0x1980] sm:$0xff]  ;;  %1126 = vmatpush1.msra.mxu0 %v597_v38  ;;  %v96_v37 = vld [vmem:[%s11025_s1 + $0x218] sm:$0xff] }
  0x56   :  { %1197 = vmatpush1.msra.mxu1 %v853_v39  ;;  %v582_v44 = vld [vmem:[%s11025_s1 + $0x1148] sm:$0xff]  ;;  %1127 = vmatprep.subr.mxu0 %v590_v40  ;;  %v581_v46 = vld [vmem:[%s11025_s1 + $0x1140] sm:$0xff]  ;;  %v95_v39 = vld [vmem:[%s11025_s1 + $0x210] sm:$0xff] }
  0x57   :  { %v838_v45 = vld [vmem:[%s11025_s1 + $0x1948] sm:$0xff]  ;;  %1198 = vmatprep.subr.mxu1 %v846_v41  ;;  %v837_v47 = vld [vmem:[%s11025_s1 + $0x1940] sm:$0xff]  ;;  %1128 = vmatpush1.msra.mxu0 %v589_v42  ;;  %v88_v41 = vld [vmem:[%s11025_s1 + $0x1d8] sm:$0xff] }
  0x58   :  { %1199 = vmatpush1.msra.mxu1 %v845_v43  ;;  %v574_v48 = vld [vmem:[%s11025_s1 + $0x1108] sm:$0xff]  ;;  %1129 = vmatprep.subr.mxu0 %v582_v44  ;;  %v573_v50 = vld [vmem:[%s11025_s1 + $0x1100] sm:$0xff]  ;;  %v87_v43 = vld [vmem:[%s11025_s1 + $0x1d0] sm:$0xff] }
  0x59   :  { %v830_v49 = vld [vmem:[%s11025_s1 + $0x1908] sm:$0xff]  ;;  %1200 = vmatprep.subr.mxu1 %v838_v45  ;;  %v829_v51 = vld [vmem:[%s11025_s1 + $0x1900] sm:$0xff]  ;;  %1130 = vmatpush1.msra.mxu0 %v581_v46  ;;  %v80_v45 = vld [vmem:[%s11025_s1 + $0x198] sm:$0xff] }
  0x5a   :  { %1201 = vmatpush1.msra.mxu1 %v837_v47  ;;  %v566_v52 = vld [vmem:[%s11025_s1 + $0x10c8] sm:$0xff]  ;;  %1131 = vmatprep.subr.mxu0 %v574_v48  ;;  %v565_v54 = vld [vmem:[%s11025_s1 + $0x10c0] sm:$0xff]  ;;  %v79_v47 = vld [vmem:[%s11025_s1 + $0x190] sm:$0xff] }
  0x5b   :  { %v822_v53 = vld [vmem:[%s11025_s1 + $0x18c8] sm:$0xff]  ;;  %1202 = vmatprep.subr.mxu1 %v830_v49  ;;  %v821_v55 = vld [vmem:[%s11025_s1 + $0x18c0] sm:$0xff]  ;;  %1132 = vmatpush1.msra.mxu0 %v573_v50  ;;  %v72_v49 = vld [vmem:[%s11025_s1 + $0x158] sm:$0xff] }
  0x5c   :  { %1203 = vmatpush1.msra.mxu1 %v829_v51  ;;  %v558_v56 = vld [vmem:[%s11025_s1 + $0x1088] sm:$0xff]  ;;  %1133 = vmatprep.subr.mxu0 %v566_v52  ;;  %v557_v58 = vld [vmem:[%s11025_s1 + $0x1080] sm:$0xff]  ;;  %v71_v51 = vld [vmem:[%s11025_s1 + $0x150] sm:$0xff] }
  0x5d   :  { %v814_v57 = vld [vmem:[%s11025_s1 + $0x1888] sm:$0xff]  ;;  %1204 = vmatprep.subr.mxu1 %v822_v53  ;;  %v813_v59 = vld [vmem:[%s11025_s1 + $0x1880] sm:$0xff]  ;;  %1134 = vmatpush1.msra.mxu0 %v565_v54  ;;  %v64_v53 = vld [vmem:[%s11025_s1 + $0x118] sm:$0xff] }
  0x5e   :  { %1205 = vmatpush1.msra.mxu1 %v821_v55  ;;  %v550_v60 = vld [vmem:[%s11025_s1 + $0x1048] sm:$0xff]  ;;  %1135 = vmatprep.subr.mxu0 %v558_v56  ;;  %v549_v62 = vld [vmem:[%s11025_s1 + $0x1040] sm:$0xff]  ;;  %v63_v55 = vld [vmem:[%s11025_s1 + $0x110] sm:$0xff] }
  0x5f   :  { %v806_v61 = vld [vmem:[%s11025_s1 + $0x1848] sm:$0xff]  ;;  %1206 = vmatprep.subr.mxu1 %v814_v57  ;;  %v805_v0 = vld [vmem:[%s11025_s1 + $0x1840] sm:$0xff]  ;;  %1136 = vmatpush1.msra.mxu0 %v557_v58  ;;  %v56_v57 = vld [vmem:[%s11025_s1 + $0xd8] sm:$0xff] }
  0x60   :  { %1207 = vmatpush1.msra.mxu1 %v813_v59  ;;  %v542_v1 = vld [vmem:[%s11025_s1 + $0x1008] sm:$0xff]  ;;  %1137 = vmatprep.subr.mxu0 %v550_v60  ;;  %v541_v4 = vld [vmem:[%s11025_s1 + $0x1000] sm:$0xff]  ;;  %v55_v59 = vld [vmem:[%s11025_s1 + $0xd0] sm:$0xff] }
  0x61   :  { %v798_v3 = vld [vmem:[%s11025_s1 + $0x1808] sm:$0xff]  ;;  %1208 = vmatprep.subr.mxu1 %v806_v61  ;;  %v797_v5 = vld [vmem:[%s11025_s1 + $0x1800] sm:$0xff]  ;;  %1138 = vmatpush1.msra.mxu0 %v549_v62  ;;  %v48_v61 = vld [vmem:[%s11025_s1 + $0x98] sm:$0xff] }
  0x62   :  { %1209 = vmatpush1.msra.mxu1 %v805_v0  ;;  %v790_v6 = vld [vmem:[%s11025_s1 + $0x17c8] sm:$0xff]  ;;  %1139 = vmatprep.subr.mxu0 %v542_v1  ;;  %v789_v9 = vld [vmem:[%s11025_s1 + $0x17c0] sm:$0xff]  ;;  %v47_v0 = vld [vmem:[%s11025_s1 + $0x90] sm:$0xff] }
  0x63   :  { %1210 = vmatprep.subr.mxu1 %v798_v3  ;;  %1140 = vmatpush1.msra.mxu0 %v541_v4  ;;  %v782_v12 = vld [vmem:[%s11025_s1 + $0x1788] sm:$0xff]  ;;  %v781_v14 = vld [vmem:[%s11025_s1 + $0x1780] sm:$0xff]  ;;  %v40_v3 = vld [vmem:[%s11025_s1 + $0x58] sm:$0xff] }
  0x64   :  { %1211 = vmatpush1.msra.mxu1 %v797_v5  ;;  %1244 = vmatprep.mubr.f32.mxu1 %v5590_v11  ;;  %v774_v16 = vld [vmem:[%s11025_s1 + $0x1748] sm:$0xff]  ;;  %v773_v18 = vld [vmem:[%s11025_s1 + $0x1740] sm:$0xff]  ;;  %v39_v5 = vld [vmem:[%s11025_s1 + $0x50] sm:$0xff] }
  0x65   :  { %1141 = vmatprep.subr.mxu0 %v790_v6  ;;  %1245 = vmatmul.mubr.f32.vlgmr.msra.gmra.mxu1 %v28_v7  ;;  %v766_v20 = vld [vmem:[%s11025_s1 + $0x1708] sm:$0xff]  ;;  %v765_v22 = vld [vmem:[%s11025_s1 + $0x1700] sm:$0xff]  ;;  %v32_v7 = vld [vmem:[%s11025_s1 + $0x18] sm:$0xff] }
  0x66   :  { %1251 = vmatprep.subr.mxu1 %v152_v8  ;;  %1142 = vmatpush2.msra.mxu0 %v789_v9  ;;  %v758_v24 = vld [vmem:[%s11025_s1 + $0x16c8] sm:$0xff]  ;;  %v757_v26 = vld [vmem:[%s11025_s1 + $0x16c0] sm:$0xff] }
  0x67   :  { %1252 = vmatpush1.msra.mxu1 %v151_v10  ;;  %1143 = vmatprep.subr.mxu0 %v782_v12  ;;  %v750_v28 = vld [vmem:[%s11025_s1 + $0x1688] sm:$0xff]  ;;  %v749_v30 = vld [vmem:[%s11025_s1 + $0x1680] sm:$0xff]  ;;  %v31_v10 = vld [vmem:[%s11025_s1 + $0x10] sm:$0xff] }
  0x68   :  { %1253 = vmatprep.subr.mxu1 %v144_v13  ;;  %1144 = vmatpush2.msra.mxu0 %v781_v14  ;;  %v742_v32 = vld [vmem:[%s11025_s1 + $0x1648] sm:$0xff]  ;;  %v741_v34 = vld [vmem:[%s11025_s1 + $0x1640] sm:$0xff]  ;;  %v280_v13 = vld [vmem:[%s11025_s1 + $0x7d8] sm:$0xff] }
  0x69   :  { %1254 = vmatpush1.msra.mxu1 %v143_v15  ;;  %1145 = vmatprep.subr.mxu0 %v774_v16  ;;  %v734_v36 = vld [vmem:[%s11025_s1 + $0x1608] sm:$0xff]  ;;  %v733_v38 = vld [vmem:[%s11025_s1 + $0x1600] sm:$0xff]  ;;  %v408_v14 = vld [vmem:[%s11025_s1 + $0xbd8] sm:$0xff] }
  0x6a   :  { %1255 = vmatprep.subr.mxu1 %v136_v17  ;;  %1146 = vmatpush2.msra.mxu0 %v773_v18  ;;  %v726_v40 = vld [vmem:[%s11025_s1 + $0x15c8] sm:$0xff]  ;;  %v725_v42 = vld [vmem:[%s11025_s1 + $0x15c0] sm:$0xff]  ;;  %v279_v15 = vld [vmem:[%s11025_s1 + $0x7d0] sm:$0xff] }
  0x6b   :  { %1256 = vmatpush1.msra.mxu1 %v135_v19  ;;  %1147 = vmatprep.subr.mxu0 %v766_v20  ;;  %v718_v44 = vld [vmem:[%s11025_s1 + $0x1588] sm:$0xff]  ;;  %v717_v46 = vld [vmem:[%s11025_s1 + $0x1580] sm:$0xff]  ;;  %v407_v16 = vld [vmem:[%s11025_s1 + $0xbd0] sm:$0xff] }
  0x6c   :  { %1257 = vmatprep.subr.mxu1 %v128_v21  ;;  %1148 = vmatpush2.msra.mxu0 %v765_v22  ;;  %v710_v48 = vld [vmem:[%s11025_s1 + $0x1548] sm:$0xff]  ;;  %v709_v50 = vld [vmem:[%s11025_s1 + $0x1540] sm:$0xff]  ;;  %v272_v17 = vld [vmem:[%s11025_s1 + $0x798] sm:$0xff] }
  0x6d   :  { %1258 = vmatpush1.msra.mxu1 %v127_v23  ;;  %1149 = vmatprep.subr.mxu0 %v758_v24  ;;  %v702_v52 = vld [vmem:[%s11025_s1 + $0x1508] sm:$0xff]  ;;  %v701_v54 = vld [vmem:[%s11025_s1 + $0x1500] sm:$0xff]  ;;  %v400_v18 = vld [vmem:[%s11025_s1 + $0xb98] sm:$0xff] }
  0x6e   :  { %1259 = vmatprep.subr.mxu1 %v120_v25  ;;  %1150 = vmatpush2.msra.mxu0 %v757_v26  ;;  %v694_v56 = vld [vmem:[%s11025_s1 + $0x14c8] sm:$0xff]  ;;  %v693_v58 = vld [vmem:[%s11025_s1 + $0x14c0] sm:$0xff]  ;;  %v271_v19 = vld [vmem:[%s11025_s1 + $0x790] sm:$0xff] }
  0x6f   :  { %1260 = vmatpush1.msra.mxu1 %v119_v27  ;;  %1151 = vmatprep.subr.mxu0 %v750_v28  ;;  %v686_v60 = vld [vmem:[%s11025_s1 + $0x1488] sm:$0xff]  ;;  %v685_v62 = vld [vmem:[%s11025_s1 + $0x1480] sm:$0xff]  ;;  %v399_v20 = vld [vmem:[%s11025_s1 + $0xb90] sm:$0xff] }
  0x70   :  { %1261 = vmatprep.subr.mxu1 %v112_v29  ;;  %1152 = vmatpush2.msra.mxu0 %v749_v30  ;;  %v678_v1 = vld [vmem:[%s11025_s1 + $0x1448] sm:$0xff]  ;;  %v677_v4 = vld [vmem:[%s11025_s1 + $0x1440] sm:$0xff]  ;;  %v264_v21 = vld [vmem:[%s11025_s1 + $0x758] sm:$0xff] }
  0x71   :  { %1262 = vmatpush1.msra.mxu1 %v111_v31  ;;  %1153 = vmatprep.subr.mxu0 %v742_v32  ;;  %v670_v6 = vld [vmem:[%s11025_s1 + $0x1408] sm:$0xff]  ;;  %v669_v8 = vld [vmem:[%s11025_s1 + $0x1400] sm:$0xff]  ;;  %v392_v22 = vld [vmem:[%s11025_s1 + $0xb58] sm:$0xff] }
  0x72   :  { %1263 = vmatprep.subr.mxu1 %v104_v33  ;;  %1154 = vmatpush2.msra.mxu0 %v741_v34  ;;  %v6417_v9 = vld [vmem:[%s11026_s0 + $0x28] sm:$0xff]  ;;  %v6425_v12 = vld [vmem:[%s11026_s0 + $0x20] sm:$0xff]  ;;  %v263_v23 = vld [vmem:[%s11025_s1 + $0x750] sm:$0xff] }
  0x73   :  { %1264 = vmatpush1.msra.mxu1 %v103_v35  ;;  %1155 = vmatprep.subr.mxu0 %v734_v36  ;;  %v391_v24 = vld [vmem:[%s11025_s1 + $0xb50] sm:$0xff]  ;;  %v256_v25 = vld [vmem:[%s11025_s1 + $0x718] sm:$0xff] }
  0x74   :  { %1265 = vmatprep.subr.mxu1 %v96_v37  ;;  %1156 = vmatpush2.msra.mxu0 %v733_v38  ;;  %v384_v26 = vld [vmem:[%s11025_s1 + $0xb18] sm:$0xff]  ;;  %v255_v27 = vld [vmem:[%s11025_s1 + $0x710] sm:$0xff] }
  0x75   :  { %1266 = vmatpush1.msra.mxu1 %v95_v39  ;;  %1157 = vmatprep.subr.mxu0 %v726_v40  ;;  %v383_v28 = vld [vmem:[%s11025_s1 + $0xb10] sm:$0xff]  ;;  %v248_v29 = vld [vmem:[%s11025_s1 + $0x6d8] sm:$0xff] }
  0x76   :  { %1267 = vmatprep.subr.mxu1 %v88_v41  ;;  %1158 = vmatpush2.msra.mxu0 %v725_v42  ;;  %v376_v30 = vld [vmem:[%s11025_s1 + $0xad8] sm:$0xff]  ;;  %v247_v31 = vld [vmem:[%s11025_s1 + $0x6d0] sm:$0xff] }
  0x77   :  { %1268 = vmatpush1.msra.mxu1 %v87_v43  ;;  %1159 = vmatprep.subr.mxu0 %v718_v44  ;;  %v375_v32 = vld [vmem:[%s11025_s1 + $0xad0] sm:$0xff]  ;;  %v240_v33 = vld [vmem:[%s11025_s1 + $0x698] sm:$0xff] }
  0x78   :  { %1269 = vmatprep.subr.mxu1 %v80_v45  ;;  %1160 = vmatpush2.msra.mxu0 %v717_v46  ;;  %v368_v34 = vld [vmem:[%s11025_s1 + $0xa98] sm:$0xff]  ;;  %v239_v35 = vld [vmem:[%s11025_s1 + $0x690] sm:$0xff] }
  0x79   :  { %1270 = vmatpush1.msra.mxu1 %v79_v47  ;;  %1161 = vmatprep.subr.mxu0 %v710_v48  ;;  %v367_v36 = vld [vmem:[%s11025_s1 + $0xa90] sm:$0xff]  ;;  %v232_v37 = vld [vmem:[%s11025_s1 + $0x658] sm:$0xff] }
  0x7a   :  { %1271 = vmatprep.subr.mxu1 %v72_v49  ;;  %1162 = vmatpush2.msra.mxu0 %v709_v50  ;;  %v360_v38 = vld [vmem:[%s11025_s1 + $0xa58] sm:$0xff]  ;;  %v231_v39 = vld [vmem:[%s11025_s1 + $0x650] sm:$0xff] }
  0x7b   :  { %1272 = vmatpush1.msra.mxu1 %v71_v51  ;;  %1163 = vmatprep.subr.mxu0 %v702_v52  ;;  %v359_v40 = vld [vmem:[%s11025_s1 + $0xa50] sm:$0xff]  ;;  %v224_v41 = vld [vmem:[%s11025_s1 + $0x618] sm:$0xff] }
  0x7c   :  { %1273 = vmatprep.subr.mxu1 %v64_v53  ;;  %1164 = vmatpush2.msra.mxu0 %v701_v54  ;;  %v352_v42 = vld [vmem:[%s11025_s1 + $0xa18] sm:$0xff]  ;;  %v223_v43 = vld [vmem:[%s11025_s1 + $0x610] sm:$0xff] }
  0x7d   :  { %1274 = vmatpush1.msra.mxu1 %v63_v55  ;;  %1165 = vmatprep.subr.mxu0 %v694_v56  ;;  %v351_v44 = vld [vmem:[%s11025_s1 + $0xa10] sm:$0xff]  ;;  %v216_v45 = vld [vmem:[%s11025_s1 + $0x5d8] sm:$0xff] }
  0x7e   :  { %1275 = vmatprep.subr.mxu1 %v56_v57  ;;  %1166 = vmatpush2.msra.mxu0 %v693_v58  ;;  %v344_v46 = vld [vmem:[%s11025_s1 + $0x9d8] sm:$0xff]  ;;  %v215_v47 = vld [vmem:[%s11025_s1 + $0x5d0] sm:$0xff] }
  0x7f   :  { %1276 = vmatpush1.msra.mxu1 %v55_v59  ;;  %1167 = vmatprep.subr.mxu0 %v686_v60  ;;  %v343_v48 = vld [vmem:[%s11025_s1 + $0x9d0] sm:$0xff]  ;;  %v208_v49 = vld [vmem:[%s11025_s1 + $0x598] sm:$0xff] }
  0x80   :  { %1277 = vmatprep.subr.mxu1 %v48_v61  ;;  %1168 = vmatpush2.msra.mxu0 %v685_v62  ;;  %v336_v50 = vld [vmem:[%s11025_s1 + $0x998] sm:$0xff]  ;;  %v207_v51 = vld [vmem:[%s11025_s1 + $0x590] sm:$0xff] }
  0x81   :  { %1278 = vmatpush1.msra.mxu1 %v47_v0  ;;  %1169 = vmatprep.subr.mxu0 %v678_v1  ;;  %v335_v52 = vld [vmem:[%s11025_s1 + $0x990] sm:$0xff]  ;;  %v200_v53 = vld [vmem:[%s11025_s1 + $0x558] sm:$0xff] }
  0x82   :  { %1279 = vmatprep.subr.mxu1 %v40_v3  ;;  %1170 = vmatpush2.msra.mxu0 %v677_v4  ;;  %v328_v54 = vld [vmem:[%s11025_s1 + $0x958] sm:$0xff]  ;;  %v199_v55 = vld [vmem:[%s11025_s1 + $0x550] sm:$0xff] }
  0x83   :  { %1280 = vmatpush1.msra.mxu1 %v39_v5  ;;  %1171 = vmatprep.subr.mxu0 %v670_v6  ;;  %v327_v56 = vld [vmem:[%s11025_s1 + $0x950] sm:$0xff]  ;;  %v192_v57 = vld [vmem:[%s11025_s1 + $0x518] sm:$0xff] }
  0x84   :  { %1281 = vmatprep.subr.mxu1 %v32_v7  ;;  %1172 = vmatpush2.msra.mxu0 %v669_v8  ;;  %v320_v58 = vld [vmem:[%s11025_s1 + $0x918] sm:$0xff]  ;;  %v191_v59 = vld [vmem:[%s11025_s1 + $0x510] sm:$0xff] }
  0x85   :  { %1173 = vmatprep.mubr.f32.mxu0 %v6417_v9  ;;  %1282 = vmatpush1.msra.mxu1 %v31_v10  ;;  %v319_v60 = vld [vmem:[%s11025_s1 + $0x910] sm:$0xff]  ;;  %v184_v61 = vld [vmem:[%s11025_s1 + $0x4d8] sm:$0xff] }
  0x86   :  { %1174 = vmatmul.mubr.f32.vlgmr.msra.gmra.mxu0 %v6425_v12  ;;  %1283 = vmatprep.subr.mxu1 %v280_v13  ;;  %v312_v62 = vld [vmem:[%s11025_s1 + $0x8d8] sm:$0xff]  ;;  %v183_v0 = vld [vmem:[%s11025_s1 + $0x4d0] sm:$0xff] }
  0x87   :  { %1322 = vmatprep.subr.mxu0 %v408_v14  ;;  %1284 = vmatpush2.msra.mxu1 %v279_v15  ;;  %v311_v1 = vld [vmem:[%s11025_s1 + $0x8d0] sm:$0xff]  ;;  %v176_v3 = vld [vmem:[%s11025_s1 + $0x498] sm:$0xff] }
  0x88   :  { %1323 = vmatpush1.msra.mxu0 %v407_v16  ;;  %1285 = vmatprep.subr.mxu1 %v272_v17  ;;  %v304_v4 = vld [vmem:[%s11025_s1 + $0x898] sm:$0xff]  ;;  %v175_v5 = vld [vmem:[%s11025_s1 + $0x490] sm:$0xff] }
  0x89   :  { %1324 = vmatprep.subr.mxu0 %v400_v18  ;;  %1286 = vmatpush2.msra.mxu1 %v271_v19  ;;  %v303_v6 = vld [vmem:[%s11025_s1 + $0x890] sm:$0xff]  ;;  %v168_v7 = vld [vmem:[%s11025_s1 + $0x458] sm:$0xff] }
  0x8a   :  { %1325 = vmatpush1.msra.mxu0 %v399_v20  ;;  %1287 = vmatprep.subr.mxu1 %v264_v21  ;;  %v296_v8 = vld [vmem:[%s11025_s1 + $0x858] sm:$0xff]  ;;  %v167_v10 = vld [vmem:[%s11025_s1 + $0x450] sm:$0xff] }
  0x8b   :  { %1326 = vmatprep.subr.mxu0 %v392_v22  ;;  %1288 = vmatpush2.msra.mxu1 %v263_v23  ;;  %v295_v13 = vld [vmem:[%s11025_s1 + $0x850] sm:$0xff]  ;;  %v160_v14 = vld [vmem:[%s11025_s1 + $0x418] sm:$0xff] }
  0x8c   :  { %1327 = vmatpush1.msra.mxu0 %v391_v24  ;;  %1289 = vmatprep.subr.mxu1 %v256_v25  ;;  %v288_v15 = vld [vmem:[%s11025_s1 + $0x818] sm:$0xff]  ;;  %v159_v16 = vld [vmem:[%s11025_s1 + $0x410] sm:$0xff] }
  0x8d   :  { %1328 = vmatprep.subr.mxu0 %v384_v26  ;;  %1290 = vmatpush2.msra.mxu1 %v255_v27  ;;  %v287_v17 = vld [vmem:[%s11025_s1 + $0x810] sm:$0xff]  ;;  %v536_v18 = vld [vmem:[%s11025_s1 + $0xfd8] sm:$0xff] }
  0x8e   :  { %1329 = vmatpush1.msra.mxu0 %v383_v28  ;;  %1291 = vmatprep.subr.mxu1 %v248_v29  ;;  %v664_v19 = vld [vmem:[%s11025_s1 + $0x13d8] sm:$0xff]  ;;  %v535_v20 = vld [vmem:[%s11025_s1 + $0xfd0] sm:$0xff] }
  0x8f   :  { %1330 = vmatprep.subr.mxu0 %v376_v30  ;;  %1292 = vmatpush2.msra.mxu1 %v247_v31  ;;  %v663_v21 = vld [vmem:[%s11025_s1 + $0x13d0] sm:$0xff]  ;;  %v528_v22 = vld [vmem:[%s11025_s1 + $0xf98] sm:$0xff] }
  0x90   :  { %1331 = vmatpush1.msra.mxu0 %v375_v32  ;;  %1293 = vmatprep.subr.mxu1 %v240_v33  ;;  %v656_v23 = vld [vmem:[%s11025_s1 + $0x1398] sm:$0xff]  ;;  %v655_v24 = vld [vmem:[%s11025_s1 + $0x1390] sm:$0xff] }
  0x91   :  { %1332 = vmatprep.subr.mxu0 %v368_v34  ;;  %1294 = vmatpush2.msra.mxu1 %v239_v35  ;;  %v648_v25 = vld [vmem:[%s11025_s1 + $0x1358] sm:$0xff]  ;;  %v519_v26 = vld [vmem:[%s11025_s1 + $0xf50] sm:$0xff] }
  0x92   :  { %1333 = vmatpush1.msra.mxu0 %v367_v36  ;;  %1295 = vmatprep.subr.mxu1 %v232_v37  ;;  %v647_v27 = vld [vmem:[%s11025_s1 + $0x1350] sm:$0xff]  ;;  %v512_v28 = vld [vmem:[%s11025_s1 + $0xf18] sm:$0xff] }
  0x93   :  { %1334 = vmatprep.subr.mxu0 %v360_v38  ;;  %1296 = vmatpush2.msra.mxu1 %v231_v39  ;;  %v640_v29 = vld [vmem:[%s11025_s1 + $0x1318] sm:$0xff]  ;;  %v511_v30 = vld [vmem:[%s11025_s1 + $0xf10] sm:$0xff] }
  0x94   :  { %1335 = vmatpush1.msra.mxu0 %v359_v40  ;;  %1297 = vmatprep.subr.mxu1 %v224_v41  ;;  %v639_v31 = vld [vmem:[%s11025_s1 + $0x1310] sm:$0xff]  ;;  %v504_v32 = vld [vmem:[%s11025_s1 + $0xed8] sm:$0xff] }
  0x95   :  { %1336 = vmatprep.subr.mxu0 %v352_v42  ;;  %1298 = vmatpush2.msra.mxu1 %v223_v43  ;;  %v632_v33 = vld [vmem:[%s11025_s1 + $0x12d8] sm:$0xff]  ;;  %v503_v34 = vld [vmem:[%s11025_s1 + $0xed0] sm:$0xff] }
  0x96   :  { %1337 = vmatpush1.msra.mxu0 %v351_v44  ;;  %1299 = vmatprep.subr.mxu1 %v216_v45  ;;  %v631_v35 = vld [vmem:[%s11025_s1 + $0x12d0] sm:$0xff]  ;;  %v496_v36 = vld [vmem:[%s11025_s1 + $0xe98] sm:$0xff] }
  0x97   :  { %1338 = vmatprep.subr.mxu0 %v344_v46  ;;  %1300 = vmatpush2.msra.mxu1 %v215_v47  ;;  %v624_v37 = vld [vmem:[%s11025_s1 + $0x1298] sm:$0xff]  ;;  %v495_v38 = vld [vmem:[%s11025_s1 + $0xe90] sm:$0xff] }
  0x98   :  { %1339 = vmatpush1.msra.mxu0 %v343_v48  ;;  %1301 = vmatprep.subr.mxu1 %v208_v49  ;;  %v623_v39 = vld [vmem:[%s11025_s1 + $0x1290] sm:$0xff]  ;;  %v488_v40 = vld [vmem:[%s11025_s1 + $0xe58] sm:$0xff] }
  0x99   :  { %1340 = vmatprep.subr.mxu0 %v336_v50  ;;  %1302 = vmatpush2.msra.mxu1 %v207_v51  ;;  %v616_v41 = vld [vmem:[%s11025_s1 + $0x1258] sm:$0xff]  ;;  %v487_v42 = vld [vmem:[%s11025_s1 + $0xe50] sm:$0xff] }
  0x9a   :  { %1341 = vmatpush1.msra.mxu0 %v335_v52  ;;  %1303 = vmatprep.subr.mxu1 %v200_v53  ;;  %v615_v43 = vld [vmem:[%s11025_s1 + $0x1250] sm:$0xff]  ;;  %v480_v44 = vld [vmem:[%s11025_s1 + $0xe18] sm:$0xff] }
  0x9b   :  { %1342 = vmatprep.subr.mxu0 %v328_v54  ;;  %1304 = vmatpush2.msra.mxu1 %v199_v55  ;;  %v608_v45 = vld [vmem:[%s11025_s1 + $0x1218] sm:$0xff]  ;;  %v479_v46 = vld [vmem:[%s11025_s1 + $0xe10] sm:$0xff] }
  0x9c   :  { %1343 = vmatpush1.msra.mxu0 %v327_v56  ;;  %1305 = vmatprep.subr.mxu1 %v192_v57  ;;  %v607_v47 = vld [vmem:[%s11025_s1 + $0x1210] sm:$0xff]  ;;  %v472_v48 = vld [vmem:[%s11025_s1 + $0xdd8] sm:$0xff] }
  0x9d   :  { %1344 = vmatprep.subr.mxu0 %v320_v58  ;;  %1306 = vmatpush2.msra.mxu1 %v191_v59  ;;  %v600_v49 = vld [vmem:[%s11025_s1 + $0x11d8] sm:$0xff]  ;;  %v471_v50 = vld [vmem:[%s11025_s1 + $0xdd0] sm:$0xff] }
  0x9e   :  { %1345 = vmatpush1.msra.mxu0 %v319_v60  ;;  %1307 = vmatprep.subr.mxu1 %v184_v61  ;;  %v599_v51 = vld [vmem:[%s11025_s1 + $0x11d0] sm:$0xff]  ;;  %v464_v52 = vld [vmem:[%s11025_s1 + $0xd98] sm:$0xff] }
  0x9f   :  { %1346 = vmatprep.subr.mxu0 %v312_v62  ;;  %1308 = vmatpush2.msra.mxu1 %v183_v0  ;;  %v592_v53 = vld [vmem:[%s11025_s1 + $0x1198] sm:$0xff]  ;;  %v463_v54 = vld [vmem:[%s11025_s1 + $0xd90] sm:$0xff] }
  0xa0   :  { %1347 = vmatpush1.msra.mxu0 %v311_v1  ;;  %1309 = vmatprep.subr.mxu1 %v176_v3  ;;  %v591_v55 = vld [vmem:[%s11025_s1 + $0x1190] sm:$0xff]  ;;  %v456_v56 = vld [vmem:[%s11025_s1 + $0xd58] sm:$0xff] }
  0xa1   :  { %1348 = vmatprep.subr.mxu0 %v304_v4  ;;  %1310 = vmatpush2.msra.mxu1 %v175_v5  ;;  %v584_v57 = vld [vmem:[%s11025_s1 + $0x1158] sm:$0xff]  ;;  %v455_v58 = vld [vmem:[%s11025_s1 + $0xd50] sm:$0xff] }
  0xa2   :  { %1349 = vmatpush1.msra.mxu0 %v303_v6  ;;  %1311 = vmatprep.subr.mxu1 %v168_v7  ;;  %v583_v59 = vld [vmem:[%s11025_s1 + $0x1150] sm:$0xff]  ;;  %v448_v60 = vld [vmem:[%s11025_s1 + $0xd18] sm:$0xff] }
  0xa3   :  { %1350 = vmatprep.subr.mxu0 %v296_v8  ;;  %1312 = vmatpush2.msra.mxu1 %v167_v10  ;;  %v576_v61 = vld [vmem:[%s11025_s1 + $0x1118] sm:$0xff]  ;;  %v447_v62 = vld [vmem:[%s11025_s1 + $0xd10] sm:$0xff] }
  0xa4   :  { %1351 = vmatpush1.msra.mxu0 %v295_v13  ;;  %1313 = vmatprep.subr.mxu1 %v160_v14  ;;  %v575_v0 = vld [vmem:[%s11025_s1 + $0x1110] sm:$0xff]  ;;  %v440_v1 = vld [vmem:[%s11025_s1 + $0xcd8] sm:$0xff] }
  0xa5   :  { %1352 = vmatprep.subr.mxu0 %v288_v15  ;;  %1314 = vmatpush2.msra.mxu1 %v159_v16  ;;  %v568_v3 = vld [vmem:[%s11025_s1 + $0x10d8] sm:$0xff]  ;;  %v439_v4 = vld [vmem:[%s11025_s1 + $0xcd0] sm:$0xff] }
  0xa6   :  { %1315 = vmatprep.mubr.f32.mxu1 %v6011_v63  ;;  %1353 = vmatpush1.msra.mxu0 %v287_v17  ;;  %v527_v63 = vld [vmem:[%s11025_s1 + $0xf90] sm:$0xff]  ;;  %v432_v6 = vld [vmem:[%s11025_s1 + $0xc98] sm:$0xff] }
  0xa7   :  { %1316 = vmatmul.mubr.f32.vlgmr.msra.gmra.mxu1 %v6022_v2  ;;  %1354 = vmatprep.subr.mxu0 %v536_v18  ;;  %v520_v2 = vld [vmem:[%s11025_s1 + $0xf58] sm:$0xff]  ;;  %v567_v5 = vld [vmem:[%s11025_s1 + $0x10d0] sm:$0xff] }
  0xa8   :  { %1393 = vmatprep.subr.mxu1 %v664_v19  ;;  %1355 = vmatpush2.msra.mxu0 %v535_v20  ;;  %v560_v7 = vld [vmem:[%s11025_s1 + $0x1098] sm:$0xff]  ;;  %v431_v8 = vld [vmem:[%s11025_s1 + $0xc90] sm:$0xff] }
  0xa9   :  { %1394 = vmatpush1.msra.mxu1 %v663_v21  ;;  %1356 = vmatprep.subr.mxu0 %v528_v22  ;;  %v559_v10 = vld [vmem:[%s11025_s1 + $0x1090] sm:$0xff]  ;;  %v424_v13 = vld [vmem:[%s11025_s1 + $0xc58] sm:$0xff] }
  0xaa   :  { %1395 = vmatprep.subr.mxu1 %v656_v23  ;;  %1357 = vmatpush2.msra.mxu0 %v527_v63  ;;  %v552_v14 = vld [vmem:[%s11025_s1 + $0x1058] sm:$0xff]  ;;  %v423_v15 = vld [vmem:[%s11025_s1 + $0xc50] sm:$0xff] }
  0xab   :  { %1396 = vmatpush1.msra.mxu1 %v655_v24  ;;  %1358 = vmatprep.subr.mxu0 %v520_v2  ;;  %v551_v16 = vld [vmem:[%s11025_s1 + $0x1050] sm:$0xff]  ;;  %v416_v17 = vld [vmem:[%s11025_s1 + $0xc18] sm:$0xff] }
  0xac   :  { %1397 = vmatprep.subr.mxu1 %v648_v25  ;;  %1359 = vmatpush2.msra.mxu0 %v519_v26  ;;  %v544_v18 = vld [vmem:[%s11025_s1 + $0x1018] sm:$0xff]  ;;  %v415_v19 = vld [vmem:[%s11025_s1 + $0xc10] sm:$0xff] }
  0xad   :  { %1398 = vmatpush1.msra.mxu1 %v647_v27  ;;  %1360 = vmatprep.subr.mxu0 %v512_v28  ;;  %v543_v20 = vld [vmem:[%s11025_s1 + $0x1010] sm:$0xff]  ;;  %v792_v21 = vld [vmem:[%s11025_s1 + $0x17d8] sm:$0xff] }
  0xae   :  { %1399 = vmatprep.subr.mxu1 %v640_v29  ;;  %1361 = vmatpush2.msra.mxu0 %v511_v30  ;;  %v920_v22 = vld [vmem:[%s11025_s1 + $0x1bd8] sm:$0xff]  ;;  %v791_v63 = vld [vmem:[%s11025_s1 + $0x17d0] sm:$0xff] }
  0xaf   :  { %1400 = vmatpush1.msra.mxu1 %v639_v31  ;;  %1362 = vmatprep.subr.mxu0 %v504_v32  ;;  %v6824_v23 = vld [vmem:[%s11026_s0 + $0x18] sm:$0xff]  ;;  %v919_v24 = vld [vmem:[%s11025_s1 + $0x1bd0] sm:$0xff] }
  0xb0   :  { %1401 = vmatprep.subr.mxu1 %v632_v33  ;;  %1363 = vmatpush2.msra.mxu0 %v503_v34  ;;  %v6836_v2 = vld [vmem:[%s11026_s0 + $0x10] sm:$0xff]  ;;  %v784_v25 = vld [vmem:[%s11025_s1 + $0x1798] sm:$0xff] }
  0xb1   :  { %1402 = vmatpush1.msra.mxu1 %v631_v35  ;;  %1364 = vmatprep.subr.mxu0 %v496_v36  ;;  %v912_v26 = vld [vmem:[%s11025_s1 + $0x1b98] sm:$0xff]  ;;  %v783_v27 = vld [vmem:[%s11025_s1 + $0x1790] sm:$0xff] }
  0xb2   :  { %1403 = vmatprep.subr.mxu1 %v624_v37  ;;  %1365 = vmatpush2.msra.mxu0 %v495_v38  ;;  %v911_v28 = vld [vmem:[%s11025_s1 + $0x1b90] sm:$0xff]  ;;  %v776_v29 = vld [vmem:[%s11025_s1 + $0x1758] sm:$0xff] }
  0xb3   :  { %1404 = vmatpush1.msra.mxu1 %v623_v39  ;;  %1366 = vmatprep.subr.mxu0 %v488_v40  ;;  %v904_v30 = vld [vmem:[%s11025_s1 + $0x1b58] sm:$0xff]  ;;  %v775_v31 = vld [vmem:[%s11025_s1 + $0x1750] sm:$0xff] }
  0xb4   :  { %1405 = vmatprep.subr.mxu1 %v616_v41  ;;  %1367 = vmatpush2.msra.mxu0 %v487_v42  ;;  %v903_v32 = vld [vmem:[%s11025_s1 + $0x1b50] sm:$0xff]  ;;  %v768_v33 = vld [vmem:[%s11025_s1 + $0x1718] sm:$0xff] }
  0xb5   :  { %1406 = vmatpush1.msra.mxu1 %v615_v43  ;;  %1368 = vmatprep.subr.mxu0 %v480_v44  ;;  %v896_v34 = vld [vmem:[%s11025_s1 + $0x1b18] sm:$0xff]  ;;  %v767_v35 = vld [vmem:[%s11025_s1 + $0x1710] sm:$0xff] }
  0xb6   :  { %1407 = vmatprep.subr.mxu1 %v608_v45  ;;  %1369 = vmatpush2.msra.mxu0 %v479_v46  ;;  %v895_v36 = vld [vmem:[%s11025_s1 + $0x1b10] sm:$0xff]  ;;  %v760_v37 = vld [vmem:[%s11025_s1 + $0x16d8] sm:$0xff] }
  0xb7   :  { %1408 = vmatpush1.msra.mxu1 %v607_v47  ;;  %1370 = vmatprep.subr.mxu0 %v472_v48  ;;  %v888_v38 = vld [vmem:[%s11025_s1 + $0x1ad8] sm:$0xff]  ;;  %v759_v39 = vld [vmem:[%s11025_s1 + $0x16d0] sm:$0xff] }
  0xb8   :  { %1409 = vmatprep.subr.mxu1 %v600_v49  ;;  %1371 = vmatpush2.msra.mxu0 %v471_v50  ;;  %v887_v40 = vld [vmem:[%s11025_s1 + $0x1ad0] sm:$0xff]  ;;  %v752_v41 = vld [vmem:[%s11025_s1 + $0x1698] sm:$0xff] }
  0xb9   :  { %1410 = vmatpush1.msra.mxu1 %v599_v51  ;;  %1372 = vmatprep.subr.mxu0 %v464_v52  ;;  %v880_v42 = vld [vmem:[%s11025_s1 + $0x1a98] sm:$0xff]  ;;  %v751_v43 = vld [vmem:[%s11025_s1 + $0x1690] sm:$0xff] }
  0xba   :  { %1411 = vmatprep.subr.mxu1 %v592_v53  ;;  %1373 = vmatpush2.msra.mxu0 %v463_v54  ;;  %v879_v44 = vld [vmem:[%s11025_s1 + $0x1a90] sm:$0xff]  ;;  %v744_v45 = vld [vmem:[%s11025_s1 + $0x1658] sm:$0xff] }
  0xbb   :  { %1412 = vmatpush1.msra.mxu1 %v591_v55  ;;  %1374 = vmatprep.subr.mxu0 %v456_v56  ;;  %v872_v46 = vld [vmem:[%s11025_s1 + $0x1a58] sm:$0xff]  ;;  %v743_v47 = vld [vmem:[%s11025_s1 + $0x1650] sm:$0xff] }
  0xbc   :  { %1413 = vmatprep.subr.mxu1 %v584_v57  ;;  %1375 = vmatpush2.msra.mxu0 %v455_v58  ;;  %v871_v48 = vld [vmem:[%s11025_s1 + $0x1a50] sm:$0xff]  ;;  %v736_v49 = vld [vmem:[%s11025_s1 + $0x1618] sm:$0xff] }
  0xbd   :  { %1414 = vmatpush1.msra.mxu1 %v583_v59  ;;  %1376 = vmatprep.subr.mxu0 %v448_v60  ;;  %v864_v50 = vld [vmem:[%s11025_s1 + $0x1a18] sm:$0xff]  ;;  %v735_v51 = vld [vmem:[%s11025_s1 + $0x1610] sm:$0xff] }
  0xbe   :  { %1415 = vmatprep.subr.mxu1 %v576_v61  ;;  %1377 = vmatpush2.msra.mxu0 %v447_v62  ;;  %v863_v52 = vld [vmem:[%s11025_s1 + $0x1a10] sm:$0xff]  ;;  %v728_v53 = vld [vmem:[%s11025_s1 + $0x15d8] sm:$0xff] }
  0xbf   :  { %1416 = vmatpush1.msra.mxu1 %v575_v0  ;;  %1378 = vmatprep.subr.mxu0 %v440_v1  ;;  %v856_v54 = vld [vmem:[%s11025_s1 + $0x19d8] sm:$0xff]  ;;  %v727_v55 = vld [vmem:[%s11025_s1 + $0x15d0] sm:$0xff] }
  0xc0   :  { %1417 = vmatprep.subr.mxu1 %v568_v3  ;;  %1379 = vmatpush2.msra.mxu0 %v439_v4  ;;  %v855_v56 = vld [vmem:[%s11025_s1 + $0x19d0] sm:$0xff]  ;;  %v720_v57 = vld [vmem:[%s11025_s1 + $0x1598] sm:$0xff] }
  0xc1   :  { %1418 = vmatpush1.msra.mxu1 %v567_v5  ;;  %1380 = vmatprep.subr.mxu0 %v432_v6  ;;  %v848_v58 = vld [vmem:[%s11025_s1 + $0x1998] sm:$0xff]  ;;  %v719_v59 = vld [vmem:[%s11025_s1 + $0x1590] sm:$0xff] }
  0xc2   :  { %1419 = vmatprep.subr.mxu1 %v560_v7  ;;  %1381 = vmatpush2.msra.mxu0 %v431_v8  ;;  %v847_v60 = vld [vmem:[%s11025_s1 + $0x1990] sm:$0xff]  ;;  %v712_v61 = vld [vmem:[%s11025_s1 + $0x1558] sm:$0xff] }
  0xc3   :  { %1420 = vmatpush1.msra.mxu1 %v559_v10  ;;  %1382 = vmatprep.subr.mxu0 %v424_v13  ;;  %v840_v62 = vld [vmem:[%s11025_s1 + $0x1958] sm:$0xff]  ;;  %v711_v0 = vld [vmem:[%s11025_s1 + $0x1550] sm:$0xff] }
  0xc4   :  { %1421 = vmatprep.subr.mxu1 %v552_v14  ;;  %1383 = vmatpush2.msra.mxu0 %v423_v15  ;;  %v839_v1 = vld [vmem:[%s11025_s1 + $0x1950] sm:$0xff]  ;;  %v704_v3 = vld [vmem:[%s11025_s1 + $0x1518] sm:$0xff] }
  0xc5   :  { %1422 = vmatpush1.msra.mxu1 %v551_v16  ;;  %1384 = vmatprep.subr.mxu0 %v416_v17  ;;  %v832_v4 = vld [vmem:[%s11025_s1 + $0x1918] sm:$0xff]  ;;  %v703_v5 = vld [vmem:[%s11025_s1 + $0x1510] sm:$0xff] }
  0xc6   :  { %1423 = vmatprep.subr.mxu1 %v544_v18  ;;  %1385 = vmatpush2.msra.mxu0 %v415_v19  ;;  %v831_v6 = vld [vmem:[%s11025_s1 + $0x1910] sm:$0xff]  ;;  %v696_v7 = vld [vmem:[%s11025_s1 + $0x14d8] sm:$0xff] }
  0xc7   :  { %1386 = vmatprep.mubr.f32.mxu0 %v6824_v23  ;;  %1424 = vmatpush1.msra.mxu1 %v543_v20  ;;  %v824_v8 = vld [vmem:[%s11025_s1 + $0x18d8] sm:$0xff]  ;;  %v695_v10 = vld [vmem:[%s11025_s1 + $0x14d0] sm:$0xff] }
  0xc8   :  { %1387 = vmatmul.mubr.f32.vlgmr.msra.gmra.mxu0 %v6836_v2  ;;  %1425 = vmatprep.subr.mxu1 %v792_v21  ;;  %v823_v13 = vld [vmem:[%s11025_s1 + $0x18d0] sm:$0xff]  ;;  %v688_v14 = vld [vmem:[%s11025_s1 + $0x1498] sm:$0xff] }
  0xc9   :  { %1464 = vmatprep.subr.mxu0 %v920_v22  ;;  %1426 = vmatpush2.msra.mxu1 %v791_v63  ;;  %v816_v15 = vld [vmem:[%s11025_s1 + $0x1898] sm:$0xff]  ;;  %v687_v16 = vld [vmem:[%s11025_s1 + $0x1490] sm:$0xff] }
  0xca   :  { %1465 = vmatpush1.msra.mxu0 %v919_v24  ;;  %1427 = vmatprep.subr.mxu1 %v784_v25  ;;  %v815_v17 = vld [vmem:[%s11025_s1 + $0x1890] sm:$0xff]  ;;  %v680_v18 = vld [vmem:[%s11025_s1 + $0x1458] sm:$0xff] }
  0xcb   :  { %1466 = vmatprep.subr.mxu0 %v912_v26  ;;  %1428 = vmatpush2.msra.mxu1 %v783_v27  ;;  %v808_v19 = vld [vmem:[%s11025_s1 + $0x1858] sm:$0xff]  ;;  %v679_v20 = vld [vmem:[%s11025_s1 + $0x1450] sm:$0xff]  ;;  %v154_v26 = vld [vmem:[%s11025_s1 + $0x3e8] sm:$0xff] }
  0xcc   :  { %1467 = vmatpush1.msra.mxu0 %v911_v28  ;;  %1429 = vmatprep.subr.mxu1 %v776_v29  ;;  %v807_v21 = vld [vmem:[%s11025_s1 + $0x1850] sm:$0xff]  ;;  %v672_v22 = vld [vmem:[%s11025_s1 + $0x1418] sm:$0xff]  ;;  %v410_v27 = vld [vmem:[%s11025_s1 + $0xbe8] sm:$0xff] }
  0xcd   :  { %1468 = vmatprep.subr.mxu0 %v904_v30  ;;  %1430 = vmatpush2.msra.mxu1 %v775_v31  ;;  %v800_v63 = vld [vmem:[%s11025_s1 + $0x1818] sm:$0xff]  ;;  %v671_v24 = vld [vmem:[%s11025_s1 + $0x1410] sm:$0xff]  ;;  %v153_v28 = vld [vmem:[%s11025_s1 + $0x3e0] sm:$0xff] }
  0xce   :  { %1469 = vmatpush1.msra.mxu0 %v903_v32  ;;  %1431 = vmatprep.subr.mxu1 %v768_v33  ;;  %v799_v25 = vld [vmem:[%s11025_s1 + $0x1810] sm:$0xff]  ;;  %v409_v29 = vld [vmem:[%s11025_s1 + $0xbe0] sm:$0xff]  ;;  %v402_v30 = vld [vmem:[%s11025_s1 + $0xba8] sm:$0xff] }
  0xcf   :  { %1470 = vmatprep.subr.mxu0 %v896_v34  ;;  %1432 = vmatpush2.msra.mxu1 %v767_v35  ;;  %v145_v31 = vld [vmem:[%s11025_s1 + $0x3a0] sm:$0xff]  ;;  %v138_v33 = vld [vmem:[%s11025_s1 + $0x368] sm:$0xff] }
  0xd0   :  { %1471 = vmatpush1.msra.mxu0 %v895_v36  ;;  %1433 = vmatprep.subr.mxu1 %v760_v37  ;;  %v401_v32 = vld [vmem:[%s11025_s1 + $0xba0] sm:$0xff]  ;;  %v394_v34 = vld [vmem:[%s11025_s1 + $0xb68] sm:$0xff] }
  0xd1   :  { %1472 = vmatprep.subr.mxu0 %v888_v38  ;;  %1434 = vmatpush2.msra.mxu1 %v759_v39  ;;  %v137_v35 = vld [vmem:[%s11025_s1 + $0x360] sm:$0xff]  ;;  %v130_v37 = vld [vmem:[%s11025_s1 + $0x328] sm:$0xff] }
  0xd2   :  { %1473 = vmatpush1.msra.mxu0 %v887_v40  ;;  %1435 = vmatprep.subr.mxu1 %v752_v41  ;;  %v393_v36 = vld [vmem:[%s11025_s1 + $0xb60] sm:$0xff]  ;;  %v386_v38 = vld [vmem:[%s11025_s1 + $0xb28] sm:$0xff] }
  0xd3   :  { %1474 = vmatprep.subr.mxu0 %v880_v42  ;;  %1436 = vmatpush2.msra.mxu1 %v751_v43  ;;  %v129_v39 = vld [vmem:[%s11025_s1 + $0x320] sm:$0xff]  ;;  %v122_v41 = vld [vmem:[%s11025_s1 + $0x2e8] sm:$0xff] }
  0xd4   :  { %1475 = vmatpush1.msra.mxu0 %v879_v44  ;;  %1437 = vmatprep.subr.mxu1 %v744_v45  ;;  %v385_v40 = vld [vmem:[%s11025_s1 + $0xb20] sm:$0xff]  ;;  %v378_v42 = vld [vmem:[%s11025_s1 + $0xae8] sm:$0xff] }
  0xd5   :  { %1476 = vmatprep.subr.mxu0 %v872_v46  ;;  %1438 = vmatpush2.msra.mxu1 %v743_v47  ;;  %v121_v43 = vld [vmem:[%s11025_s1 + $0x2e0] sm:$0xff]  ;;  %v114_v45 = vld [vmem:[%s11025_s1 + $0x2a8] sm:$0xff] }
  0xd6   :  { %1477 = vmatpush1.msra.mxu0 %v871_v48  ;;  %1439 = vmatprep.subr.mxu1 %v736_v49  ;;  %v377_v44 = vld [vmem:[%s11025_s1 + $0xae0] sm:$0xff]  ;;  %v370_v46 = vld [vmem:[%s11025_s1 + $0xaa8] sm:$0xff] }
  0xd7   :  { %1478 = vmatprep.subr.mxu0 %v864_v50  ;;  %1440 = vmatpush2.msra.mxu1 %v735_v51  ;;  %v113_v47 = vld [vmem:[%s11025_s1 + $0x2a0] sm:$0xff]  ;;  %v106_v49 = vld [vmem:[%s11025_s1 + $0x268] sm:$0xff] }
  0xd8   :  { %1479 = vmatpush1.msra.mxu0 %v863_v52  ;;  %1441 = vmatprep.subr.mxu1 %v728_v53  ;;  %v369_v48 = vld [vmem:[%s11025_s1 + $0xaa0] sm:$0xff]  ;;  %v362_v50 = vld [vmem:[%s11025_s1 + $0xa68] sm:$0xff] }
  0xd9   :  { %1480 = vmatprep.subr.mxu0 %v856_v54  ;;  %1442 = vmatpush2.msra.mxu1 %v727_v55  ;;  %v105_v51 = vld [vmem:[%s11025_s1 + $0x260] sm:$0xff]  ;;  %v98_v53 = vld [vmem:[%s11025_s1 + $0x228] sm:$0xff] }
  0xda   :  { %1481 = vmatpush1.msra.mxu0 %v855_v56  ;;  %1443 = vmatprep.subr.mxu1 %v720_v57  ;;  %v361_v52 = vld [vmem:[%s11025_s1 + $0xa60] sm:$0xff]  ;;  %v354_v54 = vld [vmem:[%s11025_s1 + $0xa28] sm:$0xff] }
  0xdb   :  { %1482 = vmatprep.subr.mxu0 %v848_v58  ;;  %1444 = vmatpush2.msra.mxu1 %v719_v59  ;;  %v97_v55 = vld [vmem:[%s11025_s1 + $0x220] sm:$0xff]  ;;  %v90_v57 = vld [vmem:[%s11025_s1 + $0x1e8] sm:$0xff] }
  0xdc   :  { %1483 = vmatpush1.msra.mxu0 %v847_v60  ;;  %1445 = vmatprep.subr.mxu1 %v712_v61  ;;  %v353_v56 = vld [vmem:[%s11025_s1 + $0xa20] sm:$0xff]  ;;  %v346_v58 = vld [vmem:[%s11025_s1 + $0x9e8] sm:$0xff] }
  0xdd   :  { %1484 = vmatprep.subr.mxu0 %v840_v62  ;;  %1446 = vmatpush2.msra.mxu1 %v711_v0  ;;  %v89_v59 = vld [vmem:[%s11025_s1 + $0x1e0] sm:$0xff]  ;;  %v82_v61 = vld [vmem:[%s11025_s1 + $0x1a8] sm:$0xff] }
  0xde   :  { %1485 = vmatpush1.msra.mxu0 %v839_v1  ;;  %1447 = vmatprep.subr.mxu1 %v704_v3  ;;  %v345_v60 = vld [vmem:[%s11025_s1 + $0x9e0] sm:$0xff]  ;;  %v338_v62 = vld [vmem:[%s11025_s1 + $0x9a8] sm:$0xff] }
  0xdf   :  { %1486 = vmatprep.subr.mxu0 %v832_v4  ;;  %1448 = vmatpush2.msra.mxu1 %v703_v5  ;;  %v81_v0 = vld [vmem:[%s11025_s1 + $0x1a0] sm:$0xff]  ;;  %v74_v3 = vld [vmem:[%s11025_s1 + $0x168] sm:$0xff] }
  0xe0   :  { %1487 = vmatpush1.msra.mxu0 %v831_v6  ;;  %1449 = vmatprep.subr.mxu1 %v696_v7  ;;  %v337_v1 = vld [vmem:[%s11025_s1 + $0x9a0] sm:$0xff]  ;;  %v330_v4 = vld [vmem:[%s11025_s1 + $0x968] sm:$0xff] }
  0xe1   :  { %1488 = vmatprep.subr.mxu0 %v824_v8  ;;  %1450 = vmatpush2.msra.mxu1 %v695_v10  ;;  %v73_v5 = vld [vmem:[%s11025_s1 + $0x160] sm:$0xff]  ;;  %v66_v7 = vld [vmem:[%s11025_s1 + $0x128] sm:$0xff] }
  0xe2   :  { %1489 = vmatpush1.msra.mxu0 %v823_v13  ;;  %1451 = vmatprep.subr.mxu1 %v688_v14  ;;  %v329_v6 = vld [vmem:[%s11025_s1 + $0x960] sm:$0xff]  ;;  %v322_v8 = vld [vmem:[%s11025_s1 + $0x928] sm:$0xff] }
  0xe3   :  { %1490 = vmatprep.subr.mxu0 %v816_v15  ;;  %1452 = vmatpush2.msra.mxu1 %v687_v16  ;;  %v65_v10 = vld [vmem:[%s11025_s1 + $0x120] sm:$0xff]  ;;  %v58_v14 = vld [vmem:[%s11025_s1 + $0xe8] sm:$0xff] }
  0xe4   :  { %1491 = vmatpush1.msra.mxu0 %v815_v17  ;;  %1453 = vmatprep.subr.mxu1 %v680_v18  ;;  %v321_v13 = vld [vmem:[%s11025_s1 + $0x920] sm:$0xff]  ;;  %v314_v15 = vld [vmem:[%s11025_s1 + $0x8e8] sm:$0xff] }
  0xe5   :  { %1492 = vmatprep.subr.mxu0 %v808_v19  ;;  %1454 = vmatpush2.msra.mxu1 %v679_v20  ;;  %v57_v16 = vld [vmem:[%s11025_s1 + $0xe0] sm:$0xff]  ;;  %v50_v18 = vld [vmem:[%s11025_s1 + $0xa8] sm:$0xff] }
  0xe6   :  { %1493 = vmatpush1.msra.mxu0 %v807_v21  ;;  %1455 = vmatprep.subr.mxu1 %v672_v22  ;;  %v313_v17 = vld [vmem:[%s11025_s1 + $0x8e0] sm:$0xff]  ;;  %v306_v19 = vld [vmem:[%s11025_s1 + $0x8a8] sm:$0xff] }
  0xe7   :  { %1494 = vmatprep.subr.mxu0 %v800_v63  ;;  %1456 = vmatpush2.msra.mxu1 %v671_v24  ;;  %v49_v20 = vld [vmem:[%s11025_s1 + $0xa0] sm:$0xff]  ;;  %v42_v22 = vld [vmem:[%s11025_s1 + $0x68] sm:$0xff] }
  0xe8   :  { %1457 = vmatprep.mubr.f32.mxu1 %v6417_v9  ;;  %1495 = vmatpush1.msra.mxu0 %v799_v25  ;;  %v146_v9 = vld [vmem:[%s11025_s1 + $0x3a8] sm:$0xff]  ;;  %v305_v21 = vld [vmem:[%s11025_s1 + $0x8a0] sm:$0xff] }
  0xe9   :  { %1458 = vmatmul.mubr.f32.vlgmr.msra.gmra.mxu1 %v6425_v12  ;;  %1528 = vmatprep.mubr.f32.mxu0 %v5590_v11  ;;  %v7043_v12 = vld [vmem:[%s11026_s0 + $0x30] sm:$0xff]  ;;  %v298_v63 = vld [vmem:[%s11025_s1 + $0x868] sm:$0xff]  ;;  %v41_v24 = vld [vmem:[%s11025_s1 + $0x60] sm:$0xff] }
  0xea   :  { %1535 = vmatprep.subr.mxu0 %v154_v26  ;;  %1606 = vmatprep.subr.mxu1 %v410_v27  ;;  %v297_v25 = vld [vmem:[%s11025_s1 + $0x860] sm:$0xff]  ;;  %v34_v26 = vld [vmem:[%s11025_s1 + $0x28] sm:$0xff] }
  0xeb   :  { %1529 = vmatmul.mubr.f32.vlgmr.msra.gmra.mxu0 %v7043_v12  ;;  %1607 = vmatpush1.msra.mxu1 %v409_v29  ;;  %v290_v27 = vld [vmem:[%s11025_s1 + $0x828] sm:$0xff]  ;;  %v289_v29 = vld [vmem:[%s11025_s1 + $0x820] sm:$0xff] }
  0xec   :  { %1536 = vmatpush1.msra.mxu0 %v153_v28  ;;  %1608 = vmatprep.subr.mxu1 %v402_v30  ;;  %v33_v28 = vld [vmem:[%s11025_s1 + $0x20] sm:$0xff]  ;;  %v538_v30 = vld [vmem:[%s11025_s1 + $0xfe8] sm:$0xff] }
  0xed   :  { %1537 = vmatprep.subr.mxu0 %v146_v9  ;;  %1609 = vmatpush1.msra.mxu1 %v401_v32  ;;  %v282_v9 = vld [vmem:[%s11025_s1 + $0x7e8] sm:$0xff]  ;;  %v537_v32 = vld [vmem:[%s11025_s1 + $0xfe0] sm:$0xff] }
  0xee   :  { %1538 = vmatpush1.msra.mxu0 %v145_v31  ;;  %1610 = vmatprep.subr.mxu1 %v394_v34  ;;  %v281_v31 = vld [vmem:[%s11025_s1 + $0x7e0] sm:$0xff]  ;;  %v530_v34 = vld [vmem:[%s11025_s1 + $0xfa8] sm:$0xff] }
  0xef   :  { %1539 = vmatprep.subr.mxu0 %v138_v33  ;;  %1611 = vmatpush1.msra.mxu1 %v393_v36  ;;  %v274_v33 = vld [vmem:[%s11025_s1 + $0x7a8] sm:$0xff]  ;;  %v529_v36 = vld [vmem:[%s11025_s1 + $0xfa0] sm:$0xff] }
  0xf0   :  { %1540 = vmatpush1.msra.mxu0 %v137_v35  ;;  %1612 = vmatprep.subr.mxu1 %v386_v38  ;;  %v273_v35 = vld [vmem:[%s11025_s1 + $0x7a0] sm:$0xff]  ;;  %v522_v38 = vld [vmem:[%s11025_s1 + $0xf68] sm:$0xff] }
  0xf1   :  { %1541 = vmatprep.subr.mxu0 %v130_v37  ;;  %1613 = vmatpush1.msra.mxu1 %v385_v40  ;;  %v266_v37 = vld [vmem:[%s11025_s1 + $0x768] sm:$0xff]  ;;  %v521_v40 = vld [vmem:[%s11025_s1 + $0xf60] sm:$0xff] }
  0xf2   :  { %1542 = vmatpush1.msra.mxu0 %v129_v39  ;;  %1614 = vmatprep.subr.mxu1 %v378_v42  ;;  %v265_v39 = vld [vmem:[%s11025_s1 + $0x760] sm:$0xff]  ;;  %v514_v42 = vld [vmem:[%s11025_s1 + $0xf28] sm:$0xff] }
  0xf3   :  { %1543 = vmatprep.subr.mxu0 %v122_v41  ;;  %1615 = vmatpush1.msra.mxu1 %v377_v44  ;;  %v258_v41 = vld [vmem:[%s11025_s1 + $0x728] sm:$0xff]  ;;  %v513_v44 = vld [vmem:[%s11025_s1 + $0xf20] sm:$0xff] }
  0xf4   :  { %1544 = vmatpush1.msra.mxu0 %v121_v43  ;;  %1616 = vmatprep.subr.mxu1 %v370_v46  ;;  %v257_v43 = vld [vmem:[%s11025_s1 + $0x720] sm:$0xff]  ;;  %v506_v46 = vld [vmem:[%s11025_s1 + $0xee8] sm:$0xff] }
  0xf5   :  { %1545 = vmatprep.subr.mxu0 %v114_v45  ;;  %1617 = vmatpush1.msra.mxu1 %v369_v48  ;;  %v250_v45 = vld [vmem:[%s11025_s1 + $0x6e8] sm:$0xff]  ;;  %v505_v48 = vld [vmem:[%s11025_s1 + $0xee0] sm:$0xff] }
  0xf6   :  { %1546 = vmatpush1.msra.mxu0 %v113_v47  ;;  %1618 = vmatprep.subr.mxu1 %v362_v50  ;;  %v249_v47 = vld [vmem:[%s11025_s1 + $0x6e0] sm:$0xff]  ;;  %v498_v50 = vld [vmem:[%s11025_s1 + $0xea8] sm:$0xff] }
  0xf7   :  { %1547 = vmatprep.subr.mxu0 %v106_v49  ;;  %1619 = vmatpush1.msra.mxu1 %v361_v52  ;;  %v242_v49 = vld [vmem:[%s11025_s1 + $0x6a8] sm:$0xff]  ;;  %v497_v52 = vld [vmem:[%s11025_s1 + $0xea0] sm:$0xff] }
  0xf8   :  { %1548 = vmatpush1.msra.mxu0 %v105_v51  ;;  %1620 = vmatprep.subr.mxu1 %v354_v54  ;;  %v241_v51 = vld [vmem:[%s11025_s1 + $0x6a0] sm:$0xff]  ;;  %v490_v54 = vld [vmem:[%s11025_s1 + $0xe68] sm:$0xff] }
  0xf9   :  { %1549 = vmatprep.subr.mxu0 %v98_v53  ;;  %1621 = vmatpush1.msra.mxu1 %v353_v56  ;;  %v234_v53 = vld [vmem:[%s11025_s1 + $0x668] sm:$0xff]  ;;  %v489_v56 = vld [vmem:[%s11025_s1 + $0xe60] sm:$0xff] }
  0xfa   :  { %1550 = vmatpush1.msra.mxu0 %v97_v55  ;;  %1622 = vmatprep.subr.mxu1 %v346_v58  ;;  %v233_v55 = vld [vmem:[%s11025_s1 + $0x660] sm:$0xff]  ;;  %v482_v58 = vld [vmem:[%s11025_s1 + $0xe28] sm:$0xff] }
  0xfb   :  { %1551 = vmatprep.subr.mxu0 %v90_v57  ;;  %1623 = vmatpush1.msra.mxu1 %v345_v60  ;;  %v226_v57 = vld [vmem:[%s11025_s1 + $0x628] sm:$0xff]  ;;  %v481_v60 = vld [vmem:[%s11025_s1 + $0xe20] sm:$0xff] }
  0xfc   :  { %1552 = vmatpush1.msra.mxu0 %v89_v59  ;;  %1624 = vmatprep.subr.mxu1 %v338_v62  ;;  %v225_v59 = vld [vmem:[%s11025_s1 + $0x620] sm:$0xff]  ;;  %v474_v62 = vld [vmem:[%s11025_s1 + $0xde8] sm:$0xff] }
  0xfd   :  { %1553 = vmatprep.subr.mxu0 %v82_v61  ;;  %1625 = vmatpush1.msra.mxu1 %v337_v1  ;;  %v218_v61 = vld [vmem:[%s11025_s1 + $0x5e8] sm:$0xff]  ;;  %v473_v1 = vld [vmem:[%s11025_s1 + $0xde0] sm:$0xff] }
  0xfe   :  { %1554 = vmatpush1.msra.mxu0 %v81_v0  ;;  %1626 = vmatprep.subr.mxu1 %v330_v4  ;;  %v217_v0 = vld [vmem:[%s11025_s1 + $0x5e0] sm:$0xff]  ;;  %v466_v4 = vld [vmem:[%s11025_s1 + $0xda8] sm:$0xff] }
  0xff   :  { %1555 = vmatprep.subr.mxu0 %v74_v3  ;;  %1627 = vmatpush1.msra.mxu1 %v329_v6  ;;  %v210_v3 = vld [vmem:[%s11025_s1 + $0x5a8] sm:$0xff]  ;;  %v465_v6 = vld [vmem:[%s11025_s1 + $0xda0] sm:$0xff] }
 0x100   :  { %1556 = vmatpush1.msra.mxu0 %v73_v5  ;;  %1628 = vmatprep.subr.mxu1 %v322_v8  ;;  %v209_v5 = vld [vmem:[%s11025_s1 + $0x5a0] sm:$0xff]  ;;  %v458_v8 = vld [vmem:[%s11025_s1 + $0xd68] sm:$0xff] }
 0x101   :  { %1557 = vmatprep.subr.mxu0 %v66_v7  ;;  %1629 = vmatpush1.msra.mxu1 %v321_v13  ;;  %v202_v7 = vld [vmem:[%s11025_s1 + $0x568] sm:$0xff]  ;;  %v457_v13 = vld [vmem:[%s11025_s1 + $0xd60] sm:$0xff] }
 0x102   :  { %1558 = vmatpush1.msra.mxu0 %v65_v10  ;;  %1630 = vmatprep.subr.mxu1 %v314_v15  ;;  %v201_v10 = vld [vmem:[%s11025_s1 + $0x560] sm:$0xff]  ;;  %v450_v15 = vld [vmem:[%s11025_s1 + $0xd28] sm:$0xff] }
 0x103   :  { %1559 = vmatprep.subr.mxu0 %v58_v14  ;;  %1631 = vmatpush1.msra.mxu1 %v313_v17  ;;  %v194_v14 = vld [vmem:[%s11025_s1 + $0x528] sm:$0xff]  ;;  %v449_v17 = vld [vmem:[%s11025_s1 + $0xd20] sm:$0xff] }
 0x104   :  { %1560 = vmatpush1.msra.mxu0 %v57_v16  ;;  %1632 = vmatprep.subr.mxu1 %v306_v19  ;;  %v193_v16 = vld [vmem:[%s11025_s1 + $0x520] sm:$0xff]  ;;  %v442_v19 = vld [vmem:[%s11025_s1 + $0xce8] sm:$0xff] }
 0x105   :  { %1561 = vmatprep.subr.mxu0 %v50_v18  ;;  %1633 = vmatpush1.msra.mxu1 %v305_v21  ;;  %v186_v18 = vld [vmem:[%s11025_s1 + $0x4e8] sm:$0xff]  ;;  %v441_v21 = vld [vmem:[%s11025_s1 + $0xce0] sm:$0xff] }
 0x106   :  { %1562 = vmatpush1.msra.mxu0 %v49_v20  ;;  %1634 = vmatprep.subr.mxu1 %v298_v63  ;;  %v185_v20 = vld [vmem:[%s11025_s1 + $0x4e0] sm:$0xff]  ;;  %v434_v63 = vld [vmem:[%s11025_s1 + $0xca8] sm:$0xff] }
 0x107   :  { %1563 = vmatprep.subr.mxu0 %v42_v22  ;;  %1635 = vmatpush1.msra.mxu1 %v297_v25  ;;  %v178_v22 = vld [vmem:[%s11025_s1 + $0x4a8] sm:$0xff]  ;;  %v433_v25 = vld [vmem:[%s11025_s1 + $0xca0] sm:$0xff] }
 0x108   :  { %1564 = vmatpush1.msra.mxu0 %v41_v24  ;;  %1636 = vmatprep.subr.mxu1 %v290_v27  ;;  %v177_v24 = vld [vmem:[%s11025_s1 + $0x4a0] sm:$0xff]  ;;  %v426_v27 = vld [vmem:[%s11025_s1 + $0xc68] sm:$0xff] }
 0x109   :  { %1565 = vmatprep.subr.mxu0 %v34_v26  ;;  %1637 = vmatpush1.msra.mxu1 %v289_v29  ;;  %v170_v26 = vld [vmem:[%s11025_s1 + $0x468] sm:$0xff]  ;;  %v425_v29 = vld [vmem:[%s11025_s1 + $0xc60] sm:$0xff] }
 0x10a   :  { %1566 = vmatpush1.msra.mxu0 %v33_v28  ;;  %1638 = vmatprep.subr.mxu1 %v538_v30  ;;  %v169_v28 = vld [vmem:[%s11025_s1 + $0x460] sm:$0xff]  ;;  %v418_v30 = vld [vmem:[%s11025_s1 + $0xc28] sm:$0xff] }
 0x10b   :  { %1567 = vmatprep.subr.mxu0 %v282_v9  ;;  %1639 = vmatpush2.msra.mxu1 %v537_v32  ;;  %v162_v9 = vld [vmem:[%s11025_s1 + $0x428] sm:$0xff]  ;;  %v417_v32 = vld [vmem:[%s11025_s1 + $0xc20] sm:$0xff] }
 0x10c   :  { %1568 = vmatpush2.msra.mxu0 %v281_v31  ;;  %1640 = vmatprep.subr.mxu1 %v530_v34  ;;  %v161_v31 = vld [vmem:[%s11025_s1 + $0x420] sm:$0xff]  ;;  %v666_v34 = vld [vmem:[%s11025_s1 + $0x13e8] sm:$0xff] }
 0x10d   :  { %1569 = vmatprep.subr.mxu0 %v274_v33  ;;  %1641 = vmatpush2.msra.mxu1 %v529_v36  ;;  %v7415_v33 = vld [vmem:[%s11026_s0 + $0x8] sm:$0xff]  ;;  %v665_v36 = vld [vmem:[%s11025_s1 + $0x13e0] sm:$0xff] }
 0x10e   :  { %1570 = vmatpush2.msra.mxu0 %v273_v35  ;;  %1642 = vmatprep.subr.mxu1 %v522_v38  ;;  %v922_v35 = vld [vmem:[%s11025_s1 + $0x1be8] sm:$0xff]  ;;  %v7434_v38 = vld [vmem:[%s11026_s0] sm:$0xff] }
 0x10f   :  { %1571 = vmatprep.subr.mxu0 %v266_v37  ;;  %1643 = vmatpush2.msra.mxu1 %v521_v40  ;;  %v921_v37 = vld [vmem:[%s11025_s1 + $0x1be0] sm:$0xff] }
 0x110   :  { %1572 = vmatpush2.msra.mxu0 %v265_v39  ;;  %1644 = vmatprep.subr.mxu1 %v514_v42  ;;  %v914_v39 = vld [vmem:[%s11025_s1 + $0x1ba8] sm:$0xff]  ;;  %v657_v40 = vld [vmem:[%s11025_s1 + $0x13a0] sm:$0xff] }
 0x111   :  { %1573 = vmatprep.subr.mxu0 %v258_v41  ;;  %1645 = vmatpush2.msra.mxu1 %v513_v44  ;;  %v913_v41 = vld [vmem:[%s11025_s1 + $0x1ba0] sm:$0xff]  ;;  %v906_v42 = vld [vmem:[%s11025_s1 + $0x1b68] sm:$0xff] }
 0x112   :  { %1574 = vmatpush2.msra.mxu0 %v257_v43  ;;  %1646 = vmatprep.subr.mxu1 %v506_v46  ;;  %v649_v43 = vld [vmem:[%s11025_s1 + $0x1360] sm:$0xff]  ;;  %v898_v46 = vld [vmem:[%s11025_s1 + $0x1b28] sm:$0xff] }
 0x113   :  { %1575 = vmatprep.subr.mxu0 %v250_v45  ;;  %1647 = vmatpush2.msra.mxu1 %v505_v48  ;;  %v905_v44 = vld [vmem:[%s11025_s1 + $0x1b60] sm:$0xff]  ;;  %v642_v45 = vld [vmem:[%s11025_s1 + $0x1328] sm:$0xff] }
 0x114   :  { %1576 = vmatpush2.msra.mxu0 %v249_v47  ;;  %1648 = vmatprep.subr.mxu1 %v498_v50  ;;  %v641_v47 = vld [vmem:[%s11025_s1 + $0x1320] sm:$0xff]  ;;  %v890_v50 = vld [vmem:[%s11025_s1 + $0x1ae8] sm:$0xff] }
 0x115   :  { %1577 = vmatprep.subr.mxu0 %v242_v49  ;;  %1649 = vmatpush2.msra.mxu1 %v497_v52  ;;  %v897_v48 = vld [vmem:[%s11025_s1 + $0x1b20] sm:$0xff]  ;;  %v634_v49 = vld [vmem:[%s11025_s1 + $0x12e8] sm:$0xff] }
 0x116   :  { %1578 = vmatpush2.msra.mxu0 %v241_v51  ;;  %1650 = vmatprep.subr.mxu1 %v490_v54  ;;  %v633_v51 = vld [vmem:[%s11025_s1 + $0x12e0] sm:$0xff]  ;;  %v882_v54 = vld [vmem:[%s11025_s1 + $0x1aa8] sm:$0xff] }
 0x117   :  { %1579 = vmatprep.subr.mxu0 %v234_v53  ;;  %1651 = vmatpush2.msra.mxu1 %v489_v56  ;;  %v889_v52 = vld [vmem:[%s11025_s1 + $0x1ae0] sm:$0xff]  ;;  %v626_v53 = vld [vmem:[%s11025_s1 + $0x12a8] sm:$0xff] }
 0x118   :  { %1580 = vmatpush2.msra.mxu0 %v233_v55  ;;  %1652 = vmatprep.subr.mxu1 %v482_v58  ;;  %v927_v55 = vlaneseq  ;;  %v625_v56 = vld [vmem:[%s11025_s1 + $0x12a0] sm:$0xff]  ;;  %v618_v58 = vld [vmem:[%s11025_s1 + $0x1268] sm:$0xff] }
 0x119   :  { %1581 = vmatprep.subr.mxu0 %v226_v57  ;;  %1653 = vmatpush2.msra.mxu1 %v481_v60  ;;  %v881_v57 = vld [vmem:[%s11025_s1 + $0x1aa0] sm:$0xff] }
 0x11a   :  { %1582 = vmatpush2.msra.mxu0 %v225_v59  ;;  %1654 = vmatprep.subr.mxu1 %v474_v62  ;;  %v874_v59 = vld [vmem:[%s11025_s1 + $0x1a68] sm:$0xff]  ;;  %v617_v60 = vld [vmem:[%s11025_s1 + $0x1260] sm:$0xff] }
 0x11b   :  { %1583 = vmatprep.subr.mxu0 %v218_v61  ;;  %1655 = vmatpush2.msra.mxu1 %v473_v1  ;;  %v873_v61 = vld [vmem:[%s11025_s1 + $0x1a60] sm:$0xff]  ;;  %v610_v62 = vld [vmem:[%s11025_s1 + $0x1228] sm:$0xff]  ;;  %v7516_v1 = vshrl.u32 %v927_v55, 7 }
 0x11c   :  { %1584 = vmatpush2.msra.mxu0 %v217_v0  ;;  %1656 = vmatprep.subr.mxu1 %v466_v4  ;;  %v866_v0 = vld [vmem:[%s11025_s1 + $0x1a28] sm:$0xff]  ;;  %v865_v4 = vld [vmem:[%s11025_s1 + $0x1a20] sm:$0xff] }
 0x11d   :  { %1585 = vmatprep.subr.mxu0 %v210_v3  ;;  %1657 = vmatpush2.msra.mxu1 %v465_v6  ;;  %v609_v3 = vld [vmem:[%s11025_s1 + $0x1220] sm:$0xff]  ;;  %v858_v6 = vld [vmem:[%s11025_s1 + $0x19e8] sm:$0xff] }
 0x11e   :  { %1586 = vmatpush2.msra.mxu0 %v209_v5  ;;  %1658 = vmatprep.subr.mxu1 %v458_v8  ;;  %v602_v5 = vld [vmem:[%s11025_s1 + $0x11e8] sm:$0xff]  ;;  %v601_v8 = vld [vmem:[%s11025_s1 + $0x11e0] sm:$0xff] }
 0x11f   :  { %1587 = vmatprep.subr.mxu0 %v202_v7  ;;  %1659 = vmatpush2.msra.mxu1 %v457_v13  ;;  %v933_v7 = vsub.s32 1, %v7516_v1  ;;  %v1033_v13 = vpop.f32.mrf.mxu0 }
 0x120   :  { %1588 = vmatpush2.msra.mxu0 %v201_v10  ;;  %1660 = vmatprep.subr.mxu1 %v450_v15  ;;  %v857_v10 = vld [vmem:[%s11025_s1 + $0x19e0] sm:$0xff]  ;;  %v850_v15 = vld [vmem:[%s11025_s1 + $0x19a8] sm:$0xff] }
 0x121   :  { %1589 = vmatprep.subr.mxu0 %v194_v14  ;;  %1661 = vmatpush2.msra.mxu1 %v449_v17  ;;  %v594_v14 = vld [vmem:[%s11025_s1 + $0x11a8] sm:$0xff]  ;;  %v849_v17 = vld [vmem:[%s11025_s1 + $0x19a0] sm:$0xff] }
 0x122   :  { %1590 = vmatpush2.msra.mxu0 %v193_v16  ;;  %1662 = vmatprep.subr.mxu1 %v442_v19  ;;  %v593_v16 = vld [vmem:[%s11025_s1 + $0x11a0] sm:$0xff]  ;;  %v929_v19 = vsub.s32 0, %v7516_v1 }
 0x123   :  { %1591 = vmatprep.subr.mxu0 %v186_v18  ;;  %1663 = vmatpush2.msra.mxu1 %v441_v21  ;;  %v7552_v18 = vld [vmem:[%s11027_s2] sm:$0xff]  ;;  %v842_v21 = vld [vmem:[%s11025_s1 + $0x1968] sm:$0xff] }
 0x124   :  { %1592 = vmatpush2.msra.mxu0 %v185_v20  ;;  %1664 = vmatprep.subr.mxu1 %v434_v63  ;;  %v586_v20 = vld [vmem:[%s11025_s1 + $0x1168] sm:$0xff]  ;;  %v585_v63 = vld [vmem:[%s11025_s1 + $0x1160] sm:$0xff] }
 0x125   :  { %1593 = vmatprep.subr.mxu0 %v178_v22  ;;  %1665 = vmatpush2.msra.mxu1 %v433_v25  ;;  %v934_v22 = vrot.slane %v7552_v18, %v933_v7  ;;  %v1035_v25 = vpop.f32.mrf.mxu0  ;;  %v140_v7 = vld [vmem:[%s11025_s1 + $0x378] sm:$0xff] }
 0x126   :  { %1594 = vmatpush2.msra.mxu0 %v177_v24  ;;  %1666 = vmatprep.subr.mxu1 %v426_v27  ;;  %v841_v24 = vld [vmem:[%s11025_s1 + $0x1960] sm:$0xff]  ;;  %v834_v27 = vld [vmem:[%s11025_s1 + $0x1928] sm:$0xff] }
 0x127   :  { %1595 = vmatprep.subr.mxu0 %v170_v26  ;;  %1667 = vmatpush2.msra.mxu1 %v425_v29  ;;  %v578_v26 = vld [vmem:[%s11025_s1 + $0x1128] sm:$0xff]  ;;  %v833_v29 = vld [vmem:[%s11025_s1 + $0x1920] sm:$0xff] }
 0x128   :  { %1596 = vmatpush2.msra.mxu0 %v169_v28  ;;  %1668 = vmatprep.subr.mxu1 %v418_v30  ;;  %v577_v28 = vld [vmem:[%s11025_s1 + $0x1120] sm:$0xff]  ;;  %v1104_v30 = vpop.f32.mrf.mxu1 }
 0x129   :  { %1597 = vmatprep.subr.mxu0 %v162_v9  ;;  %1599 = vmatprep.mubr.f32.mxu0 %v7415_v33  ;;  %v930_v9 = vrot.slane %v7552_v18, %v929_v19  ;;  %v762_v19 = vld [vmem:[%s11025_s1 + $0x16e8] sm:$0xff] }
 0x12a   :  { %1598 = vmatpush2.msra.mxu0 %v161_v31  ;;  %1669 = vmatpush2.msra.mxu1 %v417_v32  ;;  %v570_v31 = vld [vmem:[%s11025_s1 + $0x10e8] sm:$0xff] }
 0x12b   :  { %1670 = vmatprep.mubr.f32.mxu1 %v6824_v23  ;;  %1600 = vmatmul.mubr.f32.vlgmr.msra.gmra.mxu0 %v7434_v38  ;;  %v658_v23 = vld [vmem:[%s11025_s1 + $0x13a8] sm:$0xff] }
 0x12c   :  { %1671 = vmatmul.mubr.f32.vlgmr.msra.gmra.mxu1 %v6836_v2  ;;  %1677 = vmatprep.subr.mxu0 %v666_v34  ;;  %v650_v2 = vld [vmem:[%s11025_s1 + $0x1368] sm:$0xff]  ;;  %v1036_v34 = vadd.f32 %v1035_v25, %v934_v22  ;;  %v123_v22 = vld [vmem:[%s11025_s1 + $0x2f0] sm:$0xff]  ;;  %v116_v25 = vld [vmem:[%s11025_s1 + $0x2b8] sm:$0xff] }
 0x12d   :  { %1748 = vmatprep.subr.mxu1 %v922_v35  ;;  %1678 = vmatpush1.msra.mxu0 %v665_v36  ;;  %v826_v32 = vld [vmem:[%s11025_s1 + $0x18e8] sm:$0xff]  ;;  %v569_v35 = vld [vmem:[%s11025_s1 + $0x10e0] sm:$0xff] }
 0x12e   :  { %1749 = vmatpush1.msra.mxu1 %v921_v37  ;;  %1679 = vmatprep.subr.mxu0 %v658_v23  ;;  %v825_v36 = vld [vmem:[%s11025_s1 + $0x18e0] sm:$0xff]  ;;  %v562_v37 = vld [vmem:[%s11025_s1 + $0x10a8] sm:$0xff] }
 0x12f   :  { %1750 = vmatprep.subr.mxu1 %v914_v39  ;;  %1680 = vmatpush1.msra.mxu0 %v657_v40  ;;  %v818_v23 = vld [vmem:[%s11025_s1 + $0x18a8] sm:$0xff]  ;;  %v561_v39 = vld [vmem:[%s11025_s1 + $0x10a0] sm:$0xff] }
 0x130   :  { %1751 = vmatpush1.msra.mxu1 %v913_v41  ;;  %1681 = vmatprep.subr.mxu0 %v650_v2  ;;  %v817_v40 = vld [vmem:[%s11025_s1 + $0x18a0] sm:$0xff]  ;;  %v1034_v41 = vadd.f32 %v1033_v13, %v930_v9  ;;  %v1106_v2 = vpop.f32.mrf.mxu1  ;;  %v770_v13 = vld [vmem:[%s11025_s1 + $0x1728] sm:$0xff]  ;;  %v108_v9 = vld [vmem:[%s11025_s1 + $0x278] sm:$0xff] }
 0x131   :  { %1752 = vmatprep.subr.mxu1 %v906_v42  ;;  %1682 = vmatpush1.msra.mxu0 %v649_v43  ;;  %v554_v42 = vld [vmem:[%s11025_s1 + $0x1068] sm:$0xff] }
 0x132   :  { %1753 = vmatpush1.msra.mxu1 %v905_v44  ;;  %1683 = vmatprep.subr.mxu0 %v642_v45  ;;  %v810_v43 = vld [vmem:[%s11025_s1 + $0x1868] sm:$0xff]  ;;  %v1107_v45 = vadd.f32 %v1106_v2, %v1036_v34  ;;  %v1105_v55 = vadd.f32 %v1104_v30, %v1034_v41  ;;  %v745_v30 = vld [vmem:[%s11025_s1 + $0x1660] sm:$0xff]  ;;  %v92_v41 = vld [vmem:[%s11025_s1 + $0x1f8] sm:$0xff] }
 0x133   :  { %1754 = vmatprep.subr.mxu1 %v898_v46  ;;  %1684 = vmatpush1.msra.mxu0 %v641_v47  ;;  %v553_v46 = vld [vmem:[%s11025_s1 + $0x1060] sm:$0xff] }
 0x134   :  { %1755 = vmatpush1.msra.mxu1 %v897_v48  ;;  %1685 = vmatprep.subr.mxu0 %v634_v49  ;;  %v809_v47 = vld [vmem:[%s11025_s1 + $0x1860] sm:$0xff]  ;;  %v1246_v48 = vpop.f32.mrf.mxu1  ;;  %v546_v49 = vld [vmem:[%s11025_s1 + $0x1028] sm:$0xff] }
 0x135   :  { %1756 = vmatprep.subr.mxu1 %v890_v50  ;;  %1686 = vmatpush1.msra.mxu0 %v633_v51  ;;  %v802_v50 = vld [vmem:[%s11025_s1 + $0x1828] sm:$0xff] }
 0x136   :  { %1757 = vmatpush1.msra.mxu1 %v889_v52  ;;  %1687 = vmatprep.subr.mxu0 %v626_v53  ;;  %v545_v52 = vld [vmem:[%s11025_s1 + $0x1020] sm:$0xff] }
 0x137   :  { %1758 = vmatprep.subr.mxu1 %v882_v54  ;;  %1688 = vmatpush1.msra.mxu0 %v625_v56  ;;  %v801_v53 = vld [vmem:[%s11025_s1 + $0x1820] sm:$0xff]  ;;  %v794_v56 = vld [vmem:[%s11025_s1 + $0x17e8] sm:$0xff] }
 0x138   :  { %1759 = vmatpush1.msra.mxu1 %v881_v57  ;;  %1689 = vmatprep.subr.mxu0 %v618_v58  ;;  %v156_v57 = vld [vmem:[%s11025_s1 + $0x3f8] sm:$0xff]  ;;  %v1248_v58 = vpop.f32.mrf.mxu1 }
 0x139   :  { %1760 = vmatprep.subr.mxu1 %v874_v59  ;;  %1690 = vmatpush1.msra.mxu0 %v617_v60  ;;  %v793_v60 = vld [vmem:[%s11025_s1 + $0x17e0] sm:$0xff] }
 0x13a   :  { %1761 = vmatpush1.msra.mxu1 %v873_v61  ;;  %1691 = vmatprep.subr.mxu0 %v610_v62  ;;  %v155_v61 = vld [vmem:[%s11025_s1 + $0x3f0] sm:$0xff] }
 0x13b   :  { %1762 = vmatprep.subr.mxu1 %v866_v0  ;;  %1692 = vmatpush1.msra.mxu0 %v609_v3  ;;  %v786_v0 = vld [vmem:[%s11025_s1 + $0x17a8] sm:$0xff]  ;;  %v148_v3 = vld [vmem:[%s11025_s1 + $0x3b8] sm:$0xff] }
 0x13c   :  { %1763 = vmatpush1.msra.mxu1 %v865_v4  ;;  %1693 = vmatprep.subr.mxu0 %v602_v5  ;;  %v785_v4 = vld [vmem:[%s11025_s1 + $0x17a0] sm:$0xff]  ;;  %v147_v5 = vld [vmem:[%s11025_s1 + $0x3b0] sm:$0xff] }
 0x13d   :  { %1764 = vmatprep.subr.mxu1 %v858_v6  ;;  %1694 = vmatpush1.msra.mxu0 %v601_v8  ;;  %v778_v6 = vld [vmem:[%s11025_s1 + $0x1768] sm:$0xff]  ;;  %v777_v8 = vld [vmem:[%s11025_s1 + $0x1760] sm:$0xff] }
 0x13e   :  { %1765 = vmatpush1.msra.mxu1 %v857_v10  ;;  %1695 = vmatprep.subr.mxu0 %v594_v14  ;;  %v139_v10 = vld [vmem:[%s11025_s1 + $0x370] sm:$0xff]  ;;  %v132_v14 = vld [vmem:[%s11025_s1 + $0x338] sm:$0xff] }
 0x13f   :  { %1766 = vmatprep.subr.mxu1 %v850_v15  ;;  %1696 = vmatpush1.msra.mxu0 %v593_v16  ;;  %v769_v16 = vld [vmem:[%s11025_s1 + $0x1720] sm:$0xff] }
 0x140   :  { %1767 = vmatpush1.msra.mxu1 %v849_v17  ;;  %1697 = vmatprep.subr.mxu0 %v586_v20  ;;  %v131_v17 = vld [vmem:[%s11025_s1 + $0x330] sm:$0xff]  ;;  %v124_v20 = vld [vmem:[%s11025_s1 + $0x2f8] sm:$0xff] }
 0x141   :  { %1768 = vmatprep.subr.mxu1 %v842_v21  ;;  %1698 = vmatpush1.msra.mxu0 %v585_v63  ;;  %v761_v21 = vld [vmem:[%s11025_s1 + $0x16e0] sm:$0xff] }
 0x142   :  { %1769 = vmatpush1.msra.mxu1 %v841_v24  ;;  %1699 = vmatprep.subr.mxu0 %v578_v26  ;;  %v754_v24 = vld [vmem:[%s11025_s1 + $0x16a8] sm:$0xff] }
 0x143   :  { %1770 = vmatprep.subr.mxu1 %v834_v27  ;;  %1700 = vmatpush1.msra.mxu0 %v577_v28  ;;  %v753_v27 = vld [vmem:[%s11025_s1 + $0x16a0] sm:$0xff]  ;;  %v115_v28 = vld [vmem:[%s11025_s1 + $0x2b0] sm:$0xff] }
 0x144   :  { %1771 = vmatpush1.msra.mxu1 %v833_v29  ;;  %1701 = vmatprep.subr.mxu0 %v570_v31  ;;  %v746_v29 = vld [vmem:[%s11025_s1 + $0x1668] sm:$0xff]  ;;  %v107_v31 = vld [vmem:[%s11025_s1 + $0x270] sm:$0xff] }
 0x145   :  { %1772 = vmatprep.subr.mxu1 %v826_v32  ;;  %1702 = vmatpush1.msra.mxu0 %v569_v35  ;;  %v738_v35 = vld [vmem:[%s11025_s1 + $0x1628] sm:$0xff] }
 0x146   :  { %1773 = vmatpush1.msra.mxu1 %v825_v36  ;;  %v1175_v44 = vpop.f32.mrf.mxu0  ;;  %1703 = vmatprep.subr.mxu0 %v562_v37  ;;  %v100_v36 = vld [vmem:[%s11025_s1 + $0x238] sm:$0xff] }
 0x147   :  { %1774 = vmatprep.subr.mxu1 %v818_v23  ;;  %1704 = vmatpush1.msra.mxu0 %v561_v39  ;;  %v1176_v59 = vadd.f32 %v1175_v44, %v1105_v55  ;;  %v737_v23 = vld [vmem:[%s11025_s1 + $0x1620] sm:$0xff]  ;;  %v99_v39 = vld [vmem:[%s11025_s1 + $0x230] sm:$0xff]  ;;  %v706_v55 = vld [vmem:[%s11025_s1 + $0x1528] sm:$0xff] }
 0x148   :  { %1775 = vmatpush1.msra.mxu1 %v817_v40  ;;  %v1177_v51 = vpop.f32.mrf.mxu0  ;;  %1705 = vmatprep.subr.mxu0 %v554_v42  ;;  %v730_v40 = vld [vmem:[%s11025_s1 + $0x15e8] sm:$0xff]  ;;  %v729_v42 = vld [vmem:[%s11025_s1 + $0x15e0] sm:$0xff] }
 0x149   :  { %1776 = vmatprep.subr.mxu1 %v810_v43  ;;  %v1178_v54 = vadd.f32 %v1177_v51, %v1107_v45  ;;  %1706 = vmatpush1.msra.mxu0 %v553_v46  ;;  %v91_v43 = vld [vmem:[%s11025_s1 + $0x1f0] sm:$0xff]  ;;  %v722_v45 = vld [vmem:[%s11025_s1 + $0x15a8] sm:$0xff]  ;;  %v84_v46 = vld [vmem:[%s11025_s1 + $0x1b8] sm:$0xff] }
 0x14a   :  { %1777 = vmatpush1.msra.mxu1 %v809_v47  ;;  %1707 = vmatprep.subr.mxu0 %v546_v49  ;;  %v83_v49 = vld [vmem:[%s11025_s1 + $0x1b0] sm:$0xff]  ;;  %v76_v51 = vld [vmem:[%s11025_s1 + $0x178] sm:$0xff] }
 0x14b   :  { %1778 = vmatprep.subr.mxu1 %v802_v50  ;;  %1708 = vmatpush1.msra.mxu0 %v545_v52  ;;  %v7642_v62 = vadd.f32 %v1248_v58, %v1178_v54  ;;  %v714_v50 = vld [vmem:[%s11025_s1 + $0x1568] sm:$0xff]  ;;  %v713_v52 = vld [vmem:[%s11025_s1 + $0x1560] sm:$0xff] }
 0x14c   :  { %1779 = vmatpush1.msra.mxu1 %v801_v53  ;;  %1812 = vmatprep.mubr.f32.mxu1 %v5590_v11  ;;  %v75_v53 = vld [vmem:[%s11025_s1 + $0x170] sm:$0xff]  ;;  %v705_v58 = vld [vmem:[%s11025_s1 + $0x1520] sm:$0xff] }
 0x14d   :  { %1709 = vmatprep.subr.mxu0 %v794_v56  ;;  %1813 = vmatmul.mubr.f32.vlgmr.msra.gmra.mxu1 %v7043_v12  ;;  %v7663_v12 = vadd.f32 %v1246_v48, %v1176_v59  ;;  %v2142_v15 = vmul.f32 0.95, %v7642_v62  ;;  %vm2123_vm0 = vcmp.gt.f32.partialorder %v7642_v62, 1.0  ;;  %v721_v48 = vld [vmem:[%s11025_s1 + $0x15a0] sm:$0xff]  ;;  %v68_v56 = vld [vmem:[%s11025_s1 + $0x138] sm:$0xff]  ;;  %v67_v59 = vld [vmem:[%s11025_s1 + $0x130] sm:$0xff] }
 0x14e   :  { %1819 = vmatprep.subr.mxu1 %v156_v57  ;;  %1710 = vmatpush2.msra.mxu0 %v793_v60  ;;  %v5101_v32 = vsel %vm2123_vm0, 1.0, %v5590_v11  ;;  %v698_v60 = vld [vmem:[%s11025_s1 + $0x14e8] sm:$0xff] }
 0x14f   :  { %1820 = vmatpush1.msra.mxu1 %v155_v61  ;;  %1711 = vmatprep.subr.mxu0 %v786_v0  ;;  %v2141_v63 = vmul.f32 0.95, %v7663_v12  ;;  %v2146_v26 = vadd.f32 %v2142_v15, %v7642_v62  ;;  %vm2122_vm1 = vcmp.gt.f32.partialorder %v7663_v12, 1.0  ;;  %v60_v61 = vld [vmem:[%s11025_s1 + $0xf8] sm:$0xff]  ;;  %v697_v0 = vld [vmem:[%s11025_s1 + $0x14e0] sm:$0xff] }
 0x150   :  { %1821 = vmatprep.subr.mxu1 %v148_v3  ;;  %1712 = vmatpush2.msra.mxu0 %v785_v4  ;;  %v5100_v2 = vsel %vm2122_vm1, 1.0, %v5590_v11  ;;  %v59_v3 = vld [vmem:[%s11025_s1 + $0xf0] sm:$0xff]  ;;  %v44_v15 = vld [vmem:[%s11025_s1 + $0x78] sm:$0xff] }
 0x151   :  { %1822 = vmatpush1.msra.mxu1 %v147_v5  ;;  %1713 = vmatprep.subr.mxu0 %v778_v6  ;;  %v2145_v34 = vadd.f32 %v2141_v63, %v7663_v12  ;;  %v7734_v37 = vsub.f32 %v2146_v26, %v5101_v32  ;;  %v690_v6 = vld [vmem:[%s11025_s1 + $0x14a8] sm:$0xff]  ;;  %v284_v26 = vld [vmem:[%s11025_s1 + $0x7f8] sm:$0xff]  ;;  %v5582_v32 = vld [vmem:[%s11026_s0 + $0x20] sm:$0xff] }
 0x152   :  { %1823 = vmatprep.subr.mxu1 %v140_v7  ;;  %1714 = vmatpush2.msra.mxu0 %v777_v8  ;;  %v52_v7 = vld [vmem:[%s11025_s1 + $0xb8] sm:$0xff] }
 0x153   :  { %1824 = vmatpush1.msra.mxu1 %v139_v10  ;;  %1715 = vmatprep.subr.mxu0 %v770_v13  ;;  %v7757_v44 = vsub.f32 %v2145_v34, %v5100_v2  ;;  %v2176_v47 = vmul.f32 0.95, %v7734_v37  ;;  %vm2154_vm2 = vcmp.gt.f32.partialorder %v7734_v37, 1.0  ;;  %v689_v10 = vld [vmem:[%s11025_s1 + $0x14a0] sm:$0xff]  ;;  %v51_v13 = vld [vmem:[%s11025_s1 + $0xb0] sm:$0xff]  ;;  %v276_v34 = vld [vmem:[%s11025_s1 + $0x7b8] sm:$0xff] }
 0x154   :  { %1825 = vmatprep.subr.mxu1 %v132_v14  ;;  %1716 = vmatpush2.msra.mxu0 %v769_v16  ;;  %v5105_v4 = vsel %vm2154_vm2, 1.0, %v5590_v11  ;;  %v682_v14 = vld [vmem:[%s11025_s1 + $0x1468] sm:$0xff] }
 0x155   :  { %1826 = vmatpush1.msra.mxu1 %v131_v17  ;;  %1717 = vmatprep.subr.mxu0 %v762_v19  ;;  %v2175_v54 = vmul.f32 0.95, %v7757_v44  ;;  %v2180_v57 = vadd.f32 %v2176_v47, %v7642_v62  ;;  %vm2153_vm3 = vcmp.gt.f32.partialorder %v7757_v44, 1.0  ;;  %v681_v17 = vld [vmem:[%s11025_s1 + $0x1460] sm:$0xff]  ;;  %v43_v19 = vld [vmem:[%s11025_s1 + $0x70] sm:$0xff]  ;;  %v388_v47 = vld [vmem:[%s11025_s1 + $0xb38] sm:$0xff] }
 0x156   :  { %1827 = vmatprep.subr.mxu1 %v124_v20  ;;  %1718 = vmatpush2.msra.mxu0 %v761_v21  ;;  %v5104_v16 = vsel %vm2153_vm3, 1.0, %v5590_v11  ;;  %v674_v21 = vld [vmem:[%s11025_s1 + $0x1428] sm:$0xff] }
 0x157   :  { %1828 = vmatpush1.msra.mxu1 %v123_v22  ;;  %1719 = vmatprep.subr.mxu0 %v754_v24  ;;  %v2179_v5 = vadd.f32 %v2175_v54, %v7663_v12  ;;  %v7822_v8 = vsub.f32 %v2180_v57, %v5105_v4  ;;  %v36_v22 = vld [vmem:[%s11025_s1 + $0x38] sm:$0xff]  ;;  %v673_v24 = vld [vmem:[%s11025_s1 + $0x1420] sm:$0xff]  ;;  %v251_v54 = vld [vmem:[%s11025_s1 + $0x6f0] sm:$0xff] }
 0x158   :  { %1829 = vmatprep.subr.mxu1 %v116_v25  ;;  %1720 = vmatpush2.msra.mxu0 %v753_v27  ;;  %v35_v25 = vld [vmem:[%s11025_s1 + $0x30] sm:$0xff]  ;;  %v412_v27 = vld [vmem:[%s11025_s1 + $0xbf8] sm:$0xff] }
 0x159   :  { %1830 = vmatpush1.msra.mxu1 %v115_v28  ;;  %1721 = vmatprep.subr.mxu0 %v746_v29  ;;  %v7845_v20 = vsub.f32 %v2179_v5, %v5104_v16  ;;  %v2210_v63 = vmul.f32 0.95, %v7822_v8  ;;  %v5581_v29 = vld [vmem:[%s11026_s0 + $0x28] sm:$0xff]  ;;  %vm2188_vm4 = vcmp.gt.f32.partialorder %v7822_v8, 1.0  ;;  %v244_v57 = vld [vmem:[%s11025_s1 + $0x6b8] sm:$0xff]  ;;  %v235_v4 = vld [vmem:[%s11025_s1 + $0x670] sm:$0xff] }
 0x15a   :  { %1831 = vmatprep.subr.mxu1 %v108_v9  ;;  %1722 = vmatpush2.msra.mxu0 %v745_v30  ;;  %v283_v9 = vld [vmem:[%s11025_s1 + $0x7f0] sm:$0xff]  ;;  %v348_v16 = vld [vmem:[%s11025_s1 + $0x9f8] sm:$0xff] }
 0x15b   :  { %1832 = vmatpush1.msra.mxu1 %v107_v31  ;;  %1723 = vmatprep.subr.mxu0 %v738_v35  ;;  %v2209_v28 = vmul.f32 0.95, %v7845_v20  ;;  %v411_v30 = vld [vmem:[%s11025_s1 + $0xbf0] sm:$0xff]  ;;  %v2214_v31 = vadd.f32 %v2210_v63, %v7642_v62  ;;  %v404_v35 = vld [vmem:[%s11025_s1 + $0xbb8] sm:$0xff]  ;;  %vm2187_vm5 = vcmp.gt.f32.partialorder %v7845_v20, 1.0 }
 0x15c   :  { %1833 = vmatprep.subr.mxu1 %v100_v36  ;;  %1724 = vmatpush2.msra.mxu0 %v737_v23  ;;  %v275_v36 = vld [vmem:[%s11025_s1 + $0x7b0] sm:$0xff] }
 0x15d   :  { %1834 = vmatpush1.msra.mxu1 %v99_v39  ;;  %1725 = vmatprep.subr.mxu0 %v730_v40  ;;  %v403_v23 = vld [vmem:[%s11025_s1 + $0xbb0] sm:$0xff]  ;;  %v268_v39 = vld [vmem:[%s11025_s1 + $0x778] sm:$0xff]  ;;  %v2213_v2 = vadd.f32 %v2209_v28, %v7663_v12 }
 0x15e   :  { %1835 = vmatprep.subr.mxu1 %v92_v41  ;;  %1726 = vmatpush2.msra.mxu0 %v729_v42  ;;  %v396_v40 = vld [vmem:[%s11025_s1 + $0xb78] sm:$0xff]  ;;  %v5109_v41 = vsel %vm2188_vm4, 1.0, %v5590_v11  ;;  %v267_v42 = vld [vmem:[%s11025_s1 + $0x770] sm:$0xff] }
 0x15f   :  { %1836 = vmatpush1.msra.mxu1 %v91_v43  ;;  %1727 = vmatprep.subr.mxu0 %v722_v45  ;;  %v395_v43 = vld [vmem:[%s11025_s1 + $0xb70] sm:$0xff]  ;;  %v7910_v45 = vsub.f32 %v2214_v31, %v5109_v41  ;;  %v316_v41 = vld [vmem:[%s11025_s1 + $0x8f8] sm:$0xff] }
 0x160   :  { %1837 = vmatprep.subr.mxu1 %v84_v46  ;;  %1728 = vmatpush2.msra.mxu0 %v721_v48  ;;  %v260_v46 = vld [vmem:[%s11025_s1 + $0x738] sm:$0xff]  ;;  %v259_v48 = vld [vmem:[%s11025_s1 + $0x730] sm:$0xff] }
 0x161   :  { %1838 = vmatpush1.msra.mxu1 %v83_v49  ;;  %1729 = vmatprep.subr.mxu0 %v714_v50  ;;  %v387_v49 = vld [vmem:[%s11025_s1 + $0xb30] sm:$0xff]  ;;  %v5108_v50 = vsel %vm2187_vm5, 1.0, %v5590_v11  ;;  %vm11043_vm6 = vcmp.gt.f32.partialorder %v7910_v45, 1.0 }
 0x162   :  { %1839 = vmatprep.subr.mxu1 %v76_v51  ;;  %1730 = vmatpush2.msra.mxu0 %v713_v52  ;;  %v252_v51 = vld [vmem:[%s11025_s1 + $0x6f8] sm:$0xff]  ;;  %v363_v5 = vld [vmem:[%s11025_s1 + $0xa70] sm:$0xff] }
 0x163   :  { %1840 = vmatpush1.msra.mxu1 %v75_v53  ;;  %1731 = vmatprep.subr.mxu0 %v706_v55  ;;  %v380_v52 = vld [vmem:[%s11025_s1 + $0xaf8] sm:$0xff]  ;;  %v7933_v53 = vsub.f32 %v2213_v2, %v5108_v50  ;;  %v379_v55 = vld [vmem:[%s11025_s1 + $0xaf0] sm:$0xff] }
 0x164   :  { %1841 = vmatprep.subr.mxu1 %v68_v56  ;;  %1732 = vmatpush2.msra.mxu0 %v705_v58  ;;  %v2244_v56 = vmul.f32 0.95, %v7910_v45  ;;  %v372_v58 = vld [vmem:[%s11025_s1 + $0xab8] sm:$0xff]  ;;  %v203_v31 = vld [vmem:[%s11025_s1 + $0x570] sm:$0xff] }
 0x165   :  { %1842 = vmatpush1.msra.mxu1 %v67_v59  ;;  %1733 = vmatprep.subr.mxu0 %v698_v60  ;;  %v243_v59 = vld [vmem:[%s11025_s1 + $0x6b0] sm:$0xff]  ;;  %vm11042_vm7 = vcmp.gt.f32.partialorder %v7933_v53, 1.0 }
 0x166   :  { %1843 = vmatprep.subr.mxu1 %v60_v61  ;;  %1734 = vmatpush2.msra.mxu0 %v697_v0  ;;  %v371_v60 = vld [vmem:[%s11025_s1 + $0xab0] sm:$0xff]  ;;  %v236_v61 = vld [vmem:[%s11025_s1 + $0x678] sm:$0xff]  ;;  %v5112_v28 = vsel %vm11042_vm7, 1.0, %v5590_v11 }
 0x167   :  { %1844 = vmatpush1.msra.mxu1 %v59_v3  ;;  %1735 = vmatprep.subr.mxu0 %v690_v6  ;;  %v364_v0 = vld [vmem:[%s11025_s1 + $0xa78] sm:$0xff]  ;;  %v2243_v3 = vmul.f32 0.95, %v7933_v53  ;;  %v2248_v6 = vadd.f32 %v2244_v56, %v7642_v62  ;;  %v307_v50 = vld [vmem:[%s11025_s1 + $0x8b0] sm:$0xff] }
 0x168   :  { %1845 = vmatprep.subr.mxu1 %v52_v7  ;;  %1736 = vmatpush2.msra.mxu0 %v689_v10  ;;  %v228_v7 = vld [vmem:[%s11025_s1 + $0x638] sm:$0xff]  ;;  %v171_v56 = vld [vmem:[%s11025_s1 + $0x470] sm:$0xff] }
 0x169   :  { %1846 = vmatpush1.msra.mxu1 %v51_v13  ;;  %1737 = vmatprep.subr.mxu0 %v682_v14  ;;  %v356_v10 = vld [vmem:[%s11025_s1 + $0xa38] sm:$0xff]  ;;  %v227_v13 = vld [vmem:[%s11025_s1 + $0x630] sm:$0xff] }
 0x16a   :  { %1847 = vmatprep.subr.mxu1 %v44_v15  ;;  %1738 = vmatpush2.msra.mxu0 %v681_v17  ;;  %v355_v14 = vld [vmem:[%s11025_s1 + $0xa30] sm:$0xff]  ;;  %v220_v15 = vld [vmem:[%s11025_s1 + $0x5f8] sm:$0xff]  ;;  %v5113_v17 = vsel %vm11043_vm6, 1.0, %v5590_v11 }
 0x16b   :  { %1848 = vmatpush1.msra.mxu1 %v43_v19  ;;  %1739 = vmatprep.subr.mxu0 %v674_v21  ;;  %v2247_v19 = vadd.f32 %v2243_v3, %v7663_v12  ;;  %v219_v21 = vld [vmem:[%s11025_s1 + $0x5f0] sm:$0xff]  ;;  %v7998_v63 = vsub.f32 %v2248_v6, %v5113_v17  ;;  %v668_v6 = vld [vmem:[%s11025_s1 + $0x13f8] sm:$0xff] }
 0x16c   :  { %1849 = vmatprep.subr.mxu1 %v36_v22  ;;  %1740 = vmatpush2.msra.mxu0 %v673_v24  ;;  %v347_v22 = vld [vmem:[%s11025_s1 + $0x9f0] sm:$0xff]  ;;  %v212_v24 = vld [vmem:[%s11025_s1 + $0x5b8] sm:$0xff] }
 0x16d   :  { %1741 = vmatprep.mubr.f32.mxu0 %v5581_v29  ;;  %1850 = vmatpush1.msra.mxu1 %v35_v25  ;;  %v340_v25 = vld [vmem:[%s11025_s1 + $0x9b8] sm:$0xff]  ;;  %vm11041_vm8 = vcmp.gt.f32.partialorder %v7998_v63, 1.0  ;;  %v291_v3 = vld [vmem:[%s11025_s1 + $0x830] sm:$0xff] }
 0x16e   :  { %1742 = vmatmul.mubr.f32.vlgmr.msra.gmra.mxu0 %v5582_v32  ;;  %1851 = vmatprep.subr.mxu1 %v284_v26  ;;  %v211_v26 = vld [vmem:[%s11025_s1 + $0x5b0] sm:$0xff]  ;;  %v204_v29 = vld [vmem:[%s11025_s1 + $0x578] sm:$0xff] }
 0x16f   :  { %1890 = vmatprep.subr.mxu0 %v412_v27  ;;  %1852 = vmatpush2.msra.mxu1 %v283_v9  ;;  %v339_v27 = vld [vmem:[%s11025_s1 + $0x9b0] sm:$0xff]  ;;  %v332_v9 = vld [vmem:[%s11025_s1 + $0x978] sm:$0xff] }
 0x170   :  { %1891 = vmatpush1.msra.mxu0 %v411_v30  ;;  %1853 = vmatprep.subr.mxu1 %v276_v34  ;;  %v8021_v30 = vsub.f32 %v2247_v19, %v5112_v28  ;;  %v331_v32 = vld [vmem:[%s11025_s1 + $0x970] sm:$0xff]  ;;  %v2278_v34 = vmul.f32 0.95, %v7998_v63  ;;  %v524_v17 = vld [vmem:[%s11025_s1 + $0xf78] sm:$0xff] }
 0x171   :  { %1892 = vmatprep.subr.mxu0 %v404_v35  ;;  %1854 = vmatpush2.msra.mxu1 %v275_v36  ;;  %v196_v35 = vld [vmem:[%s11025_s1 + $0x538] sm:$0xff]  ;;  %v643_v28 = vld [vmem:[%s11025_s1 + $0x1330] sm:$0xff] }
 0x172   :  { %1893 = vmatpush1.msra.mxu0 %v403_v23  ;;  %1855 = vmatprep.subr.mxu1 %v268_v39  ;;  %v324_v36 = vld [vmem:[%s11025_s1 + $0x938] sm:$0xff]  ;;  %v195_v23 = vld [vmem:[%s11025_s1 + $0x530] sm:$0xff]  ;;  %v2277_v2 = vmul.f32 0.95, %v8021_v30  ;;  %vm11039_vm9 = vcmp.gt.f32.partialorder %v8021_v30, 1.0 }
 0x173   :  { %1894 = vmatprep.subr.mxu0 %v396_v40  ;;  %1856 = vmatpush2.msra.mxu1 %v267_v42  ;;  %v323_v39 = vld [vmem:[%s11025_s1 + $0x930] sm:$0xff]  ;;  %v188_v40 = vld [vmem:[%s11025_s1 + $0x4f8] sm:$0xff] }
 0x174   :  { %1895 = vmatpush1.msra.mxu0 %v395_v43  ;;  %1857 = vmatprep.subr.mxu1 %v260_v46  ;;  %v187_v42 = vld [vmem:[%s11025_s1 + $0x4f0] sm:$0xff]  ;;  %v2282_v46 = vadd.f32 %v2278_v34, %v7642_v62  ;;  %v652_v19 = vld [vmem:[%s11025_s1 + $0x1378] sm:$0xff] }
 0x175   :  { %1896 = vmatprep.subr.mxu0 %v388_v47  ;;  %1858 = vmatpush2.msra.mxu1 %v259_v48  ;;  %v315_v43 = vld [vmem:[%s11025_s1 + $0x8f0] sm:$0xff]  ;;  %v180_v47 = vld [vmem:[%s11025_s1 + $0x4b8] sm:$0xff] }
 0x176   :  { %1897 = vmatpush1.msra.mxu0 %v387_v49  ;;  %1859 = vmatprep.subr.mxu1 %v252_v51  ;;  %v308_v48 = vld [vmem:[%s11025_s1 + $0x8b8] sm:$0xff]  ;;  %v179_v49 = vld [vmem:[%s11025_s1 + $0x4b0] sm:$0xff] }
 0x177   :  { %1898 = vmatprep.subr.mxu0 %v380_v52  ;;  %1860 = vmatpush2.msra.mxu1 %v251_v54  ;;  %v172_v51 = vld [vmem:[%s11025_s1 + $0x478] sm:$0xff]  ;;  %v5117_v54 = vsel %vm11041_vm8, 1.0, %v5590_v11 }
 0x178   :  { %1899 = vmatpush1.msra.mxu0 %v379_v55  ;;  %1861 = vmatprep.subr.mxu1 %v244_v57  ;;  %v300_v52 = vld [vmem:[%s11025_s1 + $0x878] sm:$0xff]  ;;  %v2281_v55 = vadd.f32 %v2277_v2, %v7663_v12  ;;  %v299_v57 = vld [vmem:[%s11025_s1 + $0x870] sm:$0xff] }
 0x179   :  { %1900 = vmatprep.subr.mxu0 %v372_v58  ;;  %1862 = vmatpush2.msra.mxu1 %v243_v59  ;;  %v8086_v58 = vsub.f32 %v2282_v46, %v5117_v54  ;;  %v164_v59 = vld [vmem:[%s11025_s1 + $0x438] sm:$0xff]  ;;  %v627_v2 = vld [vmem:[%s11025_s1 + $0x12b0] sm:$0xff] }
 0x17a   :  { %1901 = vmatpush1.msra.mxu0 %v371_v60  ;;  %1863 = vmatprep.subr.mxu1 %v236_v61  ;;  %v292_v60 = vld [vmem:[%s11025_s1 + $0x838] sm:$0xff]  ;;  %v163_v61 = vld [vmem:[%s11025_s1 + $0x430] sm:$0xff] }
 0x17b   :  { %1902 = vmatprep.subr.mxu0 %v364_v0  ;;  %1864 = vmatpush2.msra.mxu1 %v235_v4  ;;  %v5116_v0 = vsel %vm11039_vm9, 1.0, %v5590_v11  ;;  %vm11037_vm10 = vcmp.gt.f32.partialorder %v8086_v58, 1.0  ;;  %v620_v46 = vld [vmem:[%s11025_s1 + $0x1278] sm:$0xff]  ;;  %v611_v54 = vld [vmem:[%s11025_s1 + $0x1230] sm:$0xff] }
 0x17c   :  { %1903 = vmatpush1.msra.mxu0 %v363_v5  ;;  %1865 = vmatprep.subr.mxu1 %v228_v7  ;;  %v8103_v4 = vsub.f32 %v2281_v55, %v5116_v0  ;;  %v540_v5 = vld [vmem:[%s11025_s1 + $0xff8] sm:$0xff]  ;;  %v2312_v7 = vmul.f32 0.95, %v8086_v58  ;;  %v603_v0 = vld [vmem:[%s11025_s1 + $0x11f0] sm:$0xff] }
 0x17d   :  { %1904 = vmatprep.subr.mxu0 %v356_v10  ;;  %1866 = vmatpush2.msra.mxu1 %v227_v13  ;;  %v539_v10 = vld [vmem:[%s11025_s1 + $0xff0] sm:$0xff] }
 0x17e   :  { %1905 = vmatpush1.msra.mxu0 %v355_v14  ;;  %1867 = vmatprep.subr.mxu1 %v220_v15  ;;  %v667_v13 = vld [vmem:[%s11025_s1 + $0x13f0] sm:$0xff]  ;;  %v532_v14 = vld [vmem:[%s11025_s1 + $0xfb8] sm:$0xff]  ;;  %vm11036_vm11 = vcmp.gt.f32.partialorder %v8103_v4, 1.0 }
 0x17f   :  { %1906 = vmatprep.subr.mxu0 %v348_v16  ;;  %1868 = vmatpush2.msra.mxu1 %v219_v21  ;;  %v660_v15 = vld [vmem:[%s11025_s1 + $0x13b8] sm:$0xff]  ;;  %v659_v16 = vld [vmem:[%s11025_s1 + $0x13b0] sm:$0xff]  ;;  %v2316_v21 = vadd.f32 %v2312_v7, %v7642_v62 }
 0x180   :  { %1907 = vmatpush1.msra.mxu0 %v347_v22  ;;  %1869 = vmatprep.subr.mxu1 %v212_v24  ;;  %v523_v22 = vld [vmem:[%s11025_s1 + $0xf70] sm:$0xff] }
 0x181   :  { %1908 = vmatprep.subr.mxu0 %v340_v25  ;;  %1870 = vmatpush2.msra.mxu1 %v211_v26  ;;  %v651_v24 = vld [vmem:[%s11025_s1 + $0x1370] sm:$0xff]  ;;  %v516_v25 = vld [vmem:[%s11025_s1 + $0xf38] sm:$0xff] }
 0x182   :  { %1909 = vmatpush1.msra.mxu0 %v339_v27  ;;  %1871 = vmatprep.subr.mxu1 %v204_v29  ;;  %v644_v26 = vld [vmem:[%s11025_s1 + $0x1338] sm:$0xff]  ;;  %v515_v27 = vld [vmem:[%s11025_s1 + $0xf30] sm:$0xff]  ;;  %v5121_v29 = vsel %vm11037_vm10, 1.0, %v5590_v11 }
 0x183   :  { %1910 = vmatprep.subr.mxu0 %v332_v9  ;;  %1872 = vmatpush2.msra.mxu1 %v203_v31  ;;  %v508_v31 = vld [vmem:[%s11025_s1 + $0xef8] sm:$0xff]  ;;  %v8170_v34 = vsub.f32 %v2316_v21, %v5121_v29  ;;  %v467_v7 = vld [vmem:[%s11025_s1 + $0xdb0] sm:$0xff] }
 0x184   :  { %1911 = vmatpush1.msra.mxu0 %v331_v32  ;;  %1873 = vmatprep.subr.mxu1 %v196_v35  ;;  %v636_v32 = vld [vmem:[%s11025_s1 + $0x12f8] sm:$0xff]  ;;  %v507_v35 = vld [vmem:[%s11025_s1 + $0xef0] sm:$0xff] }
 0x185   :  { %1912 = vmatprep.subr.mxu0 %v324_v36  ;;  %1874 = vmatpush2.msra.mxu1 %v195_v23  ;;  %v635_v36 = vld [vmem:[%s11025_s1 + $0x12f0] sm:$0xff]  ;;  %v500_v23 = vld [vmem:[%s11025_s1 + $0xeb8] sm:$0xff]  ;;  %vm11035_vm12 = vcmp.gt.f32.partialorder %v8170_v34, 1.0 }
 0x186   :  { %1913 = vmatpush1.msra.mxu0 %v323_v39  ;;  %1875 = vmatprep.subr.mxu1 %v188_v40  ;;  %v628_v39 = vld [vmem:[%s11025_s1 + $0x12b8] sm:$0xff]  ;;  %v5120_v40 = vsel %vm11036_vm11, 1.0, %v5590_v11  ;;  %v587_v21 = vld [vmem:[%s11025_s1 + $0x1170] sm:$0xff] }
 0x187   :  { %1914 = vmatprep.subr.mxu0 %v316_v41  ;;  %1876 = vmatpush2.msra.mxu1 %v187_v42  ;;  %v499_v41 = vld [vmem:[%s11025_s1 + $0xeb0] sm:$0xff] }
 0x188   :  { %1915 = vmatpush1.msra.mxu0 %v315_v43  ;;  %1877 = vmatprep.subr.mxu1 %v180_v47  ;;  %v492_v43 = vld [vmem:[%s11025_s1 + $0xe78] sm:$0xff]  ;;  %v2346_v47 = vmul.f32 0.95, %v8170_v34  ;;  %v579_v29 = vld [vmem:[%s11025_s1 + $0x1130] sm:$0xff] }
 0x189   :  { %1916 = vmatprep.subr.mxu0 %v308_v48  ;;  %1878 = vmatpush2.msra.mxu1 %v179_v49  ;;  %v491_v48 = vld [vmem:[%s11025_s1 + $0xe70] sm:$0xff] }
 0x18a   :  { %1917 = vmatpush1.msra.mxu0 %v307_v50  ;;  %1879 = vmatprep.subr.mxu1 %v172_v51  ;;  %v619_v49 = vld [vmem:[%s11025_s1 + $0x1270] sm:$0xff]  ;;  %v484_v50 = vld [vmem:[%s11025_s1 + $0xe38] sm:$0xff] }
 0x18b   :  { %1918 = vmatprep.subr.mxu0 %v300_v52  ;;  %1880 = vmatpush2.msra.mxu1 %v171_v56  ;;  %v612_v51 = vld [vmem:[%s11025_s1 + $0x1238] sm:$0xff]  ;;  %v483_v52 = vld [vmem:[%s11025_s1 + $0xe30] sm:$0xff] }
 0x18c   :  { %1919 = vmatpush1.msra.mxu0 %v299_v57  ;;  %1881 = vmatprep.subr.mxu1 %v164_v59  ;;  %v476_v56 = vld [vmem:[%s11025_s1 + $0xdf8] sm:$0xff]  ;;  %v2350_v59 = vadd.f32 %v2346_v47, %v7642_v62  ;;  %v435_v47 = vld [vmem:[%s11025_s1 + $0xcb0] sm:$0xff] }
 0x18d   :  { %1920 = vmatprep.subr.mxu0 %v292_v60  ;;  %1882 = vmatpush2.msra.mxu1 %v163_v61  ;;  %v604_v57 = vld [vmem:[%s11025_s1 + $0x11f8] sm:$0xff]  ;;  %v937_v60 = vsub.s32 2, %v7516_v1  ;;  %v475_v61 = vld [vmem:[%s11025_s1 + $0xdf0] sm:$0xff] }
 0x18e   :  { %1883 = vmatprep.mubr.f32.mxu1 %v7415_v33  ;;  %1921 = vmatpush1.msra.mxu0 %v291_v3  ;;  %v531_v33 = vld [vmem:[%s11025_s1 + $0xfb0] sm:$0xff]  ;;  %v468_v3 = vld [vmem:[%s11025_s1 + $0xdb8] sm:$0xff] }
 0x18f   :  { %1884 = vmatmul.mubr.f32.vlgmr.msra.gmra.mxu1 %v7434_v38  ;;  %1922 = vmatprep.subr.mxu0 %v540_v5  ;;  %v2311_v38 = vmul.f32 0.95, %v8103_v4  ;;  %v596_v5 = vld [vmem:[%s11025_s1 + $0x11b8] sm:$0xff] }
 0x190   :  { %1961 = vmatprep.subr.mxu1 %v668_v6  ;;  %1923 = vmatpush2.msra.mxu0 %v539_v10  ;;  %v941_v6 = vsub.s32 3, %v7516_v1  ;;  %v595_v10 = vld [vmem:[%s11025_s1 + $0x11b0] sm:$0xff] }
 0x191   :  { %1962 = vmatpush1.msra.mxu1 %v667_v13  ;;  %1924 = vmatprep.subr.mxu0 %v532_v14  ;;  %v2315_v9 = vadd.f32 %v2311_v38, %v7663_v12  ;;  %v5125_v13 = vsel %vm11035_vm12, 1.0, %v5590_v11 }
 0x192   :  { %1963 = vmatprep.subr.mxu1 %v660_v15  ;;  %1925 = vmatpush2.msra.mxu0 %v531_v33  ;;  %v1317_v15 = vpop.f32.mrf.mxu1  ;;  %v460_v33 = vld [vmem:[%s11025_s1 + $0xd78] sm:$0xff]  ;;  %v8260_v38 = vsub.f32 %v2350_v59, %v5125_v13 }
 0x193   :  { %1964 = vmatpush1.msra.mxu1 %v659_v16  ;;  %1926 = vmatprep.subr.mxu0 %v524_v17  ;;  %v8193_v42 = vsub.f32 %v2315_v9, %v5120_v40  ;;  %v588_v16 = vld [vmem:[%s11025_s1 + $0x1178] sm:$0xff]  ;;  %v938_v17 = vrot.slane %v7552_v18, %v937_v60 }
 0x194   :  { %1965 = vmatprep.subr.mxu1 %v652_v19  ;;  %1927 = vmatpush2.msra.mxu0 %v523_v22  ;;  %v459_v19 = vld [vmem:[%s11025_s1 + $0xd70] sm:$0xff]  ;;  %v1388_v22 = vpop.f32.mrf.mxu0  ;;  %vm11032_vm14 = vcmp.gt.f32.partialorder %v8260_v38, 1.0  ;;  %v420_v60 = vld [vmem:[%s11025_s1 + $0xc38] sm:$0xff] }
 0x195   :  { %1966 = vmatpush1.msra.mxu1 %v651_v24  ;;  %1928 = vmatprep.subr.mxu0 %v516_v25  ;;  %v2345_v55 = vmul.f32 0.95, %v8193_v42  ;;  %vm11033_vm13 = vcmp.gt.f32.partialorder %v8193_v42, 1.0  ;;  %v452_v24 = vld [vmem:[%s11025_s1 + $0xd38] sm:$0xff] }
 0x196   :  { %1967 = vmatprep.subr.mxu1 %v644_v26  ;;  %1929 = vmatpush2.msra.mxu0 %v515_v27  ;;  %v580_v25 = vld [vmem:[%s11025_s1 + $0x1138] sm:$0xff]  ;;  %v5124_v26 = vsel %vm11033_vm13, 1.0, %v5590_v11  ;;  %v942_v27 = vrot.slane %v7552_v18, %v941_v6  ;;  %v1390_v40 = vpop.f32.mrf.mxu0 }
 0x197   :  { %1968 = vmatpush1.msra.mxu1 %v643_v28  ;;  %1930 = vmatprep.subr.mxu0 %v508_v31  ;;  %v2349_v14 = vadd.f32 %v2345_v55, %v7663_v12  ;;  %v451_v28 = vld [vmem:[%s11025_s1 + $0xd30] sm:$0xff]  ;;  %v1319_v31 = vpop.f32.mrf.mxu1  ;;  %v572_v18 = vld [vmem:[%s11025_s1 + $0x10f8] sm:$0xff] }
 0x198   :  { %1969 = vmatprep.subr.mxu1 %v636_v32  ;;  %1931 = vmatpush2.msra.mxu0 %v507_v35  ;;  %v444_v32 = vld [vmem:[%s11025_s1 + $0xcf8] sm:$0xff]  ;;  %v2380_v35 = vmul.f32 0.95, %v8260_v38 }
 0x199   :  { %1970 = vmatpush1.msra.mxu1 %v635_v36  ;;  %1932 = vmatprep.subr.mxu0 %v500_v23  ;;  %v8285_v9 = vsub.f32 %v2349_v14, %v5124_v26  ;;  %v1318_v36 = vadd.f32 %v1317_v15, %v938_v17  ;;  %v443_v23 = vld [vmem:[%s11025_s1 + $0xcf0] sm:$0xff]  ;;  %v924_v17 = vld [vmem:[%s11025_s1 + $0x1bf8] sm:$0xff] }
 0x19a   :  { %1971 = vmatprep.subr.mxu1 %v628_v39  ;;  %1933 = vmatpush2.msra.mxu0 %v499_v41  ;;  %v571_v39 = vld [vmem:[%s11025_s1 + $0x10f0] sm:$0xff]  ;;  %v436_v41 = vld [vmem:[%s11025_s1 + $0xcb8] sm:$0xff] }
 0x19b   :  { %1972 = vmatpush1.msra.mxu1 %v627_v2  ;;  %1934 = vmatprep.subr.mxu0 %v492_v43  ;;  %v564_v2 = vld [vmem:[%s11025_s1 + $0x10b8] sm:$0xff]  ;;  %v1320_v43 = vadd.f32 %v1319_v31, %v942_v27  ;;  %vm11034_vm15 = vcmp.gt.f32.partialorder %v8285_v9, 1.0  ;;  %v547_v14 = vld [vmem:[%s11025_s1 + $0x1030] sm:$0xff] }
 0x19c   :  { %1973 = vmatprep.subr.mxu1 %v620_v46  ;;  %1935 = vmatpush2.msra.mxu0 %v491_v48  ;;  %v1389_v46 = vadd.f32 %v1388_v22, %v1318_v36  ;;  %v563_v48 = vld [vmem:[%s11025_s1 + $0x10b0] sm:$0xff]  ;;  %v5583_v22 = vld [vmem:[%s11026_s0 + $0x18] sm:$0xff]  ;;  %v5128_v26 = vsel %vm11034_vm15, 1.0, %v5590_v11 }
 0x19d   :  { %1974 = vmatpush1.msra.mxu1 %v619_v49  ;;  %1936 = vmatprep.subr.mxu0 %v484_v50  ;;  %v2379_v49 = vmul.f32 0.95, %v8285_v9  ;;  %v428_v50 = vld [vmem:[%s11025_s1 + $0xc78] sm:$0xff]  ;;  %v1391_v55 = vadd.f32 %v1390_v40, %v1320_v43  ;;  %v5584_v27 = vld [vmem:[%s11026_s0 + $0x10] sm:$0xff] }
 0x19e   :  { %1975 = vmatprep.subr.mxu1 %v612_v51  ;;  %1937 = vmatpush2.msra.mxu0 %v483_v52  ;;  %v556_v51 = vld [vmem:[%s11025_s1 + $0x1078] sm:$0xff]  ;;  %v915_v36 = vld [vmem:[%s11025_s1 + $0x1bb0] sm:$0xff] }
 0x19f   :  { %1976 = vmatpush1.msra.mxu1 %v611_v54  ;;  %1938 = vmatprep.subr.mxu0 %v476_v56  ;;  %v2384_v54 = vadd.f32 %v2380_v35, %v7642_v62  ;;  %v427_v56 = vld [vmem:[%s11025_s1 + $0xc70] sm:$0xff]  ;;  %v2383_v13 = vadd.f32 %v2379_v49, %v7663_v12  ;;  %v780_v40 = vld [vmem:[%s11025_s1 + $0x1778] sm:$0xff] }
 0x1a0   :  { %1977 = vmatprep.subr.mxu1 %v604_v57  ;;  %1939 = vmatpush2.msra.mxu0 %v475_v61  ;;  %v555_v57 = vld [vmem:[%s11025_s1 + $0x1070] sm:$0xff]  ;;  %v548_v61 = vld [vmem:[%s11025_s1 + $0x1038] sm:$0xff] }
 0x1a1   :  { %1978 = vmatpush1.msra.mxu1 %v603_v0  ;;  %1940 = vmatprep.subr.mxu0 %v468_v3  ;;  %v787_v35 = vld [vmem:[%s11025_s1 + $0x17b0] sm:$0xff] }
 0x1a2   :  { %1979 = vmatprep.subr.mxu1 %v596_v5  ;;  %1941 = vmatpush2.msra.mxu0 %v467_v7  ;;  %v419_v5 = vld [vmem:[%s11025_s1 + $0xc30] sm:$0xff] }
 0x1a3   :  { %1980 = vmatpush1.msra.mxu1 %v595_v10  ;;  %1942 = vmatprep.subr.mxu0 %v460_v33  ;;  %v5129_v10 = vsel %vm11032_vm14, 1.0, %v5590_v11 }
 0x1a4   :  { %1981 = vmatprep.subr.mxu1 %v588_v16  ;;  %1943 = vmatpush2.msra.mxu0 %v459_v19  ;;  %v8346_v33 = vsub.f32 %v2384_v54, %v5129_v10  ;;  %v796_v16 = vld [vmem:[%s11025_s1 + $0x17f8] sm:$0xff] }
 0x1a5   :  { %1982 = vmatpush1.msra.mxu1 %v587_v21  ;;  %1944 = vmatprep.subr.mxu0 %v452_v24  ;;  %v795_v24 = vld [vmem:[%s11025_s1 + $0x17f0] sm:$0xff]  ;;  %v756_v10 = vld [vmem:[%s11025_s1 + $0x16b8] sm:$0xff] }
 0x1a6   :  { %1983 = vmatprep.subr.mxu1 %v580_v25  ;;  %1945 = vmatpush2.msra.mxu0 %v451_v28  ;;  %v923_v25 = vld [vmem:[%s11025_s1 + $0x1bf0] sm:$0xff]  ;;  %v788_v28 = vld [vmem:[%s11025_s1 + $0x17b8] sm:$0xff]  ;;  %vm11038_vm12 = vcmp.gt.f32.partialorder %v8346_v33, 1.0 }
 0x1a7   :  { %1984 = vmatpush1.msra.mxu1 %v579_v29  ;;  %1946 = vmatprep.subr.mxu0 %v444_v32  ;;  %v916_v29 = vld [vmem:[%s11025_s1 + $0x1bb8] sm:$0xff] }
 0x1a8   :  { %1985 = vmatprep.subr.mxu1 %v572_v18  ;;  %1947 = vmatpush2.msra.mxu0 %v443_v23  ;;  %v8382_v18 = vsub.f32 %v2383_v13, %v5128_v26  ;;  %v884_v13 = vld [vmem:[%s11025_s1 + $0x1ab8] sm:$0xff] }
 0x1a9   :  { %1986 = vmatpush1.msra.mxu1 %v571_v39  ;;  %v1459_v52 = vpop.f32.mrf.mxu1  ;;  %1948 = vmatprep.subr.mxu0 %v436_v41  ;;  %v2414_v39 = vmul.f32 0.95, %v8346_v33  ;;  %v908_v41 = vld [vmem:[%s11025_s1 + $0x1b78] sm:$0xff] }
 0x1aa   :  { %1987 = vmatprep.subr.mxu1 %v564_v2  ;;  %v1460_v59 = vadd.f32 %v1459_v52, %v1389_v46  ;;  %1949 = vmatpush2.msra.mxu0 %v435_v47  ;;  %v779_v46 = vld [vmem:[%s11025_s1 + $0x1770] sm:$0xff]  ;;  %v2413_v54 = vmul.f32 0.95, %v8382_v18  ;;  %vm11040_vm10 = vcmp.gt.f32.partialorder %v8382_v18, 1.0  ;;  %v748_v26 = vld [vmem:[%s11025_s1 + $0x1678] sm:$0xff] }
 0x1ab   :  { %1988 = vmatpush1.msra.mxu1 %v563_v48  ;;  %v1530_v0 = vpop.f32.mrf.mxu0  ;;  %v1461_v3 = vpop.f32.mrf.mxu1  ;;  %1950 = vmatprep.subr.mxu0 %v428_v50  ;;  %v907_v47 = vld [vmem:[%s11025_s1 + $0x1b70] sm:$0xff]  ;;  %v772_v48 = vld [vmem:[%s11025_s1 + $0x1738] sm:$0xff] }
 0x1ac   :  { %1989 = vmatprep.subr.mxu1 %v556_v51  ;;  %v8337_v6 = vadd.f32 %v1530_v0, %v1460_v59  ;;  %v1462_v7 = vadd.f32 %v1461_v3, %v1391_v55  ;;  %1951 = vmatpush2.msra.mxu0 %v427_v56  ;;  %v900_v50 = vld [vmem:[%s11025_s1 + $0x1b38] sm:$0xff]  ;;  %v771_v55 = vld [vmem:[%s11025_s1 + $0x1730] sm:$0xff] }
 0x1ad   :  { %1990 = vmatpush1.msra.mxu1 %v555_v57  ;;  %v1532_v15 = vpop.f32.mrf.mxu0  ;;  %1952 = vmatprep.subr.mxu0 %v420_v60  ;;  %v899_v56 = vld [vmem:[%s11025_s1 + $0x1b30] sm:$0xff]  ;;  %v2418_v57 = vadd.f32 %v2414_v39, %v7642_v62  ;;  %v764_v59 = vld [vmem:[%s11025_s1 + $0x16f8] sm:$0xff] }
 0x1ae   :  { %1991 = vmatprep.subr.mxu1 %v548_v61  ;;  %v8354_v19 = vadd.f32 %v1532_v15, %v1462_v7  ;;  %vm2124_vm14 = vcmp.gt.f32.partialorder %v8337_v6, 1.0  ;;  %v2143_v21 = vmul.f32 0.95, %v8337_v6  ;;  %1953 = vmatpush2.msra.mxu0 %v419_v5  ;;  %v892_v60 = vld [vmem:[%s11025_s1 + $0x1af8] sm:$0xff]  ;;  %v763_v3 = vld [vmem:[%s11025_s1 + $0x16f0] sm:$0xff] }
 0x1af   :  { %1954 = vmatprep.mubr.f32.mxu0 %v5583_v22  ;;  %1992 = vmatpush1.msra.mxu1 %v547_v14  ;;  %v5102_v23 = vsel %vm2124_vm14, 1.0, %v5590_v11  ;;  %v891_v5 = vld [vmem:[%s11025_s1 + $0x1af0] sm:$0xff] }
 0x1b0   :  { %1955 = vmatmul.mubr.f32.vlgmr.msra.gmra.mxu0 %v5584_v27  ;;  %vm2125_vm13 = vcmp.gt.f32.partialorder %v8354_v19, 1.0  ;;  %v2144_v31 = vmul.f32 0.95, %v8354_v19  ;;  %v2147_v32 = vadd.f32 %v2143_v21, %v8337_v6  ;;  %1993 = vmatprep.subr.mxu1 %v796_v16  ;;  %v5133_v16 = vsel %vm11038_vm12, 1.0, %v5590_v11  ;;  %v755_v21 = vld [vmem:[%s11025_s1 + $0x16b0] sm:$0xff]  ;;  %v876_v27 = vld [vmem:[%s11025_s1 + $0x1a78] sm:$0xff] }
 0x1b1   :  { %2032 = vmatprep.subr.mxu0 %v924_v17  ;;  %1994 = vmatpush2.msra.mxu1 %v795_v24  ;;  %v5103_v49 = vsel %vm2125_vm13, 1.0, %v5590_v11  ;;  %v2417_v17 = vadd.f32 %v2413_v54, %v7663_v12  ;;  %v883_v22 = vld [vmem:[%s11025_s1 + $0x1ab0] sm:$0xff] }
 0x1b2   :  { %2033 = vmatpush1.msra.mxu0 %v923_v25  ;;  %v2148_v2 = vadd.f32 %v2144_v31, %v8354_v19  ;;  %v8401_v43 = vsub.f32 %v2147_v32, %v5102_v23  ;;  %1995 = vmatprep.subr.mxu1 %v788_v28  ;;  %v8472_v25 = vsub.f32 %v2418_v57, %v5133_v16  ;;  %v747_v31 = vld [vmem:[%s11025_s1 + $0x1670] sm:$0xff]  ;;  %v868_v23 = vld [vmem:[%s11025_s1 + $0x1a38] sm:$0xff] }
 0x1b3   :  { %2034 = vmatprep.subr.mxu0 %v916_v29  ;;  %1996 = vmatpush2.msra.mxu1 %v787_v35  ;;  %v875_v32 = vld [vmem:[%s11025_s1 + $0x1a70] sm:$0xff]  ;;  %v5132_v35 = vsel %vm11040_vm10, 1.0, %v5590_v11  ;;  %v724_v57 = vld [vmem:[%s11025_s1 + $0x15b8] sm:$0xff] }
 0x1b4   :  { %2035 = vmatpush1.msra.mxu0 %v915_v36  ;;  %v8418_v51 = vsub.f32 %v2148_v2, %v5103_v49  ;;  %vm2155_vm15 = vcmp.gt.f32.partialorder %v8401_v43, 1.0  ;;  %v2177_v52 = vmul.f32 0.95, %v8401_v43  ;;  %1997 = vmatprep.subr.mxu1 %v780_v40  ;;  %v740_v36 = vld [vmem:[%s11025_s1 + $0x1638] sm:$0xff]  ;;  %v739_v2 = vld [vmem:[%s11025_s1 + $0x1630] sm:$0xff]  ;;  %vm11044_vm8 = vcmp.gt.f32.partialorder %v8472_v25, 1.0 }
 0x1b5   :  { %2036 = vmatprep.subr.mxu0 %v908_v41  ;;  %1998 = vmatpush2.msra.mxu1 %v779_v46  ;;  %v5106_v7 = vsel %vm2155_vm15, 1.0, %v5590_v11  ;;  %v8502_v41 = vsub.f32 %v2417_v17, %v5132_v35  ;;  %v867_v46 = vld [vmem:[%s11025_s1 + $0x1a30] sm:$0xff]  ;;  %v732_v49 = vld [vmem:[%s11025_s1 + $0x15f8] sm:$0xff] }
 0x1b6   :  { %2037 = vmatpush1.msra.mxu0 %v907_v47  ;;  %vm2156_vm11 = vcmp.gt.f32.partialorder %v8418_v51, 1.0  ;;  %v2178_v61 = vmul.f32 0.95, %v8418_v51  ;;  %v2181_v0 = vadd.f32 %v2177_v52, %v8337_v6  ;;  %1999 = vmatprep.subr.mxu1 %v772_v48  ;;  %v2448_v48 = vmul.f32 0.95, %v8472_v25  ;;  %v3931_v51 = vld [vmem:[%s11028_s3 + $0x270] sm:$0xff] }
 0x1b7   :  { %2038 = vmatprep.subr.mxu0 %v900_v50  ;;  %2000 = vmatpush2.msra.mxu1 %v771_v55  ;;  %v5107_v24 = vsel %vm2156_vm11, 1.0, %v5590_v11  ;;  %v860_v50 = vld [vmem:[%s11025_s1 + $0x19f8] sm:$0xff]  ;;  %v731_v55 = vld [vmem:[%s11025_s1 + $0x15f0] sm:$0xff]  ;;  %vm11046_vm6 = vcmp.gt.f32.partialorder %v8502_v41, 1.0 }
 0x1b8   :  { %2039 = vmatpush1.msra.mxu0 %v899_v56  ;;  %v2182_v14 = vadd.f32 %v2178_v61, %v8354_v19  ;;  %v8457_v15 = vsub.f32 %v2181_v0, %v5106_v7  ;;  %2001 = vmatprep.subr.mxu1 %v764_v59  ;;  %v859_v56 = vld [vmem:[%s11025_s1 + $0x19f0] sm:$0xff] }
 0x1b9   :  { %2040 = vmatprep.subr.mxu0 %v892_v60  ;;  %2002 = vmatpush2.msra.mxu1 %v763_v3  ;;  %v852_v60 = vld [vmem:[%s11025_s1 + $0x19b8] sm:$0xff]  ;;  %v2447_v3 = vmul.f32 0.95, %v8502_v41  ;;  %v851_v7 = vld [vmem:[%s11025_s1 + $0x19b0] sm:$0xff] }
 0x1ba   :  { %2041 = vmatpush1.msra.mxu0 %v891_v5  ;;  %v8480_v28 = vsub.f32 %v2182_v14, %v5107_v24  ;;  %vm2189_vm12 = vcmp.gt.f32.partialorder %v8457_v15, 1.0  ;;  %v2211_v29 = vmul.f32 0.95, %v8457_v15  ;;  %2003 = vmatprep.subr.mxu1 %v756_v10  ;;  %v723_v5 = vld [vmem:[%s11025_s1 + $0x15b0] sm:$0xff]  ;;  %v2452_v10 = vadd.f32 %v2448_v48, %v7642_v62  ;;  %v844_v14 = vld [vmem:[%s11025_s1 + $0x1978] sm:$0xff] }
 0x1bb   :  { %2042 = vmatprep.subr.mxu0 %v884_v13  ;;  %2004 = vmatpush2.msra.mxu1 %v755_v21  ;;  %v5110_v47 = vsel %vm2189_vm12, 1.0, %v5590_v11  ;;  %v716_v13 = vld [vmem:[%s11025_s1 + $0x1578] sm:$0xff]  ;;  %v715_v21 = vld [vmem:[%s11025_s1 + $0x1570] sm:$0xff]  ;;  %v2451_v35 = vadd.f32 %v2447_v3, %v7663_v12 }
 0x1bc   :  { %2043 = vmatpush1.msra.mxu0 %v883_v22  ;;  %vm2190_vm9 = vcmp.gt.f32.partialorder %v8480_v28, 1.0  ;;  %v2212_v39 = vmul.f32 0.95, %v8480_v28  ;;  %v2215_v40 = vadd.f32 %v2211_v29, %v8337_v6  ;;  %2005 = vmatprep.subr.mxu1 %v748_v26  ;;  %v843_v22 = vld [vmem:[%s11025_s1 + $0x1970] sm:$0xff]  ;;  %v708_v26 = vld [vmem:[%s11025_s1 + $0x1538] sm:$0xff] }
 0x1bd   :  { %2044 = vmatprep.subr.mxu0 %v876_v27  ;;  %2006 = vmatpush2.msra.mxu1 %v747_v31  ;;  %v5111_v59 = vsel %vm2190_vm9, 1.0, %v5590_v11  ;;  %v836_v27 = vld [vmem:[%s11025_s1 + $0x1938] sm:$0xff]  ;;  %v819_v3 = vld [vmem:[%s11025_s1 + $0x18b0] sm:$0xff] }
 0x1be   :  { %2045 = vmatpush1.msra.mxu0 %v875_v32  ;;  %v2216_v52 = vadd.f32 %v2212_v39, %v8354_v19  ;;  %v8521_v54 = vsub.f32 %v2215_v40, %v5110_v47  ;;  %2007 = vmatprep.subr.mxu1 %v740_v36  ;;  %v5137_v32 = vsel %vm11044_vm8, 1.0, %v5590_v11  ;;  %v707_v36 = vld [vmem:[%s11025_s1 + $0x1530] sm:$0xff] }
 0x1bf   :  { %2046 = vmatprep.subr.mxu0 %v868_v23  ;;  %2008 = vmatpush2.msra.mxu1 %v739_v2  ;;  %v835_v23 = vld [vmem:[%s11025_s1 + $0x1930] sm:$0xff]  ;;  %v8592_v40 = vsub.f32 %v2452_v10, %v5137_v32  ;;  %v700_v2 = vld [vmem:[%s11025_s1 + $0x14f8] sm:$0xff] }
 0x1c0   :  { %2047 = vmatpush1.msra.mxu0 %v867_v46  ;;  %v8538_v61 = vsub.f32 %v2216_v52, %v5111_v59  ;;  %vm11045_vm10 = vcmp.gt.f32.partialorder %v8521_v54, 1.0  ;;  %v2245_v0 = vmul.f32 0.95, %v8521_v54  ;;  %2009 = vmatprep.subr.mxu1 %v732_v49  ;;  %v828_v46 = vld [vmem:[%s11025_s1 + $0x18f8] sm:$0xff]  ;;  %v699_v49 = vld [vmem:[%s11025_s1 + $0x14f0] sm:$0xff]  ;;  %v5136_v52 = vsel %vm11046_vm6, 1.0, %v5590_v11 }
 0x1c1   :  { %2048 = vmatprep.subr.mxu0 %v860_v50  ;;  %2010 = vmatpush2.msra.mxu1 %v731_v55  ;;  %v5114_v24 = vsel %vm11045_vm10, 1.0, %v5590_v11  ;;  %v827_v50 = vld [vmem:[%s11025_s1 + $0x18f0] sm:$0xff]  ;;  %v692_v55 = vld [vmem:[%s11025_s1 + $0x14b8] sm:$0xff] }
 0x1c2   :  { %2049 = vmatpush1.msra.mxu0 %v859_v56  ;;  %vm11049_vm7 = vcmp.gt.f32.partialorder %v8538_v61, 1.0  ;;  %v2246_v16 = vmul.f32 0.95, %v8538_v61  ;;  %v2249_v17 = vadd.f32 %v2245_v0, %v8337_v6  ;;  %2011 = vmatprep.subr.mxu1 %v724_v57  ;;  %v820_v56 = vld [vmem:[%s11025_s1 + $0x18b8] sm:$0xff]  ;;  %v691_v0 = vld [vmem:[%s11025_s1 + $0x14b0] sm:$0xff] }
 0x1c3   :  { %2050 = vmatprep.subr.mxu0 %v852_v60  ;;  %2012 = vmatpush2.msra.mxu1 %v723_v5  ;;  %v5115_v39 = vsel %vm11049_vm7, 1.0, %v5590_v11  ;;  %v8622_v60 = vsub.f32 %v2451_v35, %v5136_v52  ;;  %v684_v10 = vld [vmem:[%s11025_s1 + $0x1478] sm:$0xff]  ;;  %v675_v35 = vld [vmem:[%s11025_s1 + $0x1430] sm:$0xff] }
 0x1c4   :  { %2051 = vmatpush1.msra.mxu0 %v851_v7  ;;  %v2250_v29 = vadd.f32 %v2246_v16, %v8354_v19  ;;  %v8577_v31 = vsub.f32 %v2249_v17, %v5114_v24  ;;  %2013 = vmatprep.subr.mxu1 %v716_v13  ;;  %v2482_v7 = vmul.f32 0.95, %v8592_v40  ;;  %v812_v13 = vld [vmem:[%s11025_s1 + $0x1878] sm:$0xff]  ;;  %v683_v17 = vld [vmem:[%s11025_s1 + $0x1470] sm:$0xff] }
 0x1c5   :  { %2052 = vmatprep.subr.mxu0 %v844_v14  ;;  %2014 = vmatpush2.msra.mxu1 %v715_v21  ;;  %v811_v21 = vld [vmem:[%s11025_s1 + $0x1870] sm:$0xff]  ;;  %v2481_v32 = vmul.f32 0.95, %v8622_v60  ;;  %vm11052_vm7 = vcmp.gt.f32.partialorder %v8622_v60, 1.0 }
 0x1c6   :  { %2053 = vmatpush1.msra.mxu0 %v843_v22  ;;  %v8600_v47 = vsub.f32 %v2250_v29, %v5115_v39  ;;  %vm11047_vm8 = vcmp.gt.f32.partialorder %v8577_v31, 1.0  ;;  %v2279_v48 = vmul.f32 0.95, %v8577_v31  ;;  %2015 = vmatprep.subr.mxu1 %v708_v26  ;;  %v676_v22 = vld [vmem:[%s11025_s1 + $0x1438] sm:$0xff] }
 0x1c7   :  { %2054 = vmatprep.subr.mxu0 %v836_v27  ;;  %2016 = vmatpush2.msra.mxu1 %v707_v36  ;;  %v5118_v5 = vsel %vm11047_vm8, 1.0, %v5590_v11  ;;  %v804_v26 = vld [vmem:[%s11025_s1 + $0x1838] sm:$0xff]  ;;  %vm11050_vm8 = vcmp.gt.f32.partialorder %v8592_v40, 1.0  ;;  %v2486_v36 = vadd.f32 %v2482_v7, %v7642_v62 }
 0x1c8   :  { %2055 = vmatpush1.msra.mxu0 %v835_v23  ;;  %vm11048_vm10 = vcmp.gt.f32.partialorder %v8600_v47, 1.0  ;;  %v2280_v57 = vmul.f32 0.95, %v8600_v47  ;;  %v2283_v59 = vadd.f32 %v2279_v48, %v8337_v6  ;;  %2017 = vmatprep.subr.mxu1 %v700_v2  ;;  %v803_v23 = vld [vmem:[%s11025_s1 + $0x1830] sm:$0xff]  ;;  %v5585_v48 = vld [vmem:[%s11026_s0 + $0x28] sm:$0xff]  ;;  %v5141_v52 = vsel %vm11050_vm8, 1.0, %v5590_v11 }
 0x1c9   :  { %2056 = vmatprep.subr.mxu0 %v828_v46  ;;  %2018 = vmatpush2.msra.mxu1 %v699_v49  ;;  %v5119_v24 = vsel %vm11048_vm10, 1.0, %v5590_v11 }
 0x1ca   :  { %2057 = vmatpush1.msra.mxu0 %v827_v50  ;;  %v2284_v14 = vadd.f32 %v2280_v57, %v8354_v19  ;;  %v8641_v16 = vsub.f32 %v2283_v59, %v5118_v5  ;;  %2019 = vmatprep.subr.mxu1 %v692_v55  ;;  %v2485_v55 = vadd.f32 %v2481_v32, %v7663_v12  ;;  %v3900_v5 = vld [vmem:[%s11028_s3 + $0x178] sm:$0xff] }
 0x1cb   :  { %2058 = vmatprep.subr.mxu0 %v820_v56  ;;  %2020 = vmatpush2.msra.mxu1 %v691_v0  ;;  %v3868_v56 = vld [vmem:[%s11028_s3 + $0x78] sm:$0xff]  ;;  %v8695_v59 = vsub.f32 %v2486_v36, %v5141_v52  ;;  %v5586_v0 = vld [vmem:[%s11026_s0 + $0x20] sm:$0xff]  ;;  %v3898_v36 = vld [vmem:[%s11028_s3 + $0x168] sm:$0xff] }
 0x1cc   :  { %2059 = vmatpush1.msra.mxu0 %v819_v3  ;;  %v8658_v27 = vsub.f32 %v2284_v14, %v5119_v24  ;;  %vm11051_vm6 = vcmp.gt.f32.partialorder %v8641_v16, 1.0  ;;  %v2313_v29 = vmul.f32 0.95, %v8641_v16  ;;  %2021 = vmatprep.subr.mxu1 %v684_v10  ;;  %v5587_v3 = vld [vmem:[%s11026_s0 + $0x30] sm:$0xff]  ;;  %v11062_v14 = vmov 1.0  }
 0x1cd   :  { %2060 = vmatprep.subr.mxu0 %v812_v13  ;;  %2022 = vmatpush2.msra.mxu1 %v683_v17  ;;  %v5122_v46 = vsel %vm11051_vm6, 1.0, %v5590_v11  ;;  %11127 = vst [vmem:[#allocation5_spill] sm:$0xff] %v8695_v59  ;;  %v5140_v13 = vsel %vm11052_vm7, 1.0, %v5590_v11  ;;  %v3867_v17 = vld [vmem:[%s11028_s3 + $0x70] sm:$0xff]  ;;  %v2516_v32 = vmul.f32 0.95, %v8695_v59 }
 0x1ce   :  { %2061 = vmatpush1.msra.mxu0 %v811_v21  ;;  %vm2292_vm10 = vcmp.gt.f32.partialorder %v8658_v27, 1.0  ;;  %v2314_v39 = vmul.f32 0.95, %v8658_v27  ;;  %v2317_v2 = vadd.f32 %v2313_v29, %v8337_v6  ;;  %2023 = vmatprep.subr.mxu1 %v676_v22  ;;  %v3899_v21 = vld [vmem:[%s11028_s3 + $0x170] sm:$0xff] }
 0x1cf   :  { %2062 = vmatprep.subr.mxu0 %v804_v26  ;;  %2024 = vmatpush2.msra.mxu1 %v675_v35  ;;  %v5123_v57 = vsel %vm2292_vm10, 1.0, %v5590_v11  ;;  %v8727_v26 = vsub.f32 %v2485_v55, %v5140_v13  ;;  %v3866_v35 = vld [vmem:[%s11028_s3 + $0x68] sm:$0xff]  ;;  %v3863_v13 = vld [vmem:[%s11028_s3 + $0x50] sm:$0xff] }
 0x1d0   :  { %2025 = vmatprep.mubr.f32.mxu1 %v5585_v48  ;;  %v2318_v49 = vadd.f32 %v2314_v39, %v8354_v19  ;;  %v8682_v50 = vsub.f32 %v2317_v2, %v5122_v46  ;;  %2063 = vmatpush1.msra.mxu0 %v803_v23  ;;  %v3865_v2 = vld [vmem:[%s11028_s3 + $0x60] sm:$0xff] }
 0x1d1   :  { %2096 = vmatprep.mubr.f32.mxu0 %v5590_v11  ;;  %2026 = vmatmul.mubr.f32.vlgmr.msra.gmra.mxu1 %v5586_v0  ;;  %11128 = vst [vmem:[#allocation6_spill] sm:$0xff] %v8727_v26  ;;  %v3897_v48 = vld [vmem:[%s11028_s3 + $0x160] sm:$0xff]  ;;  %v2515_v55 = vmul.f32 0.95, %v8727_v26  ;;  %v3896_v0 = vld [vmem:[%s11028_s3 + $0x158] sm:$0xff] }
 0x1d2   :  { %2097 = vmatmul.mubr.f32.vlgmr.msra.gmra.mxu0 %v5587_v3  ;;  %v8706_v7 = vsub.f32 %v2318_v49, %v5123_v57  ;;  %vm11053_vm8 = vcmp.gt.f32.partialorder %v8682_v50, 1.0  ;;  %v2347_v10 = vmul.f32 0.95, %v8682_v50  ;;  %3988 = vmatprep.subr.mxu0 %v5590_v11  ;;  %v3864_v57 = vld [vmem:[%s11028_s3 + $0x58] sm:$0xff] }
 0x1d3   :  { %4178 = vmatprep.subr.mxu1 %v5590_v11  ;;  %3989 = vmatpush1.msra.mxu0 %v3868_v56  ;;  %v5126_v29 = vsel %vm11053_vm8, 1.0, %v5590_v11  ;;  %v2520_v56 = vadd.f32 %v2516_v32, %v7642_v62  ;;  %vm11056_vm8 = vcmp.gt.f32.partialorder %v8727_v26, 1.0 }
 0x1d4   :  { %5374 = vmatprep.mubr.msk.f32.mxu0 %vm2123_vm0, %v11062_v14  ;;  %vm2326_vm6 = vcmp.gt.f32.partialorder %v8706_v7, 1.0  ;;  %v2348_v22 = vmul.f32 0.95, %v8706_v7  ;;  %v2351_v24 = vadd.f32 %v2347_v10, %v8337_v6  ;;  %4179 = vmatpush1.msra.mxu1 %v3900_v5  ;;  %v3958_v7 = vld [vmem:[%s11028_s3 + $0x348] sm:$0xff] }
 0x1d5   :  { %5424 = vmatprep.mubr.msk.f32.mxu1 %vm2125_vm13, %v11062_v14  ;;  %3990 = vmatprep.subr.mxu0 %v5590_v11  ;;  %v5127_v46 = vsel %vm2326_vm6, 1.0, %v5590_v11  ;;  %vm11054_vm13 = vcmp.gt.f32.partialorder %v8695_v59, 1.0  ;;  %v3854_v14 = vld [vmem:[%s11028_s3 + $0x8] sm:$0xff] }
 0x1d6   :  { %4180 = vmatprep.subr.mxu1 %v5590_v11  ;;  %v2352_v23 = vadd.f32 %v2348_v22, %v8354_v19  ;;  %v8745_v39 = vsub.f32 %v2351_v24, %v5126_v29  ;;  %3991 = vmatpush1.msra.mxu0 %v3867_v17  ;;  %v3895_v17 = vld [vmem:[%s11028_s3 + $0x150] sm:$0xff]  ;;  %v5145_v24 = vsel %vm11054_vm13, 1.0, %v5590_v11  ;;  %v2519_v29 = vadd.f32 %v2515_v55, %v7663_v12  ;;  %v3893_v55 = vld [vmem:[%s11028_s3 + $0x140] sm:$0xff] }
 0x1d7   :  { %4181 = vmatpush1.msra.mxu1 %v3899_v21  ;;  %3992 = vmatprep.subr.mxu0 %v5590_v11 }
 0x1d8   :  { %4182 = vmatprep.subr.mxu1 %v5590_v11  ;;  %v8758_v49 = vsub.f32 %v2352_v23, %v5127_v46  ;;  %vm11055_vm0 = vcmp.gt.f32.partialorder %v8745_v39, 1.0  ;;  %v2381_v52 = vmul.f32 0.95, %v8745_v39  ;;  %3993 = vmatpush1.msra.mxu0 %v3866_v35  ;;  %v8798_v35 = vsub.f32 %v2520_v56, %v5145_v24  ;;  %v3894_v23 = vld [vmem:[%s11028_s3 + $0x148] sm:$0xff]  ;;  %v3859_v24 = vld [vmem:[%s11028_s3 + $0x30] sm:$0xff] }
 0x1d9   :  { %4183 = vmatpush1.msra.mxu1 %v3898_v36  ;;  %3994 = vmatprep.subr.mxu0 %v5590_v11  ;;  %v5130_v10 = vsel %vm11055_vm0, 1.0, %v5590_v11  ;;  %v3862_v36 = vld [vmem:[%s11028_s3 + $0x48] sm:$0xff] }
 0x1da   :  { %4184 = vmatprep.subr.mxu1 %v5590_v11  ;;  %vm11059_vm7 = vcmp.gt.f32.partialorder %v8758_v49, 1.0  ;;  %v2382_v3 = vmul.f32 0.95, %v8758_v49  ;;  %v2385_v5 = vadd.f32 %v2381_v52, %v8337_v6  ;;  %3995 = vmatpush1.msra.mxu0 %v3865_v2  ;;  %11129 = vst [vmem:[#allocation7_spill] sm:$0xff] %v8798_v35  ;;  %v3861_v52 = vld [vmem:[%s11028_s3 + $0x40] sm:$0xff] }
 0x1db   :  { %4185 = vmatpush1.msra.mxu1 %v3897_v48  ;;  %3996 = vmatprep.subr.mxu0 %v5590_v11  ;;  %v5131_v32 = vsel %vm11059_vm7, 1.0, %v5590_v11  ;;  %v5144_v48 = vsel %vm11056_vm8, 1.0, %v5590_v11 }
 0x1dc   :  { %4186 = vmatprep.subr.mxu1 %v5590_v11  ;;  %v2386_v21 = vadd.f32 %v2382_v3, %v8354_v19  ;;  %v8789_v22 = vsub.f32 %v2385_v5, %v5130_v10  ;;  %3997 = vmatpush1.msra.mxu0 %v3864_v57  ;;  %v2550_v5 = vmul.f32 0.95, %v8798_v35  ;;  %v3860_v10 = vld [vmem:[%s11028_s3 + $0x38] sm:$0xff] }
 0x1dd   :  { %4187 = vmatpush1.msra.mxu1 %v3896_v0  ;;  %3998 = vmatprep.subr.mxu0 %v5590_v11  ;;  %v8826_v0 = vsub.f32 %v2519_v29, %v5144_v48 }
 0x1de   :  { %4188 = vmatprep.subr.mxu1 %v5590_v11  ;;  %v8808_v2 = vsub.f32 %v2386_v21, %v5131_v32  ;;  %vm11057_vm13 = vcmp.gt.f32.partialorder %v8789_v22, 1.0  ;;  %v2415_v46 = vmul.f32 0.95, %v8789_v22  ;;  %3999 = vmatpush1.msra.mxu0 %v3863_v13  ;;  %v3892_v13 = vld [vmem:[%s11028_s3 + $0x138] sm:$0xff]  ;;  %v3891_v32 = vld [vmem:[%s11028_s3 + $0x130] sm:$0xff]  ;;  %v2554_v48 = vadd.f32 %v2550_v5, %v7642_v62  ;;  %v3857_v5 = vld [vmem:[%s11028_s3 + $0x20] sm:$0xff] }
 0x1df   :  { %4189 = vmatpush1.msra.mxu1 %v3895_v17  ;;  %4000 = vmatprep.subr.mxu0 %v5590_v11  ;;  %11130 = vst [vmem:[#allocation8_spill] sm:$0xff] %v8826_v0  ;;  %v5134_v3 = vsel %vm11057_vm13, 1.0, %v5590_v11  ;;  %vm11060_vm13 = vcmp.gt.f32.partialorder %v8798_v35, 1.0  ;;  %vm11064_vm7 = vcmp.gt.f32.partialorder %v8826_v0, 1.0 }
 0x1e0   :  { %4190 = vmatprep.subr.mxu1 %v5590_v11  ;;  %vm11058_vm0 = vcmp.gt.f32.partialorder %v8808_v2, 1.0  ;;  %v2416_v56 = vmul.f32 0.95, %v8808_v2  ;;  %v2419_v57 = vadd.f32 %v2415_v46, %v8337_v6  ;;  %4001 = vmatpush1.msra.mxu0 %v3862_v36  ;;  %v2549_v46 = vmul.f32 0.95, %v8826_v0  ;;  %v3883_v0 = vld [vmem:[%s11028_s3 + $0xf0] sm:$0xff] }
 0x1e1   :  { %4191 = vmatpush1.msra.mxu1 %v3894_v23  ;;  %4002 = vmatprep.subr.mxu0 %v5590_v11  ;;  %v5135_v29 = vsel %vm11058_vm0, 1.0, %v5590_v11 }
 0x1e2   :  { %4192 = vmatprep.subr.mxu1 %v5590_v11  ;;  %v2420_v17 = vadd.f32 %v2416_v56, %v8354_v19  ;;  %v8841_v21 = vsub.f32 %v2419_v57, %v5134_v3  ;;  %4003 = vmatpush1.msra.mxu0 %v3861_v52  ;;  %v3858_v52 = vld [vmem:[%s11028_s3 + $0x28] sm:$0xff] }
 0x1e3   :  { %4193 = vmatpush1.msra.mxu1 %v3893_v55  ;;  %4004 = vmatprep.subr.mxu0 %v5590_v11  ;;  %v3890_v55 = vld [vmem:[%s11028_s3 + $0x128] sm:$0xff] }
 0x1e4   :  { %4194 = vmatprep.subr.mxu1 %v5590_v11  ;;  %v8854_v36 = vsub.f32 %v2420_v17, %v5135_v29  ;;  %vm11061_vm8 = vcmp.gt.f32.partialorder %v8841_v21, 1.0  ;;  %v2449_v23 = vmul.f32 0.95, %v8841_v21  ;;  %4005 = vmatpush1.msra.mxu0 %v3860_v10  ;;  %v3889_v10 = vld [vmem:[%s11028_s3 + $0x120] sm:$0xff]  ;;  %v2553_v29 = vadd.f32 %v2549_v46, %v7663_v12  ;;  %v3888_v46 = vld [vmem:[%s11028_s3 + $0x118] sm:$0xff] }
 0x1e5   :  { %4195 = vmatpush1.msra.mxu1 %v3892_v13  ;;  %4006 = vmatprep.subr.mxu0 %v5590_v11  ;;  %v5138_v3 = vsel %vm11061_vm8, 1.0, %v5590_v11 }
 0x1e6   :  { %4196 = vmatprep.subr.mxu1 %v5590_v11  ;;  %vm11067_vm0 = vcmp.gt.f32.partialorder %v8854_v36, 1.0  ;;  %v2450_v56 = vmul.f32 0.95, %v8854_v36  ;;  %v2453_v57 = vadd.f32 %v2449_v23, %v8337_v6  ;;  %4007 = vmatpush1.msra.mxu0 %v3859_v24  ;;  %v5149_v24 = vsel %vm11060_vm13, 1.0, %v5590_v11 }
 0x1e7   :  { %4197 = vmatpush1.msra.mxu1 %v3891_v32  ;;  %4008 = vmatprep.subr.mxu0 %v5590_v11  ;;  %v5139_v32 = vsel %vm11067_vm0, 1.0, %v5590_v11  ;;  %v8894_v23 = vsub.f32 %v2554_v48, %v5149_v24  ;;  %v5148_v48 = vsel %vm11064_vm7, 1.0, %v5590_v11 }
 0x1e8   :  { %4198 = vmatprep.subr.mxu1 %v5590_v11  ;;  %v2454_v13 = vadd.f32 %v2450_v56, %v8354_v19  ;;  %v8885_v17 = vsub.f32 %v2453_v57, %v5138_v3  ;;  %4009 = vmatpush1.msra.mxu0 %v3858_v52  ;;  %v3856_v56 = vld [vmem:[%s11028_s3 + $0x18] sm:$0xff]  ;;  %v3855_v57 = vld [vmem:[%s11028_s3 + $0x10] sm:$0xff] }
 0x1e9   :  { %4199 = vmatpush1.msra.mxu1 %v3890_v55  ;;  %11131 = vst [vmem:[#allocation9_spill] sm:$0xff] %v8894_v23  ;;  %4010 = vmatprep.subr.mxu0 %v5590_v11  ;;  %v3887_v3 = vld [vmem:[%s11028_s3 + $0x110] sm:$0xff] }
 0x1ea   :  { %4200 = vmatprep.subr.mxu1 %v5590_v11  ;;  %v8904_v52 = vsub.f32 %v2454_v13, %v5139_v32  ;;  %vm11065_vm13 = vcmp.gt.f32.partialorder %v8885_v17, 1.0  ;;  %v2483_v55 = vmul.f32 0.95, %v8885_v17  ;;  %4011 = vmatpush1.msra.mxu0 %v3857_v5  ;;  %v8922_v13 = vsub.f32 %v2553_v29, %v5148_v48  ;;  %v3886_v29 = vld [vmem:[%s11028_s3 + $0x108] sm:$0xff] }
 0x1eb   :  { %4201 = vmatpush1.msra.mxu1 %v3889_v10  ;;  %4012 = vmatprep.subr.mxu0 %v5590_v11  ;;  %v5142_v24 = vsel %vm11065_vm13, 1.0, %v5590_v11  ;;  %v2584_v32 = vmul.f32 0.95, %v8894_v23  ;;  %vm11073_vm13 = vcmp.gt.f32.partialorder %v8894_v23, 1.0  ;;  %v3877_v23 = vld [vmem:[%s11028_s3 + $0xc0] sm:$0xff] }
 0x1ec   :  { %4202 = vmatprep.subr.mxu1 %v5590_v11  ;;  %vm11066_vm8 = vcmp.gt.f32.partialorder %v8904_v52, 1.0  ;;  %v2484_v5 = vmul.f32 0.95, %v8904_v52  ;;  %v2487_v10 = vadd.f32 %v2483_v55, %v8337_v6  ;;  %11132 = vst [vmem:[#allocation10_spill] sm:$0xff] %v8922_v13  ;;  %4013 = vmatpush1.msra.mxu0 %v3856_v56  ;;  %v3853_v55 = vld [vmem:[%s11028_s3] sm:$0xff]  ;;  %vm11076_vm0 = vcmp.gt.f32.partialorder %v8922_v13, 1.0 }
 0x1ed   :  { %4203 = vmatpush1.msra.mxu1 %v3888_v46  ;;  %4014 = vmatprep.subr.mxu0 %v5590_v11  ;;  %v5143_v48 = vsel %vm11066_vm8, 1.0, %v5590_v11  ;;  %v5153_v35 = vsel %vm11073_vm13, 1.0, %v5590_v11 }
 0x1ee   :  { %4204 = vmatprep.subr.mxu1 %v5590_v11  ;;  %v2488_v56 = vadd.f32 %v2484_v5, %v8354_v19  ;;  %v8937_v46 = vsub.f32 %v2487_v10, %v5142_v24  ;;  %4015 = vmatpush1.msra.mxu0 %v3855_v57  ;;  %v3885_v5 = vld [vmem:[%s11028_s3 + $0x100] sm:$0xff]  ;;  %v2588_v24 = vadd.f32 %v2584_v32, %v7642_v62 }
 0x1ef   :  { %4205 = vmatpush1.msra.mxu1 %v3887_v3  ;;  %4016 = vmatprep.subr.mxu0 %v5590_v11  ;;  %v2583_v3 = vmul.f32 0.95, %v8922_v13  ;;  %v3880_v13 = vld [vmem:[%s11028_s3 + $0xd8] sm:$0xff] }
 0x1f0   :  { %11133 = vst [vmem:[#allocation11_spill] sm:$0xff] %v8937_v46  ;;  %4206 = vmatprep.subr.mxu1 %v5590_v11  ;;  %v8950_v10 = vsub.f32 %v2488_v56, %v5143_v48  ;;  %vm11074_vm7 = vcmp.gt.f32.partialorder %v8937_v46, 1.0  ;;  %v2517_v57 = vmul.f32 0.95, %v8937_v46  ;;  %4017 = vmatpush1.msra.mxu0 %v3854_v14  ;;  %v3884_v56 = vld [vmem:[%s11028_s3 + $0xf8] sm:$0xff]  ;;  %v8990_v59 = vsub.f32 %v2588_v24, %v5153_v35  ;;  %v3881_v24 = vld [vmem:[%s11028_s3 + $0xe0] sm:$0xff] }
 0x1f1   :  { %4207 = vmatpush1.msra.mxu1 %v3886_v29  ;;  %4018 = vmatprep.subr.mxu0 %v5590_v11  ;;  %v3916_v48 = vld [vmem:[%s11028_s3 + $0x1f8] sm:$0xff]  ;;  %v5146_v32 = vsel %vm11074_vm7, 1.0, %v5590_v11  ;;  %v2587_v46 = vadd.f32 %v2583_v3, %v7663_v12  ;;  %v3914_v3 = vld [vmem:[%s11028_s3 + $0x1e8] sm:$0xff]  ;;  %v5152_v35 = vsel %vm11076_vm0, 1.0, %v5590_v11 }
 0x1f2   :  { %11134 = vst [vmem:[#allocation12_spill] sm:$0xff] %v8950_v10  ;;  %4208 = vmatprep.subr.mxu1 %v5590_v11  ;;  %vm11079_vm8 = vcmp.gt.f32.partialorder %v8950_v10, 1.0  ;;  %v2518_v14 = vmul.f32 0.95, %v8950_v10  ;;  %v2521_v29 = vadd.f32 %v2517_v57, %v8337_v6  ;;  %4019 = vmatpush1.msra.mxu0 %v3853_v55  ;;  %v3915_v57 = vld [vmem:[%s11028_s3 + $0x1f0] sm:$0xff]  ;;  %11136 = vst [vmem:[#allocation14_spill] sm:$0xff] %v8990_v59 }
 0x1f3   :  { %4209 = vmatpush1.msra.mxu1 %v3885_v5  ;;  %4020 = vmatprep.subr.mxu0 %v5590_v11  ;;  %v5147_v26 = vsel %vm11079_vm8, 1.0, %v5590_v11 }
 0x1f4   :  { %4210 = vmatprep.subr.mxu1 %v5590_v11  ;;  %v2522_v55 = vadd.f32 %v2518_v14, %v8354_v19  ;;  %v8981_v5 = vsub.f32 %v2521_v29, %v5146_v32  ;;  %4021 = vmatpush2.msra.mxu0 %v3884_v56  ;;  %v3882_v14 = vld [vmem:[%s11028_s3 + $0xe8] sm:$0xff]  ;;  %v9018_v32 = vsub.f32 %v2587_v46, %v5152_v35  ;;  %v3912_v46 = vld [vmem:[%s11028_s3 + $0x1d8] sm:$0xff] }
 0x1f5   :  { %4211 = vmatpush2.msra.mxu1 %v3916_v48  ;;  %4022 = vmatprep.subr.mxu0 %v5590_v11 }
 0x1f6   :  { %11135 = vst [vmem:[#allocation13_spill] sm:$0xff] %v8981_v5  ;;  %4212 = vmatprep.subr.mxu1 %v5590_v11  ;;  %v9000_v56 = vsub.f32 %v2522_v55, %v5147_v26  ;;  %vm11077_vm13 = vcmp.gt.f32.partialorder %v8981_v5, 1.0  ;;  %v2551_v48 = vmul.f32 0.95, %v8981_v5  ;;  %4023 = vmatpush2.msra.mxu0 %v3883_v0  ;;  %v3913_v26 = vld [vmem:[%s11028_s3 + $0x1e0] sm:$0xff]  ;;  %11138 = vst [vmem:[#allocation16_spill] sm:$0xff] %v9018_v32 }
 0x1f7   :  { %4213 = vmatpush2.msra.mxu1 %v3915_v57  ;;  %4024 = vmatprep.subr.mxu0 %v5590_v11  ;;  %v5150_v57 = vsel %vm11077_vm13, 1.0, %v5590_v11  ;;  %v2618_v55 = vmul.f32 0.95, %v8990_v59  ;;  %vm11085_vm13 = vcmp.gt.f32.partialorder %v8990_v59, 1.0  ;;  %vm11090_vm8 = vcmp.gt.f32.partialorder %v9018_v32, 1.0 }
 0x1f8   :  { %11137 = vst [vmem:[#allocation15_spill] sm:$0xff] %v9000_v56  ;;  %4214 = vmatprep.subr.mxu1 %v5590_v11  ;;  %vm11078_vm7 = vcmp.gt.f32.partialorder %v9000_v56, 1.0  ;;  %v2552_v0 = vmul.f32 0.95, %v9000_v56  ;;  %v2555_v29 = vadd.f32 %v2551_v48, %v8337_v6  ;;  %4025 = vmatpush2.msra.mxu0 %v3882_v14  ;;  %v3879_v48 = vld [vmem:[%s11028_s3 + $0xd0] sm:$0xff] }
 0x1f9   :  { %4215 = vmatpush2.msra.mxu1 %v3914_v3  ;;  %4026 = vmatprep.subr.mxu0 %v5590_v11  ;;  %v5151_v35 = vsel %vm11078_vm7, 1.0, %v5590_v11 }
 0x1fa   :  { %4216 = vmatprep.subr.mxu1 %v5590_v11  ;;  %v2556_v14 = vadd.f32 %v2552_v0, %v8354_v19  ;;  %v9033_v3 = vsub.f32 %v2555_v29, %v5150_v57  ;;  %4027 = vmatpush2.msra.mxu0 %v3881_v24  ;;  %v3911_v0 = vld [vmem:[%s11028_s3 + $0x1d0] sm:$0xff]  ;;  %v2622_v57 = vadd.f32 %v2618_v55, %v7642_v62 }
 0x1fb   :  { %4217 = vmatpush2.msra.mxu1 %v3913_v26  ;;  %4028 = vmatprep.subr.mxu0 %v5590_v11  ;;  %v2617_v26 = vmul.f32 0.95, %v9018_v32  ;;  %v3874_v32 = vld [vmem:[%s11028_s3 + $0xa8] sm:$0xff] }
 0x1fc   :  { %11139 = vst [vmem:[#allocation17_spill] sm:$0xff] %v9033_v3  ;;  %4218 = vmatprep.subr.mxu1 %v5590_v11  ;;  %v9046_v29 = vsub.f32 %v2556_v14, %v5151_v35  ;;  %vm11086_vm0 = vcmp.gt.f32.partialorder %v9033_v3, 1.0  ;;  %v2585_v24 = vmul.f32 0.95, %v9033_v3  ;;  %4029 = vmatpush2.msra.mxu0 %v3880_v13  ;;  %v3878_v14 = vld [vmem:[%s11028_s3 + $0xc8] sm:$0xff] }
 0x1fd   :  { %4219 = vmatpush2.msra.mxu1 %v3912_v46  ;;  %4030 = vmatprep.subr.mxu0 %v5590_v11  ;;  %v3910_v35 = vld [vmem:[%s11028_s3 + $0x1c8] sm:$0xff]  ;;  %v5154_v55 = vsel %vm11086_vm0, 1.0, %v5590_v11  ;;  %v2621_v5 = vadd.f32 %v2617_v26, %v7663_v12  ;;  %v3908_v26 = vld [vmem:[%s11028_s3 + $0x1b8] sm:$0xff] }
 0x1fe   :  { %4220 = vmatprep.subr.mxu1 %v5590_v11  ;;  %vm11092_vm7 = vcmp.gt.f32.partialorder %v9046_v29, 1.0  ;;  %v2586_v13 = vmul.f32 0.95, %v9046_v29  ;;  %v2589_v46 = vadd.f32 %v2585_v24, %v8337_v6  ;;  %4031 = vmatpush2.msra.mxu0 %v3879_v48  ;;  %v3909_v24 = vld [vmem:[%s11028_s3 + $0x1c0] sm:$0xff]  ;;  %v5157_v48 = vsel %vm11085_vm13, 1.0, %v5590_v11 }
 0x1ff   :  { %4221 = vmatpush2.msra.mxu1 %v3911_v0  ;;  %4032 = vmatprep.subr.mxu0 %v5590_v11  ;;  %v5155_v56 = vsel %vm11092_vm7, 1.0, %v5590_v11  ;;  %v9086_v10 = vsub.f32 %v2622_v57, %v5157_v48  ;;  %v5156_v57 = vsel %vm11090_vm8, 1.0, %v5590_v11 }
 0x200   :  { %4222 = vmatprep.subr.mxu1 %v5590_v11  ;;  %v2590_v0 = vadd.f32 %v2586_v13, %v8354_v19  ;;  %v9080_v3 = vsub.f32 %v2589_v46, %v5154_v55  ;;  %4033 = vmatpush2.msra.mxu0 %v3878_v14  ;;  %v3876_v13 = vld [vmem:[%s11028_s3 + $0xb8] sm:$0xff]  ;;  %v3875_v46 = vld [vmem:[%s11028_s3 + $0xb0] sm:$0xff]  ;;  %v9113_v55 = vsub.f32 %v2621_v5, %v5156_v57  ;;  %v3906_v5 = vld [vmem:[%s11028_s3 + $0x1a8] sm:$0xff] }
 0x201   :  { %4223 = vmatpush2.msra.mxu1 %v3910_v35  ;;  %11141 = vst [vmem:[#allocation19_spill] sm:$0xff] %v9086_v10  ;;  %4034 = vmatprep.subr.mxu0 %v5590_v11  ;;  %v3873_v57 = vld [vmem:[%s11028_s3 + $0xa0] sm:$0xff] }
 0x202   :  { %11140 = vst [vmem:[#allocation18_spill] sm:$0xff] %v9080_v3  ;;  %4224 = vmatprep.subr.mxu1 %v5590_v11  ;;  %v9096_v14 = vsub.f32 %v2590_v0, %v5155_v56  ;;  %vm11088_vm13 = vcmp.gt.f32.partialorder %v9080_v3, 1.0  ;;  %v2619_v35 = vmul.f32 0.95, %v9080_v3  ;;  %4035 = vmatpush2.msra.mxu0 %v3877_v23  ;;  %v3907_v56 = vld [vmem:[%s11028_s3 + $0x1b0] sm:$0xff]  ;;  %v3872_v3 = vld [vmem:[%s11028_s3 + $0x98] sm:$0xff] }
 0x203   :  { %4225 = vmatpush2.msra.mxu1 %v3909_v24  ;;  %4036 = vmatprep.subr.mxu0 %v5590_v11  ;;  %v5158_v48 = vsel %vm11088_vm13, 1.0, %v5590_v11  ;;  %v2652_v0 = vmul.f32 0.95, %v9086_v10  ;;  %vm2630_vm13 = vcmp.gt.f32.partialorder %v9086_v10, 1.0  ;;  %vm2629_vm7 = vcmp.gt.f32.partialorder %v9113_v55, 1.0  ;;  %v3869_v10 = vld [vmem:[%s11028_s3 + $0x80] sm:$0xff] }
 0x204   :  { %11142 = vst [vmem:[#allocation20_spill] sm:$0xff] %v9096_v14  ;;  %4226 = vmatprep.subr.mxu1 %v5590_v11  ;;  %vm11091_vm0 = vcmp.gt.f32.partialorder %v9096_v14, 1.0  ;;  %v2620_v23 = vmul.f32 0.95, %v9096_v14  ;;  %v2623_v24 = vadd.f32 %v2619_v35, %v8337_v6  ;;  %4037 = vmatpush2.msra.mxu0 %v3876_v13 }
 0x205   :  { %4227 = vmatpush2.msra.mxu1 %v3908_v26  ;;  %4038 = vmatprep.subr.mxu0 %v5590_v11  ;;  %v5159_v35 = vsel %vm11091_vm0, 1.0, %v5590_v11 }
 0x206   :  { %4228 = vmatprep.subr.mxu1 %v5590_v11  ;;  %v2624_v13 = vadd.f32 %v2620_v23, %v8354_v19  ;;  %v9129_v26 = vsub.f32 %v2623_v24, %v5158_v48  ;;  %4039 = vmatpush2.msra.mxu0 %v3875_v46  ;;  %v3905_v23 = vld [vmem:[%s11028_s3 + $0x1a0] sm:$0xff]  ;;  %v2651_v46 = vmul.f32 0.95, %v9113_v55  ;;  %v2656_v48 = vadd.f32 %v2652_v0, %v7642_v62 }
 0x207   :  { %4229 = vmatpush2.msra.mxu1 %v3907_v56  ;;  %4040 = vmatprep.subr.mxu0 %v5590_v11 }
 0x208   :  { %11143 = vst [vmem:[#allocation21_spill] sm:$0xff] %v9129_v26  ;;  %4230 = vmatprep.subr.mxu1 %v5590_v11  ;;  %v9142_v24 = vsub.f32 %v2624_v13, %v5159_v35  ;;  %v2653_v56 = vmul.f32 0.95, %v9129_v26  ;;  %4041 = vmatpush2.msra.mxu0 %v3874_v32  ;;  %v3904_v13 = vld [vmem:[%s11028_s3 + $0x198] sm:$0xff]  ;;  %vm11098_vm0 = vcmp.gt.f32.partialorder %v9129_v26, 1.0  ;;  %v3903_v35 = vld [vmem:[%s11028_s3 + $0x190] sm:$0xff] }
 0x209   :  { %4231 = vmatpush2.msra.mxu1 %v3906_v5  ;;  %4042 = vmatprep.subr.mxu0 %v5590_v11  ;;  %v3871_v5 = vld [vmem:[%s11028_s3 + $0x90] sm:$0xff]  ;;  %v5162_v59 = vsel %vm11098_vm0, 1.0, %v5590_v11  ;;  %v5160_v26 = vsel %vm2629_vm7, 1.0, %v5590_v11 }
 0x20a   :  { %11144 = vst [vmem:[#allocation22_spill] sm:$0xff] %v9142_v24  ;;  %4232 = vmatprep.subr.mxu1 %v5590_v11  ;;  %vm2632_vm8 = vcmp.gt.f32.partialorder %v9142_v24, 1.0  ;;  %v2654_v32 = vmul.f32 0.95, %v9142_v24  ;;  %v2657_v0 = vadd.f32 %v2653_v56, %v8337_v6  ;;  %4043 = vmatpush2.msra.mxu0 %v3873_v57  ;;  %v2655_v56 = vadd.f32 %v2651_v46, %v7663_v12  ;;  %v3902_v46 = vld [vmem:[%s11028_s3 + $0x188] sm:$0xff] }
 0x20b   :  { %4233 = vmatpush2.msra.mxu1 %v3905_v23  ;;  %4044 = vmatprep.subr.mxu0 %v5590_v11  ;;  %v5161_v57 = vsel %vm2630_vm13, 1.0, %v5590_v11  ;;  %v5163_v23 = vsel %vm2632_vm8, 1.0, %v5590_v11 }
 0x20c   :  { %4234 = vmatprep.subr.mxu1 %v5590_v11  ;;  %v2658_v14 = vadd.f32 %v2654_v32, %v8354_v19  ;;  %4045 = vmatpush2.msra.mxu0 %v3872_v3  ;;  %v3870_v3 = vld [vmem:[%s11028_s3 + $0x88] sm:$0xff]  ;;  %v9192_v24 = vsub.f32 %v2657_v0, %v5162_v59 }
 0x20d   :  { %4235 = vmatpush2.msra.mxu1 %v3904_v13  ;;  %4046 = vmatprep.subr.mxu0 %v5590_v11  ;;  %v9188_v13 = vsub.f32 %v2656_v48, %v5161_v57  ;;  %v9206_v48 = vsub.f32 %v2655_v56, %v5160_v26  ;;  %v3932_v26 = vld [vmem:[%s11028_s3 + $0x278] sm:$0xff] }
 0x20e   :  { %4236 = vmatprep.subr.mxu1 %v5590_v11  ;;  %v9190_v32 = vsub.f32 %v2658_v14, %v5163_v23  ;;  %4047 = vmatpush2.msra.mxu0 %v3871_v5  ;;  %v3901_v14 = vld [vmem:[%s11028_s3 + $0x180] sm:$0xff]  ;;  %v2687_v5 = vmul.f32 0.95, %v9192_v24  ;;  %v3964_v56 = vld [vmem:[%s11028_s3 + $0x378] sm:$0xff] }
 0x20f   :  { %4237 = vmatpush2.msra.mxu1 %v3903_v35  ;;  %4048 = vmatprep.subr.mxu0 %v5590_v11  ;;  %v2686_v0 = vmul.f32 0.95, %v9188_v13  ;;  %v11145_v35 = vmov 1.0  }
 0x210   :  { %4238 = vmatprep.subr.mxu1 %v5590_v11  ;;  %v2688_v59 = vmul.f32 0.95, %v9190_v32  ;;  %4049 = vmatpush2.msra.mxu0 %v3870_v3  ;;  %vm2666_vm0 = vcmp.gt.f32.partialorder %v9190_v32, 1.0  ;;  %v2691_v3 = vadd.f32 %v2687_v5, %v8337_v6  ;;  %v3930_v5 = vld [vmem:[%s11028_s3 + $0x268] sm:$0xff] }
 0x211   :  { %4239 = vmatpush2.msra.mxu1 %v3902_v46  ;;  %4050 = vmatprep.subr.mxu0 %v5590_v11  ;;  %v2690_v23 = vadd.f32 %v2686_v0, %v7642_v62  ;;  %v5167_v37 = vsel %vm2666_vm0, 1.0, %v5590_v11  ;;  %v3963_v46 = vld [vmem:[%s11028_s3 + $0x370] sm:$0xff] }
 0x212   :  { %4240 = vmatprep.subr.mxu1 %v5590_v11  ;;  %4051 = vmatpush2.msra.mxu0 %v3869_v10  ;;  %v2685_v10 = vmul.f32 0.95, %v9206_v48  ;;  %v2692_v57 = vadd.f32 %v2688_v59, %v8354_v19 }
 0x213   :  { %4241 = vmatpush2.msra.mxu1 %v3901_v14  ;;  %5375 = vmatmul.mubr.msk.f32.vlgmr.msra.gmra.mxu0 %vm2122_vm1, %v11145_v35  ;;  %vm2664_vm1 = vcmp.gt.f32.partialorder %v9188_v13, 1.0 }
 0x214   :  { %5425 = vmatmul.mubr.msk.f32.vlgmr.msra.gmra.mxu1 %vm2124_vm14, %v11145_v35  ;;  %5376 = vmatprep.mubr.msk.f32.mxu0 %vm2154_vm2, %v11145_v35  ;;  %vm2665_vm14 = vcmp.gt.f32.partialorder %v9192_v24, 1.0  ;;  %vm2663_vm2 = vcmp.gt.f32.partialorder %v9206_v48, 1.0  ;;  %v9255_v14 = vsub.f32 %v2692_v57, %v5167_v37  ;;  %v2689_v59 = vadd.f32 %v2685_v10, %v7663_v12 }
 0x215   :  { %5426 = vmatprep.mubr.msk.f32.mxu1 %vm2156_vm11, %v11145_v35  ;;  %4368 = vmatprep.subr.mxu0 %v5590_v11  ;;  %v5165_v44 = vsel %vm2664_vm1, 1.0, %v5590_v11  ;;  %v5166_v43 = vsel %vm2665_vm14, 1.0, %v5590_v11  ;;  %v5164_v28 = vsel %vm2663_vm2, 1.0, %v5590_v11  ;;  %v949_v37 = vsub.s32 5, %v7516_v1 }
 0x216   :  { %4558 = vmatprep.subr.mxu1 %v5590_v11  ;;  %4369 = vmatpush1.msra.mxu0 %v3932_v26  ;;  %v9272_v0 = vsub.f32 %v2690_v23, %v5165_v44  ;;  %v9274_v8 = vsub.f32 %v2691_v3, %v5166_v43  ;;  %v3962_v26 = vld [vmem:[%s11028_s3 + $0x368] sm:$0xff]  ;;  %v9292_v10 = vsub.f32 %v2689_v59, %v5164_v28  ;;  %vm2700_vm11 = vcmp.gt.f32.partialorder %v9255_v14, 1.0 }
 0x217   :  { %4559 = vmatpush1.msra.mxu1 %v3964_v56  ;;  %5377 = vmatmul.mubr.msk.f32.gmra.mxu0 %vm2153_vm3, %v11145_v35  ;;  %v2722_v56 = vmul.f32 0.95, %v9255_v14  ;;  %vm11146_vm3 = vcmp.gt.f32.partialorder %v7910_v45, 1.0  ;;  %v3929_v45 = vld [vmem:[%s11028_s3 + $0x260] sm:$0xff] }
 0x218   :  { %5427 = vmatmul.mubr.msk.f32.gmra.mxu1 %vm2155_vm15, %v11145_v35  ;;  %5378 = vmatprep.mubr.msk.f32.mxu0 %vm2188_vm4, %v11145_v35  ;;  %vm11147_vm4 = vcmp.gt.f32.partialorder %v8538_v61, 1.0  ;;  %v2720_v20 = vmul.f32 0.95, %v9272_v0  ;;  %v2721_v15 = vmul.f32 0.95, %v9274_v8  ;;  %v3961_v61 = vld [vmem:[%s11028_s3 + $0x360] sm:$0xff] }
 0x219   :  { %5428 = vmatprep.mubr.msk.f32.mxu1 %vm2190_vm9, %v11145_v35  ;;  %4370 = vmatprep.subr.mxu0 %v5590_v11  ;;  %vm11149_vm9 = vcmp.gt.f32.partialorder %v8521_v54, 1.0  ;;  %v2719_v57 = vmul.f32 0.95, %v9292_v10  ;;  %v2726_v23 = vadd.f32 %v2722_v56, %v8354_v19  ;;  %vm11151_vm15 = vcmp.gt.f32.partialorder %v8600_v47, 1.0  ;;  %v1601_v47 = vpop.f32.mrf.mxu0  ;;  %v1672_v56 = vpop.f32.mrf.mxu1 }
 0x21a   :  { %4560 = vmatprep.subr.mxu1 %v5590_v11  ;;  %4371 = vmatpush1.msra.mxu0 %v3931_v51  ;;  %v2724_v54 = vadd.f32 %v2720_v20, %v7642_v62  ;;  %v2725_v3 = vadd.f32 %v2721_v15, %v8337_v6  ;;  %v3928_v51 = vld [vmem:[%s11028_s3 + $0x258] sm:$0xff]  ;;  %v3927_v15 = vld [vmem:[%s11028_s3 + $0x250] sm:$0xff] }
 0x21b   :  { %4561 = vmatpush1.msra.mxu1 %v3963_v46  ;;  %5379 = vmatmul.mubr.msk.f32.gmra.mxu0 %vm2187_vm5, %v11145_v35  ;;  %vm11148_vm5 = vcmp.gt.f32.partialorder %v7933_v53, 1.0  ;;  %v945_v53 = vsub.s32 4, %v7516_v1  ;;  %v3960_v46 = vld [vmem:[%s11028_s3 + $0x358] sm:$0xff]  ;;  %v2723_v44 = vadd.f32 %v2719_v57, %v7663_v12  ;;  %v1603_v20 = vpop.f32.mrf.mxu0 }
 0x21c   :  { %5429 = vmatmul.mubr.msk.f32.gmra.mxu1 %vm2189_vm12, %v11145_v35  ;;  %5380 = vmatprep.mubr.msk.f32.mxu0 %vm11146_vm3, %v11145_v35  ;;  %vm11150_vm12 = vcmp.gt.f32.partialorder %v7998_v63, 1.0  ;;  %vm2698_vm3 = vcmp.gt.f32.partialorder %v9272_v0, 1.0  ;;  %v5171_v63 = vsel %vm2700_vm11, 1.0, %v5590_v11 }
 0x21d   :  { %5430 = vmatprep.mubr.msk.f32.mxu1 %vm11147_vm4, %v11145_v35  ;;  %4372 = vmatprep.subr.mxu0 %v5590_v11  ;;  %vm11099_vm4 = vcmp.gt.f32.partialorder %v9274_v8, 1.0  ;;  %v9349_v59 = vsub.f32 %v2726_v23, %v5171_v63  ;;  %v5169_v43 = vsel %vm2698_vm3, 1.0, %v5590_v11 }
 0x21e   :  { %4562 = vmatprep.subr.mxu1 %v5590_v11  ;;  %4373 = vmatpush1.msra.mxu0 %v3930_v5  ;;  %v5170_v28 = vsel %vm11099_vm4, 1.0, %v5590_v11  ;;  %v9369_v5 = vsub.f32 %v2724_v54, %v5169_v43  ;;  %v1674_v54 = vpop.f32.mrf.mxu1 }
 0x21f   :  { %4563 = vmatpush1.msra.mxu1 %v3962_v26  ;;  %5381 = vmatmul.mubr.msk.f32.gmra.mxu0 %vm11148_vm5, %v11145_v35  ;;  %vm11152_vm5 = vcmp.gt.f32.partialorder %v8021_v30, 1.0  ;;  %v5588_v30 = vld [vmem:[%s11027_s2] sm:$0xff] }
 0x220   :  { %5431 = vmatmul.mubr.msk.f32.gmra.mxu1 %vm11149_vm9, %v11145_v35  ;;  %5382 = vmatprep.mubr.msk.f32.mxu0 %vm11150_vm12, %v11145_v35  ;;  %vm11153_vm9 = vcmp.gt.f32.partialorder %v8577_v31, 1.0  ;;  %vm11106_vm12 = vcmp.gt.f32.partialorder %v9292_v10, 1.0  ;;  %v946_v31 = vrot.slane %v5588_v30, %v945_v53  ;;  %v950_v26 = vrot.slane %v5588_v30, %v949_v37  ;;  %v3925_v30 = vld [vmem:[%s11028_s3 + $0x240] sm:$0xff] }
 0x221   :  { %5432 = vmatprep.mubr.msk.f32.mxu1 %vm11151_vm15, %v11145_v35  ;;  %4374 = vmatprep.subr.mxu0 %v5590_v11  ;;  %vm11154_vm15 = vcmp.gt.f32.partialorder %v8086_v58, 1.0  ;;  %v9371_v58 = vsub.f32 %v2725_v3, %v5170_v28  ;;  %v5168_v27 = vsel %vm11106_vm12, 1.0, %v5590_v11  ;;  %vm11175_vm12 = vcmp.gt.f32.partialorder %v8885_v17, 1.0  ;;  %v11176_v17 = vld [vmem:[#allocation5_spill] sm:$0xff] }
 0x222   :  { %4564 = vmatprep.subr.mxu1 %v5590_v11  ;;  %4375 = vmatpush1.msra.mxu0 %v3929_v45  ;;  %v3959_v45 = vld [vmem:[%s11028_s3 + $0x350] sm:$0xff]  ;;  %v9389_v57 = vsub.f32 %v2723_v44, %v5168_v27  ;;  %v1602_v23 = vadd.f32 %v1601_v47, %v946_v31  ;;  %v1604_v53 = vadd.f32 %v1603_v20, %v950_v26  ;;  %v3957_v31 = vld [vmem:[%s11028_s3 + $0x340] sm:$0xff] }
 0x223   :  { %4565 = vmatpush1.msra.mxu1 %v3961_v61  ;;  %5383 = vmatmul.mubr.msk.f32.gmra.mxu0 %vm11152_vm5, %v11145_v35  ;;  %vm11156_vm5 = vcmp.gt.f32.partialorder %v8641_v16, 1.0  ;;  %v2756_v61 = vmul.f32 0.95, %v9349_v59  ;;  %v2755_v16 = vmul.f32 0.95, %v9371_v58 }
 0x224   :  { %5433 = vmatmul.mubr.msk.f32.gmra.mxu1 %vm11153_vm9, %v11145_v35  ;;  %5384 = vmatprep.mubr.msk.f32.mxu0 %vm11154_vm15, %v11145_v35  ;;  %vm11157_vm9 = vcmp.gt.f32.partialorder %v8170_v34, 1.0  ;;  %vm11158_vm15 = vcmp.gt.f32.partialorder %v8193_v42, 1.0  ;;  %v3926_v34 = vld [vmem:[%s11028_s3 + $0x248] sm:$0xff]  ;;  %v2753_v3 = vmul.f32 0.95, %v9389_v57  ;;  %v1673_v42 = vadd.f32 %v1672_v56, %v1602_v23  ;;  %v3956_v23 = vld [vmem:[%s11028_s3 + $0x338] sm:$0xff] }
 0x225   :  { %5434 = vmatprep.mubr.msk.f32.mxu1 %vm2292_vm10, %v11145_v35  ;;  %4376 = vmatprep.subr.mxu0 %v5590_v11  ;;  %vm11155_vm10 = vcmp.gt.f32.partialorder %v8103_v4, 1.0  ;;  %v2754_v4 = vmul.f32 0.95, %v9369_v5  ;;  %v2760_v37 = vadd.f32 %v2756_v61, %v8354_v19  ;;  %vm11101_vm4 = vcmp.gt.f32.partialorder %v9389_v57, 1.0  ;;  %v3924_v61 = vld [vmem:[%s11028_s3 + $0x238] sm:$0xff] }
 0x226   :  { %4566 = vmatprep.subr.mxu1 %v5590_v11  ;;  %4377 = vmatpush1.msra.mxu0 %v3928_v51  ;;  %v2759_v51 = vadd.f32 %v2755_v16, %v8337_v6 }
 0x227   :  { %4567 = vmatpush1.msra.mxu1 %v3960_v46  ;;  %5385 = vmatmul.mubr.msk.f32.gmra.mxu0 %vm11155_vm10, %v11145_v35  ;;  %vm11159_vm10 = vcmp.gt.f32.partialorder %v8682_v50, 1.0  ;;  %v1814_v50 = vpop.f32.mrf.mxu1  ;;  %v2758_v47 = vadd.f32 %v2754_v4, %v7642_v62 }
 0x228   :  { %5435 = vmatmul.mubr.msk.f32.gmra.mxu1 %vm11156_vm5, %v11145_v35  ;;  %5386 = vmatprep.mubr.msk.f32.mxu0 %vm11157_vm9, %v11145_v35  ;;  %vm11160_vm5 = vcmp.gt.f32.partialorder %v8260_v38, 1.0  ;;  %vm11161_vm9 = vcmp.gt.f32.partialorder %v8758_v49, 1.0  ;;  %v1675_v38 = vadd.f32 %v1674_v54, %v1604_v53 }
 0x229   :  { %5436 = vmatprep.mubr.msk.f32.mxu1 %vm2326_vm6, %v11145_v35  ;;  %4378 = vmatprep.subr.mxu0 %v5590_v11  ;;  %vm11103_vm6 = vcmp.gt.f32.partialorder %v9349_v59, 1.0  ;;  %v1816_v56 = vpop.f32.mrf.mxu1 }
 0x22a   :  { %4568 = vmatprep.subr.mxu1 %v5590_v11  ;;  %4379 = vmatpush1.msra.mxu0 %v3927_v15  ;;  %v5175_v49 = vsel %vm11103_vm6, 1.0, %v5590_v11  ;;  %v5172_v15 = vsel %vm11101_vm4, 1.0, %v5590_v11  ;;  %vm11168_vm4 = vcmp.gt.f32.partialorder %v8472_v25, 1.0 }
 0x22b   :  { %4569 = vmatpush1.msra.mxu1 %v3959_v45  ;;  %5387 = vmatmul.mubr.msk.f32.gmra.mxu0 %vm11158_vm15, %v11145_v35  ;;  %vm11105_vm15 = vcmp.gt.f32.partialorder %v9369_v5, 1.0  ;;  %v9444_v43 = vsub.f32 %v2760_v37, %v5175_v49 }
 0x22c   :  { %5437 = vmatmul.mubr.msk.f32.gmra.mxu1 %vm11159_vm10, %v11145_v35  ;;  %5388 = vmatprep.mubr.msk.f32.mxu0 %vm11160_vm5, %v11145_v35  ;;  %vm11100_vm10 = vcmp.gt.f32.partialorder %v9371_v58, 1.0  ;;  %vm11162_vm5 = vcmp.gt.f32.partialorder %v8285_v9, 1.0  ;;  %v2757_v9 = vadd.f32 %v2753_v3, %v7663_v12  ;;  %v5173_v26 = vsel %vm11105_vm15, 1.0, %v5590_v11  ;;  %v3955_v3 = vld [vmem:[%s11028_s3 + $0x330] sm:$0xff] }
 0x22d   :  { %5438 = vmatprep.mubr.msk.f32.mxu1 %vm11161_vm9, %v11145_v35  ;;  %4380 = vmatprep.subr.mxu0 %v5590_v11  ;;  %vm11163_vm9 = vcmp.gt.f32.partialorder %v8745_v39, 1.0  ;;  %v5174_v27 = vsel %vm11100_vm10, 1.0, %v5590_v11  ;;  %vm11167_vm10 = vcmp.gt.f32.partialorder %v8789_v22, 1.0  ;;  %v2790_v4 = vmul.f32 0.95, %v9444_v43 }
 0x22e   :  { %v1743_v63 = vpop.f32.mrf.mxu0  ;;  %4570 = vmatprep.subr.mxu1 %v5590_v11  ;;  %4381 = vmatpush1.msra.mxu0 %v3926_v34  ;;  %v9487_v16 = vsub.f32 %v2757_v9, %v5172_v15 }
 0x22f   :  { %v1744_v46 = vadd.f32 %v1743_v63, %v1673_v42  ;;  %4571 = vmatpush1.msra.mxu1 %v3958_v7  ;;  %5389 = vmatmul.mubr.msk.f32.gmra.mxu0 %vm11162_vm5, %v11145_v35  ;;  %vm11164_vm5 = vcmp.gt.f32.partialorder %v8346_v33, 1.0  ;;  %v9463_v33 = vsub.f32 %v2758_v47, %v5173_v26  ;;  %v3923_v7 = vld [vmem:[%s11028_s3 + $0x230] sm:$0xff]  ;;  %v2794_v42 = vadd.f32 %v2790_v4, %v8354_v19  ;;  %v11180_v4 = vld [vmem:[#allocation6_spill] sm:$0xff] }
 0x230   :  { %5439 = vmatmul.mubr.msk.f32.gmra.mxu1 %vm11163_vm9, %v11145_v35  ;;  %v1745_v44 = vpop.f32.mrf.mxu0  ;;  %5390 = vmatprep.mubr.msk.f32.mxu0 %vm11164_vm5, %v11145_v35  ;;  %vm11165_vm9 = vcmp.gt.f32.partialorder %v8808_v2, 1.0  ;;  %v9465_v2 = vsub.f32 %v2759_v51, %v5174_v27  ;;  %v2787_v37 = vmul.f32 0.95, %v9487_v16 }
 0x231   :  { %5440 = vmatprep.mubr.msk.f32.mxu1 %vm11165_vm9, %v11145_v35  ;;  %v9453_v39 = vadd.f32 %v1814_v50, %v1744_v46  ;;  %v1746_v28 = vadd.f32 %v1745_v44, %v1675_v38  ;;  %4382 = vmatprep.subr.mxu0 %v5590_v11  ;;  %vm11166_vm9 = vcmp.gt.f32.partialorder %v8382_v18, 1.0  ;;  %v2788_v53 = vmul.f32 0.95, %v9463_v33  ;;  %v3922_v38 = vld [vmem:[%s11028_s3 + $0x228] sm:$0xff] }
 0x232   :  { %4572 = vmatprep.subr.mxu1 %v5590_v11  ;;  %4383 = vmatpush1.msra.mxu0 %v3925_v30  ;;  %v2789_v54 = vmul.f32 0.95, %v9465_v2  ;;  %vm11113_vm15 = vcmp.gt.f32.partialorder %v9465_v2, 1.0  ;;  %v3954_v46 = vld [vmem:[%s11028_s3 + $0x328] sm:$0xff]  ;;  %v2791_v44 = vadd.f32 %v2787_v37, %v7663_v12  ;;  %v11178_v30 = vld [vmem:[#allocation12_spill] sm:$0xff] }
 0x233   :  { %v9467_v20 = vadd.f32 %v1816_v56, %v1746_v28  ;;  %4573 = vmatpush1.msra.mxu1 %v3957_v31  ;;  %vm11102_vm5 = vcmp.gt.f32.partialorder %v9453_v39, 1.0  ;;  %v2981_v45 = vmul.f32 0.95, %v9453_v39  ;;  %5391 = vmatmul.mubr.msk.f32.gmra.mxu0 %vm11166_vm9, %v11145_v35  ;;  %vm11169_vm9 = vcmp.gt.f32.partialorder %v8854_v36, 1.0 }
 0x234   :  { %5441 = vmatmul.mubr.msk.f32.gmra.mxu1 %vm11167_vm10, %v11145_v35  ;;  %5392 = vmatprep.mubr.msk.f32.mxu0 %vm11168_vm4, %v11145_v35  ;;  %v5200_v25 = vsel %vm11102_vm5, 1.0, %v5590_v11  ;;  %vm11170_vm4 = vcmp.gt.f32.partialorder %v8502_v41, 1.0  ;;  %vm11107_vm5 = vcmp.gt.f32.partialorder %v9444_v43, 1.0  ;;  %v2793_v63 = vadd.f32 %v2789_v54, %v8337_v6 }
 0x235   :  { %5442 = vmatprep.mubr.msk.f32.mxu1 %vm11169_vm9, %v11145_v35  ;;  %vm11104_vm10 = vcmp.gt.f32.partialorder %v9467_v20, 1.0  ;;  %v2982_v18 = vmul.f32 0.95, %v9467_v20  ;;  %v2985_v22 = vadd.f32 %v2981_v45, %v9453_v39  ;;  %4384 = vmatprep.subr.mxu0 %v5590_v11  ;;  %vm11171_vm9 = vcmp.gt.f32.partialorder %v8841_v21, 1.0 }
 0x236   :  { %4574 = vmatprep.subr.mxu1 %v5590_v11  ;;  %4385 = vmatpush1.msra.mxu0 %v3924_v61  ;;  %v5201_v41 = vsel %vm11104_vm10, 1.0, %v5590_v11  ;;  %vm11114_vm10 = vcmp.gt.f32.partialorder %v9463_v33, 1.0  ;;  %v5178_v9 = vsel %vm11113_vm15, 1.0, %v5590_v11 }
 0x237   :  { %4575 = vmatpush1.msra.mxu1 %v3956_v23  ;;  %v2986_v36 = vadd.f32 %v2982_v18, %v9467_v20  ;;  %v9506_v34 = vsub.f32 %v2985_v22, %v5200_v25  ;;  %5393 = vmatmul.mubr.msk.f32.gmra.mxu0 %vm11170_vm4, %v11145_v35  ;;  %vm11172_vm4 = vcmp.gt.f32.partialorder %v8592_v40, 1.0  ;;  %v2792_v40 = vadd.f32 %v2788_v53, %v7642_v62  ;;  %v11182_v18 = vld [vmem:[#allocation11_spill] sm:$0xff]  ;;  %v3921_v22 = vld [vmem:[%s11028_s3 + $0x220] sm:$0xff] }
 0x238   :  { %5443 = vmatmul.mubr.msk.f32.gmra.mxu1 %vm11171_vm9, %v11145_v35  ;;  %5394 = vmatprep.mubr.msk.f32.mxu0 %vm11172_vm4, %v11145_v35  ;;  %vm11173_vm9 = vcmp.gt.f32.partialorder %v8904_v52, 1.0  ;;  %v5179_v52 = vsel %vm11107_vm5, 1.0, %v5590_v11  ;;  %vm11111_vm5 = vcmp.gt.f32.partialorder %v9487_v16, 1.0  ;;  %v5177_v31 = vsel %vm11114_vm10, 1.0, %v5590_v11  ;;  %v3953_v53 = vld [vmem:[%s11028_s3 + $0x320] sm:$0xff] }
 0x239   :  { %5444 = vmatprep.mubr.msk.f32.mxu1 %vm11173_vm9, %v11145_v35  ;;  %v9532_v21 = vsub.f32 %v2986_v36, %v5201_v41  ;;  %vm11108_vm6 = vcmp.gt.f32.partialorder %v9506_v34, 1.0  ;;  %v3009_v50 = vmul.f32 0.95, %v9506_v34  ;;  %4386 = vmatprep.subr.mxu0 %v5590_v11  ;;  %vm11174_vm9 = vcmp.gt.f32.partialorder %v8622_v60, 1.0  ;;  %v11184_v36 = vld [vmem:[#allocation7_spill] sm:$0xff] }
 0x23a   :  { %4576 = vmatprep.subr.mxu1 %v5590_v11  ;;  %4387 = vmatpush1.msra.mxu0 %v3923_v7  ;;  %v9561_v49 = vsub.f32 %v2794_v42, %v5179_v52  ;;  %v5204_v60 = vsel %vm11108_vm6, 1.0, %v5590_v11  ;;  %v9584_v27 = vsub.f32 %v2792_v40, %v5177_v31  ;;  %v9586_v56 = vsub.f32 %v2793_v63, %v5178_v9  ;;  %v11186_v7 = vld [vmem:[#allocation15_spill] sm:$0xff]  ;;  %v11188_v52 = vld [vmem:[#allocation8_spill] sm:$0xff] }
 0x23b   :  { %4577 = vmatpush1.msra.mxu1 %v3955_v3  ;;  %vm11109_vm4 = vcmp.gt.f32.partialorder %v9532_v21, 1.0  ;;  %v3010_v47 = vmul.f32 0.95, %v9532_v21  ;;  %v3013_v51 = vadd.f32 %v3009_v50, %v9453_v39  ;;  %5395 = vmatmul.mubr.msk.f32.gmra.mxu0 %vm11174_vm9, %v11145_v35  ;;  %vm11179_vm9 = vcmp.gt.f32.partialorder %v11178_v30, 1.0 }
 0x23c   :  { %5445 = vmatmul.mubr.msk.f32.gmra.mxu1 %vm11175_vm12, %v11145_v35  ;;  %vm11177_vm12 = vcmp.gt.f32.partialorder %v11176_v17, 1.0  ;;  %4388 = vmatprep.subr.mxu0 %v5590_v11  ;;  %v5205_v15 = vsel %vm11109_vm4, 1.0, %v5590_v11  ;;  %v5176_v45 = vsel %vm11111_vm5, 1.0, %v5590_v11  ;;  %vm11183_vm6 = vcmp.gt.f32.partialorder %v11182_v18, 1.0  ;;  %v11192_v17 = vld [vmem:[#allocation9_spill] sm:$0xff]  ;;  %v3919_v18 = vld [vmem:[%s11028_s3 + $0x210] sm:$0xff] }
 0x23d   :  { %5396 = vmatprep.mubr.msk.f32.mxu0 %vm11177_vm12, %v11145_v35  ;;  %5446 = vmatprep.mubr.msk.f32.mxu1 %vm11179_vm9, %v11145_v35  ;;  %v3014_v28 = vadd.f32 %v3010_v47, %v9467_v20  ;;  %v9580_v26 = vsub.f32 %v3013_v51, %v5204_v60  ;;  %vm11181_vm9 = vcmp.gt.f32.partialorder %v11180_v4, 1.0  ;;  %v2824_v54 = vmul.f32 0.95, %v9561_v49  ;;  %v11190_v47 = vld [vmem:[#allocation13_spill] sm:$0xff]  ;;  %v3920_v51 = vld [vmem:[%s11028_s3 + $0x218] sm:$0xff] }
 0x23e   :  { %4578 = vmatprep.subr.mxu1 %v5590_v11  ;;  %4389 = vmatpush1.msra.mxu0 %v3922_v38  ;;  %v9611_v25 = vsub.f32 %v2791_v44, %v5176_v45  ;;  %vm11185_vm4 = vcmp.gt.f32.partialorder %v11184_v36, 1.0  ;;  %v2822_v42 = vmul.f32 0.95, %v9584_v27  ;;  %v2823_v41 = vmul.f32 0.95, %v9586_v56  ;;  %v3952_v38 = vld [vmem:[%s11028_s3 + $0x318] sm:$0xff] }
 0x23f   :  { %4579 = vmatpush1.msra.mxu1 %v3954_v46  ;;  %v9594_v61 = vsub.f32 %v3014_v28, %v5205_v15  ;;  %vm11110_vm12 = vcmp.gt.f32.partialorder %v9580_v26, 1.0  ;;  %v3037_v23 = vmul.f32 0.95, %v9580_v26  ;;  %5397 = vmatmul.mubr.msk.f32.gmra.mxu0 %vm11181_vm9, %v11145_v35  ;;  %vm11187_vm9 = vcmp.gt.f32.partialorder %v11186_v7, 1.0  ;;  %v11197_v4 = vld [vmem:[#allocation17_spill] sm:$0xff]  ;;  %v11199_v7 = vld [vmem:[#allocation14_spill] sm:$0xff] }
 0x240   :  { %5447 = vmatmul.mubr.msk.f32.gmra.mxu1 %vm11183_vm6, %v11145_v35  ;;  %5398 = vmatprep.mubr.msk.f32.mxu0 %vm11185_vm4, %v11145_v35  ;;  %v5208_v50 = vsel %vm11110_vm12, 1.0, %v5590_v11  ;;  %vm11189_vm4 = vcmp.gt.f32.partialorder %v11188_v52, 1.0  ;;  %vm11115_vm12 = vcmp.gt.f32.partialorder %v9561_v49, 1.0  ;;  %v2821_v46 = vmul.f32 0.95, %v9611_v25 }
 0x241   :  { %5448 = vmatprep.mubr.msk.f32.mxu1 %vm11187_vm9, %v11145_v35  ;;  %vm11112_vm6 = vcmp.gt.f32.partialorder %v9594_v61, 1.0  ;;  %v3038_v3 = vmul.f32 0.95, %v9594_v61  ;;  %v3041_v37 = vadd.f32 %v3037_v23, %v9453_v39  ;;  %4390 = vmatprep.subr.mxu0 %v5590_v11  ;;  %vm11191_vm9 = vcmp.gt.f32.partialorder %v11190_v47, 1.0  ;;  %v11195_v23 = vld [vmem:[#allocation10_spill] sm:$0xff] }
 0x242   :  { %4580 = vmatprep.subr.mxu1 %v5590_v11  ;;  %4391 = vmatpush1.msra.mxu0 %v3921_v22  ;;  %v2828_v44 = vadd.f32 %v2824_v54, %v8354_v19  ;;  %v5209_v60 = vsel %vm11112_vm6, 1.0, %v5590_v11  ;;  %vm2800_vm6 = vcmp.gt.f32.partialorder %v9584_v27, 1.0  ;;  %vm2801_vm15 = vcmp.gt.f32.partialorder %v9586_v56, 1.0  ;;  %v3951_v22 = vld [vmem:[%s11028_s3 + $0x310] sm:$0xff] }
 0x243   :  { %4581 = vmatpush1.msra.mxu1 %v3953_v53  ;;  %v3042_v40 = vadd.f32 %v3038_v3, %v9467_v20  ;;  %v9630_v63 = vsub.f32 %v3041_v37, %v5208_v50  ;;  %5399 = vmatmul.mubr.msk.f32.gmra.mxu0 %vm11189_vm4, %v11145_v35  ;;  %vm11193_vm4 = vcmp.gt.f32.partialorder %v11192_v17, 1.0  ;;  %v2826_v9 = vadd.f32 %v2822_v42, %v7642_v62  ;;  %v11201_v3 = vld [vmem:[#allocation20_spill] sm:$0xff]  ;;  %v3918_v17 = vld [vmem:[%s11028_s3 + $0x208] sm:$0xff] }
 0x244   :  { %5449 = vmatmul.mubr.msk.f32.gmra.mxu1 %vm11191_vm9, %v11145_v35  ;;  %5400 = vmatprep.mubr.msk.f32.mxu0 %vm11193_vm4, %v11145_v35  ;;  %vm11194_vm9 = vcmp.gt.f32.partialorder %v9046_v29, 1.0  ;;  %v2827_v28 = vadd.f32 %v2823_v41, %v8337_v6  ;;  %v5183_v29 = vsel %vm11115_vm12, 1.0, %v5590_v11  ;;  %vm11198_vm10 = vcmp.gt.f32.partialorder %v11197_v4, 1.0 }
 0x245   :  { %5450 = vmatprep.mubr.msk.f32.mxu1 %vm11194_vm9, %v11145_v35  ;;  %v9656_v30 = vsub.f32 %v3042_v40, %v5209_v60  ;;  %vm11116_vm5 = vcmp.gt.f32.partialorder %v9630_v63, 1.0  ;;  %v3065_v31 = vmul.f32 0.95, %v9630_v63  ;;  %4392 = vmatprep.subr.mxu0 %v5590_v11  ;;  %vm11196_vm9 = vcmp.gt.f32.partialorder %v11195_v23, 1.0  ;;  %v11205_v60 = vld [vmem:[#allocation18_spill] sm:$0xff] }
 0x246   :  { %4582 = vmatprep.subr.mxu1 %v5590_v11  ;;  %4393 = vmatpush1.msra.mxu0 %v3920_v51  ;;  %vm2799_vm12 = vcmp.gt.f32.partialorder %v9611_v25, 1.0  ;;  %v9685_v53 = vsub.f32 %v2828_v44, %v5183_v29  ;;  %v2825_v54 = vadd.f32 %v2821_v46, %v7663_v12  ;;  %v5212_v36 = vsel %vm11116_vm5, 1.0, %v5590_v11  ;;  %v11203_v44 = vld [vmem:[#allocation16_spill] sm:$0xff] }
 0x247   :  { %4583 = vmatpush1.msra.mxu1 %v3952_v38  ;;  %vm3050_vm4 = vcmp.gt.f32.partialorder %v9656_v30, 1.0  ;;  %v3066_v15 = vmul.f32 0.95, %v9656_v30  ;;  %v3069_v45 = vadd.f32 %v3065_v31, %v9453_v39  ;;  %5401 = vmatmul.mubr.msk.f32.gmra.mxu0 %vm11196_vm9, %v11145_v35  ;;  %vm11202_vm9 = vcmp.gt.f32.partialorder %v11201_v3, 1.0  ;;  %v3917_v3 = vld [vmem:[%s11028_s3 + $0x200] sm:$0xff]  ;;  %v3980_v29 = vld [vmem:[%s11028_s3 + $0x3f8] sm:$0xff] }
 0x248   :  { %5451 = vmatmul.mubr.msk.f32.gmra.mxu1 %vm11198_vm10, %v11145_v35  ;;  %vm11200_vm10 = vcmp.gt.f32.partialorder %v11199_v7, 1.0  ;;  %v5181_v37 = vsel %vm2800_vm6, 1.0, %v5590_v11  ;;  %v5182_v42 = vsel %vm2801_vm15, 1.0, %v5590_v11  ;;  %4394 = vmatprep.subr.mxu0 %v5590_v11  ;;  %v5213_v47 = vsel %vm3050_vm4, 1.0, %v5590_v11  ;;  %v11209_v7 = vld [vmem:[#allocation21_spill] sm:$0xff] }
 0x249   :  { %5402 = vmatprep.mubr.msk.f32.mxu0 %vm11200_vm10, %v11145_v35  ;;  %5452 = vmatprep.mubr.msk.f32.mxu1 %vm11202_vm9, %v11145_v35  ;;  %v3070_v41 = vadd.f32 %v3066_v15, %v9467_v20  ;;  %v9704_v50 = vsub.f32 %v3069_v45, %v5212_v36  ;;  %v9708_v40 = vsub.f32 %v2826_v9, %v5181_v37  ;;  %v5180_v51 = vsel %vm2799_vm12, 1.0, %v5590_v11  ;;  %v3950_v9 = vld [vmem:[%s11028_s3 + $0x308] sm:$0xff]  ;;  %v3969_v30 = vld [vmem:[%s11028_s3 + $0x3a0] sm:$0xff] }
 0x24a   :  { %4584 = vmatprep.subr.mxu1 %v5590_v11  ;;  %v9710_v52 = vsub.f32 %v2827_v28, %v5182_v42  ;;  %4395 = vmatpush1.msra.mxu0 %v3919_v18  ;;  %vm11204_vm9 = vcmp.gt.f32.partialorder %v11203_v44, 1.0  ;;  %vm11206_vm5 = vcmp.gt.f32.partialorder %v11205_v60, 1.0  ;;  %v2858_v31 = vmul.f32 0.95, %v9685_v53 }
 0x24b   :  { %4585 = vmatpush1.msra.mxu1 %v3951_v22  ;;  %v9718_v38 = vsub.f32 %v3070_v41, %v5213_v47  ;;  %vm11121_vm10 = vcmp.gt.f32.partialorder %v9704_v50, 1.0  ;;  %v3093_v46 = vmul.f32 0.95, %v9704_v50  ;;  %5403 = vmatmul.mubr.msk.f32.gmra.mxu0 %vm11204_vm9, %v11145_v35  ;;  %v9735_v28 = vsub.f32 %v2825_v54, %v5180_v51  ;;  %v3949_v41 = vld [vmem:[%s11028_s3 + $0x300] sm:$0xff] }
 0x24c   :  { %5453 = vmatmul.mubr.msk.f32.gmra.mxu1 %vm11206_vm5, %v11145_v35  ;;  %5404 = vmatprep.mubr.msk.f32.mxu0 %vm2630_vm13, %v11145_v35  ;;  %v2856_v4 = vmul.f32 0.95, %v9708_v40  ;;  %v2857_v18 = vmul.f32 0.95, %v9710_v52  ;;  %v5216_v22 = vsel %vm11121_vm10, 1.0, %v5590_v11  ;;  %vm2836_vm13 = vcmp.gt.f32.partialorder %v9685_v53, 1.0 }
 0x24d   :  { %5454 = vmatprep.mubr.msk.f32.mxu1 %vm2632_vm8, %v11145_v35  ;;  %vm3078_vm5 = vcmp.gt.f32.partialorder %v9718_v38, 1.0  ;;  %v3094_v45 = vmul.f32 0.95, %v9718_v38  ;;  %v3097_v23 = vadd.f32 %v3093_v46, %v9453_v39  ;;  %4396 = vmatprep.subr.mxu0 %v5590_v11  ;;  %vm11210_vm8 = vcmp.gt.f32.partialorder %v11209_v7, 1.0  ;;  %v3947_v7 = vld [vmem:[%s11028_s3 + $0x2f0] sm:$0xff] }
 0x24e   :  { %4586 = vmatprep.subr.mxu1 %v5590_v11  ;;  %4397 = vmatpush1.msra.mxu0 %v3918_v17  ;;  %v2855_v37 = vmul.f32 0.95, %v9735_v28  ;;  %v2862_v42 = vadd.f32 %v2858_v31, %v8354_v19  ;;  %v5217_v55 = vsel %vm3078_vm5, 1.0, %v5590_v11  ;;  %vm2834_vm9 = vcmp.gt.f32.partialorder %v9708_v40, 1.0  ;;  %v3948_v17 = vld [vmem:[%s11028_s3 + $0x2f8] sm:$0xff]  ;;  %v3967_v38 = vld [vmem:[%s11028_s3 + $0x390] sm:$0xff] }
 0x24f   :  { %4587 = vmatpush1.msra.mxu1 %v3950_v9  ;;  %v3098_v54 = vadd.f32 %v3094_v45, %v9467_v20  ;;  %v9754_v36 = vsub.f32 %v3097_v23, %v5216_v22  ;;  %5405 = vmatmul.mubr.msk.f32.gmra.mxu0 %vm2629_vm7, %v11145_v35  ;;  %v2860_v46 = vadd.f32 %v2856_v4, %v7642_v62  ;;  %v5187_v32 = vsel %vm2836_vm13, 1.0, %v5590_v11 }
 0x250   :  { %5455 = vmatmul.mubr.msk.f32.gmra.mxu1 %vm11210_vm8, %v11145_v35  ;;  %5406 = vmatprep.mubr.msk.f32.mxu0 %vm2664_vm1, %v11145_v35  ;;  %vm2835_vm8 = vcmp.gt.f32.partialorder %v9710_v52, 1.0  ;;  %v2861_v13 = vadd.f32 %v2857_v18, %v8337_v6  ;;  %vm2833_vm1 = vcmp.gt.f32.partialorder %v9735_v28, 1.0  ;;  %v9806_v31 = vsub.f32 %v2862_v42, %v5187_v32  ;;  %v3979_v42 = vld [vmem:[%s11028_s3 + $0x3f0] sm:$0xff] }
 0x251   :  { %5456 = vmatprep.mubr.msk.f32.mxu1 %vm2666_vm0, %v11145_v35  ;;  %v9780_v47 = vsub.f32 %v3098_v54, %v5217_v55  ;;  %vm11118_vm7 = vcmp.gt.f32.partialorder %v9754_v36, 1.0  ;;  %v3121_v51 = vmul.f32 0.95, %v9754_v36  ;;  %4398 = vmatprep.subr.mxu0 %v5590_v11  ;;  %v2859_v9 = vadd.f32 %v2855_v37, %v7663_v12 }
 0x252   :  { %4588 = vmatprep.subr.mxu1 %v5590_v11  ;;  %4399 = vmatpush1.msra.mxu0 %v3917_v3  ;;  %v5220_v48 = vsel %vm11118_vm7, 1.0, %v5590_v11  ;;  %v5185_v24 = vsel %vm2834_vm9, 1.0, %v5590_v11  ;;  %v5186_v15 = vsel %vm2835_vm8, 1.0, %v5590_v11  ;;  %v5184_v18 = vsel %vm2833_vm1, 1.0, %v5590_v11 }
 0x253   :  { %4589 = vmatpush1.msra.mxu1 %v3949_v41  ;;  %vm11120_vm0 = vcmp.gt.f32.partialorder %v9780_v47, 1.0  ;;  %v3122_v44 = vmul.f32 0.95, %v9780_v47  ;;  %v3125_v60 = vadd.f32 %v3121_v51, %v9453_v39  ;;  %5407 = vmatmul.mubr.msk.f32.gmra.mxu0 %vm2663_vm2, %v11145_v35  ;;  %v9831_v0 = vsub.f32 %v2860_v46, %v5185_v24 }
 0x254   :  { %5457 = vmatmul.mubr.msk.f32.gmra.mxu1 %vm2665_vm14, %v11145_v35  ;;  %5408 = vmatprep.mubr.msk.f32.mxu0 %vm2698_vm3, %v11145_v35  ;;  %v9833_v4 = vsub.f32 %v2861_v13, %v5186_v15  ;;  %v5221_v14 = vsel %vm11120_vm0, 1.0, %v5590_v11  ;;  %vm11211_vm2 = vcmp.gt.f32.partialorder %v9292_v10, 1.0  ;;  %v2892_v3 = vmul.f32 0.95, %v9806_v31 }
 0x255   :  { %5458 = vmatprep.mubr.msk.f32.mxu1 %vm2700_vm11, %v11145_v35  ;;  %v3126_v45 = vadd.f32 %v3122_v44, %v9467_v20  ;;  %v9828_v23 = vsub.f32 %v3125_v60, %v5220_v48  ;;  %4400 = vmatprep.subr.mxu0 %v5590_v11  ;;  %vm11212_vm11 = vcmp.gt.f32.partialorder %v9274_v8, 1.0  ;;  %v9856_v37 = vsub.f32 %v2859_v9, %v5184_v18  ;;  %v3944_v48 = vld [vmem:[%s11028_s3 + $0x2d8] sm:$0xff] }
 0x256   :  { %4590 = vmatprep.subr.mxu1 %v5590_v11  ;;  %4401 = vmatpush2.msra.mxu0 %v3948_v17  ;;  %vm11213_vm3 = vcmp.gt.f32.partialorder %v9369_v5, 1.0  ;;  %v2890_v41 = vmul.f32 0.95, %v9831_v0  ;;  %v2891_v55 = vmul.f32 0.95, %v9833_v4  ;;  %v2896_v32 = vadd.f32 %v2892_v3, %v8354_v19 }
 0x257   :  { %4591 = vmatpush2.msra.mxu1 %v3980_v29  ;;  %v9842_v22 = vsub.f32 %v3126_v45, %v5221_v14  ;;  %vm11117_vm14 = vcmp.gt.f32.partialorder %v9828_v23, 1.0  ;;  %v3149_v54 = vmul.f32 0.95, %v9828_v23  ;;  %5409 = vmatmul.mubr.msk.f32.gmra.mxu0 %vm11211_vm2, %v11145_v35  ;;  %vm11214_vm2 = vcmp.gt.f32.partialorder %v9349_v59, 1.0  ;;  %v3946_v59 = vld [vmem:[%s11028_s3 + $0x2e8] sm:$0xff] }
 0x258   :  { %5459 = vmatmul.mubr.msk.f32.gmra.mxu1 %vm11212_vm11, %v11145_v35  ;;  %5410 = vmatprep.mubr.msk.f32.mxu0 %vm11213_vm3, %v11145_v35  ;;  %v5224_v5 = vsel %vm11117_vm14, 1.0, %v5590_v11  ;;  %vm11215_vm3 = vcmp.gt.f32.partialorder %v9389_v57, 1.0  ;;  %vm2870_vm14 = vcmp.gt.f32.partialorder %v9806_v31, 1.0  ;;  %v2889_v13 = vmul.f32 0.95, %v9856_v37  ;;  %v3978_v45 = vld [vmem:[%s11028_s3 + $0x3e8] sm:$0xff] }
 0x259   :  { %5460 = vmatprep.mubr.msk.f32.mxu1 %vm11214_vm2, %v11145_v35  ;;  %vm11119_vm11 = vcmp.gt.f32.partialorder %v9842_v22, 1.0  ;;  %v3150_v8 = vmul.f32 0.95, %v9842_v22  ;;  %v3153_v10 = vadd.f32 %v3149_v54, %v9453_v39  ;;  %4402 = vmatprep.subr.mxu0 %v5590_v11  ;;  %vm11216_vm2 = vcmp.gt.f32.partialorder %v9371_v58, 1.0  ;;  %v3945_v58 = vld [vmem:[%s11028_s3 + $0x2e0] sm:$0xff] }
 0x25a   :  { %4592 = vmatprep.subr.mxu1 %v5590_v11  ;;  %4403 = vmatpush2.msra.mxu0 %v3947_v7  ;;  %v5225_v44 = vsel %vm11119_vm11, 1.0, %v5590_v11  ;;  %vm11217_vm7 = vcmp.gt.f32.partialorder %v9463_v33, 1.0  ;;  %vm2868_vm11 = vcmp.gt.f32.partialorder %v9831_v0, 1.0  ;;  %vm2869_vm0 = vcmp.gt.f32.partialorder %v9833_v4, 1.0 }
 0x25b   :  { %4593 = vmatpush2.msra.mxu1 %v3979_v42  ;;  %v3154_v51 = vadd.f32 %v3150_v8, %v9467_v20  ;;  %v9881_v46 = vsub.f32 %v3153_v10, %v5224_v5  ;;  %5411 = vmatmul.mubr.msk.f32.gmra.mxu0 %vm11215_vm3, %v11145_v35  ;;  %v2894_v33 = vadd.f32 %v2890_v41, %v7642_v62  ;;  %v5191_v9 = vsel %vm2870_vm14, 1.0, %v5590_v11  ;;  %v3942_v10 = vld [vmem:[%s11028_s3 + $0x2c8] sm:$0xff] }
 0x25c   :  { %5461 = vmatmul.mubr.msk.f32.gmra.mxu1 %vm11216_vm2, %v11145_v35  ;;  %4404 = vmatprep.subr.mxu0 %v5590_v11  ;;  %vm11218_vm2 = vcmp.gt.f32.partialorder %v9444_v43, 1.0  ;;  %v2895_v17 = vadd.f32 %v2891_v55, %v8337_v6  ;;  %vm2867_vm10 = vcmp.gt.f32.partialorder %v9856_v37, 1.0  ;;  %v9928_v24 = vsub.f32 %v2896_v32, %v5191_v9 }
 0x25d   :  { %5412 = vmatprep.mubr.msk.f32.mxu0 %vm11217_vm7, %v11145_v35  ;;  %v9902_v57 = vsub.f32 %v3154_v51, %v5225_v44  ;;  %vm3161_vm3 = vcmp.gt.f32.partialorder %v9881_v46, 1.0  ;;  %v3177_v60 = vmul.f32 0.95, %v9881_v46  ;;  %5462 = vmatprep.mubr.msk.f32.mxu1 %vm11218_vm2, %v11145_v35  ;;  %vm11219_vm2 = vcmp.gt.f32.partialorder %v9465_v2, 1.0  ;;  %v3941_v51 = vld [vmem:[%s11028_s3 + $0x2c0] sm:$0xff] }
 0x25e   :  { %4405 = vmatpush2.msra.mxu0 %v3946_v59  ;;  %4594 = vmatprep.subr.mxu1 %v5590_v11  ;;  %v2893_v15 = vadd.f32 %v2889_v13, %v7663_v12  ;;  %v5228_v14 = vsel %vm3161_vm3, 1.0, %v5590_v11  ;;  %v5189_v2 = vsel %vm2868_vm11, 1.0, %v5590_v11  ;;  %v5190_v18 = vsel %vm2869_vm0, 1.0, %v5590_v11 }
 0x25f   :  { %4406 = vmatprep.subr.mxu0 %v5590_v11  ;;  %vm3162_vm7 = vcmp.gt.f32.partialorder %v9902_v57, 1.0  ;;  %v3178_v43 = vmul.f32 0.95, %v9902_v57  ;;  %v3181_v29 = vadd.f32 %v3177_v60, %v9453_v39  ;;  %v9959_v3 = vsub.f32 %v2894_v33, %v5189_v2  ;;  %4595 = vmatpush2.msra.mxu1 %v3978_v45 }
 0x260   :  { %4407 = vmatpush2.msra.mxu0 %v3945_v58  ;;  %5463 = vmatmul.mubr.msk.f32.gmra.mxu1 %vm11219_vm2, %v11145_v35  ;;  %vm11220_vm2 = vcmp.gt.f32.partialorder %v9487_v16, 1.0  ;;  %v3943_v16 = vld [vmem:[%s11028_s3 + $0x2d0] sm:$0xff]  ;;  %v9961_v42 = vsub.f32 %v2895_v17, %v5190_v18  ;;  %v5229_v8 = vsel %vm3162_vm7, 1.0, %v5590_v11  ;;  %v5188_v41 = vsel %vm2867_vm10, 1.0, %v5590_v11  ;;  %v3940_v58 = vld [vmem:[%s11028_s3 + $0x2b8] sm:$0xff] }
 0x261   :  { %5413 = vmatmul.mubr.msk.f32.gmra.mxu0 %vm11220_vm2, %v11145_v35  ;;  %4408 = vmatprep.subr.mxu0 %v5590_v11  ;;  %v3182_v54 = vadd.f32 %v3178_v43, %v9467_v20  ;;  %v9948_v7 = vsub.f32 %v3181_v29, %v5228_v14  ;;  %vm11221_vm2 = vcmp.gt.f32.partialorder %v9561_v49, 1.0  ;;  %v2926_v55 = vmul.f32 0.95, %v9928_v24  ;;  %v3937_v14 = vld [vmem:[%s11028_s3 + $0x2a0] sm:$0xff] }
 0x262   :  { %5414 = vmatprep.mubr.msk.f32.mxu0 %vm2800_vm6, %v11145_v35  ;;  %5464 = vmatprep.mubr.msk.f32.mxu1 %vm11221_vm2, %v11145_v35  ;;  %v9984_v5 = vsub.f32 %v2893_v15, %v5188_v41  ;;  %v2924_v53 = vmul.f32 0.95, %v9959_v3  ;;  %v2925_v13 = vmul.f32 0.95, %v9961_v42 }
 0x263   :  { %4409 = vmatpush2.msra.mxu0 %v3944_v48  ;;  %v9966_v27 = vsub.f32 %v3182_v54, %v5229_v8  ;;  %vm3189_vm6 = vcmp.gt.f32.partialorder %v9948_v7, 1.0  ;;  %v3205_v49 = vmul.f32 0.95, %v9948_v7  ;;  %v2930_v40 = vadd.f32 %v2926_v55, %v8354_v19  ;;  %v3939_v19 = vld [vmem:[%s11028_s3 + $0x2b0] sm:$0xff]  ;;  %4596 = vmatprep.subr.mxu1 %v5590_v11 }
 0x264   :  { %4410 = vmatprep.subr.mxu0 %v5590_v11  ;;  %5465 = vmatmul.mubr.msk.f32.gmra.mxu1 %vm2801_vm15, %v11145_v35  ;;  %v5232_v32 = vsel %vm3189_vm6, 1.0, %v5590_v11  ;;  %vm2904_vm15 = vcmp.gt.f32.partialorder %v9928_v24, 1.0  ;;  %v2923_v52 = vmul.f32 0.95, %v9984_v5  ;;  %v2928_v31 = vadd.f32 %v2924_v53, %v7642_v62  ;;  %v3938_v62 = vld [vmem:[%s11028_s3 + $0x2a8] sm:$0xff] }
 0x265   :  { %4411 = vmatpush2.msra.mxu0 %v3943_v16  ;;  %5466 = vmatprep.mubr.msk.f32.mxu1 %vm2836_vm13, %v11145_v35  ;;  %vm3190_vm2 = vcmp.gt.f32.partialorder %v9966_v27, 1.0  ;;  %v3206_v56 = vmul.f32 0.95, %v9966_v27  ;;  %v3209_v59 = vadd.f32 %v3205_v49, %v9453_v39  ;;  %vm2902_vm13 = vcmp.gt.f32.partialorder %v9959_v3, 1.0  ;;  %v3936_v3 = vld [vmem:[%s11028_s3 + $0x298] sm:$0xff] }
 0x266   :  { %5415 = vmatmul.mubr.msk.f32.gmra.mxu0 %vm2799_vm12, %v11145_v35  ;;  %4412 = vmatprep.subr.mxu0 %v5590_v11  ;;  %v5233_v60 = vsel %vm3190_vm2, 1.0, %v5590_v11  ;;  %v2929_v9 = vadd.f32 %v2925_v13, %v8337_v6  ;;  %v5195_v28 = vsel %vm2904_vm15, 1.0, %v5590_v11  ;;  %v5193_v48 = vsel %vm2902_vm13, 1.0, %v5590_v11 }
 0x267   :  { %5416 = vmatprep.mubr.msk.f32.mxu0 %vm2834_vm9, %v11145_v35  ;;  %4413 = vmatpush2.msra.mxu0 %v3942_v10  ;;  %v3210_v25 = vadd.f32 %v3206_v56, %v9467_v20  ;;  %v10005_v44 = vsub.f32 %v3209_v59, %v5232_v32  ;;  %vm2903_vm9 = vcmp.gt.f32.partialorder %v9961_v42, 1.0  ;;  %v2934_v6 = vsub.f32 %v2930_v40, %v5195_v28  ;;  %v3935_v42 = vld [vmem:[%s11028_s3 + $0x290] sm:$0xff]  ;;  %v3933_v32 = vld [vmem:[%s11028_s3 + $0x280] sm:$0xff] }
 0x268   :  { %4414 = vmatprep.subr.mxu0 %v5590_v11  ;;  %5467 = vmatmul.mubr.msk.f32.gmra.mxu1 %vm2835_vm8, %v11145_v35  ;;  %v2927_v4 = vadd.f32 %v2923_v52, %v7663_v12  ;;  %v5194_v24 = vsel %vm2903_vm9, 1.0, %v5590_v11  ;;  %v2932_v2 = vsub.f32 %v2928_v31, %v5193_v48  ;;  %v3975_v52 = vld [vmem:[%s11028_s3 + $0x3d0] sm:$0xff] }
 0x269   :  { %4415 = vmatpush2.msra.mxu0 %v3941_v51  ;;  %5468 = vmatprep.mubr.msk.f32.mxu1 %vm2870_vm14, %v11145_v35  ;;  %v10023_v33 = vsub.f32 %v3210_v25, %v5233_v60  ;;  %vm3217_vm12 = vcmp.gt.f32.partialorder %v10005_v44, 1.0  ;;  %v3233_v17 = vmul.f32 0.95, %v10005_v44  ;;  %v2933_v37 = vsub.f32 %v2929_v9, %v5194_v24  ;;  %v3977_v51 = vld [vmem:[%s11028_s3 + $0x3e0] sm:$0xff]  ;;  %v3976_v25 = vld [vmem:[%s11028_s3 + $0x3d8] sm:$0xff]  ;;  %v3974_v9 = vld [vmem:[%s11028_s3 + $0x3c8] sm:$0xff] }
 0x26a   :  { %5417 = vmatmul.mubr.msk.f32.gmra.mxu0 %vm2833_vm1, %v11145_v35  ;;  %4416 = vmatprep.subr.mxu0 %v5590_v11  ;;  %vm2901_vm1 = vcmp.gt.f32.partialorder %v9984_v5, 1.0  ;;  %v5236_v0 = vsel %vm3217_vm12, 1.0, %v5590_v11  ;;  %v3934_v5 = vld [vmem:[%s11028_s3 + $0x288] sm:$0xff] }
 0x26b   :  { %5418 = vmatprep.mubr.msk.f32.mxu0 %vm2868_vm11, %v11145_v35  ;;  %4417 = vmatpush2.msra.mxu0 %v3940_v58  ;;  %vm3218_vm8 = vcmp.gt.f32.partialorder %v10023_v33, 1.0  ;;  %v3234_v43 = vmul.f32 0.95, %v10023_v33  ;;  %v3237_v29 = vadd.f32 %v3233_v17, %v9453_v39  ;;  %v5192_v16 = vsel %vm2901_vm1, 1.0, %v5590_v11  ;;  %v3970_v24 = vld [vmem:[%s11028_s3 + $0x3a8] sm:$0xff] }
 0x26c   :  { %4418 = vmatprep.subr.mxu0 %v5590_v11  ;;  %5469 = vmatmul.mubr.msk.f32.gmra.mxu1 %vm2869_vm0, %v11145_v35  ;;  %v5237_v12 = vsel %vm3218_vm8, 1.0, %v5590_v11  ;;  %vm2938_vm0 = vcmp.gt.f32.partialorder %v2934_v6, 1.0  ;;  %v2931_v8 = vsub.f32 %v2927_v4, %v5192_v16  ;;  %vm2936_vm11 = vcmp.gt.f32.partialorder %v2932_v2, 1.0 }
 0x26d   :  { %4419 = vmatpush2.msra.mxu0 %v3939_v19  ;;  %5470 = vmatprep.mubr.msk.f32.mxu1 %vm2904_vm15, %v11145_v35  ;;  %v3238_v15 = vadd.f32 %v3234_v43, %v9467_v20  ;;  %v10066_v45 = vsub.f32 %v3237_v29, %v5236_v0  ;;  %vm2937_vm15 = vcmp.gt.f32.partialorder %v2933_v37, 1.0  ;;  %v3972_v0 = vld [vmem:[%s11028_s3 + $0x3b8] sm:$0xff] }
 0x26e   :  { %5419 = vmatmul.mubr.msk.f32.gmra.mxu0 %vm2867_vm10, %v11145_v35  ;;  %4420 = vmatprep.subr.mxu0 %v5590_v11 }
 0x26f   :  { %5420 = vmatprep.mubr.msk.f32.mxu0 %vm2902_vm13, %v11145_v35  ;;  %4421 = vmatpush2.msra.mxu0 %v3938_v62  ;;  %v10084_v18 = vsub.f32 %v3238_v15, %v5237_v12  ;;  %vm3245_vm10 = vcmp.gt.f32.partialorder %v10066_v45, 1.0  ;;  %v3261_v54 = vmul.f32 0.95, %v10066_v45  ;;  %vm2935_vm13 = vcmp.gt.f32.partialorder %v2931_v8, 1.0  ;;  %v3968_v8 = vld [vmem:[%s11028_s3 + $0x398] sm:$0xff] }
 0x270   :  { %4422 = vmatprep.subr.mxu0 %v5590_v11  ;;  %5471 = vmatmul.mubr.msk.f32.gmra.mxu1 %vm2903_vm9, %v11145_v35  ;;  %v5240_v41 = vsel %vm3245_vm10, 1.0, %v5590_v11 }
 0x271   :  { %4423 = vmatpush2.msra.mxu0 %v3937_v14  ;;  %5472 = vmatprep.mubr.msk.f32.mxu1 %vm2938_vm0, %v11145_v35  ;;  %vm3246_vm14 = vcmp.gt.f32.partialorder %v10084_v18, 1.0  ;;  %v3262_v49 = vmul.f32 0.95, %v10084_v18  ;;  %v3265_v10 = vadd.f32 %v3261_v54, %v9453_v39 }
 0x272   :  { %5421 = vmatmul.mubr.msk.f32.gmra.mxu0 %vm2901_vm1, %v11145_v35  ;;  %4424 = vmatprep.subr.mxu0 %v5590_v11  ;;  %v5241_v59 = vsel %vm3246_vm14, 1.0, %v5590_v11  ;;  %vm11222_vm1 = vcmp.gt.f32.partialorder %v9467_v20, 1.0 }
 0x273   :  { %5422 = vmatprep.mubr.msk.f32.mxu0 %vm2936_vm11, %v11145_v35  ;;  %4425 = vmatpush2.msra.mxu0 %v3936_v3  ;;  %v3266_v55 = vadd.f32 %v3262_v49, %v9467_v20  ;;  %v10114_v56 = vsub.f32 %v3265_v10, %v5240_v41  ;;  %vm11223_vm11 = vcmp.gt.f32.partialorder %v9453_v39, 1.0  ;;  %v953_v3 = vsub.s32 6, %v7516_v1 }
 0x274   :  { %4426 = vmatprep.subr.mxu0 %v5590_v11  ;;  %5473 = vmatmul.mubr.msk.f32.gmra.mxu1 %vm2937_vm15, %v11145_v35  ;;  %vm11224_vm15 = vcmp.gt.f32.partialorder %v9532_v21, 1.0  ;;  %v3973_v21 = vld [vmem:[%s11028_s3 + $0x3c0] sm:$0xff]  ;;  %v957_v10 = vsub.s32 7, %v7516_v1 }
 0x275   :  { %4427 = vmatpush2.msra.mxu0 %v3935_v42  ;;  %v10128_v53 = vsub.f32 %v3266_v55, %v5241_v59  ;;  %vm3273_vm9 = vcmp.gt.f32.partialorder %v10114_v56, 1.0  ;;  %v3289_v13 = vmul.f32 0.95, %v10114_v56  ;;  %4597 = vmatpush2.msra.mxu1 %v3977_v51  ;;  %v1885_v42 = vpop.f32.mrf.mxu1  ;;  %v1956_v51 = vpop.f32.mrf.mxu0 }
 0x276   :  { %5423 = vmatmul.mubr.msk.f32.gmra.mxu0 %vm2935_vm13, %v11145_v35  ;;  %4428 = vmatprep.subr.mxu0 %v5590_v11  ;;  %v5244_v60 = vsel %vm3273_vm9, 1.0, %v5590_v11 }
 0x277   :  { %4429 = vmatpush2.msra.mxu0 %v3934_v5  ;;  %5474 = vmatprep.mubr.msk.f32.mxu0 %vm11222_vm1, %v11145_v35  ;;  %vm3274_vm0 = vcmp.gt.f32.partialorder %v10128_v53, 1.0  ;;  %v3290_v58 = vmul.f32 0.95, %v10128_v53  ;;  %v3293_v40 = vadd.f32 %v3289_v13, %v9453_v39  ;;  %v5589_v5 = vld [vmem:[%s11027_s2] sm:$0xff] }
 0x278   :  { %4430 = vmatprep.subr.mxu0 %v5590_v11  ;;  %4598 = vmatprep.subr.mxu1 %v5590_v11  ;;  %v5245_v31 = vsel %vm3274_vm0, 1.0, %v5590_v11  ;;  %v954_v59 = vrot.slane %v5589_v5, %v953_v3 }
 0x279   :  { %4431 = vmatpush2.msra.mxu0 %v3933_v32  ;;  %v3294_v17 = vadd.f32 %v3290_v58, %v9467_v20  ;;  %v10155_v19 = vsub.f32 %v3293_v40, %v5244_v60  ;;  %4599 = vmatpush2.msra.mxu1 %v3976_v25  ;;  %v958_v25 = vrot.slane %v5589_v5, %v957_v10  ;;  %v1887_v40 = vpop.f32.mrf.mxu1 }
 0x27a   :  { %5475 = vmatmul.mubr.msk.f32.vlgmr.msra.gmra.mxu0 %vm11223_vm11, %v11145_v35  ;;  %4600 = vmatprep.subr.mxu1 %v5590_v11  ;;  %vm11225_vm11 = vcmp.gt.f32.partialorder %v9506_v34, 1.0 }
 0x27b   :  { %5476 = vmatprep.mubr.msk.f32.mxu0 %vm11224_vm15, %v11145_v35  ;;  %v10170_v28 = vsub.f32 %v3294_v17, %v5245_v31  ;;  %vm11122_vm13 = vcmp.gt.f32.partialorder %v10155_v19, 1.0  ;;  %v3317_v43 = vmul.f32 0.95, %v10155_v19  ;;  %4601 = vmatpush2.msra.mxu1 %v3975_v52  ;;  %vm11226_vm15 = vcmp.gt.f32.partialorder %v9594_v61, 1.0  ;;  %v3971_v61 = vld [vmem:[%s11028_s3 + $0x3b0] sm:$0xff]  ;;  %v1958_v31 = vpop.f32.mrf.mxu0 }
 0x27c   :  { %4602 = vmatprep.subr.mxu1 %v5590_v11  ;;  %v5248_v6 = vsel %vm11122_vm13, 1.0, %v5590_v11  ;;  %v1886_v17 = vadd.f32 %v1885_v42, %v954_v59 }
 0x27d   :  { %vm3302_vm1 = vcmp.gt.f32.partialorder %v10170_v28, 1.0  ;;  %v3318_v29 = vmul.f32 0.95, %v10170_v28  ;;  %v3321_v62 = vadd.f32 %v3317_v43, %v9453_v39  ;;  %4603 = vmatpush2.msra.mxu1 %v3974_v9 }
 0x27e   :  { %5477 = vmatmul.mubr.msk.f32.gmra.mxu0 %vm11225_vm11, %v11145_v35  ;;  %4604 = vmatprep.subr.mxu1 %v5590_v11  ;;  %v5249_v34 = vsel %vm3302_vm1, 1.0, %v5590_v11 }
 0x27f   :  { %5478 = vmatprep.mubr.msk.f32.mxu0 %vm11226_vm15, %v11145_v35  ;;  %v3322_v48 = vadd.f32 %v3318_v29, %v9467_v20  ;;  %v10195_v4 = vsub.f32 %v3321_v62, %v5248_v6  ;;  %4605 = vmatpush2.msra.mxu1 %v3973_v21  ;;  %vm11227_vm15 = vcmp.gt.f32.partialorder %v9580_v26, 1.0  ;;  %v1888_v21 = vadd.f32 %v1887_v40, %v958_v25 }
 0x280   :  { %4606 = vmatprep.subr.mxu1 %v5590_v11  ;;  %v1957_v29 = vadd.f32 %v1956_v51, %v1886_v17 }
 0x281   :  { %v10204_v15 = vsub.f32 %v3322_v48, %v5249_v34  ;;  %vm11123_vm11 = vcmp.gt.f32.partialorder %v10195_v4, 1.0  ;;  %v3345_v14 = vmul.f32 0.95, %v10195_v4  ;;  %4607 = vmatpush2.msra.mxu1 %v3972_v0 }
 0x282   :  { %5479 = vmatmul.mubr.msk.f32.gmra.mxu0 %vm11227_vm15, %v11145_v35  ;;  %4608 = vmatprep.subr.mxu1 %v5590_v11  ;;  %v5252_v26 = vsel %vm11123_vm11, 1.0, %v5590_v11  ;;  %vm11230_vm11 = vcmp.gt.f32.partialorder %v9780_v47, 1.0  ;;  %v3965_v47 = vld [vmem:[%s11028_s3 + $0x380] sm:$0xff] }
 0x283   :  { %5480 = vmatprep.mubr.msk.f32.mxu0 %vm3050_vm4, %v11145_v35  ;;  %vm3330_vm13 = vcmp.gt.f32.partialorder %v10204_v15, 1.0  ;;  %v3346_v2 = vmul.f32 0.95, %v10204_v15  ;;  %v3349_v12 = vadd.f32 %v3345_v14, %v9453_v39  ;;  %4609 = vmatpush2.msra.mxu1 %v3971_v61  ;;  %vm11228_vm4 = vcmp.gt.f32.partialorder %v9630_v63, 1.0 }
 0x284   :  { %4610 = vmatprep.subr.mxu1 %v5590_v11  ;;  %v5253_v16 = vsel %vm3330_vm13, 1.0, %v5590_v11 }
 0x285   :  { %v3350_v37 = vadd.f32 %v3346_v2, %v9467_v20  ;;  %v10229_v54 = vsub.f32 %v3349_v12, %v5252_v26  ;;  %4611 = vmatpush2.msra.mxu1 %v3970_v24 }
 0x286   :  { %5481 = vmatmul.mubr.msk.f32.gmra.mxu0 %vm11228_vm4, %v11145_v35  ;;  %4612 = vmatprep.subr.mxu1 %v5590_v11  ;;  %vm11229_vm4 = vcmp.gt.f32.partialorder %v9704_v50, 1.0  ;;  %v3966_v50 = vld [vmem:[%s11028_s3 + $0x388] sm:$0xff] }
 0x287   :  { %5482 = vmatprep.mubr.msk.f32.mxu0 %vm3078_vm5, %v11145_v35  ;;  %v10245_v49 = vsub.f32 %v3350_v37, %v5253_v16  ;;  %vm11124_vm15 = vcmp.gt.f32.partialorder %v10229_v54, 1.0  ;;  %v3373_v63 = vmul.f32 0.95, %v10229_v54  ;;  %4613 = vmatpush2.msra.mxu1 %v3969_v30 }
 0x288   :  { %4614 = vmatprep.subr.mxu1 %v5590_v11  ;;  %v5256_v1 = vsel %vm11124_vm15, 1.0, %v5590_v11  ;;  %vm11232_vm15 = vcmp.gt.f32.partialorder %v9842_v22, 1.0  ;;  %v1959_v22 = vadd.f32 %v1958_v31, %v1888_v21 }
 0x289   :  { %vm11125_vm5 = vcmp.gt.f32.partialorder %v10245_v49, 1.0  ;;  %v3374_v41 = vmul.f32 0.95, %v10245_v49  ;;  %v3377_v55 = vadd.f32 %v3373_v63, %v9453_v39  ;;  %4615 = vmatpush2.msra.mxu1 %v3968_v8 }
 0x28a   :  { %5483 = vmatmul.mubr.msk.f32.gmra.mxu0 %vm11229_vm4, %v11145_v35  ;;  %4616 = vmatprep.subr.mxu1 %v5590_v11  ;;  %v5257_v58 = vsel %vm11125_vm5, 1.0, %v5590_v11  ;;  %vm11231_vm4 = vcmp.gt.f32.partialorder %v9754_v36, 1.0 }
 0x28b   :  { %5484 = vmatprep.mubr.msk.f32.mxu0 %vm11230_vm11, %v11145_v35  ;;  %v3378_v13 = vadd.f32 %v3374_v41, %v9467_v20  ;;  %v10274_v32 = vsub.f32 %v3377_v55, %v5256_v1  ;;  %4617 = vmatpush2.msra.mxu1 %v3967_v38 }
 0x28c   :  { %4618 = vmatprep.subr.mxu1 %v5590_v11 }
 0x28d   :  { %v10283_v60 = vsub.f32 %v3378_v13, %v5257_v58  ;;  %vm3385_vm11 = vcmp.gt.f32.partialorder %v10274_v32, 1.0  ;;  %v3401_v52 = vmul.f32 0.95, %v10274_v32  ;;  %4619 = vmatpush2.msra.mxu1 %v3966_v50 }
 0x28e   :  { %5485 = vmatmul.mubr.msk.f32.gmra.mxu0 %vm11231_vm4, %v11145_v35  ;;  %4620 = vmatprep.subr.mxu1 %v5590_v11  ;;  %v5260_v36 = vsel %vm3385_vm11, 1.0, %v5590_v11 }
 0x28f   :  { %5486 = vmatprep.mubr.msk.f32.mxu0 %vm11232_vm15, %v11145_v35  ;;  %vm3386_vm5 = vcmp.gt.f32.partialorder %v10283_v60, 1.0  ;;  %v3402_v9 = vmul.f32 0.95, %v10283_v60  ;;  %v3405_v43 = vadd.f32 %v3401_v52, %v9453_v39  ;;  %4621 = vmatpush2.msra.mxu1 %v3965_v47  ;;  %vm11233_vm15 = vcmp.gt.f32.partialorder %v9828_v23, 1.0 }
 0x290   :  { %v5261_v34 = vsel %vm3386_vm5, 1.0, %v5590_v11 }
 0x291   :  { %v3406_v62 = vadd.f32 %v3402_v9, %v9467_v20  ;;  %v10301_v6 = vsub.f32 %v3405_v43, %v5260_v36  ;;  %v2027_v0 = vpop.f32.mrf.mxu1 }
 0x292   :  { %5487 = vmatmul.mubr.msk.f32.gmra.mxu0 %vm11233_vm15, %v11145_v35  ;;  %v2098_v48 = vpop.f32.mrf.mxu0  ;;  %v2028_v61 = vadd.f32 %v2027_v0, %v1957_v29 }
 0x293   :  { %5488 = vmatprep.mubr.msk.f32.mxu0 %vm3162_vm7, %v11145_v35  ;;  %v10312_v14 = vsub.f32 %v3406_v62, %v5261_v34  ;;  %vm11126_vm4 = vcmp.gt.f32.partialorder %v10301_v6, 1.0  ;;  %v3429_v24 = vmul.f32 0.95, %v10301_v6  ;;  %v2029_v2 = vpop.f32.mrf.mxu1 }
 0x294   :  { %v10316_v23 = vadd.f32 %v2098_v48, %v2028_v61  ;;  %v2030_v12 = vadd.f32 %v2029_v2, %v1959_v22  ;;  %v2100_v57 = vpop.f32.mrf.mxu0  ;;  %v5264_v30 = vsel %vm11126_vm4, 1.0, %v5590_v11 }
 0x295   :  { %vm3414_vm15 = vcmp.gt.f32.partialorder %v10312_v14, 1.0  ;;  %v3430_v26 = vmul.f32 0.95, %v10312_v14  ;;  %v3433_v37 = vadd.f32 %v3429_v24, %v9453_v39 }
 0x296   :  { %5489 = vmatmul.mubr.msk.f32.gmra.mxu0 %vm3161_vm3, %v11145_v35  ;;  %v10330_v16 = vadd.f32 %v2100_v57, %v2030_v12  ;;  %vm2967_vm7 = vcmp.gt.f32.partialorder %v10316_v23, 1.0  ;;  %v2983_v3 = vmul.f32 0.95, %v10316_v23  ;;  %v5265_v8 = vsel %vm3414_vm15, 1.0, %v5590_v11 }
 0x297   :  { %5490 = vmatprep.mubr.msk.f32.mxu0 %vm3190_vm2, %v11145_v35  ;;  %v3434_v46 = vadd.f32 %v3430_v26, %v9467_v20  ;;  %v10338_v63 = vsub.f32 %v3433_v37, %v5264_v30  ;;  %v5202_v38 = vsel %vm2967_vm7, 1.0, %v5590_v11 }
 0x298   :  { %vm2968_vm3 = vcmp.gt.f32.partialorder %v10330_v16, 1.0  ;;  %v2984_v10 = vmul.f32 0.95, %v10330_v16  ;;  %v2987_v27 = vadd.f32 %v2983_v3, %v10316_v23 }
 0x299   :  { %v10343_v42 = vsub.f32 %v3434_v46, %v5265_v8  ;;  %5524 = vmatprep.mubr.msk.f32.mxu1 %vm2968_vm3, %v11145_v35  ;;  %vm3441_vm2 = vcmp.gt.f32.partialorder %v10338_v63, 1.0  ;;  %v3457_v41 = vmul.f32 0.95, %v10338_v63  ;;  %v5203_v5 = vsel %vm2968_vm3, 1.0, %v5590_v11 }
 0x29a   :  { %5491 = vmatmul.mubr.msk.f32.gmra.mxu0 %vm3189_vm6, %v11145_v35  ;;  %5525 = vmatmul.mubr.msk.f32.vlgmr.msra.gmra.mxu1 %vm2967_vm7, %v11145_v35  ;;  %v2988_v55 = vadd.f32 %v2984_v10, %v10330_v16  ;;  %v2991_v1 = vsub.f32 %v2987_v27, %v5202_v38  ;;  %v5268_v59 = vsel %vm3441_vm2, 1.0, %v5590_v11 }
 0x29b   :  { %5492 = vmatprep.mubr.msk.f32.mxu0 %vm3218_vm8, %v11145_v35  ;;  %vm3442_vm4 = vcmp.gt.f32.partialorder %v10343_v42, 1.0  ;;  %v3458_v7 = vmul.f32 0.95, %v10343_v42  ;;  %v3461_v51 = vadd.f32 %v3457_v41, %v9453_v39 }
 0x29c   :  { %v2992_v50 = vsub.f32 %v2988_v55, %v5203_v5  ;;  %vm2995_vm6 = vcmp.gt.f32.partialorder %v2991_v1, 1.0  ;;  %v3011_v33 = vmul.f32 0.95, %v2991_v1  ;;  %v5269_v25 = vsel %vm3442_vm4, 1.0, %v5590_v11 }
 0x29d   :  { %v3462_v13 = vadd.f32 %v3458_v7, %v9467_v20  ;;  %v10371_v58 = vsub.f32 %v3461_v51, %v5268_v59  ;;  %v5206_v44 = vsel %vm2995_vm6, 1.0, %v5590_v11 }
 0x29e   :  { %5493 = vmatmul.mubr.msk.f32.gmra.mxu0 %vm3217_vm12, %v11145_v35  ;;  %vm2996_vm8 = vcmp.gt.f32.partialorder %v2992_v50, 1.0  ;;  %v3012_v40 = vmul.f32 0.95, %v2992_v50  ;;  %v3015_v47 = vadd.f32 %v3011_v33, %v10316_v23 }
 0x29f   :  { %5494 = vmatprep.mubr.msk.f32.mxu0 %vm3246_vm14, %v11145_v35  ;;  %v10377_v52 = vsub.f32 %v3462_v13, %v5269_v25  ;;  %5526 = vmatprep.mubr.msk.f32.mxu1 %vm2996_vm8, %v11145_v35  ;;  %vm3469_vm12 = vcmp.gt.f32.partialorder %v10371_v58, 1.0  ;;  %v3485_v17 = vmul.f32 0.95, %v10371_v58  ;;  %v5207_v43 = vsel %vm2996_vm8, 1.0, %v5590_v11 }
 0x2a0   :  { %5527 = vmatmul.mubr.msk.f32.gmra.mxu1 %vm2995_vm6, %v11145_v35  ;;  %v3016_v31 = vadd.f32 %v3012_v40, %v10330_v16  ;;  %v3019_v18 = vsub.f32 %v3015_v47, %v5206_v44  ;;  %v5272_v21 = vsel %vm3469_vm12, 1.0, %v5590_v11 }
 0x2a1   :  { %vm3470_vm14 = vcmp.gt.f32.partialorder %v10377_v52, 1.0  ;;  %v3486_v9 = vmul.f32 0.95, %v10377_v52  ;;  %v3489_v36 = vadd.f32 %v3485_v17, %v9453_v39 }
 0x2a2   :  { %5495 = vmatmul.mubr.msk.f32.gmra.mxu0 %vm3245_vm10, %v11145_v35  ;;  %v3020_v29 = vsub.f32 %v3016_v31, %v5207_v43  ;;  %vm3023_vm7 = vcmp.gt.f32.partialorder %v3019_v18, 1.0  ;;  %v3039_v62 = vmul.f32 0.95, %v3019_v18  ;;  %v5273_v45 = vsel %vm3470_vm14, 1.0, %v5590_v11 }
 0x2a3   :  { %5496 = vmatprep.mubr.msk.f32.mxu0 %vm3274_vm0, %v11145_v35  ;;  %v3490_v22 = vadd.f32 %v3486_v9, %v9467_v20  ;;  %v10402_v0 = vsub.f32 %v3489_v36, %v5272_v21  ;;  %v5210_v53 = vsel %vm3023_vm7, 1.0, %v5590_v11 }
 0x2a4   :  { %vm3024_vm10 = vcmp.gt.f32.partialorder %v3020_v29, 1.0  ;;  %v3040_v48 = vmul.f32 0.95, %v3020_v29  ;;  %v3043_v34 = vadd.f32 %v3039_v62, %v10316_v23 }
 0x2a5   :  { %v10405_v61 = vsub.f32 %v3490_v22, %v5273_v45  ;;  %5528 = vmatprep.mubr.msk.f32.mxu1 %vm3024_vm10, %v11145_v35  ;;  %vm3497_vm0 = vcmp.gt.f32.partialorder %v10402_v0, 1.0  ;;  %v3513_v24 = vmul.f32 0.95, %v10402_v0  ;;  %v5211_v26 = vsel %vm3024_vm10, 1.0, %v5590_v11 }
 0x2a6   :  { %5497 = vmatmul.mubr.msk.f32.gmra.mxu0 %vm3273_vm9, %v11145_v35  ;;  %5529 = vmatmul.mubr.msk.f32.gmra.mxu1 %vm3023_vm7, %v11145_v35  ;;  %v3044_v2 = vadd.f32 %v3040_v48, %v10330_v16  ;;  %v3047_v12 = vsub.f32 %v3043_v34, %v5210_v53  ;;  %v5276_v57 = vsel %vm3497_vm0, 1.0, %v5590_v11  ;;  %vm11235_vm7 = vcmp.gt.f32.partialorder %v10195_v4, 1.0 }
 0x2a7   :  { %5498 = vmatprep.mubr.msk.f32.mxu0 %vm3302_vm1, %v11145_v35  ;;  %vm3498_vm3 = vcmp.gt.f32.partialorder %v10405_v61, 1.0  ;;  %v3514_v56 = vmul.f32 0.95, %v10405_v61  ;;  %v3517_v30 = vadd.f32 %v3513_v24, %v9453_v39  ;;  %vm11234_vm1 = vcmp.gt.f32.partialorder %v10155_v19, 1.0 }
 0x2a8   :  { %v3048_v37 = vsub.f32 %v3044_v2, %v5211_v26  ;;  %vm3051_vm9 = vcmp.gt.f32.partialorder %v3047_v12, 1.0  ;;  %v3067_v28 = vmul.f32 0.95, %v3047_v12  ;;  %v5277_v46 = vsel %vm3498_vm3, 1.0, %v5590_v11 }
 0x2a9   :  { %v3518_v3 = vadd.f32 %v3514_v56, %v9467_v20  ;;  %v10433_v8 = vsub.f32 %v3517_v30, %v5276_v57  ;;  %v5214_v19 = vsel %vm3051_vm9, 1.0, %v5590_v11  ;;  %vm11236_vm10 = vcmp.gt.f32.partialorder %v10245_v49, 1.0 }
 0x2aa   :  { %5499 = vmatmul.mubr.msk.f32.gmra.mxu0 %vm11234_vm1, %v11145_v35  ;;  %vm3052_vm6 = vcmp.gt.f32.partialorder %v3048_v37, 1.0  ;;  %v3068_v10 = vmul.f32 0.95, %v3048_v37  ;;  %v3071_v27 = vadd.f32 %v3067_v28, %v10316_v23 }
 0x2ab   :  { %5500 = vmatprep.mubr.msk.f32.mxu0 %vm3330_vm13, %v11145_v35  ;;  %v10439_v38 = vsub.f32 %v3518_v3, %v5277_v46  ;;  %5530 = vmatprep.mubr.msk.f32.mxu1 %vm3052_vm6, %v11145_v35  ;;  %vm3525_vm8 = vcmp.gt.f32.partialorder %v10433_v8, 1.0  ;;  %v3541_v41 = vmul.f32 0.95, %v10433_v8  ;;  %v5215_v7 = vsel %vm3052_vm6, 1.0, %v5590_v11 }
 0x2ac   :  { %5531 = vmatmul.mubr.msk.f32.gmra.mxu1 %vm3051_vm9, %v11145_v35  ;;  %v3072_v55 = vadd.f32 %v3068_v10, %v10330_v16  ;;  %v3075_v15 = vsub.f32 %v3071_v27, %v5214_v19  ;;  %v5280_v5 = vsel %vm3525_vm8, 1.0, %v5590_v11  ;;  %vm11237_vm6 = vcmp.gt.f32.partialorder %v10229_v54, 1.0 }
 0x2ad   :  { %vm3526_vm13 = vcmp.gt.f32.partialorder %v10439_v38, 1.0  ;;  %v3542_v1 = vmul.f32 0.95, %v10439_v38  ;;  %v3545_v59 = vadd.f32 %v3541_v41, %v9453_v39 }
 0x2ae   :  { %5501 = vmatmul.mubr.msk.f32.gmra.mxu0 %vm11235_vm7, %v11145_v35  ;;  %v3076_v51 = vsub.f32 %v3072_v55, %v5215_v7  ;;  %vm3079_vm9 = vcmp.gt.f32.partialorder %v3075_v15, 1.0  ;;  %v3095_v50 = vmul.f32 0.95, %v3075_v15  ;;  %v5281_v4 = vsel %vm3526_vm13, 1.0, %v5590_v11 }
 0x2af   :  { %5502 = vmatprep.mubr.msk.f32.mxu0 %vm11236_vm10, %v11145_v35  ;;  %v3546_v33 = vadd.f32 %v3542_v1, %v9467_v20  ;;  %v10464_v13 = vsub.f32 %v3545_v59, %v5280_v5  ;;  %v5218_v49 = vsel %vm3079_vm9, 1.0, %v5590_v11 }
 0x2b0   :  { %vm3080_vm1 = vcmp.gt.f32.partialorder %v3076_v51, 1.0  ;;  %v3096_v25 = vmul.f32 0.95, %v3076_v51  ;;  %v3099_v40 = vadd.f32 %v3095_v50, %v10316_v23 }
 0x2b1   :  { %v10467_v47 = vsub.f32 %v3546_v33, %v5281_v4  ;;  %5532 = vmatprep.mubr.msk.f32.mxu1 %vm3080_vm1, %v11145_v35  ;;  %v5219_v18 = vsel %vm3080_vm1, 1.0, %v5590_v11  ;;  %v3569_v54 = vmul.f32 0.95, %v10464_v13 }
 0x2b2   :  { %5503 = vmatmul.mubr.msk.f32.gmra.mxu0 %vm11237_vm6, %v11145_v35  ;;  %5533 = vmatmul.mubr.msk.f32.gmra.mxu1 %vm3079_vm9, %v11145_v35  ;;  %v3100_v44 = vadd.f32 %v3096_v25, %v10330_v16  ;;  %v3103_v17 = vsub.f32 %v3099_v40, %v5218_v49  ;;  %vm3553_vm9 = vcmp.gt.f32.partialorder %v10464_v13, 1.0 }
 0x2b3   :  { %5504 = vmatprep.mubr.msk.f32.mxu0 %vm3386_vm5, %v11145_v35  ;;  %v3570_v31 = vmul.f32 0.95, %v10467_v47  ;;  %vm3554_vm5 = vcmp.gt.f32.partialorder %v10467_v47, 1.0  ;;  %v3573_v32 = vadd.f32 %v3569_v54, %v9453_v39  ;;  %v5284_v24 = vsel %vm3553_vm9, 1.0, %v5590_v11 }
 0x2b4   :  { %v3104_v9 = vsub.f32 %v3100_v44, %v5219_v18  ;;  %vm3107_vm7 = vcmp.gt.f32.partialorder %v3103_v17, 1.0  ;;  %v3123_v43 = vmul.f32 0.95, %v3103_v17  ;;  %v5285_v14 = vsel %vm3554_vm5, 1.0, %v5590_v11 }
 0x2b5   :  { %v3574_v60 = vadd.f32 %v3570_v31, %v9467_v20  ;;  %v5222_v29 = vsel %vm3107_vm7, 1.0, %v5590_v11  ;;  %v10512_v2 = vsub.f32 %v3573_v32, %v5284_v24 }
 0x2b6   :  { %5505 = vmatmul.mubr.msk.f32.gmra.mxu0 %vm3385_vm11, %v11145_v35  ;;  %vm3108_vm10 = vcmp.gt.f32.partialorder %v3104_v9, 1.0  ;;  %v3124_v21 = vmul.f32 0.95, %v3104_v9  ;;  %v3127_v36 = vadd.f32 %v3123_v43, %v10316_v23  ;;  %vm11238_vm11 = vcmp.gt.f32.partialorder %v10301_v6, 1.0  ;;  %v10590_v9 = vld [vmem:[%s11029_s4] ss:$0 sm:$0xff] }
 0x2b7   :  { %5506 = vmatprep.mubr.msk.f32.mxu0 %vm3414_vm15, %v11145_v35  ;;  %5534 = vmatprep.mubr.msk.f32.mxu1 %vm3108_vm10, %v11145_v35  ;;  %v5223_v45 = vsel %vm3108_vm10, 1.0, %v5590_v11  ;;  %v10504_v48 = vsub.f32 %v3574_v60, %v5285_v14  ;;  %v3597_v63 = vmul.f32 0.95, %v10512_v2  ;;  %vm3581_vm6 = vcmp.gt.f32.partialorder %v10512_v2, 1.0 }
 0x2b8   :  { %5535 = vmatmul.mubr.msk.f32.gmra.mxu1 %vm3107_vm7, %v11145_v35  ;;  %v3128_v62 = vadd.f32 %v3124_v21, %v10330_v16  ;;  %v3131_v22 = vsub.f32 %v3127_v36, %v5222_v29  ;;  %v5288_v7 = vsel %vm3581_vm6, 1.0, %v5590_v11 }
 0x2b9   :  { %v3598_v56 = vmul.f32 0.95, %v10504_v48  ;;  %v3601_v58 = vadd.f32 %v3597_v63, %v9453_v39 }
 0x2ba   :  { %5507 = vmatmul.mubr.msk.f32.gmra.mxu0 %vm11238_vm11, %v11145_v35  ;;  %v3132_v34 = vsub.f32 %v3128_v62, %v5223_v45  ;;  %vm3135_vm15 = vcmp.gt.f32.partialorder %v3131_v22, 1.0  ;;  %v3151_v53 = vmul.f32 0.95, %v3131_v22 }
 0x2bb   :  { %5508 = vmatprep.mubr.msk.f32.mxu0 %vm3442_vm4, %v11145_v35  ;;  %v5226_v42 = vsel %vm3135_vm15, 1.0, %v5590_v11  ;;  %v3602_v52 = vadd.f32 %v3598_v56, %v9467_v20  ;;  %v3605_v5 = vsub.f32 %v3601_v58, %v5288_v7 }
 0x2bc   :  { %vm3136_vm1 = vcmp.gt.f32.partialorder %v3132_v34, 1.0  ;;  %v3152_v6 = vmul.f32 0.95, %v3132_v34  ;;  %v3155_v12 = vadd.f32 %v3151_v53, %v10316_v23 }
 0x2bd   :  { %5536 = vmatprep.mubr.msk.f32.mxu1 %vm3136_vm1, %v11145_v35  ;;  %v5227_v30 = vsel %vm3136_vm1, 1.0, %v5590_v11  ;;  %v3625_v25 = vmul.f32 0.95, %v3605_v5  ;;  %vm3609_vm7 = vcmp.gt.f32.partialorder %v3605_v5, 1.0 }
 0x2be   :  { %5509 = vmatmul.mubr.msk.f32.gmra.mxu0 %vm3441_vm2, %v11145_v35  ;;  %5537 = vmatmul.mubr.msk.f32.gmra.mxu1 %vm3135_vm15, %v11145_v35  ;;  %v3156_v26 = vadd.f32 %v3152_v6, %v10330_v16  ;;  %v3159_v57 = vsub.f32 %v3155_v12, %v5226_v42  ;;  %vm3582_vm2 = vcmp.gt.f32.partialorder %v10504_v48, 1.0  ;;  %v5292_v43 = vsel %vm3609_vm7, 1.0, %v5590_v11 }
 0x2bf   :  { %5510 = vmatprep.mubr.msk.f32.mxu0 %vm3470_vm14, %v11145_v35  ;;  %v5289_v61 = vsel %vm3582_vm2, 1.0, %v5590_v11  ;;  %v3629_v31 = vadd.f32 %v3625_v25, %v9453_v39 }
 0x2c0   :  { %v3160_v37 = vsub.f32 %v3156_v26, %v5227_v30  ;;  %vm3163_vm4 = vcmp.gt.f32.partialorder %v3159_v57, 1.0  ;;  %v3179_v28 = vmul.f32 0.95, %v3159_v57  ;;  %v3606_v55 = vsub.f32 %v3602_v52, %v5289_v61 }
 0x2c1   :  { %v5230_v10 = vsel %vm3163_vm4, 1.0, %v5590_v11  ;;  %v3633_v32 = vsub.f32 %v3629_v31, %v5292_v43 }
 0x2c2   :  { %5511 = vmatmul.mubr.msk.f32.gmra.mxu0 %vm3469_vm12, %v11145_v35  ;;  %vm3164_vm14 = vcmp.gt.f32.partialorder %v3160_v37, 1.0  ;;  %v3180_v3 = vmul.f32 0.95, %v3160_v37  ;;  %v3183_v46 = vadd.f32 %v3179_v28, %v10316_v23  ;;  %v3626_v51 = vmul.f32 0.95, %v3606_v55 }
 0x2c3   :  { %5512 = vmatprep.mubr.msk.f32.mxu0 %vm3498_vm3, %v11145_v35  ;;  %5538 = vmatprep.mubr.msk.f32.mxu1 %vm3164_vm14, %v11145_v35  ;;  %v5231_v41 = vsel %vm3164_vm14, 1.0, %v5590_v11  ;;  %vm3637_vm11 = vcmp.gt.f32.partialorder %v3633_v32, 1.0 }
 0x2c4   :  { %5539 = vmatmul.mubr.msk.f32.gmra.mxu1 %vm3163_vm4, %v11145_v35  ;;  %v3184_v27 = vadd.f32 %v3180_v3, %v10330_v16  ;;  %v3187_v19 = vsub.f32 %v3183_v46, %v5230_v10  ;;  %v3630_v49 = vadd.f32 %v3626_v51, %v9467_v20 }
 0x2c6   :  { %5513 = vmatmul.mubr.msk.f32.gmra.mxu0 %vm3497_vm0, %v11145_v35  ;;  %v3188_v15 = vsub.f32 %v3184_v27, %v5231_v41  ;;  %vm3191_vm12 = vcmp.gt.f32.partialorder %v3187_v19, 1.0  ;;  %v3207_v1 = vmul.f32 0.95, %v3187_v19 }
 0x2c7   :  { %5514 = vmatprep.mubr.msk.f32.mxu0 %vm3526_vm13, %v11145_v35  ;;  %v5234_v38 = vsel %vm3191_vm12, 1.0, %v5590_v11 }
 0x2c8   :  { %vm3192_vm3 = vcmp.gt.f32.partialorder %v3188_v15, 1.0  ;;  %v3208_v59 = vmul.f32 0.95, %v3188_v15  ;;  %v3211_v0 = vadd.f32 %v3207_v1, %v10316_v23 }
 0x2c9   :  { %5540 = vmatprep.mubr.msk.f32.mxu1 %vm3192_vm3, %v11145_v35  ;;  %v5235_v4 = vsel %vm3192_vm3, 1.0, %v5590_v11 }
 0x2ca   :  { %5515 = vmatmul.mubr.msk.f32.gmra.mxu0 %vm3525_vm8, %v11145_v35  ;;  %5541 = vmatmul.mubr.msk.f32.gmra.mxu1 %vm3191_vm12, %v11145_v35  ;;  %v3212_v50 = vadd.f32 %v3208_v59, %v10330_v16  ;;  %v3215_v33 = vsub.f32 %v3211_v0, %v5234_v38  ;;  %vm3610_vm8 = vcmp.gt.f32.partialorder %v3606_v55, 1.0 }
 0x2cb   :  { %5516 = vmatprep.mubr.msk.f32.mxu0 %vm3554_vm5, %v11145_v35  ;;  %v5293_v13 = vsel %vm3610_vm8, 1.0, %v5590_v11 }
 0x2cc   :  { %v3216_v40 = vsub.f32 %v3212_v50, %v5235_v4  ;;  %vm3219_vm0 = vcmp.gt.f32.partialorder %v3215_v33, 1.0  ;;  %v3235_v8 = vmul.f32 0.95, %v3215_v33  ;;  %v3634_v39 = vsub.f32 %v3630_v49, %v5293_v13 }
 0x2cd   :  { %v5238_v17 = vsel %vm3219_vm0, 1.0, %v5590_v11 }
 0x2ce   :  { %5517 = vmatmul.mubr.msk.f32.gmra.mxu0 %vm3553_vm9, %v11145_v35  ;;  %vm3220_vm13 = vcmp.gt.f32.partialorder %v3216_v40, 1.0  ;;  %v3236_v47 = vmul.f32 0.95, %v3216_v40  ;;  %v3239_v44 = vadd.f32 %v3235_v8, %v10316_v23  ;;  %vm3638_vm9 = vcmp.gt.f32.partialorder %v3634_v39, 1.0 }
 0x2cf   :  { %5518 = vmatprep.mubr.msk.f32.mxu0 %vm3582_vm2, %v11145_v35  ;;  %5542 = vmatprep.mubr.msk.f32.mxu1 %vm3220_vm13, %v11145_v35  ;;  %v5239_v54 = vsel %vm3220_vm13, 1.0, %v5590_v11 }
 0x2d0   :  { %5543 = vmatmul.mubr.msk.f32.gmra.mxu1 %vm3219_vm0, %v11145_v35  ;;  %v3240_v20 = vadd.f32 %v3236_v47, %v10330_v16  ;;  %v3243_v18 = vsub.f32 %v3239_v44, %v5238_v17 }
 0x2d2   :  { %5519 = vmatmul.mubr.msk.f32.gmra.mxu0 %vm3581_vm6, %v11145_v35  ;;  %v3244_v60 = vsub.f32 %v3240_v20, %v5239_v54  ;;  %vm3247_vm5 = vcmp.gt.f32.partialorder %v3243_v18, 1.0  ;;  %v3263_v21 = vmul.f32 0.95, %v3243_v18 }
 0x2d3   :  { %5520 = vmatprep.mubr.msk.f32.mxu0 %vm3610_vm8, %v11145_v35  ;;  %v4054_v36 = vpop.f32.mrf.mxu0  ;;  %v5242_v34 = vsel %vm3247_vm5, 1.0, %v5590_v11 }
 0x2d4   :  { %v4244_v29 = vpop.f32.mrf.mxu1  ;;  %v4055_v62 = vadd.f32 %v10590_v9, %v4054_v36  ;;  %vm3248_vm10 = vcmp.gt.f32.partialorder %v3244_v60, 1.0  ;;  %v3264_v22 = vmul.f32 0.95, %v3244_v60  ;;  %v3267_v14 = vadd.f32 %v3263_v21, %v10316_v23 }
 0x2d5   :  { %v4056_v45 = vpop.f32.mrf.mxu0  ;;  %5544 = vmatprep.mubr.msk.f32.mxu1 %vm3248_vm10, %v11145_v35  ;;  %v5243_v42 = vsel %vm3248_vm10, 1.0, %v5590_v11 }
 0x2d6   :  { %5521 = vmatmul.mubr.msk.f32.gmra.mxu0 %vm3609_vm7, %v11145_v35  ;;  %v4246_v48 = vpop.f32.mrf.mxu1  ;;  %v10604_v53 = vadd.f32 %v4244_v29, %v4055_v62  ;;  %5545 = vmatmul.mubr.msk.f32.gmra.mxu1 %vm3247_vm5, %v11145_v35  ;;  %v3268_v24 = vadd.f32 %v3264_v22, %v10330_v16  ;;  %v3271_v2 = vsub.f32 %v3267_v14, %v5242_v34 }
 0x2d7   :  { %5522 = vmatprep.mubr.msk.f32.mxu0 %vm3638_vm9, %v11145_v35  ;;  %v4059_v6 = vpop.f32.mrf.mxu0 }
 0x2d8   :  { %v4249_v12 = vpop.f32.mrf.mxu1  ;;  %v4060_v56 = vadd.f32 %v10590_v9, %v4059_v6  ;;  %v3272_v26 = vsub.f32 %v3268_v24, %v5243_v42  ;;  %vm3275_vm15 = vcmp.gt.f32.partialorder %v3271_v2, 1.0  ;;  %v3291_v57 = vmul.f32 0.95, %v3271_v2 }
 0x2d9   :  { %v4061_v30 = vpop.f32.mrf.mxu0  ;;  %v5246_v10 = vsel %vm3275_vm15, 1.0, %v5590_v11 }
 0x2da   :  { %5523 = vmatmul.mubr.msk.f32.gmra.mxu0 %vm3637_vm11, %v11145_v35  ;;  %v4251_v63 = vpop.f32.mrf.mxu1  ;;  %v10614_v37 = vadd.f32 %v4249_v12, %v4060_v56  ;;  %vm3276_vm1 = vcmp.gt.f32.partialorder %v3272_v26, 1.0  ;;  %v3292_v28 = vmul.f32 0.95, %v3272_v26  ;;  %v3295_v52 = vadd.f32 %v3291_v57, %v10316_v23 }
 0x2db   :  { %v4064_v3 = vpop.f32.mrf.mxu0  ;;  %5546 = vmatprep.mubr.msk.f32.mxu1 %vm3276_vm1, %v11145_v35  ;;  %v5247_v55 = vsel %vm3276_vm1, 1.0, %v5590_v11 }
 0x2dc   :  { %v4254_v46 = vpop.f32.mrf.mxu1  ;;  %v4065_v58 = vadd.f32 %v10590_v9, %v4064_v3  ;;  %5547 = vmatmul.mubr.msk.f32.gmra.mxu1 %vm3275_vm15, %v11145_v35  ;;  %v3296_v27 = vadd.f32 %v3292_v28, %v10330_v16  ;;  %v3299_v61 = vsub.f32 %v3295_v52, %v5246_v10 }
 0x2dd   :  { %v4066_v19 = vpop.f32.mrf.mxu0 }
 0x2de   :  { %v4256_v41 = vpop.f32.mrf.mxu1  ;;  %v10623_v15 = vadd.f32 %v4254_v46, %v4065_v58  ;;  %v3300_v1 = vsub.f32 %v3296_v27, %v5247_v55  ;;  %vm3303_vm4 = vcmp.gt.f32.partialorder %v3299_v61, 1.0  ;;  %v3319_v7 = vmul.f32 0.95, %v3299_v61 }
 0x2df   :  { %v4069_v5 = vpop.f32.mrf.mxu0  ;;  %v5250_v4 = vsel %vm3303_vm4, 1.0, %v5590_v11 }
 0x2e0   :  { %v4259_v59 = vpop.f32.mrf.mxu1  ;;  %v4070_v0 = vadd.f32 %v10590_v9, %v4069_v5  ;;  %vm3304_vm2 = vcmp.gt.f32.partialorder %v3300_v1, 1.0  ;;  %v3320_v38 = vmul.f32 0.95, %v3300_v1  ;;  %v3323_v51 = vadd.f32 %v3319_v7, %v10316_v23 }
 0x2e1   :  { %v4071_v50 = vpop.f32.mrf.mxu0  ;;  %5548 = vmatprep.mubr.msk.f32.mxu1 %vm3304_vm2, %v11145_v35  ;;  %v5251_v44 = vsel %vm3304_vm2, 1.0, %v5590_v11 }
 0x2e2   :  { %v4261_v33 = vpop.f32.mrf.mxu1  ;;  %v10629_v25 = vadd.f32 %v4259_v59, %v4070_v0  ;;  %5549 = vmatmul.mubr.msk.f32.gmra.mxu1 %vm3303_vm4, %v11145_v35  ;;  %v3324_v40 = vadd.f32 %v3320_v38, %v10330_v16  ;;  %v3327_v8 = vsub.f32 %v3323_v51, %v5250_v4 }
 0x2e3   :  { %v4074_v49 = vpop.f32.mrf.mxu0 }
 0x2e4   :  { %v4264_v47 = vpop.f32.mrf.mxu1  ;;  %v4075_v17 = vadd.f32 %v10590_v9, %v4074_v49  ;;  %v3328_v31 = vsub.f32 %v3324_v40, %v5251_v44  ;;  %vm3331_vm14 = vcmp.gt.f32.partialorder %v3327_v8, 1.0  ;;  %v3347_v13 = vmul.f32 0.95, %v3327_v8 }
 0x2e5   :  { %v4076_v20 = vpop.f32.mrf.mxu0  ;;  %v5254_v36 = vsel %vm3331_vm14, 1.0, %v5590_v11 }
 0x2e6   :  { %v4266_v18 = vpop.f32.mrf.mxu1  ;;  %v10635_v54 = vadd.f32 %v4264_v47, %v4075_v17  ;;  %vm3332_vm6 = vcmp.gt.f32.partialorder %v3328_v31, 1.0  ;;  %v3348_v39 = vmul.f32 0.95, %v3328_v31  ;;  %v3351_v43 = vadd.f32 %v3347_v13, %v10316_v23 }
 0x2e7   :  { %v4079_v60 = vpop.f32.mrf.mxu0  ;;  %5550 = vmatprep.mubr.msk.f32.mxu1 %vm3332_vm6, %v11145_v35  ;;  %v5255_v45 = vsel %vm3332_vm6, 1.0, %v5590_v11 }
 0x2e8   :  { %v4269_v21 = vpop.f32.mrf.mxu1  ;;  %v4080_v29 = vadd.f32 %v10590_v9, %v4079_v60  ;;  %5551 = vmatmul.mubr.msk.f32.gmra.mxu1 %vm3331_vm14, %v11145_v35  ;;  %v3352_v32 = vadd.f32 %v3348_v39, %v10330_v16  ;;  %v3355_v62 = vsub.f32 %v3351_v43, %v5254_v36 }
 0x2e9   :  { %v4081_v22 = vpop.f32.mrf.mxu0 }
 0x2ea   :  { %v4271_v14 = vpop.f32.mrf.mxu1  ;;  %v10644_v48 = vadd.f32 %v4269_v21, %v4080_v29  ;;  %v3356_v34 = vsub.f32 %v3352_v32, %v5255_v45  ;;  %vm3359_vm12 = vcmp.gt.f32.partialorder %v3355_v62, 1.0  ;;  %v3375_v24 = vmul.f32 0.95, %v3355_v62 }
 0x2eb   :  { %v4084_v2 = vpop.f32.mrf.mxu0  ;;  %v5258_v30 = vsel %vm3359_vm12, 1.0, %v5590_v11 }
 0x2ec   :  { %v4274_v6 = vpop.f32.mrf.mxu1  ;;  %v4085_v12 = vadd.f32 %v10590_v9, %v4084_v2  ;;  %vm3360_vm3 = vcmp.gt.f32.partialorder %v3356_v34, 1.0  ;;  %v3376_v42 = vmul.f32 0.95, %v3356_v34  ;;  %v3379_v56 = vadd.f32 %v3375_v24, %v10316_v23 }
 0x2ed   :  { %v4086_v26 = vpop.f32.mrf.mxu0  ;;  %5552 = vmatprep.mubr.msk.f32.mxu1 %vm3360_vm3, %v11145_v35  ;;  %v5259_v10 = vsel %vm3360_vm3, 1.0, %v5590_v11 }
 0x2ee   :  { %v4276_v57 = vpop.f32.mrf.mxu1  ;;  %v10650_v63 = vadd.f32 %v4274_v6, %v4085_v12  ;;  %5553 = vmatmul.mubr.msk.f32.gmra.mxu1 %vm3359_vm12, %v11145_v35  ;;  %v3380_v28 = vadd.f32 %v3376_v42, %v10330_v16  ;;  %v3383_v52 = vsub.f32 %v3379_v56, %v5258_v30 }
 0x2ef   :  { %v4089_v3 = vpop.f32.mrf.mxu0 }
 0x2f0   :  { %v4279_v46 = vpop.f32.mrf.mxu1  ;;  %v4090_v58 = vadd.f32 %v10590_v9, %v4089_v3  ;;  %v3384_v27 = vsub.f32 %v3380_v28, %v5259_v10  ;;  %vm3387_vm0 = vcmp.gt.f32.partialorder %v3383_v52, 1.0  ;;  %v3403_v61 = vmul.f32 0.95, %v3383_v52 }
 0x2f1   :  { %v4091_v19 = vpop.f32.mrf.mxu0  ;;  %v5262_v0 = vsel %vm3387_vm0, 1.0, %v5590_v11 }
 0x2f2   :  { %v4281_v41 = vpop.f32.mrf.mxu1  ;;  %v10656_v55 = vadd.f32 %v4279_v46, %v4090_v58  ;;  %vm3388_vm8 = vcmp.gt.f32.partialorder %v3384_v27, 1.0  ;;  %v3404_v1 = vmul.f32 0.95, %v3384_v27  ;;  %v3407_v7 = vadd.f32 %v3403_v61, %v10316_v23 }
 0x2f3   :  { %v4094_v5 = vpop.f32.mrf.mxu0  ;;  %5554 = vmatprep.mubr.msk.f32.mxu1 %vm3388_vm8, %v11145_v35  ;;  %v5263_v40 = vsel %vm3388_vm8, 1.0, %v5590_v11 }
 0x2f4   :  { %v4284_v59 = vpop.f32.mrf.mxu1  ;;  %v4095_v38 = vadd.f32 %v10590_v9, %v4094_v5  ;;  %5555 = vmatmul.mubr.msk.f32.gmra.mxu1 %vm3387_vm0, %v11145_v35  ;;  %v3408_v51 = vadd.f32 %v3404_v1, %v10330_v16  ;;  %v3411_v50 = vsub.f32 %v3407_v7, %v5262_v0 }
 0x2f5   :  { %v4096_v33 = vpop.f32.mrf.mxu0 }
 0x2f6   :  { %v4286_v4 = vpop.f32.mrf.mxu1  ;;  %v10665_v8 = vadd.f32 %v4284_v59, %v4095_v38  ;;  %v3412_v49 = vsub.f32 %v3408_v51, %v5263_v40  ;;  %vm3415_vm13 = vcmp.gt.f32.partialorder %v3411_v50, 1.0  ;;  %v3431_v47 = vmul.f32 0.95, %v3411_v50 }
 0x2f7   :  { %v4099_v44 = vpop.f32.mrf.mxu0  ;;  %v5266_v43 = vsel %vm3415_vm13, 1.0, %v5590_v11 }
 0x2f8   :  { %v4289_v17 = vpop.f32.mrf.mxu1  ;;  %v4100_v31 = vadd.f32 %v10590_v9, %v4099_v44  ;;  %vm3416_vm7 = vcmp.gt.f32.partialorder %v3412_v49, 1.0  ;;  %v3432_v13 = vmul.f32 0.95, %v3412_v49  ;;  %v3435_v20 = vadd.f32 %v3431_v47, %v10316_v23 }
 0x2f9   :  { %v4101_v18 = vpop.f32.mrf.mxu0  ;;  %5556 = vmatprep.mubr.msk.f32.mxu1 %vm3416_vm7, %v11145_v35  ;;  %v5267_v62 = vsel %vm3416_vm7, 1.0, %v5590_v11 }
 0x2fa   :  { %v4291_v39 = vpop.f32.mrf.mxu1  ;;  %v10671_v60 = vadd.f32 %v4289_v17, %v4100_v31  ;;  %5557 = vmatmul.mubr.msk.f32.gmra.mxu1 %vm3415_vm13, %v11145_v35  ;;  %v3436_v21 = vadd.f32 %v3432_v13, %v10330_v16  ;;  %v3439_v36 = vsub.f32 %v3435_v20, %v5266_v43 }
 0x2fb   :  { %v4104_v29 = vpop.f32.mrf.mxu0 }
 0x2fc   :  { %v4294_v32 = vpop.f32.mrf.mxu1  ;;  %v4105_v22 = vadd.f32 %v10590_v9, %v4104_v29  ;;  %v3440_v14 = vsub.f32 %v3436_v21, %v5267_v62  ;;  %vm3443_vm5 = vcmp.gt.f32.partialorder %v3439_v36, 1.0  ;;  %v3459_v45 = vmul.f32 0.95, %v3439_v36 }
 0x2fd   :  { %v4106_v34 = vpop.f32.mrf.mxu0  ;;  %v5270_v26 = vsel %vm3443_vm5, 1.0, %v5590_v11 }
 0x2fe   :  { %v4296_v24 = vpop.f32.mrf.mxu1  ;;  %v10677_v2 = vadd.f32 %v4294_v32, %v4105_v22  ;;  %vm3444_vm10 = vcmp.gt.f32.partialorder %v3440_v14, 1.0  ;;  %v3460_v6 = vmul.f32 0.95, %v3440_v14  ;;  %v3463_v12 = vadd.f32 %v3459_v45, %v10316_v23 }
 0x2ff   :  { %v4109_v42 = vpop.f32.mrf.mxu0  ;;  %5558 = vmatprep.mubr.msk.f32.mxu1 %vm3444_vm10, %v11145_v35  ;;  %v5271_v46 = vsel %vm3444_vm10, 1.0, %v5590_v11 }
 0x300   :  { %v4299_v56 = vpop.f32.mrf.mxu1  ;;  %v4110_v57 = vadd.f32 %v10590_v9, %v4109_v42  ;;  %5559 = vmatmul.mubr.msk.f32.gmra.mxu1 %vm3443_vm5, %v11145_v35  ;;  %v3464_v30 = vadd.f32 %v3460_v6, %v10330_v16  ;;  %v3467_v28 = vsub.f32 %v3463_v12, %v5270_v26 }
 0x301   :  { %v4111_v52 = vpop.f32.mrf.mxu0 }
 0x302   :  { %v4301_v3 = vpop.f32.mrf.mxu1  ;;  %v10686_v10 = vadd.f32 %v4299_v56, %v4110_v57  ;;  %v3468_v58 = vsub.f32 %v3464_v30, %v5271_v46  ;;  %vm3471_vm9 = vcmp.gt.f32.partialorder %v3467_v28, 1.0  ;;  %v3487_v27 = vmul.f32 0.95, %v3467_v28 }
 0x303   :  { %v4114_v61 = vpop.f32.mrf.mxu0  ;;  %v5274_v0 = vsel %vm3471_vm9, 1.0, %v5590_v11 }
 0x304   :  { %v4304_v19 = vpop.f32.mrf.mxu1  ;;  %v4115_v41 = vadd.f32 %v10590_v9, %v4114_v61  ;;  %vm3472_vm11 = vcmp.gt.f32.partialorder %v3468_v58, 1.0  ;;  %v3488_v1 = vmul.f32 0.95, %v3468_v58  ;;  %v3491_v7 = vadd.f32 %v3487_v27, %v10316_v23 }
 0x305   :  { %v4116_v5 = vpop.f32.mrf.mxu0  ;;  %5560 = vmatprep.mubr.msk.f32.mxu1 %vm3472_vm11, %v11145_v35  ;;  %v5275_v40 = vsel %vm3472_vm11, 1.0, %v5590_v11 }
 0x306   :  { %v4306_v59 = vpop.f32.mrf.mxu1  ;;  %v10692_v38 = vadd.f32 %v4304_v19, %v4115_v41  ;;  %5561 = vmatmul.mubr.msk.f32.gmra.mxu1 %vm3471_vm9, %v11145_v35  ;;  %v3492_v51 = vadd.f32 %v3488_v1, %v10330_v16  ;;  %v3495_v50 = vsub.f32 %v3491_v7, %v5274_v0 }
 0x307   :  { %v4119_v33 = vpop.f32.mrf.mxu0 }
 0x308   :  { %v4309_v4 = vpop.f32.mrf.mxu1  ;;  %v4120_v49 = vadd.f32 %v10590_v9, %v4119_v33  ;;  %v3496_v47 = vsub.f32 %v3492_v51, %v5275_v40  ;;  %vm3499_vm15 = vcmp.gt.f32.partialorder %v3495_v50, 1.0  ;;  %v3515_v44 = vmul.f32 0.95, %v3495_v50 }
 0x309   :  { %v4121_v17 = vpop.f32.mrf.mxu0  ;;  %v5278_v21 = vsel %vm3499_vm15, 1.0, %v5590_v11 }
 0x30a   :  { %v4311_v31 = vpop.f32.mrf.mxu1  ;;  %v10698_v13 = vadd.f32 %v4309_v4, %v4120_v49  ;;  %vm3500_vm1 = vcmp.gt.f32.partialorder %v3496_v47, 1.0  ;;  %v3516_v20 = vmul.f32 0.95, %v3496_v47  ;;  %v3519_v18 = vadd.f32 %v3515_v44, %v10316_v23 }
 0x30b   :  { %v4124_v39 = vpop.f32.mrf.mxu0  ;;  %5562 = vmatprep.mubr.msk.f32.mxu1 %vm3500_vm1, %v11145_v35  ;;  %v5279_v14 = vsel %vm3500_vm1, 1.0, %v5590_v11 }
 0x30c   :  { %v4314_v43 = vpop.f32.mrf.mxu1  ;;  %v4125_v36 = vadd.f32 %v10590_v9, %v4124_v39  ;;  %5563 = vmatmul.mubr.msk.f32.gmra.mxu1 %vm3499_vm15, %v11145_v35  ;;  %v3520_v29 = vadd.f32 %v3516_v20, %v10330_v16  ;;  %v3523_v32 = vsub.f32 %v3519_v18, %v5278_v21 }
 0x30d   :  { %v4126_v62 = vpop.f32.mrf.mxu0 }
 0x30e   :  { %v4316_v22 = vpop.f32.mrf.mxu1  ;;  %v10707_v45 = vadd.f32 %v4314_v43, %v4125_v36  ;;  %v3524_v34 = vsub.f32 %v3520_v29, %v5279_v14  ;;  %vm3527_vm4 = vcmp.gt.f32.partialorder %v3523_v32, 1.0  ;;  %v3543_v24 = vmul.f32 0.95, %v3523_v32 }
 0x30f   :  { %v4129_v6 = vpop.f32.mrf.mxu0  ;;  %v5282_v28 = vsel %vm3527_vm4, 1.0, %v5590_v11 }
 0x310   :  { %v4319_v12 = vpop.f32.mrf.mxu1  ;;  %v4130_v42 = vadd.f32 %v10590_v9, %v4129_v6  ;;  %vm3528_vm2 = vcmp.gt.f32.partialorder %v3524_v34, 1.0  ;;  %v3544_v56 = vmul.f32 0.95, %v3524_v34  ;;  %v3547_v26 = vadd.f32 %v3543_v24, %v10316_v23 }
 0x311   :  { %v4131_v57 = vpop.f32.mrf.mxu0  ;;  %5564 = vmatprep.mubr.msk.f32.mxu1 %vm3528_vm2, %v11145_v35  ;;  %v5283_v61 = vsel %vm3528_vm2, 1.0, %v5590_v11 }
 0x312   :  { %v4321_v30 = vpop.f32.mrf.mxu1  ;;  %v10713_v52 = vadd.f32 %v4319_v12, %v4130_v42  ;;  %5565 = vmatmul.mubr.msk.f32.gmra.mxu1 %vm3527_vm4, %v11145_v35  ;;  %v3548_v3 = vadd.f32 %v3544_v56, %v10330_v16  ;;  %v3551_v46 = vsub.f32 %v3547_v26, %v5282_v28 }
 0x313   :  { %v4134_v58 = vpop.f32.mrf.mxu0 }
 0x314   :  { %v4324_v27 = vpop.f32.mrf.mxu1  ;;  %v4135_v19 = vadd.f32 %v10590_v9, %v4134_v58  ;;  %v3552_v41 = vsub.f32 %v3548_v3, %v5283_v61  ;;  %vm3555_vm14 = vcmp.gt.f32.partialorder %v3551_v46, 1.0  ;;  %v3571_v1 = vmul.f32 0.95, %v3551_v46 }
 0x315   :  { %v4136_v7 = vpop.f32.mrf.mxu0  ;;  %v5286_v4 = vsel %vm3555_vm14, 1.0, %v5590_v11 }
 0x316   :  { %v4326_v5 = vpop.f32.mrf.mxu1  ;;  %v10719_v59 = vadd.f32 %v4324_v27, %v4135_v19  ;;  %vm3556_vm6 = vcmp.gt.f32.partialorder %v3552_v41, 1.0  ;;  %v3572_v0 = vmul.f32 0.95, %v3552_v41  ;;  %v3575_v51 = vadd.f32 %v3571_v1, %v10316_v23 }
 0x317   :  { %v4139_v50 = vpop.f32.mrf.mxu0  ;;  %5566 = vmatprep.mubr.msk.f32.mxu1 %vm3556_vm6, %v11145_v35  ;;  %v5287_v31 = vsel %vm3556_vm6, 1.0, %v5590_v11 }
 0x318   :  { %v4329_v33 = vpop.f32.mrf.mxu1  ;;  %v4140_v40 = vadd.f32 %v10590_v9, %v4139_v50  ;;  %5567 = vmatmul.mubr.msk.f32.gmra.mxu1 %vm3555_vm14, %v11145_v35  ;;  %v3576_v49 = vadd.f32 %v3572_v0, %v10330_v16  ;;  %v3579_v47 = vsub.f32 %v3575_v51, %v5286_v4 }
 0x319   :  { %v4141_v44 = vpop.f32.mrf.mxu0 }
 0x31a   :  { %v4331_v17 = vpop.f32.mrf.mxu1  ;;  %v10728_v20 = vadd.f32 %v4329_v33, %v4140_v40  ;;  %v3580_v18 = vsub.f32 %v3576_v49, %v5287_v31  ;;  %vm3583_vm12 = vcmp.gt.f32.partialorder %v3579_v47, 1.0  ;;  %v3599_v39 = vmul.f32 0.95, %v3579_v47 }
 0x31b   :  { %v4144_v43 = vpop.f32.mrf.mxu0  ;;  %v5290_v14 = vsel %vm3583_vm12, 1.0, %v5590_v11 }
 0x31c   :  { %v4334_v21 = vpop.f32.mrf.mxu1  ;;  %v4145_v36 = vadd.f32 %v10590_v9, %v4144_v43  ;;  %vm3584_vm3 = vcmp.gt.f32.partialorder %v3580_v18, 1.0  ;;  %v3600_v29 = vmul.f32 0.95, %v3580_v18  ;;  %v3603_v32 = vadd.f32 %v3599_v39, %v10316_v23 }
 0x31d   :  { %v4146_v62 = vpop.f32.mrf.mxu0  ;;  %5568 = vmatprep.mubr.msk.f32.mxu1 %vm3584_vm3, %v11145_v35  ;;  %v5291_v42 = vsel %vm3584_vm3, 1.0, %v5590_v11 }
 0x31e   :  { %v4336_v22 = vpop.f32.mrf.mxu1  ;;  %v10734_v34 = vadd.f32 %v4334_v21, %v4145_v36  ;;  %v3607_v24 = vsub.f32 %v3603_v32, %v5290_v14  ;;  %5569 = vmatmul.mubr.msk.f32.gmra.mxu1 %vm3583_vm12, %v11145_v35  ;;  %v3604_v6 = vadd.f32 %v3600_v29, %v10330_v16 }
 0x320   :  { %v4339_v12 = vpop.f32.mrf.mxu1  ;;  %v3627_v26 = vmul.f32 0.95, %v3607_v24  ;;  %v3608_v57 = vsub.f32 %v3604_v6, %v5291_v42  ;;  %vm3611_vm0 = vcmp.gt.f32.partialorder %v3607_v24, 1.0 }
 0x321   :  { %v4149_v56 = vpop.f32.mrf.mxu0  ;;  %v5294_v19 = vsel %vm3611_vm0, 1.0, %v5590_v11 }
 0x322   :  { %v4150_v30 = vadd.f32 %v10590_v9, %v4149_v56  ;;  %v4341_v28 = vpop.f32.mrf.mxu1  ;;  %vm3612_vm8 = vcmp.gt.f32.partialorder %v3608_v57, 1.0  ;;  %v3628_v46 = vmul.f32 0.95, %v3608_v57  ;;  %v3631_v58 = vadd.f32 %v3627_v26, %v10316_v23 }
 0x323   :  { %v4151_v3 = vpop.f32.mrf.mxu0  ;;  %5570 = vmatprep.mubr.msk.f32.mxu1 %vm3612_vm8, %v11145_v35  ;;  %v5295_v5 = vsel %vm3612_vm8, 1.0, %v5590_v11 }
 0x324   :  { %v10741_v27 = vadd.f32 %v4339_v12, %v4150_v30  ;;  %v4344_v61 = vpop.f32.mrf.mxu1  ;;  %5571 = vmatmul.mubr.msk.f32.gmra.mxu1 %vm3611_vm0, %v11145_v35  ;;  %v3632_v41 = vadd.f32 %v3628_v46, %v10330_v16  ;;  %v3635_v0 = vsub.f32 %v3631_v58, %v5294_v19 }
 0x326   :  { %v4154_v1 = vpop.f32.mrf.mxu0  ;;  %v4346_v7 = vpop.f32.mrf.mxu1  ;;  %v3636_v50 = vsub.f32 %v3632_v41, %v5295_v5  ;;  %vm3639_vm7 = vcmp.gt.f32.partialorder %v3635_v0, 1.0 }
 0x327   :  { %v4155_v51 = vadd.f32 %v10590_v9, %v4154_v1 }
 0x328   :  { %v4156_v23 = vpop.f32.mrf.mxu0  ;;  %v4349_v33 = vpop.f32.mrf.mxu1  ;;  %vm3640_vm13 = vcmp.gt.f32.partialorder %v3636_v50, 1.0 }
 0x329   :  { %v10749_v4 = vadd.f32 %v4344_v61, %v4155_v51  ;;  %5572 = vmatprep.mubr.msk.f32.mxu1 %vm3640_vm13, %v11145_v35 }
 0x32a   :  { %v4159_v40 = vpop.f32.mrf.mxu0  ;;  %v4351_v49 = vpop.f32.mrf.mxu1  ;;  %5573 = vmatmul.mubr.msk.f32.gmra.mxu1 %vm3639_vm7, %v11145_v35 }
 0x32b   :  { %v4160_v16 = vadd.f32 %v10590_v9, %v4159_v40 }
 0x32c   :  { %v4161_v47 = vpop.f32.mrf.mxu0  ;;  %v4354_v44 = vpop.f32.mrf.mxu1 }
 0x32d   :  { %v10754_v17 = vadd.f32 %v4349_v33, %v4160_v16 }
 0x32e   :  { %v4164_v31 = vpop.f32.mrf.mxu0  ;;  %v4356_v18 = vpop.f32.mrf.mxu1 }
 0x32f   :  { %v4165_v39 = vadd.f32 %v10590_v9, %v4164_v31 }
 0x330   :  { %v4166_v43 = vpop.f32.mrf.mxu0  ;;  %v4359_v21 = vpop.f32.mrf.mxu1 }
 0x331   :  { %v10757_v36 = vadd.f32 %v4354_v44, %v4165_v39 }
 0x332   :  { %v4169_v29 = vpop.f32.mrf.mxu0  ;;  %v4361_v32 = vpop.f32.mrf.mxu1 }
 0x333   :  { %v4170_v62 = vadd.f32 %v10590_v9, %v4169_v29 }
 0x334   :  { %v4171_v22 = vpop.f32.mrf.mxu0  ;;  %v4364_v14 = vpop.f32.mrf.mxu1 }
 0x335   :  { %v10760_v24 = vadd.f32 %v4359_v21, %v4170_v62 }
 0x336   :  { %v4174_v35 = vpop.f32.mrf.mxu0  ;;  %v4366_v6 = vpop.f32.mrf.mxu1 }
 0x337   :  { %v4175_v12 = vadd.f32 %v10590_v9, %v4174_v35 }
 0x338   :  { %v4176_v42 = vpop.f32.mrf.mxu0 }
 0x339   :  { %v10763_v56 = vadd.f32 %v4364_v14, %v4175_v12 }
 0x33a   :  { %v4434_v26 = vpop.f32.mrf.mxu0 }
 0x33b   :  { %v4435_v50 = vadd.f32 %v4434_v26, %v10604_v53 }
 0x33c   :  { %v4436_v57 = vpop.f32.mrf.mxu0 }
 0x33e   :  { %v4439_v30 = vpop.f32.mrf.mxu0 }
 0x33f   :  { %v4440_v31 = vadd.f32 %v4439_v30, %v10614_v37 }
 0x340   :  { %v4441_v28 = vpop.f32.mrf.mxu0 }
 0x342   :  { %v4444_v3 = vpop.f32.mrf.mxu0 }
 0x343   :  { %v4445_v22 = vadd.f32 %v4444_v3, %v10623_v15 }
 0x344   :  { %v4446_v46 = vpop.f32.mrf.mxu0 }
 0x346   :  { %v4449_v58 = vpop.f32.mrf.mxu0 }
 0x347   :  { %v4450_v28 = vadd.f32 %v4449_v58, %v10629_v25 }
 0x348   :  { %v4451_v61 = vpop.f32.mrf.mxu0 }
 0x34a   :  { %v4454_v19 = vpop.f32.mrf.mxu0 }
 0x34c   :  { %v4456_v41 = vpop.f32.mrf.mxu0 }
 0x34e   :  { %v10765_v1 = vpop.f32.mrf.mxu0 }
 0x350   :  { %v4461_v7 = vpop.f32.mrf.mxu0 }
 0x352   :  { %v10767_v5 = vpop.f32.mrf.mxu0 }
 0x354   :  { %v4466_v0 = vpop.f32.mrf.mxu0 }
 0x356   :  { %v10769_v9 = vpop.f32.mrf.mxu0 }
 0x358   :  { %v4471_v51 = vpop.f32.mrf.mxu0 }
 0x35a   :  { %v10772_v23 = vpop.f32.mrf.mxu0  ;;  %v4624_v33 = vpop.f32.mrf.mxu1 }
 0x35b   :  { %v4625_v49 = vadd.f32 %v4624_v33, %v4435_v50  ;;  %v4455_v33 = vadd.f32 %v4454_v19, %v10635_v54 }
 0x35c   :  { %v4476_v40 = vpop.f32.mrf.mxu0  ;;  %v4626_v16 = vpop.f32.mrf.mxu1 }
 0x35d   :  { %vm4775_vm5 = vcmp.gt.f32.partialorder %v4625_v49, 1.0  ;;  %4779 = vst [vmem:[%s11030_s6] sm:$0xff] %v4625_v49  ;;  %v4781_v21 = vmul.f32 0.95, %v4625_v49 }
 0x35e   :  { %v10774_v47 = vpop.f32.mrf.mxu0  ;;  %v5301_v44 = vsel %vm4775_vm5, 1.0, %v5590_v11 }
 0x35f   :  { %4778 = vst [vmem:[%s11031_s5] sm:$0xff] %v5301_v44 }
 0x360   :  { %v4481_v53 = vpop.f32.mrf.mxu0  ;;  %v4629_v18 = vpop.f32.mrf.mxu1 }
 0x361   :  { %v4630_v43 = vadd.f32 %v4629_v18, %v4440_v31 }
 0x362   :  { %v10784_v39 = vpop.f32.mrf.mxu0  ;;  %v4631_v29 = vpop.f32.mrf.mxu1 }
 0x363   :  { %v4782_v62 = vadd.f32 %v4781_v21, %v4630_v43  ;;  %v4460_v21 = vadd.f32 %v10765_v1, %v10644_v48 }
 0x364   :  { %v4486_v32 = vpop.f32.mrf.mxu0 }
 0x365   :  { %v4783_v14 = vsub.f32 %v4782_v62, %v5301_v44 }
 0x366   :  { %v10787_v35 = vpop.f32.mrf.mxu0  ;;  %v4634_v6 = vpop.f32.mrf.mxu1 }
 0x367   :  { %vm4784_vm10 = vcmp.gt.f32.partialorder %v4783_v14, 1.0  ;;  %5304 = vst [vmem:[%s11030_s6 + $0x8] sm:$0xff] %v4783_v14  ;;  %v4635_v12 = vadd.f32 %v4634_v6, %v4445_v22  ;;  %v4792_v42 = vmul.f32 0.95, %v4783_v14 }
 0x368   :  { %v4491_v37 = vpop.f32.mrf.mxu0  ;;  %v5302_v26 = vsel %vm4784_vm10, 1.0, %v5590_v11  ;;  %v4636_v57 = vpop.f32.mrf.mxu1 }
 0x369   :  { %5303 = vst [vmem:[%s11031_s5 + $0x8] sm:$0xff] %v5302_v26  ;;  %v4793_v30 = vadd.f32 %v4792_v42, %v4635_v12  ;;  %v4465_v42 = vadd.f32 %v10767_v5, %v10650_v63 }
 0x36a   :  { %v10796_v15 = vpop.f32.mrf.mxu0 }
 0x36b   :  { %v4794_v3 = vsub.f32 %v4793_v30, %v5302_v26 }
 0x36c   :  { %v4496_v46 = vpop.f32.mrf.mxu0  ;;  %v4639_v61 = vpop.f32.mrf.mxu1 }
 0x36d   :  { %vm4795_vm9 = vcmp.gt.f32.partialorder %v4794_v3, 1.0  ;;  %5307 = vst [vmem:[%s11030_s6 + $0x10] sm:$0xff] %v4794_v3  ;;  %v4640_v7 = vadd.f32 %v4639_v61, %v4450_v28  ;;  %v4803_v0 = vmul.f32 0.95, %v4794_v3 }
 0x36e   :  { %v10802_v41 = vpop.f32.mrf.mxu0  ;;  %v5305_v51 = vsel %vm4795_vm9, 1.0, %v5590_v11  ;;  %v4641_v50 = vpop.f32.mrf.mxu1 }
 0x36f   :  { %5306 = vst [vmem:[%s11031_s5 + $0x10] sm:$0xff] %v5305_v51  ;;  %v4804_v58 = vadd.f32 %v4803_v0, %v4640_v7 }
 0x370   :  { %v4501_v25 = vpop.f32.mrf.mxu0 }
 0x371   :  { %v4805_v40 = vsub.f32 %v4804_v58, %v5305_v51  ;;  %v4470_v51 = vadd.f32 %v10769_v9, %v10656_v55 }
 0x372   :  { %v10809_v49 = vpop.f32.mrf.mxu0  ;;  %v4644_v16 = vpop.f32.mrf.mxu1 }
 0x373   :  { %vm4806_vm11 = vcmp.gt.f32.partialorder %v4805_v40, 1.0  ;;  %5310 = vst [vmem:[%s11030_s6 + $0x18] sm:$0xff] %v4805_v40  ;;  %v4645_v31 = vadd.f32 %v4644_v16, %v4455_v33  ;;  %v4814_v53 = vmul.f32 0.95, %v4805_v40 }
 0x374   :  { %v4506_v44 = vpop.f32.mrf.mxu0  ;;  %v5308_v18 = vsel %vm4806_vm11, 1.0, %v5590_v11  ;;  %v4646_v43 = vpop.f32.mrf.mxu1 }
 0x375   :  { %5309 = vst [vmem:[%s11031_s5 + $0x18] sm:$0xff] %v5308_v18  ;;  %v4815_v19 = vadd.f32 %v4814_v53, %v4645_v31  ;;  %v4475_v53 = vadd.f32 %v10772_v23, %v10665_v8 }
 0x376   :  { %v10818_v54 = vpop.f32.mrf.mxu0 }
 0x377   :  { %v4816_v29 = vsub.f32 %v4815_v19, %v5308_v18 }
 0x378   :  { %v4511_v32 = vpop.f32.mrf.mxu0  ;;  %v4649_v62 = vpop.f32.mrf.mxu1 }
 0x379   :  { %vm4817_vm15 = vcmp.gt.f32.partialorder %v4816_v29, 1.0  ;;  %5313 = vst [vmem:[%s11030_s6 + $0x20] sm:$0xff] %v4816_v29  ;;  %v4650_v14 = vadd.f32 %v4649_v62, %v4460_v21  ;;  %v4825_v6 = vmul.f32 0.95, %v4816_v29 }
 0x37a   :  { %v10825_v22 = vpop.f32.mrf.mxu0  ;;  %v5311_v37 = vsel %vm4817_vm15, 1.0, %v5590_v11  ;;  %v4651_v12 = vpop.f32.mrf.mxu1 }
 0x37b   :  { %5312 = vst [vmem:[%s11031_s5 + $0x20] sm:$0xff] %v5311_v37  ;;  %v4826_v1 = vadd.f32 %v4825_v6, %v4650_v14  ;;  %v4480_v6 = vadd.f32 %v10774_v47, %v10671_v60  ;;  %v4485_v60 = vadd.f32 %v10784_v39, %v10677_v2  ;;  %v4490_v39 = vadd.f32 %v10787_v35, %v10686_v10 }
 0x37c   :  { %v4516_v48 = vpop.f32.mrf.mxu0  ;;  %v4495_v10 = vadd.f32 %v10796_v15, %v10692_v38  ;;  %v4500_v38 = vadd.f32 %v10802_v41, %v10698_v13  ;;  %v4505_v13 = vadd.f32 %v10809_v49, %v10707_v45  ;;  %v4510_v45 = vadd.f32 %v10818_v54, %v10713_v52 }
 0x37d   :  { %v4827_v26 = vsub.f32 %v4826_v1, %v5311_v37  ;;  %v4515_v52 = vadd.f32 %v10825_v22, %v10719_v59 }
 0x37e   :  { %v4519_v57 = vpop.f32.mrf.mxu0  ;;  %v4654_v28 = vpop.f32.mrf.mxu1 }
 0x37f   :  { %v10834_v30 = vadd.f32 %v4519_v57, %v10728_v20  ;;  %vm4828_vm1 = vcmp.gt.f32.partialorder %v4827_v26, 1.0  ;;  %5316 = vst [vmem:[%s11030_s6 + $0x28] sm:$0xff] %v4827_v26  ;;  %v4655_v46 = vadd.f32 %v4654_v28, %v4465_v42  ;;  %v4836_v61 = vmul.f32 0.95, %v4827_v26 }
 0x380   :  { %v4521_v3 = vpop.f32.mrf.mxu0  ;;  %v5314_v7 = vsel %vm4828_vm1, 1.0, %v5590_v11  ;;  %v4656_v0 = vpop.f32.mrf.mxu1 }
 0x381   :  { %5315 = vst [vmem:[%s11031_s5 + $0x28] sm:$0xff] %v5314_v7  ;;  %v4837_v5 = vadd.f32 %v4836_v61, %v4655_v46 }
 0x382   :  { %v4524_v63 = vpop.f32.mrf.mxu0 }
 0x383   :  { %v10844_v20 = vadd.f32 %v4524_v63, %v10734_v34  ;;  %v4838_v50 = vsub.f32 %v4837_v5, %v5314_v7 }
 0x384   :  { %v4526_v25 = vpop.f32.mrf.mxu0  ;;  %v4659_v58 = vpop.f32.mrf.mxu1 }
 0x385   :  { %vm4839_vm4 = vcmp.gt.f32.partialorder %v4838_v50, 1.0  ;;  %5319 = vst [vmem:[%s11030_s6 + $0x30] sm:$0xff] %v4838_v50  ;;  %v4660_v40 = vadd.f32 %v4659_v58, %v4470_v51  ;;  %v4847_v16 = vmul.f32 0.95, %v4838_v50 }
 0x386   :  { %v4529_v33 = vpop.f32.mrf.mxu0  ;;  %v5317_v44 = vsel %vm4839_vm4, 1.0, %v5590_v11  ;;  %v4661_v34 = vpop.f32.mrf.mxu1 }
 0x387   :  { %v10853_v31 = vadd.f32 %v4529_v33, %v10741_v27  ;;  %5318 = vst [vmem:[%s11031_s5 + $0x30] sm:$0xff] %v5317_v44  ;;  %v4848_v9 = vadd.f32 %v4847_v16, %v4660_v40 }
 0x388   :  { %v4531_v55 = vpop.f32.mrf.mxu0 }
 0x389   :  { %v4849_v18 = vsub.f32 %v4848_v9, %v5317_v44 }
 0x38a   :  { %v4534_v43 = vpop.f32.mrf.mxu0  ;;  %v4664_v21 = vpop.f32.mrf.mxu1 }
 0x38b   :  { %v10861_v19 = vadd.f32 %v4534_v43, %v10749_v4  ;;  %vm4850_vm2 = vcmp.gt.f32.partialorder %v4849_v18, 1.0  ;;  %5322 = vst [vmem:[%s11030_s6 + $0x38] sm:$0xff] %v4849_v18  ;;  %v4665_v29 = vadd.f32 %v4664_v21, %v4475_v53  ;;  %v4858_v32 = vmul.f32 0.95, %v4849_v18 }
 0x38c   :  { %v4536_v27 = vpop.f32.mrf.mxu0  ;;  %v5320_v62 = vsel %vm4850_vm2, 1.0, %v5590_v11  ;;  %v4666_v14 = vpop.f32.mrf.mxu1 }
 0x38d   :  { %5321 = vst [vmem:[%s11031_s5 + $0x38] sm:$0xff] %v5320_v62  ;;  %v4859_v23 = vadd.f32 %v4858_v32, %v4665_v29 }
 0x38e   :  { %v4539_v8 = vpop.f32.mrf.mxu0 }
 0x38f   :  { %v10871_v4 = vadd.f32 %v4539_v8, %v10754_v17  ;;  %v4860_v37 = vsub.f32 %v4859_v23, %v5320_v62 }
 0x390   :  { %v4541_v12 = vpop.f32.mrf.mxu0  ;;  %v4669_v48 = vpop.f32.mrf.mxu1 }
 0x391   :  { %vm4861_vm14 = vcmp.gt.f32.partialorder %v4860_v37, 1.0  ;;  %5325 = vst [vmem:[%s11030_s6 + $0x40] sm:$0xff] %v4860_v37  ;;  %v4670_v42 = vadd.f32 %v4669_v48, %v4480_v6  ;;  %v4869_v26 = vmul.f32 0.95, %v4860_v37 }
 0x392   :  { %v4544_v1 = vpop.f32.mrf.mxu0  ;;  %v5323_v17 = vsel %vm4861_vm14, 1.0, %v5590_v11  ;;  %v4671_v28 = vpop.f32.mrf.mxu1 }
 0x393   :  { %v10879_v57 = vadd.f32 %v4544_v1, %v10757_v36  ;;  %v4870_v46 = vadd.f32 %v4869_v26, %v4670_v42  ;;  %5324 = vst [vmem:[%s11031_s5 + $0x40] sm:$0xff] %v5323_v17 }
 0x394   :  { %v4546_v3 = vpop.f32.mrf.mxu0 }
 0x395   :  { %v4871_v47 = vsub.f32 %v4870_v46, %v5323_v17 }
 0x396   :  { %v4549_v61 = vpop.f32.mrf.mxu0  ;;  %v4674_v0 = vpop.f32.mrf.mxu1 }
 0x397   :  { %v10888_v7 = vadd.f32 %v4549_v61, %v10760_v24  ;;  %5328 = vst [vmem:[%s11030_s6 + $0x48] sm:$0xff] %v4871_v47  ;;  %v4675_v63 = vadd.f32 %v4674_v0, %v4485_v60  ;;  %vm4872_vm6 = vcmp.gt.f32.partialorder %v4871_v47, 1.0  ;;  %v4880_v5 = vmul.f32 0.95, %v4871_v47 }
 0x398   :  { %v4551_v36 = vpop.f32.mrf.mxu0  ;;  %v5326_v51 = vsel %vm4872_vm6, 1.0, %v5590_v11  ;;  %v4676_v50 = vpop.f32.mrf.mxu1 }
 0x399   :  { %5327 = vst [vmem:[%s11031_s5 + $0x48] sm:$0xff] %v5326_v51  ;;  %v4881_v2 = vadd.f32 %v4880_v5, %v4675_v63 }
 0x39a   :  { %v4554_v25 = vpop.f32.mrf.mxu0 }
 0x39b   :  { %v10898_v24 = vadd.f32 %v4554_v25, %v10763_v56  ;;  %v4882_v58 = vsub.f32 %v4881_v2, %v5326_v51 }
 0x39c   :  { %v4556_v33 = vpop.f32.mrf.mxu0  ;;  %v4679_v40 = vpop.f32.mrf.mxu1 }
 0x39d   :  { %5331 = vst [vmem:[%s11030_s6 + $0x50] sm:$0xff] %v4882_v58  ;;  %v4680_v16 = vadd.f32 %v4679_v40, %v4490_v39  ;;  %vm4883_vm12 = vcmp.gt.f32.partialorder %v4882_v58, 1.0  ;;  %v4891_v44 = vmul.f32 0.95, %v4882_v58 }
 0x39e   :  { %v5329_v34 = vsel %vm4883_vm12, 1.0, %v5590_v11  ;;  %v4681_v55 = vpop.f32.mrf.mxu1 }
 0x39f   :  { %5330 = vst [vmem:[%s11031_s5 + $0x50] sm:$0xff] %v5329_v34  ;;  %v4892_v56 = vadd.f32 %v4891_v44, %v4680_v16 }
 0x3a1   :  { %v4893_v35 = vsub.f32 %v4892_v56, %v5329_v34 }
 0x3a2   :  { %v4684_v9 = vpop.f32.mrf.mxu1 }
 0x3a3   :  { %5334 = vst [vmem:[%s11030_s6 + $0x58] sm:$0xff] %v4893_v35  ;;  %v4685_v53 = vadd.f32 %v4684_v9, %v4495_v10  ;;  %vm4894_vm3 = vcmp.gt.f32.partialorder %v4893_v35, 1.0  ;;  %v4902_v18 = vmul.f32 0.95, %v4893_v35 }
 0x3a4   :  { %v5332_v43 = vsel %vm4894_vm3, 1.0, %v5590_v11  ;;  %v4686_v21 = vpop.f32.mrf.mxu1 }
 0x3a5   :  { %5333 = vst [vmem:[%s11031_s5 + $0x58] sm:$0xff] %v5332_v43  ;;  %v4903_v27 = vadd.f32 %v4902_v18, %v4685_v53 }
 0x3a7   :  { %v4904_v15 = vsub.f32 %v4903_v27, %v5332_v43 }
 0x3a8   :  { %v4689_v29 = vpop.f32.mrf.mxu1 }
 0x3a9   :  { %5337 = vst [vmem:[%s11030_s6 + $0x60] sm:$0xff] %v4904_v15  ;;  %v4690_v32 = vadd.f32 %v4689_v29, %v4500_v38  ;;  %vm4905_vm0 = vcmp.gt.f32.partialorder %v4904_v15, 1.0  ;;  %v4913_v62 = vmul.f32 0.95, %v4904_v15 }
 0x3aa   :  { %v5335_v14 = vsel %vm4905_vm0, 1.0, %v5590_v11  ;;  %v4691_v8 = vpop.f32.mrf.mxu1 }
 0x3ab   :  { %5336 = vst [vmem:[%s11031_s5 + $0x60] sm:$0xff] %v5335_v14  ;;  %v4914_v23 = vadd.f32 %v4913_v62, %v4690_v32 }
 0x3ad   :  { %v4915_v41 = vsub.f32 %v4914_v23, %v5335_v14 }
 0x3ae   :  { %v4694_v6 = vpop.f32.mrf.mxu1 }
 0x3af   :  { %5340 = vst [vmem:[%s11030_s6 + $0x68] sm:$0xff] %v4915_v41  ;;  %v4695_v37 = vadd.f32 %v4694_v6, %v4505_v13  ;;  %vm4916_vm8 = vcmp.gt.f32.partialorder %v4915_v41, 1.0  ;;  %v4924_v12 = vmul.f32 0.95, %v4915_v41 }
 0x3b0   :  { %v5338_v48 = vsel %vm4916_vm8, 1.0, %v5590_v11  ;;  %v4696_v1 = vpop.f32.mrf.mxu1 }
 0x3b1   :  { %5339 = vst [vmem:[%s11031_s5 + $0x68] sm:$0xff] %v5338_v48  ;;  %v4925_v42 = vadd.f32 %v4924_v12, %v4695_v37 }
 0x3b3   :  { %v4926_v49 = vsub.f32 %v4925_v42, %v5338_v48 }
 0x3b4   :  { %v4699_v26 = vpop.f32.mrf.mxu1 }
 0x3b5   :  { %5343 = vst [vmem:[%s11030_s6 + $0x70] sm:$0xff] %v4926_v49  ;;  %v4700_v17 = vadd.f32 %v4699_v26, %v4510_v45  ;;  %vm4927_vm13 = vcmp.gt.f32.partialorder %v4926_v49, 1.0  ;;  %v4935_v28 = vmul.f32 0.95, %v4926_v49 }
 0x3b6   :  { %v5341_v3 = vsel %vm4927_vm13, 1.0, %v5590_v11  ;;  %v4701_v46 = vpop.f32.mrf.mxu1 }
 0x3b7   :  { %5342 = vst [vmem:[%s11031_s5 + $0x70] sm:$0xff] %v5341_v3  ;;  %v4936_v60 = vadd.f32 %v4935_v28, %v4700_v17 }
 0x3b9   :  { %v4937_v54 = vsub.f32 %v4936_v60, %v5341_v3 }
 0x3ba   :  { %v4704_v47 = vpop.f32.mrf.mxu1 }
 0x3bb   :  { %5346 = vst [vmem:[%s11030_s6 + $0x78] sm:$0xff] %v4937_v54  ;;  %v4705_v61 = vadd.f32 %v4704_v47, %v4515_v52  ;;  %vm4938_vm7 = vcmp.gt.f32.partialorder %v4937_v54, 1.0  ;;  %v4946_v0 = vmul.f32 0.95, %v4937_v54 }
 0x3bc   :  { %v5344_v36 = vsel %vm4938_vm7, 1.0, %v5590_v11  ;;  %v4706_v63 = vpop.f32.mrf.mxu1 }
 0x3bd   :  { %5345 = vst [vmem:[%s11031_s5 + $0x78] sm:$0xff] %v5344_v36  ;;  %v4947_v5 = vadd.f32 %v4946_v0, %v4705_v61 }
 0x3bf   :  { %v4948_v51 = vsub.f32 %v4947_v5, %v5344_v36 }
 0x3c0   :  { %v4709_v50 = vpop.f32.mrf.mxu1 }
 0x3c1   :  { %5349 = vst [vmem:[%s11030_s6 + $0x80] sm:$0xff] %v4948_v51  ;;  %v4710_v59 = vadd.f32 %v4709_v50, %v10834_v30  ;;  %vm4949_vm5 = vcmp.gt.f32.partialorder %v4948_v51, 1.0  ;;  %v4957_v22 = vmul.f32 0.95, %v4948_v51 }
 0x3c2   :  { %v5347_v25 = vsel %vm4949_vm5, 1.0, %v5590_v11  ;;  %v4711_v2 = vpop.f32.mrf.mxu1 }
 0x3c3   :  { %5348 = vst [vmem:[%s11031_s5 + $0x80] sm:$0xff] %v5347_v25  ;;  %v4958_v39 = vadd.f32 %v4957_v22, %v4710_v59 }
 0x3c5   :  { %v4959_v58 = vsub.f32 %v4958_v39, %v5347_v25 }
 0x3c6   :  { %v4714_v33 = vpop.f32.mrf.mxu1 }
 0x3c7   :  { %5352 = vst [vmem:[%s11030_s6 + $0x88] sm:$0xff] %v4959_v58  ;;  %v4715_v40 = vadd.f32 %v4714_v33, %v10844_v20  ;;  %vm4960_vm10 = vcmp.gt.f32.partialorder %v4959_v58, 1.0  ;;  %v4968_v30 = vmul.f32 0.95, %v4959_v58 }
 0x3c8   :  { %v5350_v16 = vsel %vm4960_vm10, 1.0, %v5590_v11  ;;  %v4716_v44 = vpop.f32.mrf.mxu1 }
 0x3c9   :  { %5351 = vst [vmem:[%s11031_s5 + $0x88] sm:$0xff] %v5350_v16  ;;  %v4969_v34 = vadd.f32 %v4968_v30, %v4715_v40 }
 0x3cb   :  { %v4970_v55 = vsub.f32 %v4969_v34, %v5350_v16 }
 0x3cc   :  { %v4719_v56 = vpop.f32.mrf.mxu1 }
 0x3cd   :  { %5355 = vst [vmem:[%s11030_s6 + $0x90] sm:$0xff] %v4970_v55  ;;  %v4720_v10 = vadd.f32 %v4719_v56, %v10853_v31  ;;  %vm4971_vm9 = vcmp.gt.f32.partialorder %v4970_v55, 1.0  ;;  %v4979_v20 = vmul.f32 0.95, %v4970_v55 }
 0x3ce   :  { %v5353_v35 = vsel %vm4971_vm9, 1.0, %v5590_v11  ;;  %v4721_v9 = vpop.f32.mrf.mxu1 }
 0x3cf   :  { %5354 = vst [vmem:[%s11031_s5 + $0x90] sm:$0xff] %v5353_v35  ;;  %v4980_v53 = vadd.f32 %v4979_v20, %v4720_v10 }
 0x3d1   :  { %v4981_v18 = vsub.f32 %v4980_v53, %v5353_v35 }
 0x3d2   :  { %v4724_v43 = vpop.f32.mrf.mxu1 }
 0x3d3   :  { %5358 = vst [vmem:[%s11030_s6 + $0x98] sm:$0xff] %v4981_v18  ;;  %v4725_v21 = vadd.f32 %v4724_v43, %v10861_v19  ;;  %vm4982_vm11 = vcmp.gt.f32.partialorder %v4981_v18, 1.0  ;;  %v4990_v31 = vmul.f32 0.95, %v4981_v18 }
 0x3d4   :  { %v5356_v27 = vsel %vm4982_vm11, 1.0, %v5590_v11  ;;  %v4726_v38 = vpop.f32.mrf.mxu1 }
 0x3d5   :  { %5357 = vst [vmem:[%s11031_s5 + $0x98] sm:$0xff] %v5356_v27  ;;  %v4991_v15 = vadd.f32 %v4990_v31, %v4725_v21 }
 0x3d7   :  { %v4992_v29 = vsub.f32 %v4991_v15, %v5356_v27 }
 0x3d8   :  { %v4729_v32 = vpop.f32.mrf.mxu1 }
 0x3d9   :  { %5361 = vst [vmem:[%s11030_s6 + $0xa0] sm:$0xff] %v4992_v29  ;;  %v4730_v62 = vadd.f32 %v4729_v32, %v10871_v4  ;;  %vm4993_vm15 = vcmp.gt.f32.partialorder %v4992_v29, 1.0  ;;  %v5001_v19 = vmul.f32 0.95, %v4992_v29 }
 0x3da   :  { %v5359_v14 = vsel %vm4993_vm15, 1.0, %v5590_v11  ;;  %v4731_v8 = vpop.f32.mrf.mxu1 }
 0x3db   :  { %5360 = vst [vmem:[%s11031_s5 + $0xa0] sm:$0xff] %v5359_v14  ;;  %v5002_v23 = vadd.f32 %v5001_v19, %v4730_v62 }
 0x3dd   :  { %v5003_v13 = vsub.f32 %v5002_v23, %v5359_v14 }
 0x3de   :  { %v4734_v41 = vpop.f32.mrf.mxu1 }
 0x3df   :  { %5364 = vst [vmem:[%s11030_s6 + $0xa8] sm:$0xff] %v5003_v13  ;;  %v4735_v6 = vadd.f32 %v4734_v41, %v10879_v57  ;;  %vm5004_vm1 = vcmp.gt.f32.partialorder %v5003_v13, 1.0  ;;  %v5012_v4 = vmul.f32 0.95, %v5003_v13 }
 0x3e0   :  { %v5362_v37 = vsel %vm5004_vm1, 1.0, %v5590_v11  ;;  %v4736_v12 = vpop.f32.mrf.mxu1 }
 0x3e1   :  { %5363 = vst [vmem:[%s11031_s5 + $0xa8] sm:$0xff] %v5362_v37  ;;  %v5013_v48 = vadd.f32 %v5012_v4, %v4735_v6 }
 0x3e3   :  { %v5014_v1 = vsub.f32 %v5013_v48, %v5362_v37 }
 0x3e4   :  { %v4739_v42 = vpop.f32.mrf.mxu1 }
 0x3e5   :  { %5367 = vst [vmem:[%s11030_s6 + $0xb0] sm:$0xff] %v5014_v1  ;;  %v4740_v45 = vadd.f32 %v4739_v42, %v10888_v7  ;;  %vm5015_vm4 = vcmp.gt.f32.partialorder %v5014_v1, 1.0  ;;  %v5023_v57 = vmul.f32 0.95, %v5014_v1 }
 0x3e6   :  { %v5365_v49 = vsel %vm5015_vm4, 1.0, %v5590_v11  ;;  %v4741_v26 = vpop.f32.mrf.mxu1 }
 0x3e7   :  { %5366 = vst [vmem:[%s11031_s5 + $0xb0] sm:$0xff] %v5365_v49  ;;  %v5024_v17 = vadd.f32 %v5023_v57, %v4740_v45 }
 0x3e9   :  { %v5025_v28 = vsub.f32 %v5024_v17, %v5365_v49 }
 0x3ea   :  { %v4744_v3 = vpop.f32.mrf.mxu1 }
 0x3eb   :  { %5370 = vst [vmem:[%s11030_s6 + $0xb8] sm:$0xff] %v5025_v28  ;;  %v4745_v46 = vadd.f32 %v4744_v3, %v10898_v24  ;;  %vm5026_vm2 = vcmp.gt.f32.partialorder %v5025_v28, 1.0  ;;  %v5034_v7 = vmul.f32 0.95, %v5025_v28 }
 0x3ec   :  { %v5368_v60 = vsel %vm5026_vm2, 1.0, %v5590_v11  ;;  %v4746_v52 = vpop.f32.mrf.mxu1 }
 0x3ed   :  { %5369 = vst [vmem:[%s11031_s5 + $0xb8] sm:$0xff] %v5368_v60  ;;  %v5035_v54 = vadd.f32 %v5034_v7, %v4745_v46 }
 0x3ef   :  { %v5036_v47 = vsub.f32 %v5035_v54, %v5368_v60 }
 0x3f1   :  { %vm5037_vm14 = vcmp.gt.f32.partialorder %v5036_v47, 1.0  ;;  %5373 = vst [vmem:[%s11030_s6 + $0xc0] sm:$0xff] %v5036_v47 }
 0x3f2   :  { %v5371_v61 = vsel %vm5037_vm14, 1.0, %v5590_v11 }
 0x3f3   :  { %5372 = vst [vmem:[%s11031_s5 + $0xc0] sm:$0xff] %v5371_v61 }

</bundles_post_ra>
